<compile_context>
chip_gen: v6e
topology: v6e:2x2x1
jax: 0.10.0
libtpu: 0.0.40
codegen_flags: <defaults>
</compile_context>

<pallas_src>
import functools

import jax
import jax.numpy as jnp
from jax.experimental import pallas as pl
from jax.experimental.pallas import tpu as pltpu

_VMEM_LIMIT = 48 * 1024 * 1024      # <= 64 MiB VMEM on v7x, fine on v5e/v6e
_LRELU_SLOPE = 0.2
_IN_EPS = 1e-5


def _round_up(x, m):
    return ((x + m - 1) // m) * m


# ---------------------------------------------------------------------------
# Kernel 1: fused 4x4-conv-as-16-shifted-matmuls (+ bias, + optional LeakyReLU)
# ---------------------------------------------------------------------------
def _conv4x4_kernel(x_ref, w_ref, b_ref, o_ref, acc_ref, *,
                    offsets, mo, apply_lrelu, slope):
    # x_ref : (1, Mi, Cin)   bf16  flattened zero-padded image (one batch item)
    # w_ref : (16, Cin, Cout) bf16  per-tap weights
    # b_ref : (1, Cout)       f32
    # o_ref : (1, Mo, Cout)   f32   flat output (padded row width, junk cols)
    # acc_ref: (Mo, Cout)     f32   VMEM accumulator
    acc_ref[...] = jnp.zeros_like(acc_ref)
    for t, off in enumerate(offsets):               # 16 static taps, unrolled
        a = x_ref[0, off:off + mo, :]               # (Mo, Cin) shifted window
        acc_ref[...] += jnp.dot(a, w_ref[t],
                                preferred_element_type=jnp.float32)
    r = acc_ref[...] + b_ref[...]                   # (Mo,Cout) + (1,Cout)
    if apply_lrelu:
        r = jnp.where(r >= 0, r, slope * r)
    o_ref[0] = r.astype(o_ref.dtype)


def conv2d_k4(x_nhwc, w_hwio, bias, *, stride, fuse_lrelu):
    """4x4 conv, padding=1, stride in {1,2}. x: (N,H,W,Cin) f32 -> (N,OH,OW,Cout) f32."""
    N, H, W, Cin = x_nhwc.shape
    Cout = w_hwio.shape[-1]

    # Pad Cin to a multiple of 8 with zeros (no effect on the result).
    Cin_p = _round_up(Cin, 8)
    if Cin_p != Cin:
        x_nhwc = jnp.pad(x_nhwc, ((0, 0), (0, 0), (0, 0), (0, Cin_p - Cin)))
        w_hwio = jnp.pad(w_hwio, ((0, 0), (0, 0), (0, Cin_p - Cin), (0, 0)))

    xp = jnp.pad(x_nhwc, ((0, 0), (1, 1), (1, 1), (0, 0)))   # conv padding = 1

    if stride == 1:
        OH, OW = H - 1, W - 1
        Hv, Wv = H + 2, W + 2
        wrow = Wv
        x_flat = xp.reshape(N, Hv * Wv, Cin_p)
        offsets = [ki * Wv + kj for ki in range(4) for kj in range(4)]
    else:
        assert stride == 2 and H % 2 == 0 and W % 2 == 0
        OH, OW = H // 2, W // 2
        Hr, Wr = (H + 2) // 2, (W + 2) // 2
        wrow = Wr
        # space-to-depth relabel: xs[n, pi, pj, r, c] = xp[n, 2r+pi, 2c+pj]
        xs = xp.reshape(N, Hr, 2, Wr, 2, Cin_p).transpose(0, 2, 4, 1, 3, 5)
        x_flat = xs.reshape(N, 4 * Hr * Wr, Cin_p)
        offsets = []
        for ki in range(4):
            for kj in range(4):
                pi, qi = ki % 2, ki // 2
                pj, qj = kj % 2, kj // 2
                offsets.append((pi * 2 + pj) * Hr * Wr + qi * Wr + qj)

    mo = _round_up(OH * wrow, 8)                 # flat output rows kept / image
    mi = _round_up(max(offsets) + mo, 8)         # flat input rows needed / image
    pad_rows = mi - x_flat.shape[1]
    assert pad_rows >= 0
    x_flat = jnp.pad(x_flat, ((0, 0), (0, pad_rows), (0, 0)))

    x_bf = x_flat.astype(jnp.bfloat16)
    w_bf = w_hwio.reshape(16, Cin_p, Cout).astype(jnp.bfloat16)
    b_f32 = bias.reshape(1, Cout).astype(jnp.float32)

    kernel = functools.partial(_conv4x4_kernel, offsets=tuple(offsets), mo=mo,
                               apply_lrelu=fuse_lrelu, slope=_LRELU_SLOPE)

    y_flat = pl.pallas_call(
        kernel,
        out_shape=jax.ShapeDtypeStruct((N, mo, Cout), jnp.float32),
        grid=(N,),
        in_specs=[
            pl.BlockSpec((1, mi, Cin_p), lambda n: (n, 0, 0)),
            pl.BlockSpec((16, Cin_p, Cout), lambda n: (0, 0, 0)),   # resident
            pl.BlockSpec((1, Cout), lambda n: (0, 0)),              # resident
        ],
        out_specs=pl.BlockSpec((1, mo, Cout), lambda n: (n, 0, 0)),
        scratch_shapes=[pltpu.VMEM((mo, Cout), jnp.float32)],
        compiler_params=pltpu.CompilerParams(
            dimension_semantics=("parallel",),
            vmem_limit_bytes=_VMEM_LIMIT,
        ),
    )(x_bf, w_bf, b_f32)

    # Drop the junk columns that come from keeping the padded row width.
    y = y_flat[:, :OH * wrow, :].reshape(N, OH, wrow, Cout)[:, :, :OW, :]
    return y


# ---------------------------------------------------------------------------
# Kernel 2: InstanceNorm2d (affine=False, eps=1e-5) fused with LeakyReLU(0.2)
# Operates on an (N, OH*OW, C) NHWC view: channels in lanes, spatial reduce
# over sublanes.
# ---------------------------------------------------------------------------
def _inorm_lrelu_kernel(x_ref, o_ref, *, eps, slope):
    x = x_ref[0]                                      # (S, C) f32
    mean = jnp.mean(x, axis=0, keepdims=True)         # (1, C)
    xc = x - mean
    var = jnp.mean(xc * xc, axis=0, keepdims=True)    # biased var (InstanceNorm)
    y = xc * jax.lax.rsqrt(var + eps)
    o_ref[0] = jnp.where(y >= 0, y, slope * y)


def instance_norm_lrelu(x_nhwc, *, eps=_IN_EPS, slope=_LRELU_SLOPE):
    N, H, W, C = x_nhwc.shape
    S = H * W
    x3 = x_nhwc.reshape(N, S, C)
    out = pl.pallas_call(
        functools.partial(_inorm_lrelu_kernel, eps=eps, slope=slope),
        out_shape=jax.ShapeDtypeStruct((N, S, C), x3.dtype),
        grid=(N,),
        in_specs=[pl.BlockSpec((1, S, C), lambda n: (n, 0, 0))],
        out_specs=pl.BlockSpec((1, S, C), lambda n: (n, 0, 0)),
        compiler_params=pltpu.CompilerParams(
            dimension_semantics=("parallel",),
            vmem_limit_bytes=_VMEM_LIMIT,
        ),
    )(x3)
    return out.reshape(N, H, W, C)


# ---------------------------------------------------------------------------
# NLayerDiscriminator parameters & forward
# ---------------------------------------------------------------------------
def make_discriminator_params(key, input_nc=3, ndf=8, n_layers=3):
    # (cin, cout, stride, norm, act) -- matches the PyTorch constructor,
    # use_actnorm=False -> InstanceNorm2d -> use_bias=True everywhere.
    cfg = [(input_nc, ndf, 2, False, True)]
    nf_mult = 1
    for n in range(1, n_layers):
        nf_mult_prev, nf_mult = nf_mult, min(2 ** n, 8)
        cfg.append((ndf * nf_mult_prev, ndf * nf_mult, 2, True, True))
    nf_mult_prev, nf_mult = nf_mult, min(2 ** n_layers, 8)
    cfg.append((ndf * nf_mult_prev, ndf * nf_mult, 1, True, True))
    cfg.append((ndf * nf_mult, 1, 1, False, False))

    params = []
    for (cin, cout, stride, norm, act) in cfg:
        key, kw_, kb_ = jax.random.split(key, 3)
        w = 0.05 * jax.random.normal(kw_, (4, 4, cin, cout), jnp.float32)  # HWIO
        b = 0.05 * jax.random.normal(kb_, (cout,), jnp.float32)
        params.append(dict(w=w, b=b, stride=stride, norm=norm, act=act))
    return params


def nlayer_discriminator_apply(x_nchw, params):
    h = jnp.transpose(x_nchw, (0, 2, 3, 1))            # NHWC once, up front
    for p in params:
        fuse_lrelu = p["act"] and not p["norm"]        # first layer only
        h = conv2d_k4(h, p["w"], p["b"], stride=p["stride"],
                      fuse_lrelu=fuse_lrelu)
        if p["norm"]:
            h = instance_norm_lrelu(h)                 # norm + LeakyReLU fused
    return jnp.transpose(h, (0, 3, 1, 2))              # tiny final map -> NCHW


def nlayer_discriminator_forward(input0, input1, params):
    """Matches NLayerDiscriminator.forward(input0, input1)."""
    if input1 is None:
        return nlayer_discriminator_apply(input0, params), None
    n0 = input0.shape[0]
    x = jnp.concatenate([input0, input1], axis=0)      # one batched pass
    y = nlayer_discriminator_apply(x, params)
    return y[:n0], y[n0:]


# ---------------------------------------------------------------------------
# Pure-JAX reference (in-script correctness check).  It mirrors the bf16
# quantization points of the Pallas path so the check isolates kernel
# correctness from bf16 rounding (vs. a pure-f32 PyTorch reference the expected
# deviation would be ~1e-2).
# ---------------------------------------------------------------------------
def _reference_apply(x, params):
    h = x
    for p in params:
        a = h.astype(jnp.bfloat16).astype(jnp.float32)
        w = p["w"].astype(jnp.bfloat16).astype(jnp.float32)
        h = jax.lax.conv_general_dilated(
            a, w, window_strides=(p["stride"],) * 2,
            padding=((1, 1), (1, 1)),
            dimension_numbers=("NCHW", "HWIO", "NCHW"),
            precision=jax.lax.Precision.HIGHEST)
        h = h + p["b"].reshape(1, -1, 1, 1)
        if p["norm"]:
            mean = jnp.mean(h, axis=(2, 3), keepdims=True)
            var = jnp.var(h, axis=(2, 3), keepdims=True)
            h = (h - mean) / jnp.sqrt(var + _IN_EPS)
        if p["act"]:
            h = jnp.where(h >= 0, h, _LRELU_SLOPE * h)
    return h


if __name__ == "__main__":
    key = jax.random.PRNGKey(0)
    N, input_nc, Himg, Wimg = 2, 3, 32, 32
    ndf, n_layers = 8, 3

    kp, k0, k1 = jax.random.split(key, 3)
    params = make_discriminator_params(kp, input_nc=input_nc, ndf=ndf,
                                       n_layers=n_layers)
    x0 = jax.random.normal(k0, (N, input_nc, Himg, Wimg), jnp.float32)
    x1 = jax.random.normal(k1, (N, input_nc, Himg, Wimg), jnp.float32)

    out0, out1 = nlayer_discriminator_forward(x0, x1, params)
    out0, out1 = jax.block_until_ready((out0, out1))

    ref0 = _reference_apply(x0, params)
    ref1 = _reference_apply(x1, params)
    ref0, ref1 = jax.block_until_ready((ref0, ref1))

    assert out0.shape == ref0.shape == (N, 1, 2, 2), out0.shape
    assert jnp.allclose(out0, ref0, atol=2e-2, rtol=2e-2), \
        float(jnp.max(jnp.abs(out0 - ref0)))
    assert jnp.allclose(out1, ref1, atol=2e-2, rtol=2e-2), \
        float(jnp.max(jnp.abs(out1 - ref1)))

    # input1=None path, like the PyTorch module.
    o_only, none_out = nlayer_discriminator_forward(x0, None, params)
    jax.block_until_ready(o_only)
    assert none_out is None
    assert jnp.allclose(o_only, ref0, atol=2e-2, rtol=2e-2)

    print("KERNEL_OK")
</pallas_src>

<mosaic_0001>
module attributes {stable_mosaic.version = 11 : i64} {
  func.func @_conv4x4_kernel(%arg0: i32, %arg1: memref<1x1160x8xbf16, #tpu.memory_space<vmem>>, %arg2: memref<16x8x8xbf16, #tpu.memory_space<vmem>>, %arg3: memref<1x8xf32, #tpu.memory_space<vmem>>, %arg4: memref<1x272x8xf32, #tpu.memory_space<vmem>>, %arg5: memref<272x8xf32, #tpu.memory_space<vmem>>) attributes {dimension_semantics = [#tpu.dimension_semantics<parallel>], iteration_bounds = array<i64: 4>, scalar_prefetch = 0 : i64, scratch_operands = 1 : i64, tpu.core_type = #tpu.core_type<tc>, window_params = [{transform_indices = @transform_0, window_bounds = array<i64: 1, 1160, 8>}, {pipeline_mode = #tpu.pipeline_mode<synchronous>, transform_indices = @transform_1, window_bounds = array<i64: 16, 8, 8>}, {pipeline_mode = #tpu.pipeline_mode<synchronous>, transform_indices = @transform_2, window_bounds = array<i64: 1, 8>}, {transform_indices = @transform_3, window_bounds = array<i64: 1, 272, 8>}]} {
    %cst = arith.constant 0.000000e+00 : f32
    %0 = vector.broadcast %cst : f32 to vector<272x8xf32>
    %c0 = arith.constant 0 : index
    %c0_0 = arith.constant 0 : index
    %1 = vector.load %arg5[%c0, %c0_0] : memref<272x8xf32, #tpu.memory_space<vmem>>, vector<272x8xf32>
    tpu.vector_store %arg5[%c0, %c0_0], %0 {strides = array<i32>} : memref<272x8xf32, #tpu.memory_space<vmem>>, vector<272x8xf32>,
    %c0_1 = arith.constant 0 : index
    %c0_2 = arith.constant 0 : index
    %c0_3 = arith.constant 0 : index
    %2 = vector.load %arg1[%c0_1, %c0_2, %c0_3] : memref<1x1160x8xbf16, #tpu.memory_space<vmem>>, vector<1x272x8xbf16>
    %3 = vector.shape_cast %2 : vector<1x272x8xbf16> to vector<272x8xbf16>
    %c0_4 = arith.constant 0 : index
    %c0_5 = arith.constant 0 : index
    %4 = vector.load %arg5[%c0_4, %c0_5] : memref<272x8xf32, #tpu.memory_space<vmem>>, vector<272x8xf32>
    %c0_6 = arith.constant 0 : index
    %c0_7 = arith.constant 0 : index
    %c0_8 = arith.constant 0 : index
    %5 = vector.load %arg2[%c0_6, %c0_7, %c0_8] : memref<16x8x8xbf16, #tpu.memory_space<vmem>>, vector<1x8x8xbf16>
    %6 = vector.shape_cast %5 : vector<1x8x8xbf16> to vector<8x8xbf16>
    %cst_9 = arith.constant dense<0.000000e+00> : vector<272x8xf32>
    %7 = tpu.matmul %3, %6, %cst_9 {dimension_numbers = #tpu.dot_dimension_numbers<[1], [0], [0], [1], [0, 0, 1, 1], [], []>} : vector<272x8xbf16>, vector<8x8xbf16>, vector<272x8xf32> -> vector<272x8xf32>
    %8 = arith.addf %4, %7 : vector<272x8xf32>
    %c0_10 = arith.constant 0 : index
    %c0_11 = arith.constant 0 : index
    %9 = vector.load %arg5[%c0_10, %c0_11] : memref<272x8xf32, #tpu.memory_space<vmem>>, vector<272x8xf32>
    tpu.vector_store %arg5[%c0_10, %c0_11], %8 {strides = array<i32>} : memref<272x8xf32, #tpu.memory_space<vmem>>, vector<272x8xf32>,
    %c0_12 = arith.constant 0 : index
    %c289 = arith.constant 289 : index
    %c0_13 = arith.constant 0 : index
    %10 = vector.load %arg1[%c0_12, %c289, %c0_13] : memref<1x1160x8xbf16, #tpu.memory_space<vmem>>, vector<1x272x8xbf16>
    %11 = vector.shape_cast %10 : vector<1x272x8xbf16> to vector<272x8xbf16>
    %c0_14 = arith.constant 0 : index
    %c0_15 = arith.constant 0 : index
    %12 = vector.load %arg5[%c0_14, %c0_15] : memref<272x8xf32, #tpu.memory_space<vmem>>, vector<272x8xf32>
    %c1 = arith.constant 1 : index
    %c0_16 = arith.constant 0 : index
    %c0_17 = arith.constant 0 : index
    %13 = vector.load %arg2[%c1, %c0_16, %c0_17] : memref<16x8x8xbf16, #tpu.memory_space<vmem>>, vector<1x8x8xbf16>
    %14 = vector.shape_cast %13 : vector<1x8x8xbf16> to vector<8x8xbf16>
    %cst_18 = arith.constant dense<0.000000e+00> : vector<272x8xf32>
    %15 = tpu.matmul %11, %14, %cst_18 {dimension_numbers = #tpu.dot_dimension_numbers<[1], [0], [0], [1], [0, 0, 1, 1], [], []>} : vector<272x8xbf16>, vector<8x8xbf16>, vector<272x8xf32> -> vector<272x8xf32>
    %16 = arith.addf %12, %15 : vector<272x8xf32>
    %c0_19 = arith.constant 0 : index
    %c0_20 = arith.constant 0 : index
    %17 = vector.load %arg5[%c0_19, %c0_20] : memref<272x8xf32, #tpu.memory_space<vmem>>, vector<272x8xf32>
    tpu.vector_store %arg5[%c0_19, %c0_20], %16 {strides = array<i32>} : memref<272x8xf32, #tpu.memory_space<vmem>>, vector<272x8xf32>,
    %c0_21 = arith.constant 0 : index
    %c1_22 = arith.constant 1 : index
    %c0_23 = arith.constant 0 : index
    %18 = vector.load %arg1[%c0_21, %c1_22, %c0_23] : memref<1x1160x8xbf16, #tpu.memory_space<vmem>>, vector<1x272x8xbf16>
    %19 = vector.shape_cast %18 : vector<1x272x8xbf16> to vector<272x8xbf16>
    %c0_24 = arith.constant 0 : index
    %c0_25 = arith.constant 0 : index
    %20 = vector.load %arg5[%c0_24, %c0_25] : memref<272x8xf32, #tpu.memory_space<vmem>>, vector<272x8xf32>
    %c2 = arith.constant 2 : index
    %c0_26 = arith.constant 0 : index
    %c0_27 = arith.constant 0 : index
    %21 = vector.load %arg2[%c2, %c0_26, %c0_27] : memref<16x8x8xbf16, #tpu.memory_space<vmem>>, vector<1x8x8xbf16>
    %22 = vector.shape_cast %21 : vector<1x8x8xbf16> to vector<8x8xbf16>
    %cst_28 = arith.constant dense<0.000000e+00> : vector<272x8xf32>
    %23 = tpu.matmul %19, %22, %cst_28 {dimension_numbers = #tpu.dot_dimension_numbers<[1], [0], [0], [1], [0, 0, 1, 1], [], []>} : vector<272x8xbf16>, vector<8x8xbf16>, vector<272x8xf32> -> vector<272x8xf32>
    %24 = arith.addf %20, %23 : vector<272x8xf32>
    %c0_29 = arith.constant 0 : index
    %c0_30 = arith.constant 0 : index
    %25 = vector.load %arg5[%c0_29, %c0_30] : memref<272x8xf32, #tpu.memory_space<vmem>>, vector<272x8xf32>
    tpu.vector_store %arg5[%c0_29, %c0_30], %24 {strides = array<i32>} : memref<272x8xf32, #tpu.memory_space<vmem>>, vector<272x8xf32>,
    %c0_31 = arith.constant 0 : index
    %c290 = arith.constant 290 : index
    %c0_32 = arith.constant 0 : index
    %26 = vector.load %arg1[%c0_31, %c290, %c0_32] : memref<1x1160x8xbf16, #tpu.memory_space<vmem>>, vector<1x272x8xbf16>
    %27 = vector.shape_cast %26 : vector<1x272x8xbf16> to vector<272x8xbf16>
    %c0_33 = arith.constant 0 : index
    %c0_34 = arith.constant 0 : index
    %28 = vector.load %arg5[%c0_33, %c0_34] : memref<272x8xf32, #tpu.memory_space<vmem>>, vector<272x8xf32>
    %c3 = arith.constant 3 : index
    %c0_35 = arith.constant 0 : index
    %c0_36 = arith.constant 0 : index
    %29 = vector.load %arg2[%c3, %c0_35, %c0_36] : memref<16x8x8xbf16, #tpu.memory_space<vmem>>, vector<1x8x8xbf16>
    %30 = vector.shape_cast %29 : vector<1x8x8xbf16> to vector<8x8xbf16>
    %cst_37 = arith.constant dense<0.000000e+00> : vector<272x8xf32>
    %31 = tpu.matmul %27, %30, %cst_37 {dimension_numbers = #tpu.dot_dimension_numbers<[1], [0], [0], [1], [0, 0, 1, 1], [], []>} : vector<272x8xbf16>, vector<8x8xbf16>, vector<272x8xf32> -> vector<272x8xf32>
    %32 = arith.addf %28, %31 : vector<272x8xf32>
    %c0_38 = arith.constant 0 : index
    %c0_39 = arith.constant 0 : index
    %33 = vector.load %arg5[%c0_38, %c0_39] : memref<272x8xf32, #tpu.memory_space<vmem>>, vector<272x8xf32>
    tpu.vector_store %arg5[%c0_38, %c0_39], %32 {strides = array<i32>} : memref<272x8xf32, #tpu.memory_space<vmem>>, vector<272x8xf32>,
    %c0_40 = arith.constant 0 : index
    %c578 = arith.constant 578 : index
    %c0_41 = arith.constant 0 : index
    %34 = vector.load %arg1[%c0_40, %c578, %c0_41] : memref<1x1160x8xbf16, #tpu.memory_space<vmem>>, vector<1x272x8xbf16>
    %35 = vector.shape_cast %34 : vector<1x272x8xbf16> to vector<272x8xbf16>
    %c0_42 = arith.constant 0 : index
    %c0_43 = arith.constant 0 : index
    %36 = vector.load %arg5[%c0_42, %c0_43] : memref<272x8xf32, #tpu.memory_space<vmem>>, vector<272x8xf32>
    %c4 = arith.constant 4 : index
    %c0_44 = arith.constant 0 : index
    %c0_45 = arith.constant 0 : index
    %37 = vector.load %arg2[%c4, %c0_44, %c0_45] : memref<16x8x8xbf16, #tpu.memory_space<vmem>>, vector<1x8x8xbf16>
    %38 = vector.shape_cast %37 : vector<1x8x8xbf16> to vector<8x8xbf16>
    %cst_46 = arith.constant dense<0.000000e+00> : vector<272x8xf32>
    %39 = tpu.matmul %35, %38, %cst_46 {dimension_numbers = #tpu.dot_dimension_numbers<[1], [0], [0], [1], [0, 0, 1, 1], [], []>} : vector<272x8xbf16>, vector<8x8xbf16>, vector<272x8xf32> -> vector<272x8xf32>
    %40 = arith.addf %36, %39 : vector<272x8xf32>
    %c0_47 = arith.constant 0 : index
    %c0_48 = arith.constant 0 : index
    %41 = vector.load %arg5[%c0_47, %c0_48] : memref<272x8xf32, #tpu.memory_space<vmem>>, vector<272x8xf32>
    tpu.vector_store %arg5[%c0_47, %c0_48], %40 {strides = array<i32>} : memref<272x8xf32, #tpu.memory_space<vmem>>, vector<272x8xf32>,
    %c0_49 = arith.constant 0 : index
    %c867 = arith.constant 867 : index
    %c0_50 = arith.constant 0 : index
    %42 = vector.load %arg1[%c0_49, %c867, %c0_50] : memref<1x1160x8xbf16, #tpu.memory_space<vmem>>, vector<1x272x8xbf16>
    %43 = vector.shape_cast %42 : vector<1x272x8xbf16> to vector<272x8xbf16>
    %c0_51 = arith.constant 0 : index
    %c0_52 = arith.constant 0 : index
    %44 = vector.load %arg5[%c0_51, %c0_52] : memref<272x8xf32, #tpu.memory_space<vmem>>, vector<272x8xf32>
    %c5 = arith.constant 5 : index
    %c0_53 = arith.constant 0 : index
    %c0_54 = arith.constant 0 : index
    %45 = vector.load %arg2[%c5, %c0_53, %c0_54] : memref<16x8x8xbf16, #tpu.memory_space<vmem>>, vector<1x8x8xbf16>
    %46 = vector.shape_cast %45 : vector<1x8x8xbf16> to vector<8x8xbf16>
    %cst_55 = arith.constant dense<0.000000e+00> : vector<272x8xf32>
    %47 = tpu.matmul %43, %46, %cst_55 {dimension_numbers = #tpu.dot_dimension_numbers<[1], [0], [0], [1], [0, 0, 1, 1], [], []>} : vector<272x8xbf16>, vector<8x8xbf16>, vector<272x8xf32> -> vector<272x8xf32>
    %48 = arith.addf %44, %47 : vector<272x8xf32>
    %c0_56 = arith.constant 0 : index
    %c0_57 = arith.constant 0 : index
    %49 = vector.load %arg5[%c0_56, %c0_57] : memref<272x8xf32, #tpu.memory_space<vmem>>, vector<272x8xf32>
    tpu.vector_store %arg5[%c0_56, %c0_57], %48 {strides = array<i32>} : memref<272x8xf32, #tpu.memory_space<vmem>>, vector<272x8xf32>,
    %c0_58 = arith.constant 0 : index
    %c579 = arith.constant 579 : index
    %c0_59 = arith.constant 0 : index
    %50 = vector.load %arg1[%c0_58, %c579, %c0_59] : memref<1x1160x8xbf16, #tpu.memory_space<vmem>>, vector<1x272x8xbf16>
    %51 = vector.shape_cast %50 : vector<1x272x8xbf16> to vector<272x8xbf16>
    %c0_60 = arith.constant 0 : index
    %c0_61 = arith.constant 0 : index
    %52 = vector.load %arg5[%c0_60, %c0_61] : memref<272x8xf32, #tpu.memory_space<vmem>>, vector<272x8xf32>
    %c6 = arith.constant 6 : index
    %c0_62 = arith.constant 0 : index
    %c0_63 = arith.constant 0 : index
    %53 = vector.load %arg2[%c6, %c0_62, %c0_63] : memref<16x8x8xbf16, #tpu.memory_space<vmem>>, vector<1x8x8xbf16>
    %54 = vector.shape_cast %53 : vector<1x8x8xbf16> to vector<8x8xbf16>
    %cst_64 = arith.constant dense<0.000000e+00> : vector<272x8xf32>
    %55 = tpu.matmul %51, %54, %cst_64 {dimension_numbers = #tpu.dot_dimension_numbers<[1], [0], [0], [1], [0, 0, 1, 1], [], []>} : vector<272x8xbf16>, vector<8x8xbf16>, vector<272x8xf32> -> vector<272x8xf32>
    %56 = arith.addf %52, %55 : vector<272x8xf32>
    %c0_65 = arith.constant 0 : index
    %c0_66 = arith.constant 0 : index
    %57 = vector.load %arg5[%c0_65, %c0_66] : memref<272x8xf32, #tpu.memory_space<vmem>>, vector<272x8xf32>
    tpu.vector_store %arg5[%c0_65, %c0_66], %56 {strides = array<i32>} : memref<272x8xf32, #tpu.memory_space<vmem>>, vector<272x8xf32>,
    %c0_67 = arith.constant 0 : index
    %c868 = arith.constant 868 : index
    %c0_68 = arith.constant 0 : index
    %58 = vector.load %arg1[%c0_67, %c868, %c0_68] : memref<1x1160x8xbf16, #tpu.memory_space<vmem>>, vector<1x272x8xbf16>
    %59 = vector.shape_cast %58 : vector<1x272x8xbf16> to vector<272x8xbf16>
    %c0_69 = arith.constant 0 : index
    %c0_70 = arith.constant 0 : index
    %60 = vector.load %arg5[%c0_69, %c0_70] : memref<272x8xf32, #tpu.memory_space<vmem>>, vector<272x8xf32>
    %c7 = arith.constant 7 : index
    %c0_71 = arith.constant 0 : index
    %c0_72 = arith.constant 0 : index
    %61 = vector.load %arg2[%c7, %c0_71, %c0_72] : memref<16x8x8xbf16, #tpu.memory_space<vmem>>, vector<1x8x8xbf16>
    %62 = vector.shape_cast %61 : vector<1x8x8xbf16> to vector<8x8xbf16>
    %cst_73 = arith.constant dense<0.000000e+00> : vector<272x8xf32>
    %63 = tpu.matmul %59, %62, %cst_73 {dimension_numbers = #tpu.dot_dimension_numbers<[1], [0], [0], [1], [0, 0, 1, 1], [], []>} : vector<272x8xbf16>, vector<8x8xbf16>, vector<272x8xf32> -> vector<272x8xf32>
    %64 = arith.addf %60, %63 : vector<272x8xf32>
    %c0_74 = arith.constant 0 : index
    %c0_75 = arith.constant 0 : index
    %65 = vector.load %arg5[%c0_74, %c0_75] : memref<272x8xf32, #tpu.memory_space<vmem>>, vector<272x8xf32>
    tpu.vector_store %arg5[%c0_74, %c0_75], %64 {strides = array<i32>} : memref<272x8xf32, #tpu.memory_space<vmem>>, vector<272x8xf32>,
    %c0_76 = arith.constant 0 : index
    %c17 = arith.constant 17 : index
    %c0_77 = arith.constant 0 : index
    %66 = vector.load %arg1[%c0_76, %c17, %c0_77] : memref<1x1160x8xbf16, #tpu.memory_space<vmem>>, vector<1x272x8xbf16>
    %67 = vector.shape_cast %66 : vector<1x272x8xbf16> to vector<272x8xbf16>
    %c0_78 = arith.constant 0 : index
    %c0_79 = arith.constant 0 : index
    %68 = vector.load %arg5[%c0_78, %c0_79] : memref<272x8xf32, #tpu.memory_space<vmem>>, vector<272x8xf32>
    %c8 = arith.constant 8 : index
    %c0_80 = arith.constant 0 : index
    %c0_81 = arith.constant 0 : index
    %69 = vector.load %arg2[%c8, %c0_80, %c0_81] : memref<16x8x8xbf16, #tpu.memory_space<vmem>>, vector<1x8x8xbf16>
    %70 = vector.shape_cast %69 : vector<1x8x8xbf16> to vector<8x8xbf16>
    %cst_82 = arith.constant dense<0.000000e+00> : vector<272x8xf32>
    %71 = tpu.matmul %67, %70, %cst_82 {dimension_numbers = #tpu.dot_dimension_numbers<[1], [0], [0], [1], [0, 0, 1, 1], [], []>} : vector<272x8xbf16>, vector<8x8xbf16>, vector<272x8xf32> -> vector<272x8xf32>
    %72 = arith.addf %68, %71 : vector<272x8xf32>
    %c0_83 = arith.constant 0 : index
    %c0_84 = arith.constant 0 : index
    %73 = vector.load %arg5[%c0_83, %c0_84] : memref<272x8xf32, #tpu.memory_space<vmem>>, vector<272x8xf32>
    tpu.vector_store %arg5[%c0_83, %c0_84], %72 {strides = array<i32>} : memref<272x8xf32, #tpu.memory_space<vmem>>, vector<272x8xf32>,
    %c0_85 = arith.constant 0 : index
    %c306 = arith.constant 306 : index
    %c0_86 = arith.constant 0 : index
    %74 = vector.load %arg1[%c0_85, %c306, %c0_86] : memref<1x1160x8xbf16, #tpu.memory_space<vmem>>, vector<1x272x8xbf16>
    %75 = vector.shape_cast %74 : vector<1x272x8xbf16> to vector<272x8xbf16>
    %c0_87 = arith.constant 0 : index
    %c0_88 = arith.constant 0 : index
    %76 = vector.load %arg5[%c0_87, %c0_88] : memref<272x8xf32, #tpu.memory_space<vmem>>, vector<272x8xf32>
    %c9 = arith.constant 9 : index
    %c0_89 = arith.constant 0 : index
    %c0_90 = arith.constant 0 : index
    %77 = vector.load %arg2[%c9, %c0_89, %c0_90] : memref<16x8x8xbf16, #tpu.memory_space<vmem>>, vector<1x8x8xbf16>
    %78 = vector.shape_cast %77 : vector<1x8x8xbf16> to vector<8x8xbf16>
    %cst_91 = arith.constant dense<0.000000e+00> : vector<272x8xf32>
    %79 = tpu.matmul %75, %78, %cst_91 {dimension_numbers = #tpu.dot_dimension_numbers<[1], [0], [0], [1], [0, 0, 1, 1], [], []>} : vector<272x8xbf16>, vector<8x8xbf16>, vector<272x8xf32> -> vector<272x8xf32>
    %80 = arith.addf %76, %79 : vector<272x8xf32>
    %c0_92 = arith.constant 0 : index
    %c0_93 = arith.constant 0 : index
    %81 = vector.load %arg5[%c0_92, %c0_93] : memref<272x8xf32, #tpu.memory_space<vmem>>, vector<272x8xf32>
    tpu.vector_store %arg5[%c0_92, %c0_93], %80 {strides = array<i32>} : memref<272x8xf32, #tpu.memory_space<vmem>>, vector<272x8xf32>,
    %c0_94 = arith.constant 0 : index
    %c18 = arith.constant 18 : index
    %c0_95 = arith.constant 0 : index
    %82 = vector.load %arg1[%c0_94, %c18, %c0_95] : memref<1x1160x8xbf16, #tpu.memory_space<vmem>>, vector<1x272x8xbf16>
    %83 = vector.shape_cast %82 : vector<1x272x8xbf16> to vector<272x8xbf16>
    %c0_96 = arith.constant 0 : index
    %c0_97 = arith.constant 0 : index
    %84 = vector.load %arg5[%c0_96, %c0_97] : memref<272x8xf32, #tpu.memory_space<vmem>>, vector<272x8xf32>
    %c10 = arith.constant 10 : index
    %c0_98 = arith.constant 0 : index
    %c0_99 = arith.constant 0 : index
    %85 = vector.load %arg2[%c10, %c0_98, %c0_99] : memref<16x8x8xbf16, #tpu.memory_space<vmem>>, vector<1x8x8xbf16>
    %86 = vector.shape_cast %85 : vector<1x8x8xbf16> to vector<8x8xbf16>
    %cst_100 = arith.constant dense<0.000000e+00> : vector<272x8xf32>
    %87 = tpu.matmul %83, %86, %cst_100 {dimension_numbers = #tpu.dot_dimension_numbers<[1], [0], [0], [1], [0, 0, 1, 1], [], []>} : vector<272x8xbf16>, vector<8x8xbf16>, vector<272x8xf32> -> vector<272x8xf32>
    %88 = arith.addf %84, %87 : vector<272x8xf32>
    %c0_101 = arith.constant 0 : index
    %c0_102 = arith.constant 0 : index
    %89 = vector.load %arg5[%c0_101, %c0_102] : memref<272x8xf32, #tpu.memory_space<vmem>>, vector<272x8xf32>
    tpu.vector_store %arg5[%c0_101, %c0_102], %88 {strides = array<i32>} : memref<272x8xf32, #tpu.memory_space<vmem>>, vector<272x8xf32>,
    %c0_103 = arith.constant 0 : index
    %c307 = arith.constant 307 : index
    %c0_104 = arith.constant 0 : index
    %90 = vector.load %arg1[%c0_103, %c307, %c0_104] : memref<1x1160x8xbf16, #tpu.memory_space<vmem>>, vector<1x272x8xbf16>
    %91 = vector.shape_cast %90 : vector<1x272x8xbf16> to vector<272x8xbf16>
    %c0_105 = arith.constant 0 : index
    %c0_106 = arith.constant 0 : index
    %92 = vector.load %arg5[%c0_105, %c0_106] : memref<272x8xf32, #tpu.memory_space<vmem>>, vector<272x8xf32>
    %c11 = arith.constant 11 : index
    %c0_107 = arith.constant 0 : index
    %c0_108 = arith.constant 0 : index
    %93 = vector.load %arg2[%c11, %c0_107, %c0_108] : memref<16x8x8xbf16, #tpu.memory_space<vmem>>, vector<1x8x8xbf16>
    %94 = vector.shape_cast %93 : vector<1x8x8xbf16> to vector<8x8xbf16>
    %cst_109 = arith.constant dense<0.000000e+00> : vector<272x8xf32>
    %95 = tpu.matmul %91, %94, %cst_109 {dimension_numbers = #tpu.dot_dimension_numbers<[1], [0], [0], [1], [0, 0, 1, 1], [], []>} : vector<272x8xbf16>, vector<8x8xbf16>, vector<272x8xf32> -> vector<272x8xf32>
    %96 = arith.addf %92, %95 : vector<272x8xf32>
    %c0_110 = arith.constant 0 : index
    %c0_111 = arith.constant 0 : index
    %97 = vector.load %arg5[%c0_110, %c0_111] : memref<272x8xf32, #tpu.memory_space<vmem>>, vector<272x8xf32>
    tpu.vector_store %arg5[%c0_110, %c0_111], %96 {strides = array<i32>} : memref<272x8xf32, #tpu.memory_space<vmem>>, vector<272x8xf32>,
    %c0_112 = arith.constant 0 : index
    %c595 = arith.constant 595 : index
    %c0_113 = arith.constant 0 : index
    %98 = vector.load %arg1[%c0_112, %c595, %c0_113] : memref<1x1160x8xbf16, #tpu.memory_space<vmem>>, vector<1x272x8xbf16>
    %99 = vector.shape_cast %98 : vector<1x272x8xbf16> to vector<272x8xbf16>
    %c0_114 = arith.constant 0 : index
    %c0_115 = arith.constant 0 : index
    %100 = vector.load %arg5[%c0_114, %c0_115] : memref<272x8xf32, #tpu.memory_space<vmem>>, vector<272x8xf32>
    %c12 = arith.constant 12 : index
    %c0_116 = arith.constant 0 : index
    %c0_117 = arith.constant 0 : index
    %101 = vector.load %arg2[%c12, %c0_116, %c0_117] : memref<16x8x8xbf16, #tpu.memory_space<vmem>>, vector<1x8x8xbf16>
    %102 = vector.shape_cast %101 : vector<1x8x8xbf16> to vector<8x8xbf16>
    %cst_118 = arith.constant dense<0.000000e+00> : vector<272x8xf32>
    %103 = tpu.matmul %99, %102, %cst_118 {dimension_numbers = #tpu.dot_dimension_numbers<[1], [0], [0], [1], [0, 0, 1, 1], [], []>} : vector<272x8xbf16>, vector<8x8xbf16>, vector<272x8xf32> -> vector<272x8xf32>
    %104 = arith.addf %100, %103 : vector<272x8xf32>
    %c0_119 = arith.constant 0 : index
    %c0_120 = arith.constant 0 : index
    %105 = vector.load %arg5[%c0_119, %c0_120] : memref<272x8xf32, #tpu.memory_space<vmem>>, vector<272x8xf32>
    tpu.vector_store %arg5[%c0_119, %c0_120], %104 {strides = array<i32>} : memref<272x8xf32, #tpu.memory_space<vmem>>, vector<272x8xf32>,
    %c0_121 = arith.constant 0 : index
    %c884 = arith.constant 884 : index
    %c0_122 = arith.constant 0 : index
    %106 = vector.load %arg1[%c0_121, %c884, %c0_122] : memref<1x1160x8xbf16, #tpu.memory_space<vmem>>, vector<1x272x8xbf16>
    %107 = vector.shape_cast %106 : vector<1x272x8xbf16> to vector<272x8xbf16>
    %c0_123 = arith.constant 0 : index
    %c0_124 = arith.constant 0 : index
    %108 = vector.load %arg5[%c0_123, %c0_124] : memref<272x8xf32, #tpu.memory_space<vmem>>, vector<272x8xf32>
    %c13 = arith.constant 13 : index
    %c0_125 = arith.constant 0 : index
    %c0_126 = arith.constant 0 : index
    %109 = vector.load %arg2[%c13, %c0_125, %c0_126] : memref<16x8x8xbf16, #tpu.memory_space<vmem>>, vector<1x8x8xbf16>
    %110 = vector.shape_cast %109 : vector<1x8x8xbf16> to vector<8x8xbf16>
    %cst_127 = arith.constant dense<0.000000e+00> : vector<272x8xf32>
    %111 = tpu.matmul %107, %110, %cst_127 {dimension_numbers = #tpu.dot_dimension_numbers<[1], [0], [0], [1], [0, 0, 1, 1], [], []>} : vector<272x8xbf16>, vector<8x8xbf16>, vector<272x8xf32> -> vector<272x8xf32>
    %112 = arith.addf %108, %111 : vector<272x8xf32>
    %c0_128 = arith.constant 0 : index
    %c0_129 = arith.constant 0 : index
    %113 = vector.load %arg5[%c0_128, %c0_129] : memref<272x8xf32, #tpu.memory_space<vmem>>, vector<272x8xf32>
    tpu.vector_store %arg5[%c0_128, %c0_129], %112 {strides = array<i32>} : memref<272x8xf32, #tpu.memory_space<vmem>>, vector<272x8xf32>,
    %c0_130 = arith.constant 0 : index
    %c596 = arith.constant 596 : index
    %c0_131 = arith.constant 0 : index
    %114 = vector.load %arg1[%c0_130, %c596, %c0_131] : memref<1x1160x8xbf16, #tpu.memory_space<vmem>>, vector<1x272x8xbf16>
    %115 = vector.shape_cast %114 : vector<1x272x8xbf16> to vector<272x8xbf16>
    %c0_132 = arith.constant 0 : index
    %c0_133 = arith.constant 0 : index
    %116 = vector.load %arg5[%c0_132, %c0_133] : memref<272x8xf32, #tpu.memory_space<vmem>>, vector<272x8xf32>
    %c14 = arith.constant 14 : index
    %c0_134 = arith.constant 0 : index
    %c0_135 = arith.constant 0 : index
    %117 = vector.load %arg2[%c14, %c0_134, %c0_135] : memref<16x8x8xbf16, #tpu.memory_space<vmem>>, vector<1x8x8xbf16>
    %118 = vector.shape_cast %117 : vector<1x8x8xbf16> to vector<8x8xbf16>
    %cst_136 = arith.constant dense<0.000000e+00> : vector<272x8xf32>
    %119 = tpu.matmul %115, %118, %cst_136 {dimension_numbers = #tpu.dot_dimension_numbers<[1], [0], [0], [1], [0, 0, 1, 1], [], []>} : vector<272x8xbf16>, vector<8x8xbf16>, vector<272x8xf32> -> vector<272x8xf32>
    %120 = arith.addf %116, %119 : vector<272x8xf32>
    %c0_137 = arith.constant 0 : index
    %c0_138 = arith.constant 0 : index
    %121 = vector.load %arg5[%c0_137, %c0_138] : memref<272x8xf32, #tpu.memory_space<vmem>>, vector<272x8xf32>
    tpu.vector_store %arg5[%c0_137, %c0_138], %120 {strides = array<i32>} : memref<272x8xf32, #tpu.memory_space<vmem>>, vector<272x8xf32>,
    %c0_139 = arith.constant 0 : index
    %c885 = arith.constant 885 : index
    %c0_140 = arith.constant 0 : index
    %122 = vector.load %arg1[%c0_139, %c885, %c0_140] : memref<1x1160x8xbf16, #tpu.memory_space<vmem>>, vector<1x272x8xbf16>
    %123 = vector.shape_cast %122 : vector<1x272x8xbf16> to vector<272x8xbf16>
    %c0_141 = arith.constant 0 : index
    %c0_142 = arith.constant 0 : index
    %124 = vector.load %arg5[%c0_141, %c0_142] : memref<272x8xf32, #tpu.memory_space<vmem>>, vector<272x8xf32>
    %c15 = arith.constant 15 : index
    %c0_143 = arith.constant 0 : index
    %c0_144 = arith.constant 0 : index
    %125 = vector.load %arg2[%c15, %c0_143, %c0_144] : memref<16x8x8xbf16, #tpu.memory_space<vmem>>, vector<1x8x8xbf16>
    %126 = vector.shape_cast %125 : vector<1x8x8xbf16> to vector<8x8xbf16>
    %cst_145 = arith.constant dense<0.000000e+00> : vector<272x8xf32>
    %127 = tpu.matmul %123, %126, %cst_145 {dimension_numbers = #tpu.dot_dimension_numbers<[1], [0], [0], [1], [0, 0, 1, 1], [], []>} : vector<272x8xbf16>, vector<8x8xbf16>, vector<272x8xf32> -> vector<272x8xf32>
    %128 = arith.addf %124, %127 : vector<272x8xf32>
    %c0_146 = arith.constant 0 : index
    %c0_147 = arith.constant 0 : index
    %129 = vector.load %arg5[%c0_146, %c0_147] : memref<272x8xf32, #tpu.memory_space<vmem>>, vector<272x8xf32>
    tpu.vector_store %arg5[%c0_146, %c0_147], %128 {strides = array<i32>} : memref<272x8xf32, #tpu.memory_space<vmem>>, vector<272x8xf32>,
    %c0_148 = arith.constant 0 : index
    %c0_149 = arith.constant 0 : index
    %130 = vector.load %arg5[%c0_148, %c0_149] : memref<272x8xf32, #tpu.memory_space<vmem>>, vector<272x8xf32>
    %c0_150 = arith.constant 0 : index
    %c0_151 = arith.constant 0 : index
    %131 = vector.load %arg3[%c0_150, %c0_151] : memref<1x8xf32, #tpu.memory_space<vmem>>, vector<1x8xf32>
    %132 = vector.broadcast %131 : vector<1x8xf32> to vector<272x8xf32>
    %133 = arith.addf %130, %132 : vector<272x8xf32>
    %cst_152 = arith.constant 0.000000e+00 : f32
    %134 = vector.broadcast %cst_152 : f32 to vector<272x8xf32>
    %135 = arith.cmpf oge, %133, %134 : vector<272x8xf32>
    %cst_153 = arith.constant 2.000000e-01 : f32
    %136 = vector.broadcast %cst_153 : f32 to vector<272x8xf32>
    %137 = arith.mulf %136, %133 : vector<272x8xf32>
    %138 = arith.select %135, %133, %137 : vector<272x8xi1>, vector<272x8xf32>
    %c0_154 = arith.constant 0 : index
    %c0_155 = arith.constant 0 : index
    %c0_156 = arith.constant 0 : index
    %139 = vector.load %arg4[%c0_154, %c0_155, %c0_156] : memref<1x272x8xf32, #tpu.memory_space<vmem>>, vector<1x272x8xf32>
    %140 = vector.shape_cast %139 : vector<1x272x8xf32> to vector<272x8xf32>
    %141 = vector.shape_cast %138 : vector<272x8xf32> to vector<1x272x8xf32>
    tpu.vector_store %arg4[%c0_154, %c0_155, %c0_156], %141 {strides = array<i32>} : memref<1x272x8xf32, #tpu.memory_space<vmem>>, vector<1x272x8xf32>,
    return
  }
  func.func @transform_0(%arg0: i32) -> (i32, i32, i32) {
    %c0_i32 = arith.constant 0 : i32
    %c0_i32_0 = arith.constant 0 : i32
    %c0_i32_1 = arith.constant 0 : i32
    return %arg0, %c0_i32, %c0_i32_0 : i32, i32, i32
  }
  func.func @transform_1(%arg0: i32) -> (i32, i32, i32) {
    %c0_i32 = arith.constant 0 : i32
    %c0_i32_0 = arith.constant 0 : i32
    %c0_i32_1 = arith.constant 0 : i32
    %c0_i32_2 = arith.constant 0 : i32
    return %c0_i32, %c0_i32_0, %c0_i32_1 : i32, i32, i32
  }
  func.func @transform_2(%arg0: i32) -> (i32, i32) {
    %c0_i32 = arith.constant 0 : i32
    %c0_i32_0 = arith.constant 0 : i32
    %c0_i32_1 = arith.constant 0 : i32
    return %c0_i32, %c0_i32_0 : i32, i32
  }
  func.func @transform_3(%arg0: i32) -> (i32, i32, i32) {
    %c0_i32 = arith.constant 0 : i32
    %c0_i32_0 = arith.constant 0 : i32
    %c0_i32_1 = arith.constant 0 : i32
    return %arg0, %c0_i32, %c0_i32_0 : i32, i32, i32
  }
}

</mosaic_0001>

<bundles_post_ra>
// kernel: tpu_custom_call.1
= control target key start
LH: loop header
LB: loop body
LE: loop exit
PB: predicated region body
PF: predicated region fallthrough
CT: control target
= control target key end

     0   :  { %s11465_s12 = smov 0   ;;  %s14051_s0 = inlined_call_operand.vmem [shape: bf16[4,1160,8], index: 0, kind: input, shape index: {}]   ;;  %s14052_s1 = inlined_call_operand.vmem [shape: bf16[16,8,8], index: 1, kind: input, shape index: {}]   ;;  %s14053_s2 = inlined_call_operand.vmem [shape: f32[1,8], index: 2, kind: input, shape index: {}]   ;;  %s14054_s3 = inlined_call_operand.vmem [shape: f32[4,272,8], index: 3, kind: output, shape index: {}]  }
   0x1 LB: > { %s9144_s13 = sadd.s32 4294967295, %s11441_s12   ;;  %p9148_p0 = scmp.ge.s32.totalorder %s11441_s12, 1  ;;  %s11441_s12 = sphi %s11465_s12, %s13_s12  }
   0x2   : > { %p137_p1 = scmp.lt.s32.totalorder %s11441_s12, 5 }
   0x4   : > { %p138_p2 = pnand %p9148_p0, %p137_p1 }
   0x5   : > { %p161_p3 = scmp.lt.s32.totalorder (!%p138_p2), %s9144_s13, 3 }
   0x6   : > { %141 = sbr.rel (%p138_p2) target bundleno = 1320 (0x528), region = 32 }
   0xb   : > { %v275_v0 = vld [vmem:[%s14052_s1] sm:$0xf]  ;;  %vm412_vm0 = vcmask 1043456   ;;  %v11443_v1 = vmov 0.0   ;;  %vm11444_vm1 = vmmov 0   ;;  %vm172_vm2 = vcmask 64512  }
   0xc   : > { %10016 = vmatprep.subr.bf16.mxu0 %v11443_v1  ;;  %v414_v2 = vsel %vm412_vm0, %v275_v0, 0  ;;  %10018 = vmatprep.mubr.msk.bf16.mxu0 %vm11444_vm1, %v11443_v1  ;;  %v9185_v3 = vld [vmem:[%s14052_s1 + $0x4] sm:$0xf]  ;;  %s14056_s13 = smov (!%p161_p3, %s9144_s13), 3  ;;  %173 = vst.msk [vmem:[#allocation2] sm:$0xff] %vm172_vm2, %v11443_v1  ;;  %174 = vst.msk [vmem:[#allocation2 + $0x8] sm:$0xff] %vm172_vm2, %v11443_v1 }
   0xd   : > { %10017 = vmatpush3.bf16.msra.mxu0 %v414_v2  ;;  %175 = vst.msk [vmem:[#allocation2 + $0x10] sm:$0xff] %vm172_vm2, %v11443_v1  ;;  %176 = vst.msk [vmem:[#allocation2 + $0x18] sm:$0xff] %vm172_vm2, %v11443_v1  ;;  %10086 = vmatprep.subr.bf16.mxu1 %v11443_v1  ;;  %v1005_v4 = vsel %vm412_vm0, %v9185_v3, 0  ;;  %s11136_s18 = smul.u32 580, %s14056_s13  ;;  %v9221_v5 = vld [vmem:[%s14052_s1 + $0x8] sm:$0xf] }
   0xe   : > { %177 = vst.msk [vmem:[#allocation2 + $0x20] sm:$0xff] %vm172_vm2, %v11443_v1  ;;  %178 = vst.msk [vmem:[#allocation2 + $0x28] sm:$0xff] %vm172_vm2, %v11443_v1  ;;  %10156 = vmatprep.subr.bf16.mxu0 %v11443_v1  ;;  %10087 = vmatpush3.bf16.msra.mxu1 %v1005_v4  ;;  %v1595_v7 = vsel %vm412_vm0, %v9221_v5, 0  ;;  %v9257_v14 = vld [vmem:[%s14052_s1 + $0xc] sm:$0xf]  ;;  %vm1993_vm4 = vcmask 1046528  }
   0xf   : > { %179 = vst.msk [vmem:[#allocation2 + $0x30] sm:$0xff] %vm172_vm2, %v11443_v1  ;;  %180 = vst.msk [vmem:[#allocation2 + $0x38] sm:$0xff] %vm172_vm2, %v11443_v1  ;;  %10088 = vmatprep.mubr.msk.bf16.mxu1 %vm11444_vm1, %v11443_v1  ;;  %10226 = vmatprep.subr.bf16.mxu1 %v11443_v1  ;;  %s11566_s23 = scalar_lea.vmem %s14051_s0, %s11136_s18  ;;  %vm812_vm3 = vsmask.f32 7424  ;;  %v2081_v21 = vsel %vm412_vm0, %v9257_v14, 0  ;;  %vm4187_vm6 = vcmask 1045504  }
  0x10   : > { %181 = vst.msk [vmem:[#allocation2 + $0x40] sm:$0xff] %vm172_vm2, %v11443_v1  ;;  %182 = vst.msk [vmem:[#allocation2 + $0x48] sm:$0xff] %vm172_vm2, %v11443_v1  ;;  %v11148_v6 = vld [vmem:[%s11566_s23] sm:$0xff]   ;;  %v11149_v8 = vld [vmem:[%s11566_s23 + $0x90] sm:$0xff]   ;;  %vm2964_vm5 = vsmask.f32 6400 }
  0x11   : > { %183 = vst.msk [vmem:[#allocation2 + $0x50] sm:$0xff] %vm172_vm2, %v11443_v1  ;;  %184 = vst.msk [vmem:[#allocation2 + $0x58] sm:$0xff] %vm172_vm2, %v11443_v1  ;;  %10019 = vmatmul.mubr.msk.bf16.vlgmr.msra.gmra.mxu0 %vm172_vm2, %v11148_v6  ;;  %v11150_v9 = vld [vmem:[%s11566_s23 + $0x98] sm:$0xff]   ;;  %v814_v10 = vshrl.u32 %v11149_v8, 16  ;;  %v816_v11 = vshll.u32 %v11149_v8, 16  ;;  %v11152_v13 = vld [vmem:[%s11566_s23 + $0xa0] sm:$0xff]  }
  0x12   : > { %185 = vst.msk [vmem:[#allocation2 + $0x60] sm:$0xff] %vm172_vm2, %v11443_v1  ;;  %186 = vst.msk [vmem:[#allocation2 + $0x68] sm:$0xff] %vm172_vm2, %v11443_v1  ;;  %10157 = vmatpush3.bf16.msra.mxu0 %v1595_v7  ;;  %10022 = vmatprep.mubr.msk.bf16.mxu0 %vm11444_vm1, %v11443_v1  ;;  %v821_v12 = vshll.u32 %v11150_v9, 16  ;;  %v11151_v17 = vld [vmem:[%s11566_s23 + $0x8] sm:$0xff]   ;;  %v825_v19 = vshrl.u32 %v11150_v9, 16  ;;  %v829_v20 = vshll.u32 %v11152_v13, 16 }
  0x13   : > { %187 = vst.msk [vmem:[#allocation2 + $0x70] sm:$0xff] %vm172_vm2, %v11443_v1  ;;  %188 = vst.msk [vmem:[#allocation2 + $0x78] sm:$0xff] %vm172_vm2, %v11443_v1  ;;  %10296 = vmatprep.subr.bf16.mxu0 %v11443_v1  ;;  %v818_v15 = vrot.slane %v816_v11, 1  ;;  %v11154_v25 = vld [vmem:[%s11566_s23 + $0xa8] sm:$0xff]   ;;  %v11153_v26 = vld [vmem:[%s11566_s23 + $0x10] sm:$0xff]   ;;  %v833_v28 = vshrl.u32 %v11152_v13, 16 }
  0x14   : > { %189 = vst.msk [vmem:[#allocation2 + $0x80] sm:$0xff] %vm172_vm2, %v11443_v1  ;;  %190 = vst.msk [vmem:[#allocation2 + $0x88] sm:$0xff] %vm172_vm2, %v11443_v1  ;;  %v823_v16 = vrot.slane %v821_v12, 1  ;;  %v831_v24 = vrot.slane %v829_v20, 1  ;;  %v837_v29 = vshll.u32 %v11154_v25, 16  ;;  %v11156_v30 = vld [vmem:[%s11566_s23 + $0xb0] sm:$0xff]  }
  0x15   : > { %191 = vst.msk [vmem:[#allocation2 + $0x90] sm:$0xff] %vm172_vm2, %v11443_v1  ;;  %192 = vst.msk [vmem:[#allocation2 + $0x98] sm:$0xff] %vm172_vm2, %v11443_v1  ;;  %v819_v18 = vor.u32 %v818_v15, %v814_v10  ;;  %v11155_v33 = vld [vmem:[%s11566_s23 + $0x18] sm:$0xff]   ;;  %v845_v34 = vshll.u32 %v11156_v30, 16  ;;  %v841_v36 = vshrl.u32 %v11154_v25, 16  ;;  %v11157_v40 = vld [vmem:[%s11566_s23 + $0x20] sm:$0xff]  }
  0x16   : > { %193 = vst.msk [vmem:[#allocation2 + $0xa0] sm:$0xff] %vm172_vm2, %v11443_v1  ;;  %194 = vst.msk [vmem:[#allocation2 + $0xa8] sm:$0xff] %vm172_vm2, %v11443_v1  ;;  %v827_v23 = vor.u32 %v825_v19, %v823_v16  ;;  %v835_v31 = vor.u32 %v833_v28, %v831_v24  ;;  %v839_v32 = vrot.slane %v837_v29, 1  ;;  %v11158_v38 = vld [vmem:[%s11566_s23 + $0xb8] sm:$0xff]   ;;  %v849_v42 = vshrl.u32 %v11156_v30, 16  ;;  %v11160_v46 = vld [vmem:[%s11566_s23 + $0xc0] sm:$0xff]  }
  0x17   : > { %195 = vst.msk [vmem:[#allocation2 + $0xb0] sm:$0xff] %vm172_vm2, %v11443_v1  ;;  %196 = vst.msk [vmem:[#allocation2 + $0xb8] sm:$0xff] %vm172_vm2, %v11443_v1  ;;  %v824_v22 = vsel %vm812_vm3, %v819_v18, %v823_v16  ;;  %v847_v37 = vrot.slane %v845_v34, 1  ;;  %v853_v43 = vshll.u32 %v11158_v38, 16  ;;  %v11159_v47 = vld [vmem:[%s11566_s23 + $0x28] sm:$0xff]   ;;  %v857_v49 = vshrl.u32 %v11158_v38, 16 }
  0x18   : > { %197 = vst.msk [vmem:[#allocation2 + $0xc0] sm:$0xff] %vm172_vm2, %v11443_v1  ;;  %198 = vst.msk [vmem:[#allocation2 + $0xc8] sm:$0xff] %vm172_vm2, %v11443_v1  ;;  %10089 = vmatmul.mubr.msk.bf16.vlgmr.msra.gmra.mxu1 %vm172_vm2, %v824_v22  ;;  %v832_v27 = vsel %vm812_vm3, %v827_v23, %v831_v24  ;;  %v840_v35 = vsel %vm812_vm3, %v835_v31, %v839_v32  ;;  %v843_v39 = vor.u32 %v841_v36, %v839_v32  ;;  %v11162_v53 = vld [vmem:[%s11566_s23 + $0xc8] sm:$0xff]   ;;  %v11161_v54 = vld [vmem:[%s11566_s23 + $0x30] sm:$0xff]   ;;  %vm8425_vm7 = vsmask.f32 5376 }
  0x19   : > { %199 = vst.msk [vmem:[#allocation2 + $0xd0] sm:$0xff] %vm172_vm2, %v11443_v1  ;;  %200 = vst.msk [vmem:[#allocation2 + $0xd8] sm:$0xff] %vm172_vm2, %v11443_v1  ;;  %10023 = vmatmul.mubr.msk.bf16.gmra.mxu0 %vm172_vm2, %v11151_v17  ;;  %10227 = vmatpush3.bf16.msra.mxu1 %v2081_v21  ;;  %v851_v44 = vor.u32 %v849_v42, %v847_v37  ;;  %v855_v45 = vrot.slane %v853_v43, 1  ;;  %v861_v50 = vshll.u32 %v11160_v46, 16  ;;  %v865_v56 = vshrl.u32 %v11160_v46, 16  ;;  %v11164_v60 = vld [vmem:[%s11566_s23 + $0xd0] sm:$0xff]  }
  0x1a   : > { %201 = vst.msk [vmem:[#allocation2 + $0xe0] sm:$0xff] %vm172_vm2, %v11443_v1  ;;  %202 = vst.msk [vmem:[#allocation2 + $0xe8] sm:$0xff] %vm172_vm2, %v11443_v1  ;;  %10026 = vmatprep.mubr.msk.bf16.mxu0 %vm11444_vm1, %v11443_v1  ;;  %10092 = vmatprep.mubr.msk.bf16.mxu1 %vm11444_vm1, %v11443_v1  ;;  %v848_v41 = vsel %vm812_vm3, %v843_v39, %v847_v37  ;;  %v869_v57 = vshll.u32 %v11162_v53, 16  ;;  %v11163_v61 = vld [vmem:[%s11566_s23 + $0x38] sm:$0xff]   ;;  %v873_v63 = vshrl.u32 %v11162_v53, 16  ;;  %v877_v0 = vshll.u32 %v11164_v60, 16 }
  0x1b   : > { %203 = vst.msk [vmem:[#allocation2 + $0xf0] sm:$0xff] %vm172_vm2, %v11443_v1  ;;  %204 = vst.msk [vmem:[#allocation2 + $0xf8] sm:$0xff] %vm172_vm2, %v11443_v1  ;;  %10366 = vmatprep.subr.bf16.mxu1 %v11443_v1  ;;  %v856_v48 = vsel %vm812_vm3, %v851_v44, %v855_v45  ;;  %v859_v51 = vor.u32 %v857_v49, %v855_v45  ;;  %v863_v52 = vrot.slane %v861_v50, 1  ;;  %v11166_v2 = vld [vmem:[%s11566_s23 + $0xd8] sm:$0xff]   ;;  %v11165_v5 = vld [vmem:[%s11566_s23 + $0x40] sm:$0xff]   ;;  %v881_v6 = vshrl.u32 %v11164_v60, 16 }
  0x1c   : > { %205 = vst.msk [vmem:[#allocation2 + $0x100] sm:$0xff] %vm172_vm2, %v11443_v1  ;;  %206 = vst.msk [vmem:[#allocation2 + $0x108] sm:$0xff] %vm172_vm2, %v11443_v1  ;;  %v871_v59 = vrot.slane %v869_v57, 1  ;;  %v879_v4 = vrot.slane %v877_v0, 1  ;;  %v885_v7 = vshll.u32 %v11166_v2, 16  ;;  %v11168_v10 = vld [vmem:[%s11566_s23 + $0xe0] sm:$0xff]  }
  0x1d   : > { %v864_v55 = vsel %vm812_vm3, %v859_v51, %v863_v52  ;;  %v867_v58 = vor.u32 %v865_v56, %v863_v52  ;;  %v11167_v12 = vld [vmem:[%s11566_s23 + $0x48] sm:$0xff]   ;;  %v889_v14 = vshrl.u32 %v11166_v2, 16  ;;  %v893_v15 = vshll.u32 %v11168_v10, 16  ;;  %v11169_v19 = vld [vmem:[%s11566_s23 + $0x50] sm:$0xff]   ;;  %v11174_v32 = vld [vmem:[%s11566_s23 + $0xf8] sm:$0xff]   ;;  %s11137_s27 = smul.u32 272, %s14056_s13 }
  0x1e   : > { %v875_v3 = vor.u32 %v873_v63, %v871_v59  ;;  %v887_v9 = vrot.slane %v885_v7, 1  ;;  %v883_v11 = vor.u32 %v881_v6, %v879_v4  ;;  %v11170_v18 = vld [vmem:[%s11566_s23 + $0xe8] sm:$0xff]   ;;  %v897_v21 = vshrl.u32 %v11168_v10, 16  ;;  %v11172_v25 = vld [vmem:[%s11566_s23 + $0xf0] sm:$0xff]   ;;  %v11176_v39 = vld [vmem:[%s11566_s23 + $0x100] sm:$0xff]  }
  0x1f   : > { %v872_v62 = vsel %vm812_vm3, %v867_v58, %v871_v59  ;;  %v895_v17 = vrot.slane %v893_v15, 1  ;;  %v901_v22 = vshll.u32 %v11170_v18, 16  ;;  %v905_v28 = vshrl.u32 %v11170_v18, 16  ;;  %v11178_v46 = vld [vmem:[%s11566_s23 + $0x108] sm:$0xff]   ;;  %v11180_v53 = vld [vmem:[%s11566_s23 + $0x110] sm:$0xff]   ;;  %v11181_v2 = vld [vmem:[%s11566_s23 + $0x80] sm:$0xff]   ;;  %s13885_s30 = scalar_lea.vmem %s14054_s3, %s11137_s27 }
  0x20   : > { %10093 = vmatmul.mubr.msk.bf16.gmra.mxu1 %vm172_vm2, %v832_v27  ;;  %v880_v8 = vsel %vm812_vm3, %v875_v3, %v879_v4  ;;  %v888_v13 = vsel %vm812_vm3, %v883_v11, %v887_v9  ;;  %v891_v16 = vor.u32 %v889_v14, %v887_v9  ;;  %v909_v29 = vshll.u32 %v11172_v25, 16  ;;  %v11184_v59 = vld [vmem:[%s11566_s23 + $0x8] sm:$0xff]   ;;  %v11187_v9 = vld [vmem:[%s11566_s23 + $0x10] sm:$0xff]   ;;  %v11186_v15 = vld [vmem:[%s11566_s23 + $0x98] sm:$0xff]  }
  0x21   : > { %10027 = vmatmul.mubr.msk.bf16.gmra.mxu0 %vm172_vm2, %v11153_v26  ;;  %10096 = vmatprep.mubr.msk.bf16.mxu1 %vm11444_vm1, %v11443_v1  ;;  %v899_v23 = vor.u32 %v897_v21, %v895_v17  ;;  %v903_v24 = vrot.slane %v901_v22, 1  ;;  %v11171_v26 = vld [vmem:[%s11566_s23 + $0x58] sm:$0xff]   ;;  %v917_v36 = vshll.u32 %v11174_v32, 16  ;;  %v921_v42 = vshrl.u32 %v11174_v32, 16  ;;  %v9293_v10 = vld [vmem:[%s14052_s1 + $0x10] sm:$0xf] }
  0x22   : > { %10030 = vmatprep.mubr.msk.bf16.mxu0 %vm11444_vm1, %v11443_v1  ;;  %v896_v20 = vsel %vm812_vm3, %v891_v16, %v895_v17  ;;  %v911_v31 = vrot.slane %v909_v29, 1  ;;  %v925_v43 = vshll.u32 %v11176_v39, 16  ;;  %v929_v49 = vshrl.u32 %v11176_v39, 16  ;;  %v11189_v22 = vld [vmem:[%s11566_s23 + $0x18] sm:$0xff]  }
  0x23   : > { %v904_v27 = vsel %vm812_vm3, %v899_v23, %v903_v24  ;;  %v907_v30 = vor.u32 %v905_v28, %v903_v24  ;;  %v919_v38 = vrot.slane %v917_v36, 1  ;;  %v933_v50 = vshll.u32 %v11178_v46, 16 }
  0x24   : > { %v927_v45 = vrot.slane %v925_v43, 1  ;;  %v937_v57 = vshrl.u32 %v11178_v46, 16  ;;  %v941_v58 = vshll.u32 %v11180_v53, 16  ;;  %v1411_v0 = vshll.u32 %v11184_v59, 16  ;;  %v11193_v43 = vld [vmem:[%s11566_s23 + $0x28] sm:$0xff]  }
  0x25   : > { %v912_v34 = vsel %vm812_vm3, %v907_v30, %v911_v31  ;;  %v923_v44 = vor.u32 %v921_v42, %v919_v38  ;;  %v935_v52 = vrot.slane %v933_v50, 1  ;;  %v945_v6 = vshrl.u32 %v11180_v53, 16  ;;  %v11192_v50 = vld [vmem:[%s11566_s23 + $0xb0] sm:$0xff]  }
  0x26   : > { %v931_v51 = vor.u32 %v929_v49, %v927_v45  ;;  %v943_v63 = vrot.slane %v941_v58, 1  ;;  %v1419_v14 = vshll.u32 %v11187_v9, 16  ;;  %v2566_v17 = vsel %vm412_vm0, %v9293_v10, 0 }
  0x27   : > { %v1415_v18 = vshrl.u32 %v11184_v59, 16  ;;  %v1423_v29 = vshrl.u32 %v11187_v9, 16  ;;  %v1431_v39 = vshrl.u32 %v11189_v22, 16  ;;  %v1443_v46 = vshll.u32 %v11193_v43, 16  ;;  %v11194_v59 = vld [vmem:[%s11566_s23 + $0xb8] sm:$0xff]  }
  0x28   : > { %10097 = vmatmul.mubr.msk.bf16.gmra.mxu1 %vm172_vm2, %v840_v35  ;;  %v913_v35 = vshrl.u32 %v11172_v25, 16  ;;  %v936_v56 = vsel %vm812_vm3, %v931_v51, %v935_v52  ;;  %v1421_v21 = vrot.slane %v1419_v14, 1  ;;  %v1995_v25 = vrot.slane %v11186_v15, 1  ;;  %v11198_v14 = vld [vmem:[%s11566_s23 + $0xc8] sm:$0xff]  }
  0x29   : > { %10031 = vmatmul.mubr.msk.bf16.gmra.mxu0 %vm172_vm2, %v11155_v33  ;;  %10100 = vmatprep.mubr.msk.bf16.mxu1 %vm11444_vm1, %v11443_v1  ;;  %v11173_v33 = vld [vmem:[%s11566_s23 + $0x60] sm:$0xff]   ;;  %v1445_v51 = vrot.slane %v1443_v46, 1 }
  0x2a   : > { %10034 = vmatprep.mubr.msk.bf16.mxu0 %vm11444_vm1, %v11443_v1  ;;  %v915_v37 = vor.u32 %v913_v35, %v911_v31  ;;  %v11188_v31 = vld [vmem:[%s11566_s23 + $0xa0] sm:$0xff]   ;;  %v1425_v35 = vor.u32 %v1423_v29, %v1421_v21 }
  0x2b   : > { %v1997_v36 = vrot.slane %v11188_v31, 1  ;;  %v242_v31 = vld [vmem:[#allocation2 + $0x8] sm:$0xff] }
  0x30   : > { %10101 = vmatmul.mubr.msk.bf16.gmra.mxu1 %vm172_vm2, %v848_v41  ;;  %v920_v41 = vsel %vm812_vm3, %v915_v37, %v919_v38 }
  0x31   : > { %10035 = vmatmul.mubr.msk.bf16.gmra.mxu0 %vm172_vm2, %v11157_v40  ;;  %10104 = vmatprep.mubr.msk.bf16.mxu1 %vm11444_vm1, %v11443_v1  ;;  %v11175_v40 = vld [vmem:[%s11566_s23 + $0x68] sm:$0xff]  }
  0x32   : > { %10038 = vmatprep.mubr.msk.bf16.mxu0 %vm11444_vm1, %v11443_v1 }
  0x38   : > { %10105 = vmatmul.mubr.msk.bf16.gmra.mxu1 %vm172_vm2, %v856_v48  ;;  %v928_v48 = vsel %vm812_vm3, %v923_v44, %v927_v45 }
  0x39   : > { %10039 = vmatmul.mubr.msk.bf16.gmra.mxu0 %vm172_vm2, %v11159_v47  ;;  %10108 = vmatprep.mubr.msk.bf16.mxu1 %vm11444_vm1, %v11443_v1  ;;  %v11177_v47 = vld [vmem:[%s11566_s23 + $0x70] sm:$0xff]  }
  0x3a   : > { %10042 = vmatprep.mubr.msk.bf16.mxu0 %vm11444_vm1, %v11443_v1 }
  0x40   : > { %10109 = vmatmul.mubr.msk.bf16.gmra.mxu1 %vm172_vm2, %v864_v55  ;;  %v11179_v55 = vld [vmem:[%s11566_s23 + $0x78] sm:$0xff]  }
  0x41   : > { %10043 = vmatmul.mubr.msk.bf16.gmra.mxu0 %vm172_vm2, %v11161_v54  ;;  %10112 = vmatprep.mubr.msk.bf16.mxu1 %vm11444_vm1, %v11443_v1  ;;  %v11183_v54 = vld [vmem:[%s11566_s23] sm:$0xff]  }
  0x42   : > { %10046 = vmatprep.mubr.msk.bf16.mxu0 %vm11444_vm1, %v11443_v1  ;;  %v1406_v60 = vshll.u32 %v11183_v54, 16  ;;  %v1404_v3 = vshrl.u32 %v11183_v54, 16  ;;  %v2001_v54 = vrot.slane %v11192_v50, 1  ;;  %v244_v50 = vld [vmem:[#allocation2 + $0x18] sm:$0xff] }
  0x44   : > { %v1408_v4 = vrot.slane %v1406_v60, 1 }
  0x46   : > { %v1409_v11 = vor.u32 %v1408_v4, %v1404_v3 }
  0x48   : > { %10113 = vmatmul.mubr.msk.bf16.gmra.mxu1 %vm172_vm2, %v872_v62  ;;  %v939_v62 = vor.u32 %v937_v57, %v935_v52  ;;  %v11195_v52 = vld [vmem:[%s11566_s23 + $0x30] sm:$0xff]   ;;  %v1447_v57 = vshrl.u32 %v11193_v43, 16 }
  0x49   : > { %10047 = vmatmul.mubr.msk.bf16.gmra.mxu0 %vm172_vm2, %v11163_v61  ;;  %10116 = vmatprep.mubr.msk.bf16.mxu1 %vm11444_vm1, %v11443_v1  ;;  %v11182_v61 = vld [vmem:[%s11566_s23 + $0x118] ss:$0 sps:$4 sm:$0x11]   ;;  %v1455_v3 = vshrl.u32 %v11195_v52, 16 }
  0x4a   : > { %10050 = vmatprep.mubr.msk.bf16.mxu0 %vm11444_vm1, %v11443_v1  ;;  %v949_v7 = vshll.u32 %v11182_v61, 16  ;;  %v11197_v61 = vld [vmem:[%s11566_s23 + $0x38] sm:$0xff]  }
  0x50   : > { %10117 = vmatmul.mubr.msk.bf16.gmra.mxu1 %vm172_vm2, %v880_v8  ;;  %v1413_v8 = vrot.slane %v1411_v0, 1  ;;  %v1459_v0 = vshll.u32 %v11197_v61, 16 }
  0x51   : > { %10051 = vmatmul.mubr.msk.bf16.gmra.mxu0 %vm172_vm2, %v11165_v5  ;;  %10120 = vmatprep.mubr.msk.bf16.mxu1 %vm11444_vm1, %v11443_v1  ;;  %v944_v5 = vsel %vm812_vm3, %v939_v62, %v943_v63  ;;  %v1449_v62 = vor.u32 %v1447_v57, %v1445_v51 }
  0x52   : > { %10054 = vmatprep.mubr.msk.bf16.mxu0 %vm11444_vm1, %v11443_v1  ;;  %v1414_v16 = vsel %vm812_vm3, %v1409_v11, %v1413_v8  ;;  %v1417_v23 = vor.u32 %v1415_v18, %v1413_v8  ;;  %v2007_v18 = vrot.slane %v11198_v14, 1 }
  0x54   : > { %v1422_v28 = vsel %vm812_vm3, %v1417_v23, %v1421_v21 }
  0x58   : > { %10121 = vmatmul.mubr.msk.bf16.gmra.mxu1 %vm172_vm2, %v888_v13  ;;  %v951_v13 = vrot.slane %v949_v7, 1  ;;  %v11199_v7 = vld [vmem:[%s11566_s23 + $0x40] sm:$0xff]  }
  0x59   : > { %10055 = vmatmul.mubr.msk.bf16.gmra.mxu0 %vm172_vm2, %v11167_v12  ;;  %10124 = vmatprep.mubr.msk.bf16.mxu1 %vm11444_vm1, %v11443_v1  ;;  %v947_v12 = vor.u32 %v945_v6, %v943_v63  ;;  %v2003_v63 = vrot.slane %v11194_v59, 1  ;;  %v1461_v6 = vrot.slane %v1459_v0, 1  ;;  %v1467_v10 = vshll.u32 %v11199_v7, 16 }
  0x5a   : > { %10058 = vmatprep.mubr.msk.bf16.mxu0 %vm11444_vm1, %v11443_v1 }
  0x5b   : > { %v2004_v4 = vsel %vm1993_vm4, %v2001_v54, %v2003_v63  ;;  %v1469_v15 = vrot.slane %v1467_v10, 1 }
  0x60   : > { %10125 = vmatmul.mubr.msk.bf16.gmra.mxu1 %vm172_vm2, %v896_v20  ;;  %v11185_v20 = vld [vmem:[%s11566_s23 + $0x90] sm:$0xfe]  }
  0x61   : > { %10059 = vmatmul.mubr.msk.bf16.gmra.mxu0 %vm172_vm2, %v11169_v19  ;;  %10128 = vmatprep.mubr.msk.bf16.mxu1 %vm11444_vm1, %v11443_v1  ;;  %v952_v19 = vsel %vm812_vm3, %v947_v12, %v951_v13  ;;  %v1994_v24 = vrot.slane %v11185_v20, 1  ;;  %v1463_v12 = vshrl.u32 %v11197_v61, 16  ;;  %v241_v20 = vld [vmem:[#allocation2] sm:$0xff] }
  0x62   : > { %10062 = vmatprep.mubr.msk.bf16.mxu0 %vm11444_vm1, %v11443_v1 }
  0x63   : > { %v1996_v30 = vsel %vm1993_vm4, %v1994_v24, %v1995_v25  ;;  %v11200_v24 = vld [vmem:[%s11566_s23 + $0xd0] sm:$0xff]  }
  0x68   : > { %10129 = vmatmul.mubr.msk.bf16.gmra.mxu1 %vm172_vm2, %v904_v27  ;;  %v1427_v27 = vshll.u32 %v11189_v22, 16  ;;  %v1471_v22 = vshrl.u32 %v11199_v7, 16 }
  0x69   : > { %10063 = vmatmul.mubr.msk.bf16.gmra.mxu0 %vm172_vm2, %v11171_v26  ;;  %10132 = vmatprep.mubr.msk.bf16.mxu1 %vm11444_vm1, %v11443_v1  ;;  %v9329_v26 = vld [vmem:[%s14052_s1 + $0x14] sm:$0xf] }
  0x6a   : > { %10066 = vmatprep.mubr.msk.bf16.mxu0 %vm11444_vm1, %v11443_v1  ;;  %v3178_v32 = vsel %vm412_vm0, %v9329_v26, 0  ;;  %v1473_v29 = vor.u32 %v1471_v22, %v1469_v15 }
  0x70   : > { %10133 = vmatmul.mubr.msk.bf16.gmra.mxu1 %vm172_vm2, %v912_v34  ;;  %v11191_v34 = vld [vmem:[%s11566_s23 + $0x20] sm:$0xff]  }
  0x71   : > { %10067 = vmatmul.mubr.msk.bf16.gmra.mxu0 %vm172_vm2, %v11173_v33  ;;  %10136 = vmatprep.mubr.msk.bf16.mxu1 %vm11444_vm1, %v11443_v1  ;;  %v1429_v33 = vrot.slane %v1427_v27, 1  ;;  %v1435_v37 = vshll.u32 %v11191_v34, 16  ;;  %v11203_v27 = vld [vmem:[%s11566_s23 + $0x50] sm:$0xff]  }
  0x72   : > { %10070 = vmatprep.mubr.msk.bf16.mxu0 %vm11444_vm1, %v11443_v1  ;;  %v1487_v61 = vshrl.u32 %v11203_v27, 16 }
  0x73   : > { %v1430_v38 = vsel %vm812_vm3, %v1425_v35, %v1429_v33  ;;  %v1437_v42 = vrot.slane %v1435_v37, 1  ;;  %v1433_v44 = vor.u32 %v1431_v39, %v1429_v33 }
  0x78   : > { %10137 = vmatmul.mubr.msk.bf16.gmra.mxu1 %vm172_vm2, %v920_v41  ;;  %v11190_v41 = vld [vmem:[%s11566_s23 + $0xa8] sm:$0xff]  }
  0x79   : > { %10071 = vmatmul.mubr.msk.bf16.gmra.mxu0 %vm172_vm2, %v11175_v40  ;;  %10140 = vmatprep.mubr.msk.bf16.mxu1 %vm11444_vm1, %v11443_v1  ;;  %v1998_v40 = vsel %vm1993_vm4, %v1995_v25, %v1997_v36  ;;  %v1999_v45 = vrot.slane %v11190_v41, 1  ;;  %v11823_v41 = vld [vmem:[%s11566_s23 + $0xd8] sm:$0xff]  }
  0x7a   : > { %10074 = vmatprep.mubr.msk.bf16.mxu0 %vm11444_vm1, %v11443_v1 }
  0x7b   : > { %v2000_v49 = vsel %vm1993_vm4, %v1997_v36, %v1999_v45  ;;  %v2002_v58 = vsel %vm1993_vm4, %v1999_v45, %v2001_v54  ;;  %v243_v36 = vld [vmem:[#allocation2 + $0x10] sm:$0xff] }
  0x80   : > { %10141 = vmatmul.mubr.msk.bf16.gmra.mxu1 %vm172_vm2, %v928_v48  ;;  %v1439_v48 = vshrl.u32 %v11191_v34, 16  ;;  %v1483_v34 = vshll.u32 %v11203_v27, 16 }
  0x81   : > { %10075 = vmatmul.mubr.msk.bf16.gmra.mxu0 %vm172_vm2, %v11177_v47  ;;  %10144 = vmatprep.mubr.msk.bf16.mxu1 %vm11444_vm1, %v11443_v1  ;;  %v1438_v47 = vsel %vm812_vm3, %v1433_v44, %v1437_v42  ;;  %v11828_v44 = vld [vmem:[%s11566_s23 + $0x58] sm:$0xff]  }
  0x82   : > { %10078 = vmatprep.mubr.msk.bf16.mxu0 %vm11444_vm1, %v11443_v1  ;;  %v1441_v53 = vor.u32 %v1439_v48, %v1437_v42  ;;  %v1485_v43 = vrot.slane %v1483_v34, 1  ;;  %v1495_v22 = vshrl.u32 %v11828_v44, 16 }
  0x88   : > { %10145 = vmatmul.mubr.msk.bf16.gmra.mxu1 %vm172_vm2, %v936_v56  ;;  %v1446_v56 = vsel %vm812_vm3, %v1441_v53, %v1445_v51  ;;  %v2011_v51 = vrot.slane %v11823_v41, 1 }
  0x89   : > { %10079 = vmatmul.mubr.msk.bf16.gmra.mxu0 %vm172_vm2, %v11179_v55  ;;  %10148 = vmatprep.mubr.msk.bf16.mxu1 %vm11444_vm1, %v11443_v1  ;;  %v1451_v55 = vshll.u32 %v11195_v52, 16 }
  0x8a   : > { %10082 = vmatprep.mubr.msk.bf16.mxu0 %vm11444_vm1, %v11443_v1 }
  0x8b   : > { %v1453_v60 = vrot.slane %v1451_v55, 1  ;;  %v245_v55 = vld [vmem:[#allocation2 + $0x20] sm:$0xff] }
  0x8d   : > { %v1457_v8 = vor.u32 %v1455_v3, %v1453_v60 }
  0x8f   : > { %v1462_v11 = vsel %vm812_vm3, %v1457_v8, %v1461_v6 }
  0x90   : > { %10149 = vmatmul.mubr.msk.bf16.gmra.mxu1 %vm172_vm2, %v944_v5  ;;  %v11196_v5 = vld [vmem:[%s11566_s23 + $0xc0] sm:$0xff]  }
  0x91   : > { %10083 = vmatmul.mubr.msk.bf16.gmra.mxu0 %vm172_vm2, %v11181_v2  ;;  %10152 = vmatprep.mubr.msk.bf16.mxu1 %vm11444_vm1, %v11443_v1  ;;  %v1454_v2 = vsel %vm812_vm3, %v1449_v62, %v1453_v60  ;;  %v2005_v9 = vrot.slane %v11196_v5, 1  ;;  %v11841_v60 = vld [vmem:[%s11566_s23 + $0xe0] sm:$0xff]  }
  0x92   : > { %10158 = vmatprep.mubr.msk.bf16.mxu0 %vm11444_vm1, %v11443_v1 }
  0x93   : > { %v2006_v13 = vsel %vm1993_vm4, %v2003_v63, %v2005_v9  ;;  %v2008_v23 = vsel %vm1993_vm4, %v2005_v9, %v2007_v18  ;;  %v1489_v9 = vor.u32 %v1487_v61, %v1485_v43 }
  0x98   : > { %10153 = vmatmul.mubr.msk.bf16.gmra.mxu1 %vm172_vm2, %v952_v19 }
  0x99   : > { %10159 = vmatmul.mubr.msk.bf16.vlgmr.msra.gmra.mxu0 %vm172_vm2, %v1414_v16  ;;  %10228 = vmatprep.mubr.msk.bf16.mxu1 %vm11444_vm1, %v11443_v1  ;;  %v11201_v16 = vld [vmem:[%s11566_s23 + $0x48] sm:$0xff]  }
  0x9a   : > { %10297 = vmatpush3.bf16.msra.mxu0 %v2566_v17  ;;  %10162 = vmatprep.mubr.msk.bf16.mxu0 %vm11444_vm1, %v11443_v1  ;;  %v1465_v17 = vor.u32 %v1463_v12, %v1461_v6  ;;  %v1475_v19 = vshll.u32 %v11201_v16, 16  ;;  %v11847_v6 = vld [vmem:[%s11566_s23 + $0x60] sm:$0xff]   ;;  %v246_v12 = vld [vmem:[#allocation2 + $0x28] sm:$0xff] }
  0x9b   : > { %10436 = vmatprep.subr.bf16.mxu0 %v11443_v1 }
  0x9c   : > { %v1470_v21 = vsel %vm812_vm3, %v1465_v17, %v1469_v15  ;;  %v1477_v26 = vrot.slane %v1475_v19, 1  ;;  %v247_v17 = vld [vmem:[#allocation2 + $0x30] sm:$0xff] }
  0x9e   : > { %v1478_v37 = vsel %vm812_vm3, %v1473_v29, %v1477_v26 }
  0xa0   : > { %10229 = vmatmul.mubr.msk.bf16.vlgmr.msra.gmra.mxu1 %vm172_vm2, %v1996_v30 }
  0xa1   : > { %10163 = vmatmul.mubr.msk.bf16.gmra.mxu0 %vm172_vm2, %v1422_v28  ;;  %10367 = vmatpush3.bf16.msra.mxu1 %v3178_v32  ;;  %v2009_v32 = vrot.slane %v11200_v24, 1 }
  0xa2   : > { %10166 = vmatprep.mubr.msk.bf16.mxu0 %vm11444_vm1, %v11443_v1  ;;  %10232 = vmatprep.mubr.msk.bf16.mxu1 %vm11444_vm1, %v11443_v1 }
  0xa3   : > { %10506 = vmatprep.subr.bf16.mxu1 %v11443_v1  ;;  %v2012_v0 = vsel %vm1993_vm4, %v2009_v32, %v2011_v51 }
  0xa8   : > { %10233 = vmatmul.mubr.msk.bf16.gmra.mxu1 %vm172_vm2, %v1998_v40  ;;  %v2010_v40 = vsel %vm1993_vm4, %v2007_v18, %v2009_v32  ;;  %v1499_v18 = vshll.u32 %v11847_v6, 16 }
  0xa9   : > { %10167 = vmatmul.mubr.msk.bf16.gmra.mxu0 %vm172_vm2, %v1430_v38  ;;  %10236 = vmatprep.mubr.msk.bf16.mxu1 %vm11444_vm1, %v11443_v1  ;;  %v1479_v38 = vshrl.u32 %v11201_v16, 16 }
  0xaa   : > { %10170 = vmatprep.mubr.msk.bf16.mxu0 %vm11444_vm1, %v11443_v1 }
  0xb0   : > { %10237 = vmatmul.mubr.msk.bf16.gmra.mxu1 %vm172_vm2, %v2000_v49 }
  0xb1   : > { %10171 = vmatmul.mubr.msk.bf16.gmra.mxu0 %vm172_vm2, %v1438_v47  ;;  %10240 = vmatprep.mubr.msk.bf16.mxu1 %vm11444_vm1, %v11443_v1  ;;  %v1481_v47 = vor.u32 %v1479_v38, %v1477_v26 }
  0xb2   : > { %10174 = vmatprep.mubr.msk.bf16.mxu0 %vm11444_vm1, %v11443_v1 }
  0xb3   : > { %v1486_v59 = vsel %vm812_vm3, %v1481_v47, %v1485_v43  ;;  %v11882_v47 = vld [vmem:[%s11566_s23 + $0xf0] sm:$0xff]  }
  0xb8   : > { %10241 = vmatmul.mubr.msk.bf16.gmra.mxu1 %vm172_vm2, %v2002_v58 }
  0xb9   : > { %10175 = vmatmul.mubr.msk.bf16.gmra.mxu0 %vm172_vm2, %v1446_v56  ;;  %10244 = vmatprep.mubr.msk.bf16.mxu1 %vm11444_vm1, %v11443_v1  ;;  %v1491_v56 = vshll.u32 %v11828_v44, 16 }
  0xba   : > { %10178 = vmatprep.mubr.msk.bf16.mxu0 %vm11444_vm1, %v11443_v1 }
  0xbb   : > { %v1493_v5 = vrot.slane %v1491_v56, 1  ;;  %v11889_v56 = vld [vmem:[%s11566_s23 + $0x70] sm:$0xff]  }
  0xbd   : > { %v1497_v34 = vor.u32 %v1495_v22, %v1493_v5 }
  0xc0   : > { %10245 = vmatmul.mubr.msk.bf16.gmra.mxu1 %vm172_vm2, %v2004_v4 }
  0xc1   : > { %10179 = vmatmul.mubr.msk.bf16.gmra.mxu0 %vm172_vm2, %v1454_v2  ;;  %10248 = vmatprep.mubr.msk.bf16.mxu1 %vm11444_vm1, %v11443_v1 }
  0xc2   : > { %10182 = vmatprep.mubr.msk.bf16.mxu0 %vm11444_vm1, %v11443_v1 }
  0xc8   : > { %10249 = vmatmul.mubr.msk.bf16.gmra.mxu1 %vm172_vm2, %v2006_v13  ;;  %v2013_v13 = vrot.slane %v11841_v60, 1 }
  0xc9   : > { %10183 = vmatmul.mubr.msk.bf16.gmra.mxu0 %vm172_vm2, %v1462_v11  ;;  %10252 = vmatprep.mubr.msk.bf16.mxu1 %vm11444_vm1, %v11443_v1 }
  0xca   : > { %10186 = vmatprep.mubr.msk.bf16.mxu0 %vm11444_vm1, %v11443_v1  ;;  %v2014_v26 = vsel %vm1993_vm4, %v2011_v51, %v2013_v13 }
  0xd0   : > { %10253 = vmatmul.mubr.msk.bf16.gmra.mxu1 %vm172_vm2, %v2008_v23  ;;  %v11862_v23 = vld [vmem:[%s11566_s23 + $0xe8] sm:$0xff]  }
  0xd1   : > { %v450_v25 = vpop.f32.mrf.mxu0  ;;  %10187 = vmatmul.mubr.msk.bf16.gmra.mxu0 %vm172_vm2, %v1470_v21  ;;  %10256 = vmatprep.mubr.msk.bf16.mxu1 %vm11444_vm1, %v11443_v1  ;;  %v1494_v21 = vsel %vm812_vm3, %v1489_v9, %v1493_v5  ;;  %v2015_v38 = vrot.slane %v11862_v23, 1  ;;  %v1515_v5 = vshll.u32 %v11889_v56, 16  ;;  %v11903_v9 = vld [vmem:[%s11566_s23 + $0xf8] sm:$0xff]  }
  0xd2   : > { %v585_v28 = vadd.f32 %v450_v25, %v241_v20  ;;  %10190 = vmatprep.mubr.msk.bf16.mxu0 %vm11444_vm1, %v11443_v1 }
  0xd3   : > { %v10020_v30 = vpop.f32.mrf.mxu0  ;;  %v2016_v51 = vsel %vm1993_vm4, %v2013_v13, %v2015_v38 }
  0xd4   : > { %619 = vst.msk [vmem:[#allocation2] sm:$0xff] %vm172_vm2, %v585_v28  ;;  %v1501_v30 = vrot.slane %v1499_v18, 1  ;;  %v11910_v18 = vld [vmem:[%s11566_s23 + $0x78] sm:$0xff]  }
  0xd5   : > { %v453_v33 = vpop.f32.mrf.mxu0 }
  0xd6   : > { %v586_v35 = vadd.f32 %v453_v33, %v242_v31  ;;  %v11868_v31 = vld [vmem:[%s11566_s23 + $0x68] sm:$0xff]  }
  0xd7   : > { %v10021_v39 = vpop.f32.mrf.mxu0  ;;  %v1507_v43 = vshll.u32 %v11868_v31, 16 }
  0xd8   : > { %620 = vst.msk [vmem:[#allocation2 + $0x8] sm:$0xff] %vm172_vm2, %v586_v35  ;;  %v1041_v45 = vpop.f32.mrf.mxu1  ;;  %10257 = vmatmul.mubr.msk.bf16.gmra.mxu1 %vm172_vm2, %v2010_v40 }
  0xd9   : > { %v458_v42 = vpop.f32.mrf.mxu0  ;;  %10191 = vmatmul.mubr.msk.bf16.gmra.mxu0 %vm172_vm2, %v1478_v37  ;;  %10260 = vmatprep.mubr.msk.bf16.mxu1 %vm11444_vm1, %v11443_v1  ;;  %v248_v37 = vld [vmem:[#allocation2 + $0x38] sm:$0xff] }
  0xda   : > { %v587_v46 = vadd.f32 %v458_v42, %v243_v36  ;;  %10194 = vmatprep.mubr.msk.bf16.mxu0 %vm11444_vm1, %v11443_v1  ;;  %v10090_v53 = vpop.f32.mrf.mxu1  ;;  %v249_v42 = vld [vmem:[#allocation2 + $0x40] sm:$0xff] }
  0xdb   : > { %v688_v48 = vld [vmem:[#allocation2] sm:$0xff]  ;;  %v10024_v49 = vpop.f32.mrf.mxu0 }
  0xdc   : > { %v1176_v52 = vadd.f32 %v1041_v45, %v688_v48  ;;  %621 = vst.msk [vmem:[#allocation2 + $0x10] sm:$0xff] %vm172_vm2, %v587_v46  ;;  %v1044_v57 = vpop.f32.mrf.mxu1  ;;  %v1502_v46 = vsel %vm812_vm3, %v1497_v34, %v1501_v30  ;;  %v1503_v48 = vshrl.u32 %v11847_v6, 16  ;;  %v11924_v34 = vld [vmem:[%s11566_s23 + $0x100] sm:$0xff]  }
  0xdd   : > { %v461_v54 = vpop.f32.mrf.mxu0 }
  0xde   : > { %1210 = vst.msk [vmem:[#allocation2] sm:$0xff] %vm172_vm2, %v1176_v52  ;;  %v588_v58 = vadd.f32 %v461_v54, %v244_v50  ;;  %v10091_v3 = vpop.f32.mrf.mxu1 }
  0xdf   : > { %v689_v62 = vld [vmem:[#allocation2 + $0x8] sm:$0xff]  ;;  %v10025_v63 = vpop.f32.mrf.mxu0 }
  0xe0   : > { %v1177_v2 = vadd.f32 %v1044_v57, %v689_v62  ;;  %622 = vst.msk [vmem:[#allocation2 + $0x18] sm:$0xff] %vm172_vm2, %v588_v58  ;;  %v1049_v7 = vpop.f32.mrf.mxu1  ;;  %10261 = vmatmul.mubr.msk.bf16.gmra.mxu1 %vm172_vm2, %v2012_v0  ;;  %v250_v62 = vld [vmem:[#allocation2 + $0x48] sm:$0xff]  ;;  %v2017_v63 = vrot.slane %v11882_v47, 1 }
  0xe1   : > { %v466_v4 = vpop.f32.mrf.mxu0  ;;  %10195 = vmatmul.mubr.msk.bf16.gmra.mxu0 %vm172_vm2, %v1486_v59  ;;  %10264 = vmatprep.mubr.msk.bf16.mxu1 %vm11444_vm1, %v11443_v1  ;;  %v1505_v59 = vor.u32 %v1503_v48, %v1501_v30  ;;  %v1523_v30 = vshll.u32 %v11910_v18, 16 }
  0xe2   : > { %1211 = vst.msk [vmem:[#allocation2 + $0x8] sm:$0xff] %vm172_vm2, %v1177_v2  ;;  %v589_v8 = vadd.f32 %v466_v4, %v245_v55  ;;  %10198 = vmatprep.mubr.msk.bf16.mxu0 %vm11444_vm1, %v11443_v1  ;;  %v10094_v15 = vpop.f32.mrf.mxu1  ;;  %v1509_v55 = vrot.slane %v1507_v43, 1  ;;  %v251_v4 = vld [vmem:[#allocation2 + $0x50] sm:$0xff]  ;;  %v2018_v13 = vsel %vm1993_vm4, %v2015_v38, %v2017_v63  ;;  %v11931_v43 = vld [vmem:[%s11566_s23 + $0x80] sm:$0xff]  }
  0xe3   : > { %v690_v10 = vld [vmem:[#allocation2 + $0x10] sm:$0xff]  ;;  %v10028_v11 = vpop.f32.mrf.mxu0 }
  0xe4   : > { %v1178_v14 = vadd.f32 %v1049_v7, %v690_v10  ;;  %623 = vst.msk [vmem:[#allocation2 + $0x20] sm:$0xff] %vm172_vm2, %v589_v8  ;;  %v1052_v19 = vpop.f32.mrf.mxu1  ;;  %v1510_v8 = vsel %vm812_vm3, %v1505_v59, %v1509_v55  ;;  %v1511_v10 = vshrl.u32 %v11868_v31, 16  ;;  %v11945_v59 = vld [vmem:[%s11566_s23 + $0x108] sm:$0xff]  }
  0xe5   : > { %v469_v16 = vpop.f32.mrf.mxu0 }
  0xe6   : > { %1212 = vst.msk [vmem:[#allocation2 + $0x10] sm:$0xff] %vm172_vm2, %v1178_v14  ;;  %v590_v20 = vadd.f32 %v469_v16, %v246_v12  ;;  %v10095_v28 = vpop.f32.mrf.mxu1 }
  0xe7   : > { %v691_v24 = vld [vmem:[#allocation2 + $0x18] sm:$0xff]  ;;  %v10029_v25 = vpop.f32.mrf.mxu0 }
  0xe8   : > { %v1179_v27 = vadd.f32 %v1052_v19, %v691_v24  ;;  %624 = vst.msk [vmem:[#allocation2 + $0x28] sm:$0xff] %vm172_vm2, %v590_v20  ;;  %v1057_v32 = vpop.f32.mrf.mxu1  ;;  %10265 = vmatmul.mubr.msk.bf16.gmra.mxu1 %vm172_vm2, %v2014_v26  ;;  %v252_v24 = vld [vmem:[#allocation2 + $0x58] sm:$0xff]  ;;  %v2019_v25 = vrot.slane %v11903_v9, 1 }
  0xe9   : > { %v474_v29 = vpop.f32.mrf.mxu0  ;;  %10199 = vmatmul.mubr.msk.bf16.gmra.mxu0 %vm172_vm2, %v1494_v21  ;;  %10268 = vmatprep.mubr.msk.bf16.mxu1 %vm11444_vm1, %v11443_v1  ;;  %v1513_v21 = vor.u32 %v1511_v10, %v1509_v55  ;;  %v1531_v55 = vshll.u32 %v11931_v43, 16 }
  0xea   : > { %1213 = vst.msk [vmem:[#allocation2 + $0x18] sm:$0xff] %vm172_vm2, %v1179_v27  ;;  %v591_v33 = vadd.f32 %v474_v29, %v247_v17  ;;  %10202 = vmatprep.mubr.msk.bf16.mxu0 %vm11444_vm1, %v11443_v1  ;;  %v10098_v40 = vpop.f32.mrf.mxu1  ;;  %v1517_v17 = vrot.slane %v1515_v5, 1  ;;  %v253_v29 = vld [vmem:[#allocation2 + $0x60] sm:$0xff]  ;;  %v2020_v38 = vsel %vm1993_vm4, %v2017_v63, %v2019_v25  ;;  %v11217_v5 = vld [vmem:[%s11566_s23 + $0x88] ss:$0 sps:$4 sm:$0x11]  }
  0xeb   : > { %v692_v35 = vld [vmem:[#allocation2 + $0x20] sm:$0xff]  ;;  %v10032_v36 = vpop.f32.mrf.mxu0 }
  0xec   : > { %v1180_v39 = vadd.f32 %v1057_v32, %v692_v35  ;;  %625 = vst.msk [vmem:[#allocation2 + $0x30] sm:$0xff] %vm172_vm2, %v591_v33  ;;  %v1060_v44 = vpop.f32.mrf.mxu1  ;;  %v1518_v33 = vsel %vm812_vm3, %v1513_v21, %v1517_v17  ;;  %v1519_v35 = vshrl.u32 %v11889_v56, 16  ;;  %v11963_v21 = vld [vmem:[%s11566_s23 + $0x110] sm:$0xff]  }
  0xed   : > { %v477_v41 = vpop.f32.mrf.mxu0 }
  0xee   : > { %1214 = vst.msk [vmem:[#allocation2 + $0x20] sm:$0xff] %vm172_vm2, %v1180_v39  ;;  %v592_v45 = vadd.f32 %v477_v41, %v248_v37  ;;  %v10099_v53 = vpop.f32.mrf.mxu1 }
  0xef   : > { %v693_v49 = vld [vmem:[#allocation2 + $0x28] sm:$0xff]  ;;  %v10033_v50 = vpop.f32.mrf.mxu0 }
  0xf0   : > { %v1181_v52 = vadd.f32 %v1060_v44, %v693_v49  ;;  %626 = vst.msk [vmem:[#allocation2 + $0x38] sm:$0xff] %vm172_vm2, %v592_v45  ;;  %v1065_v57 = vpop.f32.mrf.mxu1  ;;  %10269 = vmatmul.mubr.msk.bf16.gmra.mxu1 %vm172_vm2, %v2016_v51  ;;  %v254_v49 = vld [vmem:[#allocation2 + $0x68] sm:$0xff]  ;;  %v2021_v50 = vrot.slane %v11924_v34, 1  ;;  %v11219_v34 = vld [vmem:[%s11566_s23 + $0x120] sm:$0xfe]  }
  0xf1   : > { %v482_v54 = vpop.f32.mrf.mxu0  ;;  %10203 = vmatmul.mubr.msk.bf16.gmra.mxu0 %vm172_vm2, %v1502_v46  ;;  %10272 = vmatprep.mubr.msk.bf16.mxu1 %vm11444_vm1, %v11443_v1  ;;  %v1521_v46 = vor.u32 %v1519_v35, %v1517_v17  ;;  %v1539_v17 = vshll.u32 %v11217_v5, 16 }
  0xf2   : > { %1215 = vst.msk [vmem:[#allocation2 + $0x28] sm:$0xff] %vm172_vm2, %v1181_v52  ;;  %v593_v58 = vadd.f32 %v482_v54, %v249_v42  ;;  %10206 = vmatprep.mubr.msk.bf16.mxu0 %vm11444_vm1, %v11443_v1  ;;  %v10102_v2 = vpop.f32.mrf.mxu1  ;;  %v1525_v42 = vrot.slane %v1523_v30, 1  ;;  %v255_v54 = vld [vmem:[#allocation2 + $0x70] sm:$0xff]  ;;  %v2022_v63 = vsel %vm1993_vm4, %v2019_v25, %v2021_v50 }
  0xf3   : > { %v694_v60 = vld [vmem:[#allocation2 + $0x30] sm:$0xff]  ;;  %v10036_v61 = vpop.f32.mrf.mxu0  ;;  %v1541_v30 = vrot.slane %v1539_v17, 1  ;;  %v11224_v17 = vld [vmem:[%s11566_s23 + $0x1c0] sm:$0xff]  }
  0xf4   : > { %v1182_v0 = vadd.f32 %v1065_v57, %v694_v60  ;;  %627 = vst.msk [vmem:[#allocation2 + $0x40] sm:$0xff] %vm172_vm2, %v593_v58  ;;  %v1068_v6 = vpop.f32.mrf.mxu1  ;;  %v1526_v58 = vsel %vm812_vm3, %v1521_v46, %v1525_v42  ;;  %v1527_v60 = vshrl.u32 %v11910_v18, 16 }
  0xf5   : > { %v485_v3 = vpop.f32.mrf.mxu0 }
  0xf6   : > { %1216 = vst.msk [vmem:[#allocation2 + $0x30] sm:$0xff] %vm172_vm2, %v1182_v0  ;;  %v594_v7 = vadd.f32 %v485_v3, %v250_v62  ;;  %v10103_v15 = vpop.f32.mrf.mxu1 }
  0xf7   : > { %v695_v11 = vld [vmem:[#allocation2 + $0x38] sm:$0xff]  ;;  %v10037_v12 = vpop.f32.mrf.mxu0 }
  0xf8   : > { %v1183_v14 = vadd.f32 %v1068_v6, %v695_v11  ;;  %628 = vst.msk [vmem:[#allocation2 + $0x48] sm:$0xff] %vm172_vm2, %v594_v7  ;;  %v1073_v19 = vpop.f32.mrf.mxu1  ;;  %10273 = vmatmul.mubr.msk.bf16.gmra.mxu1 %vm172_vm2, %v2018_v13  ;;  %v256_v11 = vld [vmem:[#allocation2 + $0x78] sm:$0xff]  ;;  %v2023_v12 = vrot.slane %v11945_v59, 1 }
  0xf9   : > { %v490_v16 = vpop.f32.mrf.mxu0  ;;  %10207 = vmatmul.mubr.msk.bf16.gmra.mxu0 %vm172_vm2, %v1510_v8  ;;  %10276 = vmatprep.mubr.msk.bf16.mxu1 %vm11444_vm1, %v11443_v1  ;;  %v1529_v8 = vor.u32 %v1527_v60, %v1525_v42  ;;  %v11218_v42 = vld [vmem:[%s11566_s23 + $0x118] ss:$0 sps:$4 sm:$0x11]  }
  0xfa   : > { %1217 = vst.msk [vmem:[#allocation2 + $0x38] sm:$0xff] %vm172_vm2, %v1183_v14  ;;  %v595_v20 = vadd.f32 %v490_v16, %v251_v4  ;;  %10210 = vmatprep.mubr.msk.bf16.mxu0 %vm11444_vm1, %v11443_v1  ;;  %v10106_v27 = vpop.f32.mrf.mxu1  ;;  %v1533_v4 = vrot.slane %v1531_v55, 1  ;;  %v257_v16 = vld [vmem:[#allocation2 + $0x80] sm:$0xff]  ;;  %v2024_v25 = vsel %vm1993_vm4, %v2021_v50, %v2023_v12 }
  0xfb   : > { %v696_v22 = vld [vmem:[#allocation2 + $0x40] sm:$0xff]  ;;  %v10040_v23 = vpop.f32.mrf.mxu0 }
  0xfc   : > { %v1184_v26 = vadd.f32 %v1073_v19, %v696_v22  ;;  %629 = vst.msk [vmem:[#allocation2 + $0x50] sm:$0xff] %vm172_vm2, %v595_v20  ;;  %v1076_v31 = vpop.f32.mrf.mxu1  ;;  %v1534_v20 = vsel %vm812_vm3, %v1529_v8, %v1533_v4  ;;  %v1535_v22 = vshrl.u32 %v11931_v43, 16  ;;  %v11221_v43 = vld [vmem:[%s11566_s23 + $0x1b0] sm:$0xfe]   ;;  %v261_v8 = vld [vmem:[#allocation2 + $0xa0] sm:$0xff] }
  0xfd   : > { %v493_v28 = vpop.f32.mrf.mxu0  ;;  %v2969_v59 = vshll.u32 %v11221_v43, 16 }
  0xfe   : > { %1218 = vst.msk [vmem:[#allocation2 + $0x40] sm:$0xff] %vm172_vm2, %v1184_v26  ;;  %v596_v32 = vadd.f32 %v493_v28, %v252_v24  ;;  %v10107_v40 = vpop.f32.mrf.mxu1 }
  0xff   : > { %v697_v36 = vld [vmem:[#allocation2 + $0x48] sm:$0xff]  ;;  %v10041_v37 = vpop.f32.mrf.mxu0 }
 0x100   : > { %v1185_v39 = vadd.f32 %v1076_v31, %v697_v36  ;;  %630 = vst.msk [vmem:[#allocation2 + $0x58] sm:$0xff] %vm172_vm2, %v596_v32  ;;  %v1081_v44 = vpop.f32.mrf.mxu1  ;;  %10277 = vmatmul.mubr.msk.bf16.gmra.mxu1 %vm172_vm2, %v2020_v38  ;;  %v2025_v37 = vrot.slane %v11963_v21, 1  ;;  %v11978_v38 = vld [vmem:[%s11566_s23 + $0x128] sm:$0xff]  }
 0x101   : > { %v498_v41 = vpop.f32.mrf.mxu0  ;;  %10211 = vmatmul.mubr.msk.bf16.gmra.mxu0 %vm172_vm2, %v1518_v33  ;;  %10280 = vmatprep.mubr.msk.bf16.mxu1 %vm11444_vm1, %v11443_v1  ;;  %v1537_v33 = vor.u32 %v1535_v22, %v1533_v4  ;;  %v2480_v55 = vrot.slane %v11978_v38, 1  ;;  %v9365_v4 = vld [vmem:[%s14052_s1 + $0x18] sm:$0xf] }
 0x102   : > { %1219 = vst.msk [vmem:[#allocation2 + $0x48] sm:$0xff] %vm172_vm2, %v1185_v39  ;;  %v597_v45 = vadd.f32 %v498_v41, %v253_v29  ;;  %10214 = vmatprep.mubr.msk.bf16.mxu0 %vm11444_vm1, %v11443_v1  ;;  %v10110_v52 = vpop.f32.mrf.mxu1  ;;  %v258_v29 = vld [vmem:[#allocation2 + $0x88] sm:$0xff]  ;;  %v3789_v21 = vsel %vm412_vm0, %v9365_v4, 0 }
 0x103   : > { %v698_v47 = vld [vmem:[#allocation2 + $0x50] sm:$0xff]  ;;  %v10044_v48 = vpop.f32.mrf.mxu0 }
 0x104   : > { %v1186_v51 = vadd.f32 %v1081_v44, %v698_v47  ;;  %631 = vst.msk [vmem:[#allocation2 + $0x60] sm:$0xff] %vm172_vm2, %v597_v45  ;;  %v1084_v56 = vpop.f32.mrf.mxu1  ;;  %v11222_v44 = vld [vmem:[%s11566_s23 + $0x1b8] sm:$0xff]   ;;  %v259_v47 = vld [vmem:[#allocation2 + $0x90] sm:$0xff]  ;;  %v1542_v48 = vsel %vm812_vm3, %v1537_v33, %v1541_v30 }
 0x105   : > { %v501_v53 = vpop.f32.mrf.mxu0  ;;  %v2974_v60 = vshrl.u32 %v11222_v44, 16 }
 0x106   : > { %1220 = vst.msk [vmem:[#allocation2 + $0x50] sm:$0xff] %vm172_vm2, %v1186_v51  ;;  %v598_v57 = vadd.f32 %v501_v53, %v254_v49  ;;  %v10111_v2 = vpop.f32.mrf.mxu1  ;;  %v2026_v51 = vsel %vm1993_vm4, %v2023_v12, %v2025_v37 }
 0x107   : > { %v699_v61 = vld [vmem:[#allocation2 + $0x58] sm:$0xff]  ;;  %v10045_v62 = vpop.f32.mrf.mxu0 }
 0x108   : > { %v1187_v0 = vadd.f32 %v1084_v56, %v699_v61  ;;  %632 = vst.msk [vmem:[#allocation2 + $0x68] sm:$0xff] %vm172_vm2, %v598_v57  ;;  %v1089_v6 = vpop.f32.mrf.mxu1  ;;  %10281 = vmatmul.mubr.msk.bf16.gmra.mxu1 %vm172_vm2, %v2022_v63  ;;  %v260_v57 = vld [vmem:[#allocation2 + $0x98] sm:$0xff]  ;;  %v2977_v61 = vshll.u32 %v11222_v44, 16 }
 0x109   : > { %v506_v3 = vpop.f32.mrf.mxu0  ;;  %10215 = vmatmul.mubr.msk.bf16.gmra.mxu0 %vm172_vm2, %v1526_v58  ;;  %10284 = vmatprep.mubr.msk.bf16.mxu1 %vm11444_vm1, %v11443_v1  ;;  %v2966_v58 = vshrl.u32 %v11221_v43, 16 }
 0x10a   : > { %1221 = vst.msk [vmem:[#allocation2 + $0x58] sm:$0xff] %vm172_vm2, %v1187_v0  ;;  %v599_v7 = vadd.f32 %v506_v3, %v255_v54  ;;  %10218 = vmatprep.mubr.msk.bf16.mxu0 %vm11444_vm1, %v11443_v1  ;;  %v10114_v14 = vpop.f32.mrf.mxu1  ;;  %v2479_v54 = vrot.slane %v11219_v34, 1  ;;  %v2027_v3 = vrot.slane %v11218_v42, 1 }
 0x10b   : > { %v700_v9 = vld [vmem:[#allocation2 + $0x60] sm:$0xff]  ;;  %v10048_v10 = vpop.f32.mrf.mxu0  ;;  %v2976_v14 = vrot.slane %v2974_v60, 1 }
 0x10c   : > { %v1188_v13 = vadd.f32 %v1089_v6, %v700_v9  ;;  %633 = vst.msk [vmem:[#allocation2 + $0x70] sm:$0xff] %vm172_vm2, %v599_v7  ;;  %v1092_v18 = vpop.f32.mrf.mxu1  ;;  %v2968_v9 = vrot.slane %v2966_v58, 1  ;;  %v2971_v10 = vrot.slane %v2969_v59, 2  ;;  %v264_v59 = vld [vmem:[#allocation2 + $0xb8] sm:$0xff] }
 0x10d   : > { %v509_v15 = vpop.f32.mrf.mxu0 }
 0x10e   : > { %1222 = vst.msk [vmem:[#allocation2 + $0x60] sm:$0xff] %vm172_vm2, %v1188_v13  ;;  %v600_v19 = vadd.f32 %v509_v15, %v256_v11  ;;  %v10115_v27 = vpop.f32.mrf.mxu1  ;;  %v2481_v13 = vsel %vm1993_vm4, %v2479_v54, %v2480_v55  ;;  %v2979_v15 = vrot.slane %v2977_v61, 2  ;;  %v2972_v33 = vor.u32 %v2971_v10, %v2968_v9  ;;  %v265_v10 = vld [vmem:[#allocation2 + $0xc0] sm:$0xff] }
 0x10f   : > { %v701_v23 = vld [vmem:[#allocation2 + $0x68] sm:$0xff]  ;;  %v10049_v24 = vpop.f32.mrf.mxu0 }
 0x110   : > { %v1189_v26 = vadd.f32 %v1092_v18, %v701_v23  ;;  %634 = vst.msk [vmem:[#allocation2 + $0x78] sm:$0xff] %vm172_vm2, %v600_v19  ;;  %v1097_v31 = vpop.f32.mrf.mxu1  ;;  %10285 = vmatmul.mubr.msk.bf16.gmra.mxu1 %vm172_vm2, %v2024_v25  ;;  %v2980_v34 = vor.u32 %v2979_v15, %v2976_v14 }
 0x111   : > { %v514_v28 = vpop.f32.mrf.mxu0  ;;  %10219 = vmatmul.mubr.msk.bf16.gmra.mxu0 %vm172_vm2, %v1534_v20  ;;  %10288 = vmatprep.mubr.msk.bf16.mxu1 %vm11444_vm1, %v11443_v1  ;;  %v2028_v20 = vsel %vm1993_vm4, %v2025_v37, %v2027_v3  ;;  %v9401_v37 = vld [vmem:[%s14052_s1 + $0x1c] sm:$0xf] }
 0x112   : > { %1223 = vst.msk [vmem:[#allocation2 + $0x68] sm:$0xff] %vm172_vm2, %v1189_v26  ;;  %v601_v32 = vadd.f32 %v514_v28, %v257_v16  ;;  %10222 = vmatprep.mubr.msk.bf16.mxu0 %vm11444_vm1, %v11443_v1  ;;  %v10118_v40 = vpop.f32.mrf.mxu1  ;;  %v12005_v16 = vld [vmem:[%s11566_s23 + $0x130] sm:$0xff]   ;;  %v2983_v28 = vshrl.u32 %v11224_v17, 16 }
 0x113   : > { %v702_v35 = vld [vmem:[#allocation2 + $0x70] sm:$0xff]  ;;  %v10052_v36 = vpop.f32.mrf.mxu0  ;;  %v2482_v27 = vrot.slane %v12005_v16, 1 }
 0x114   : > { %v1190_v39 = vadd.f32 %v1097_v31, %v702_v35  ;;  %635 = vst.msk [vmem:[#allocation2 + $0x80] sm:$0xff] %vm172_vm2, %v601_v32  ;;  %v1100_v45 = vpop.f32.mrf.mxu1  ;;  %v262_v32 = vld [vmem:[#allocation2 + $0xa8] sm:$0xff]  ;;  %v263_v40 = vld [vmem:[#allocation2 + $0xb0] sm:$0xff]  ;;  %v2985_v44 = vrot.slane %v2983_v28, 1 }
 0x115   : > { %v517_v41 = vpop.f32.mrf.mxu0  ;;  %v2483_v43 = vsel %vm1993_vm4, %v2480_v55, %v2482_v27 }
 0x116   : > { %1224 = vst.msk [vmem:[#allocation2 + $0x70] sm:$0xff] %vm172_vm2, %v1190_v39  ;;  %v602_v46 = vadd.f32 %v517_v41, %v258_v29  ;;  %v10119_v53 = vpop.f32.mrf.mxu1  ;;  %v2986_v29 = vshll.u32 %v11224_v17, 16 }
 0x117   : > { %v703_v49 = vld [vmem:[#allocation2 + $0x78] sm:$0xff]  ;;  %v10053_v50 = vpop.f32.mrf.mxu0 }
 0x118   : > { %v1191_v52 = vadd.f32 %v1100_v45, %v703_v49  ;;  %636 = vst.msk [vmem:[#allocation2 + $0x88] sm:$0xff] %vm172_vm2, %v602_v46  ;;  %v1105_v62 = vpop.f32.mrf.mxu1  ;;  %10289 = vmatmul.mubr.msk.bf16.gmra.mxu1 %vm172_vm2, %v2026_v51  ;;  %v2988_v45 = vrot.slane %v2986_v29, 2  ;;  %v12029_v46 = vld [vmem:[%s11566_s23 + $0x138] sm:$0xff]   ;;  %v2981_v50 = vsel %vm2964_vm5, %v2972_v33, %v2980_v34  ;;  %v4275_v51 = vsel %vm412_vm0, %v9401_v37, 0 }
 0x119   : > { %v522_v56 = vpop.f32.mrf.mxu0  ;;  %10223 = vmatmul.mubr.msk.bf16.gmra.mxu0 %vm172_vm2, %v1542_v48  ;;  %10292 = vmatprep.mubr.msk.bf16.mxu1 %vm11444_vm1, %v11443_v1 }
 0x11a   : > { %1225 = vst.msk [vmem:[#allocation2 + $0x78] sm:$0xff] %vm172_vm2, %v1191_v52  ;;  %v603_v63 = vadd.f32 %v522_v56, %v259_v47  ;;  %10298 = vmatprep.mubr.msk.bf16.mxu0 %vm11444_vm1, %v11443_v1  ;;  %v10122_v6 = vpop.f32.mrf.mxu1  ;;  %v11226_v47 = vld [vmem:[%s11566_s23 + $0x1c8] sm:$0xff]   ;;  %v2484_v56 = vrot.slane %v12029_v46, 1  ;;  %v2989_v60 = vor.u32 %v2988_v45, %v2985_v44 }
 0x11b   : > { %v704_v0 = vld [vmem:[#allocation2 + $0x80] sm:$0xff]  ;;  %v10056_v2 = vpop.f32.mrf.mxu0  ;;  %v2992_v61 = vshrl.u32 %v11226_v47, 16 }
 0x11c   : > { %v1192_v5 = vadd.f32 %v1105_v62, %v704_v0  ;;  %637 = vst.msk [vmem:[#allocation2 + $0x90] sm:$0xff] %vm172_vm2, %v603_v63  ;;  %v1108_v11 = vpop.f32.mrf.mxu1  ;;  %v2995_v62 = vshll.u32 %v11226_v47, 16  ;;  %v12048_v6 = vld [vmem:[%s11566_s23 + $0x140] sm:$0xff]   ;;  %v2990_v9 = vsel %vm2964_vm5, %v2980_v34, %v2989_v60 }
 0x11d   : > { %v525_v7 = vpop.f32.mrf.mxu0 }
 0x11e   : > { %1226 = vst.msk [vmem:[#allocation2 + $0x80] sm:$0xff] %vm172_vm2, %v1192_v5  ;;  %v604_v12 = vadd.f32 %v525_v7, %v260_v57  ;;  %v10123_v23 = vpop.f32.mrf.mxu1  ;;  %v2485_v5 = vsel %vm1993_vm4, %v2482_v27, %v2484_v56 }
 0x11f   : > { %v705_v18 = vld [vmem:[#allocation2 + $0x88] sm:$0xff]  ;;  %v10057_v19 = vpop.f32.mrf.mxu0 }
 0x120   : > { %v1193_v22 = vadd.f32 %v1108_v11, %v705_v18  ;;  %638 = vst.msk [vmem:[#allocation2 + $0x98] sm:$0xff] %vm172_vm2, %v604_v12  ;;  %v1113_v25 = vpop.f32.mrf.mxu1  ;;  %10293 = vmatmul.mubr.msk.bf16.gmra.mxu1 %vm172_vm2, %v2028_v20  ;;  %v2994_v11 = vrot.slane %v2992_v61, 1  ;;  %v2997_v12 = vrot.slane %v2995_v62, 2  ;;  %v2486_v19 = vrot.slane %v12048_v6, 1  ;;  %v269_v62 = vld [vmem:[#allocation2 + $0xe0] sm:$0xff] }
 0x121   : > { %v530_v24 = vpop.f32.mrf.mxu0  ;;  %10299 = vmatmul.mubr.msk.bf16.vlgmr.msra.gmra.mxu0 %vm172_vm2, %v2481_v13  ;;  %10368 = vmatprep.mubr.msk.bf16.mxu1 %vm11444_vm1, %v11443_v1  ;;  %v11228_v13 = vld [vmem:[%s11566_s23 + $0x1d0] sm:$0xff]  }
 0x122   : > { %1227 = vst.msk [vmem:[#allocation2 + $0x88] sm:$0xff] %vm172_vm2, %v1193_v22  ;;  %v605_v26 = vadd.f32 %v530_v24, %v261_v8  ;;  %10437 = vmatpush3.bf16.msra.mxu0 %v3789_v21  ;;  %10302 = vmatprep.mubr.msk.bf16.mxu0 %vm11444_vm1, %v11443_v1  ;;  %v10126_v36 = vpop.f32.mrf.mxu1  ;;  %v266_v22 = vld [vmem:[#allocation2 + $0xc8] sm:$0xff]  ;;  %v2998_v23 = vor.u32 %v2997_v12, %v2994_v11  ;;  %v3001_v24 = vshrl.u32 %v11228_v13, 16 }
 0x123   : > { %v706_v30 = vld [vmem:[#allocation2 + $0x90] sm:$0xff]  ;;  %v10060_v31 = vpop.f32.mrf.mxu0  ;;  %10576 = vmatprep.subr.bf16.mxu0 %v11443_v1  ;;  %v270_v11 = vld [vmem:[#allocation2 + $0xe8] sm:$0xff] }
 0x124   : > { %v1194_v35 = vadd.f32 %v1113_v25, %v706_v30  ;;  %639 = vst.msk [vmem:[#allocation2 + $0xa0] sm:$0xff] %vm172_vm2, %v605_v26  ;;  %v1116_v41 = vpop.f32.mrf.mxu1  ;;  %v3004_v25 = vshll.u32 %v11228_v13, 16  ;;  %v2487_v31 = vsel %vm1993_vm4, %v2484_v56, %v2486_v19  ;;  %v267_v36 = vld [vmem:[#allocation2 + $0xd0] sm:$0xff]  ;;  %v3003_v37 = vrot.slane %v3001_v24, 1 }
 0x125   : > { %v533_v39 = vpop.f32.mrf.mxu0 }
 0x126   : > { %1228 = vst.msk [vmem:[#allocation2 + $0x90] sm:$0xff] %vm172_vm2, %v1194_v35  ;;  %v606_v42 = vadd.f32 %v533_v39, %v262_v32  ;;  %v10127_v53 = vpop.f32.mrf.mxu1  ;;  %v12065_v32 = vld [vmem:[%s11566_s23 + $0x148] sm:$0xff]   ;;  %v2999_v35 = vsel %vm2964_vm5, %v2989_v60, %v2998_v23  ;;  %v3006_v39 = vrot.slane %v3004_v25, 2  ;;  %v271_v25 = vld [vmem:[#allocation2 + $0xf0] sm:$0xff] }
 0x127   : > { %v707_v48 = vld [vmem:[#allocation2 + $0x98] sm:$0xff]  ;;  %v10061_v49 = vpop.f32.mrf.mxu0  ;;  %v2488_v46 = vrot.slane %v12065_v32, 1 }
 0x128   : > { %v1195_v52 = vadd.f32 %v1116_v41, %v707_v48  ;;  %640 = vst.msk [vmem:[#allocation2 + $0xa8] sm:$0xff] %vm172_vm2, %v606_v42  ;;  %v1121_v38 = vpop.f32.mrf.mxu1  ;;  %10369 = vmatmul.mubr.msk.bf16.vlgmr.msra.gmra.mxu1 %vm172_vm2, %v2981_v50  ;;  %v268_v49 = vld [vmem:[#allocation2 + $0xd8] sm:$0xff]  ;;  %v3007_v50 = vor.u32 %v3006_v39, %v3003_v37 }
 0x129   : > { %v538_v54 = vpop.f32.mrf.mxu0  ;;  %10303 = vmatmul.mubr.msk.bf16.gmra.mxu0 %vm172_vm2, %v2483_v43  ;;  %10507 = vmatpush3.bf16.msra.mxu1 %v4275_v51  ;;  %v272_v37 = vld [vmem:[#allocation2 + $0xf8] sm:$0xff] }
 0x12a   : > { %1229 = vst.msk [vmem:[#allocation2 + $0x98] sm:$0xff] %vm172_vm2, %v1195_v52  ;;  %v607_v55 = vadd.f32 %v538_v54, %v263_v40  ;;  %10306 = vmatprep.mubr.msk.bf16.mxu0 %vm11444_vm1, %v11443_v1  ;;  %10372 = vmatprep.mubr.msk.bf16.mxu1 %vm11444_vm1, %v11443_v1  ;;  %v10130_v0 = vpop.f32.mrf.mxu1  ;;  %v11230_v40 = vld [vmem:[%s11566_s23 + $0x1d8] sm:$0xff]   ;;  %v3008_v61 = vsel %vm2964_vm5, %v2998_v23, %v3007_v50 }
 0x12b   : > { %v708_v57 = vld [vmem:[#allocation2 + $0xa0] sm:$0xff]  ;;  %v10064_v58 = vpop.f32.mrf.mxu0  ;;  %10646 = vmatprep.subr.bf16.mxu1 %v11443_v1  ;;  %v3010_v51 = vshrl.u32 %v11230_v40, 16  ;;  %v3013_v52 = vshll.u32 %v11230_v40, 16 }
 0x12c   : > { %v1196_v63 = vadd.f32 %v1121_v38, %v708_v57  ;;  %641 = vst.msk [vmem:[#allocation2 + $0xb0] sm:$0xff] %vm172_vm2, %v607_v55  ;;  %v1124_v3 = vpop.f32.mrf.mxu1  ;;  %v2489_v57 = vsel %vm1993_vm4, %v2486_v19, %v2488_v46  ;;  %v12082_v58 = vld [vmem:[%s11566_s23 + $0x150] sm:$0xff]  }
 0x12d   : > { %v541_v2 = vpop.f32.mrf.mxu0  ;;  %v3015_v0 = vrot.slane %v3013_v52, 2  ;;  %v273_v52 = vld [vmem:[#allocation2 + $0x100] sm:$0xff] }
 0x12e   : > { %1230 = vst.msk [vmem:[#allocation2 + $0xa0] sm:$0xff] %vm172_vm2, %v1196_v63  ;;  %v608_v4 = vadd.f32 %v541_v2, %v264_v59  ;;  %v10131_v15 = vpop.f32.mrf.mxu1  ;;  %v3012_v63 = vrot.slane %v3010_v51, 1  ;;  %v11232_v2 = vld [vmem:[%s11566_s23 + $0x1e0] sm:$0xff]  }
 0x12f   : > { %v709_v7 = vld [vmem:[#allocation2 + $0xa8] sm:$0xff]  ;;  %v10065_v8 = vpop.f32.mrf.mxu0  ;;  %v3019_v13 = vshrl.u32 %v11232_v2, 16 }
 0x130   : > { %v1197_v14 = vadd.f32 %v1124_v3, %v709_v7  ;;  %642 = vst.msk [vmem:[#allocation2 + $0xb8] sm:$0xff] %vm172_vm2, %v608_v4  ;;  %v1129_v17 = vpop.f32.mrf.mxu1  ;;  %10373 = vmatmul.mubr.msk.bf16.gmra.mxu1 %vm172_vm2, %v2990_v9  ;;  %v2490_v8 = vrot.slane %v12082_v58, 1  ;;  %v3016_v12 = vor.u32 %v3015_v0, %v3012_v63  ;;  %v274_v63 = vld [vmem:[#allocation2 + $0x108] sm:$0xff] }
 0x131   : > { %v546_v16 = vpop.f32.mrf.mxu0  ;;  %10307 = vmatmul.mubr.msk.bf16.gmra.mxu0 %vm172_vm2, %v2485_v5  ;;  %10376 = vmatprep.mubr.msk.bf16.mxu1 %vm11444_vm1, %v11443_v1 }
 0x132   : > { %1231 = vst.msk [vmem:[#allocation2 + $0xa8] sm:$0xff] %vm172_vm2, %v1197_v14  ;;  %v609_v18 = vadd.f32 %v546_v16, %v265_v10  ;;  %10310 = vmatprep.mubr.msk.bf16.mxu0 %vm11444_vm1, %v11443_v1  ;;  %v10134_v27 = vpop.f32.mrf.mxu1  ;;  %v3022_v14 = vshll.u32 %v11232_v2, 16  ;;  %v3017_v24 = vsel %vm2964_vm5, %v3007_v50, %v3016_v12 }
 0x133   : > { %v710_v20 = vld [vmem:[#allocation2 + $0xb0] sm:$0xff]  ;;  %v10068_v21 = vpop.f32.mrf.mxu0 }
 0x134   : > { %v1198_v26 = vadd.f32 %v1129_v17, %v710_v20  ;;  %643 = vst.msk [vmem:[#allocation2 + $0xc0] sm:$0xff] %vm172_vm2, %v609_v18  ;;  %v1132_v29 = vpop.f32.mrf.mxu1  ;;  %v2491_v20 = vsel %vm1993_vm4, %v2488_v46, %v2490_v8  ;;  %v12099_v21 = vld [vmem:[%s11566_s23 + $0x158] sm:$0xff]   ;;  %v3024_v27 = vrot.slane %v3022_v14, 2 }
 0x135   : > { %v549_v28 = vpop.f32.mrf.mxu0 }
 0x136   : > { %1232 = vst.msk [vmem:[#allocation2 + $0xb0] sm:$0xff] %vm172_vm2, %v1198_v26  ;;  %v610_v30 = vadd.f32 %v549_v28, %v266_v22  ;;  %v10135_v42 = vpop.f32.mrf.mxu1  ;;  %v3021_v26 = vrot.slane %v3019_v13, 1  ;;  %v11234_v28 = vld [vmem:[%s11566_s23 + $0x1e8] sm:$0xff]  }
 0x137   : > { %v711_v33 = vld [vmem:[#allocation2 + $0xb8] sm:$0xff]  ;;  %v10069_v34 = vpop.f32.mrf.mxu0  ;;  %v3028_v40 = vshrl.u32 %v11234_v28, 16 }
 0x138   : > { %v1199_v41 = vadd.f32 %v1132_v29, %v711_v33  ;;  %644 = vst.msk [vmem:[#allocation2 + $0xc8] sm:$0xff] %vm172_vm2, %v610_v30  ;;  %v1137_v44 = vpop.f32.mrf.mxu1  ;;  %10377 = vmatmul.mubr.msk.bf16.gmra.mxu1 %vm172_vm2, %v2999_v35  ;;  %v2492_v34 = vrot.slane %v12099_v21, 1  ;;  %v3025_v39 = vor.u32 %v3024_v27, %v3021_v26 }
 0x139   : > { %v554_v43 = vpop.f32.mrf.mxu0  ;;  %10311 = vmatmul.mubr.msk.bf16.gmra.mxu0 %vm172_vm2, %v2487_v31  ;;  %10380 = vmatprep.mubr.msk.bf16.mxu1 %vm11444_vm1, %v11443_v1 }
 0x13a   : > { %1233 = vst.msk [vmem:[#allocation2 + $0xb8] sm:$0xff] %vm172_vm2, %v1199_v41  ;;  %v611_v45 = vadd.f32 %v554_v43, %v267_v36  ;;  %10314 = vmatprep.mubr.msk.bf16.mxu0 %vm11444_vm1, %v11443_v1  ;;  %v10138_v54 = vpop.f32.mrf.mxu1  ;;  %v3031_v41 = vshll.u32 %v11234_v28, 16  ;;  %v3026_v51 = vsel %vm2964_vm5, %v3016_v12, %v3025_v39 }
 0x13b   : > { %v712_v47 = vld [vmem:[#allocation2 + $0xc0] sm:$0xff]  ;;  %v10072_v48 = vpop.f32.mrf.mxu0 }
 0x13c   : > { %v1200_v53 = vadd.f32 %v1137_v44, %v712_v47  ;;  %645 = vst.msk [vmem:[#allocation2 + $0xd0] sm:$0xff] %vm172_vm2, %v611_v45  ;;  %v1140_v55 = vpop.f32.mrf.mxu1  ;;  %v2493_v47 = vsel %vm1993_vm4, %v2490_v8, %v2492_v34  ;;  %v12116_v48 = vld [vmem:[%s11566_s23 + $0x160] sm:$0xff]   ;;  %v3033_v54 = vrot.slane %v3031_v41, 2 }
 0x13d   : > { %v557_v38 = vpop.f32.mrf.mxu0 }
 0x13e   : > { %1234 = vst.msk [vmem:[#allocation2 + $0xc0] sm:$0xff] %vm172_vm2, %v1200_v53  ;;  %v612_v56 = vadd.f32 %v557_v38, %v268_v49  ;;  %v10139_v4 = vpop.f32.mrf.mxu1  ;;  %v3030_v53 = vrot.slane %v3028_v40, 1  ;;  %v11236_v38 = vld [vmem:[%s11566_s23 + $0x1f0] sm:$0xff]  }
 0x13f   : > { %v713_v59 = vld [vmem:[#allocation2 + $0xc8] sm:$0xff]  ;;  %v10073_v60 = vpop.f32.mrf.mxu0  ;;  %v3037_v2 = vshrl.u32 %v11236_v38, 16 }
 0x140   : > { %v1201_v3 = vadd.f32 %v1140_v55, %v713_v59  ;;  %646 = vst.msk [vmem:[#allocation2 + $0xd8] sm:$0xff] %vm172_vm2, %v612_v56  ;;  %v1145_v6 = vpop.f32.mrf.mxu1  ;;  %10381 = vmatmul.mubr.msk.bf16.gmra.mxu1 %vm172_vm2, %v3008_v61  ;;  %v2494_v60 = vrot.slane %v12116_v48, 1  ;;  %v3034_v0 = vor.u32 %v3033_v54, %v3030_v53 }
 0x141   : > { %v562_v5 = vpop.f32.mrf.mxu0  ;;  %10315 = vmatmul.mubr.msk.bf16.gmra.mxu0 %vm172_vm2, %v2489_v57  ;;  %10384 = vmatprep.mubr.msk.bf16.mxu1 %vm11444_vm1, %v11443_v1  ;;  %v3039_v14 = vrot.slane %v3037_v2, 1 }
 0x142   : > { %1235 = vst.msk [vmem:[#allocation2 + $0xc8] sm:$0xff] %vm172_vm2, %v1201_v3  ;;  %v613_v7 = vadd.f32 %v562_v5, %v269_v62  ;;  %10318 = vmatprep.mubr.msk.bf16.mxu0 %vm11444_vm1, %v11443_v1  ;;  %v10142_v16 = vpop.f32.mrf.mxu1  ;;  %v3040_v3 = vshll.u32 %v11236_v38, 16  ;;  %v3035_v13 = vsel %vm2964_vm5, %v3025_v39, %v3034_v0 }
 0x143   : > { %v714_v9 = vld [vmem:[#allocation2 + $0xd0] sm:$0xff]  ;;  %v10076_v10 = vpop.f32.mrf.mxu0  ;;  %v11238_v16 = vld [vmem:[%s11566_s23 + $0x1f8] sm:$0xff]  }
 0x144   : > { %v1202_v15 = vadd.f32 %v1145_v6, %v714_v9  ;;  %647 = vst.msk [vmem:[#allocation2 + $0xe0] sm:$0xff] %vm172_vm2, %v613_v7  ;;  %v1148_v18 = vpop.f32.mrf.mxu1  ;;  %v2495_v9 = vsel %vm1993_vm4, %v2492_v34, %v2494_v60  ;;  %v12133_v10 = vld [vmem:[%s11566_s23 + $0x168] sm:$0xff]   ;;  %v3046_v27 = vshrl.u32 %v11238_v16, 16  ;;  %v3049_v28 = vshll.u32 %v11238_v16, 16 }
 0x145   : > { %v565_v17 = vpop.f32.mrf.mxu0 }
 0x146   : > { %1236 = vst.msk [vmem:[#allocation2 + $0xd0] sm:$0xff] %vm172_vm2, %v1202_v15  ;;  %v614_v19 = vadd.f32 %v565_v17, %v270_v11  ;;  %v10143_v30 = vpop.f32.mrf.mxu1  ;;  %v3042_v15 = vrot.slane %v3040_v3, 2  ;;  %v3048_v41 = vrot.slane %v3046_v27, 1 }
 0x147   : > { %v715_v22 = vld [vmem:[#allocation2 + $0xd8] sm:$0xff]  ;;  %v10077_v23 = vpop.f32.mrf.mxu0 }
 0x148   : > { %v1203_v29 = vadd.f32 %v1148_v18, %v715_v22  ;;  %648 = vst.msk [vmem:[#allocation2 + $0xe8] sm:$0xff] %vm172_vm2, %v614_v19  ;;  %v1153_v32 = vpop.f32.mrf.mxu1  ;;  %10385 = vmatmul.mubr.msk.bf16.gmra.mxu1 %vm172_vm2, %v3017_v24  ;;  %v1279_v19 = vld [vmem:[#allocation2] sm:$0xff]  ;;  %v2496_v23 = vrot.slane %v12133_v10, 1  ;;  %v3043_v26 = vor.u32 %v3042_v15, %v3039_v14 }
 0x149   : > { %v570_v31 = vpop.f32.mrf.mxu0  ;;  %10319 = vmatmul.mubr.msk.bf16.gmra.mxu0 %vm172_vm2, %v2491_v20  ;;  %10388 = vmatprep.mubr.msk.bf16.mxu1 %vm11444_vm1, %v11443_v1 }
 0x14a   : > { %1237 = vst.msk [vmem:[#allocation2 + $0xd8] sm:$0xff] %vm172_vm2, %v1203_v29  ;;  %v615_v33 = vadd.f32 %v570_v31, %v271_v25  ;;  %10322 = vmatprep.mubr.msk.bf16.mxu0 %vm11444_vm1, %v11443_v1  ;;  %v10146_v43 = vpop.f32.mrf.mxu1  ;;  %v1280_v31 = vld [vmem:[#allocation2 + $0x8] sm:$0xff]  ;;  %v3044_v40 = vsel %vm2964_vm5, %v3034_v0, %v3043_v26 }
 0x14b   : > { %v716_v35 = vld [vmem:[#allocation2 + $0xe0] sm:$0xff]  ;;  %v10080_v36 = vpop.f32.mrf.mxu0 }
 0x14c   : > { %v1204_v42 = vadd.f32 %v1153_v32, %v716_v35  ;;  %649 = vst.msk [vmem:[#allocation2 + $0xf0] sm:$0xff] %vm172_vm2, %v615_v33  ;;  %v1156_v45 = vpop.f32.mrf.mxu1  ;;  %v2497_v35 = vsel %vm1993_vm4, %v2494_v60, %v2496_v23  ;;  %v12150_v36 = vld [vmem:[%s11566_s23 + $0x170] sm:$0xff]   ;;  %v11240_v43 = vld [vmem:[%s11566_s23 + $0x200] sm:$0xff]  }
 0x14d   : > { %v573_v44 = vpop.f32.mrf.mxu0  ;;  %v3055_v54 = vshrl.u32 %v11240_v43, 16  ;;  %v3058_v38 = vshll.u32 %v11240_v43, 16 }
 0x14e   : > { %1238 = vst.msk [vmem:[#allocation2 + $0xe0] sm:$0xff] %vm172_vm2, %v1204_v42  ;;  %v616_v46 = vadd.f32 %v573_v44, %v272_v37  ;;  %v10147_v56 = vpop.f32.mrf.mxu1  ;;  %v3051_v42 = vrot.slane %v3049_v28, 2 }
 0x14f   : > { %v717_v49 = vld [vmem:[#allocation2 + $0xe8] sm:$0xff]  ;;  %v10081_v50 = vpop.f32.mrf.mxu0  ;;  %v3057_v3 = vrot.slane %v3055_v54, 1 }
 0x150   : > { %v1205_v55 = vadd.f32 %v1156_v45, %v717_v49  ;;  %650 = vst.msk [vmem:[#allocation2 + $0xf8] sm:$0xff] %vm172_vm2, %v616_v46  ;;  %v1161_v58 = vpop.f32.mrf.mxu1  ;;  %10389 = vmatmul.mubr.msk.bf16.gmra.mxu1 %vm172_vm2, %v3026_v51  ;;  %v1281_v46 = vld [vmem:[#allocation2 + $0x10] sm:$0xff]  ;;  %v2498_v50 = vrot.slane %v12150_v36, 1  ;;  %v3052_v53 = vor.u32 %v3051_v42, %v3048_v41 }
 0x151   : > { %v578_v57 = vpop.f32.mrf.mxu0  ;;  %10323 = vmatmul.mubr.msk.bf16.gmra.mxu0 %vm172_vm2, %v2493_v47  ;;  %10392 = vmatprep.mubr.msk.bf16.mxu1 %vm11444_vm1, %v11443_v1 }
 0x152   : > { %1239 = vst.msk [vmem:[#allocation2 + $0xe8] sm:$0xff] %vm172_vm2, %v1205_v55  ;;  %v617_v59 = vadd.f32 %v578_v57, %v273_v52  ;;  %10326 = vmatprep.mubr.msk.bf16.mxu0 %vm11444_vm1, %v11443_v1  ;;  %v10150_v5 = vpop.f32.mrf.mxu1  ;;  %v1282_v57 = vld [vmem:[#allocation2 + $0x18] sm:$0xff]  ;;  %v3053_v2 = vsel %vm2964_vm5, %v3043_v26, %v3052_v53 }
 0x153   : > { %v718_v61 = vld [vmem:[#allocation2 + $0xf0] sm:$0xff]  ;;  %v10084_v62 = vpop.f32.mrf.mxu0  ;;  %v11242_v5 = vld [vmem:[%s11566_s23 + $0x208] sm:$0xff]  }
 0x154   : > { %v1206_v4 = vadd.f32 %v1161_v58, %v718_v61  ;;  %651 = vst.msk [vmem:[#allocation2 + $0x100] sm:$0xff] %vm172_vm2, %v617_v59  ;;  %v1164_v7 = vpop.f32.mrf.mxu1  ;;  %v2499_v61 = vsel %vm1993_vm4, %v2496_v23, %v2498_v50  ;;  %v12167_v62 = vld [vmem:[%s11566_s23 + $0x178] sm:$0xff]   ;;  %v3064_v16 = vshrl.u32 %v11242_v5, 16 }
 0x155   : > { %v581_v6 = vpop.f32.mrf.mxu0 }
 0x156   : > { %1240 = vst.msk [vmem:[#allocation2 + $0xf0] sm:$0xff] %vm172_vm2, %v1206_v4  ;;  %v618_v8 = vadd.f32 %v581_v6, %v274_v63  ;;  %v10151_v18 = vpop.f32.mrf.mxu1  ;;  %v3060_v4 = vrot.slane %v3058_v38, 2 }
 0x157   : > { %v719_v11 = vld [vmem:[#allocation2 + $0xf8] sm:$0xff]  ;;  %v10085_v12 = vpop.f32.mrf.mxu0 }
 0x158   : > { %v1207_v17 = vadd.f32 %v1164_v7, %v719_v11  ;;  %652 = vst.msk [vmem:[#allocation2 + $0x108] sm:$0xff] %vm172_vm2, %v618_v8  ;;  %v1169_v21 = vpop.f32.mrf.mxu1  ;;  %10393 = vmatmul.mubr.msk.bf16.gmra.mxu1 %vm172_vm2, %v3035_v13  ;;  %v1283_v8 = vld [vmem:[#allocation2 + $0x20] sm:$0xff]  ;;  %v2500_v12 = vrot.slane %v12167_v62, 1  ;;  %v3061_v15 = vor.u32 %v3060_v4, %v3057_v3 }
 0x159   : > { %v1631_v20 = vpop.f32.mrf.mxu0  ;;  %10327 = vmatmul.mubr.msk.bf16.gmra.mxu0 %vm172_vm2, %v2495_v9  ;;  %10396 = vmatprep.mubr.msk.bf16.mxu1 %vm11444_vm1, %v11443_v1 }
 0x15a   : > { %1241 = vst.msk [vmem:[#allocation2 + $0xf8] sm:$0xff] %vm172_vm2, %v1207_v17  ;;  %v1766_v22 = vadd.f32 %v1631_v20, %v1279_v19  ;;  %10330 = vmatprep.mubr.msk.bf16.mxu0 %vm11444_vm1, %v11443_v1  ;;  %v10154_v30 = vpop.f32.mrf.mxu1  ;;  %v3067_v17 = vshll.u32 %v11242_v5, 16  ;;  %v1284_v20 = vld [vmem:[#allocation2 + $0x28] sm:$0xff]  ;;  %v3062_v28 = vsel %vm2964_vm5, %v3052_v53, %v3061_v15 }
 0x15b   : > { %v720_v24 = vld [vmem:[#allocation2 + $0x100] sm:$0xff]  ;;  %v10160_v25 = vpop.f32.mrf.mxu0 }
 0x15c   : > { %v1208_v29 = vadd.f32 %v1169_v21, %v720_v24  ;;  %1800 = vst.msk [vmem:[#allocation2] sm:$0xff] %vm172_vm2, %v1766_v22  ;;  %v1172_v33 = vpop.f32.mrf.mxu1  ;;  %v2501_v24 = vsel %vm1993_vm4, %v2498_v50, %v2500_v12  ;;  %v12184_v25 = vld [vmem:[%s11566_s23 + $0x180] sm:$0xff]   ;;  %v3069_v30 = vrot.slane %v3067_v17, 2 }
 0x15d   : > { %v1634_v32 = vpop.f32.mrf.mxu0 }
 0x15e   : > { %1242 = vst.msk [vmem:[#allocation2 + $0x100] sm:$0xff] %vm172_vm2, %v1208_v29  ;;  %v1767_v34 = vadd.f32 %v1634_v32, %v1280_v31  ;;  %v10155_v45 = vpop.f32.mrf.mxu1  ;;  %v3066_v29 = vrot.slane %v3064_v16, 1  ;;  %v11244_v31 = vld [vmem:[%s11566_s23 + $0x210] sm:$0xff]  }
 0x15f   : > { %v721_v37 = vld [vmem:[#allocation2 + $0x108] sm:$0xff]  ;;  %v10161_v39 = vpop.f32.mrf.mxu0  ;;  %v3073_v43 = vshrl.u32 %v11244_v31, 16 }
 0x160   : > { %v1209_v44 = vadd.f32 %v1172_v33, %v721_v37  ;;  %1801 = vst.msk [vmem:[#allocation2 + $0x8] sm:$0xff] %vm172_vm2, %v1767_v34  ;;  %v2117_v48 = vpop.f32.mrf.mxu1  ;;  %10397 = vmatmul.mubr.msk.bf16.gmra.mxu1 %vm172_vm2, %v3044_v40  ;;  %v1285_v34 = vld [vmem:[#allocation2 + $0x30] sm:$0xff]  ;;  %v2502_v39 = vrot.slane %v12184_v25, 1  ;;  %v3070_v42 = vor.u32 %v3069_v30, %v3066_v29 }
 0x161   : > { %v1639_v47 = vpop.f32.mrf.mxu0  ;;  %10331 = vmatmul.mubr.msk.bf16.gmra.mxu0 %vm172_vm2, %v2497_v35  ;;  %10400 = vmatprep.mubr.msk.bf16.mxu1 %vm11444_vm1, %v11443_v1 }
 0x162   : > { %1243 = vst.msk [vmem:[#allocation2 + $0x108] sm:$0xff] %vm172_vm2, %v1209_v44  ;;  %v1768_v49 = vadd.f32 %v1639_v47, %v1281_v46  ;;  %10334 = vmatprep.mubr.msk.bf16.mxu0 %vm11444_vm1, %v11443_v1  ;;  %v10230_v56 = vpop.f32.mrf.mxu1  ;;  %v3076_v44 = vshll.u32 %v11244_v31, 16  ;;  %v1286_v47 = vld [vmem:[#allocation2 + $0x38] sm:$0xff]  ;;  %v3071_v38 = vsel %vm2964_vm5, %v3061_v15, %v3070_v42 }
 0x163   : > { %v1869_v51 = vld [vmem:[#allocation2] sm:$0xff]  ;;  %v10164_v52 = vpop.f32.mrf.mxu0 }
 0x164   : > { %v2252_v55 = vadd.f32 %v2117_v48, %v1869_v51  ;;  %1802 = vst.msk [vmem:[#allocation2 + $0x10] sm:$0xff] %vm172_vm2, %v1768_v49  ;;  %v2120_v59 = vpop.f32.mrf.mxu1  ;;  %v2503_v51 = vsel %vm1993_vm4, %v2500_v12, %v2502_v39  ;;  %v12201_v52 = vld [vmem:[%s11566_s23 + $0x188] sm:$0xff]   ;;  %v3078_v56 = vrot.slane %v3076_v44, 2 }
 0x165   : > { %v1642_v58 = vpop.f32.mrf.mxu0 }
 0x166   : > { %2286 = vst.msk [vmem:[#allocation2] sm:$0xff] %vm172_vm2, %v2252_v55  ;;  %v1769_v60 = vadd.f32 %v1642_v58, %v1282_v57  ;;  %v10231_v7 = vpop.f32.mrf.mxu1  ;;  %v3075_v55 = vrot.slane %v3073_v43, 1  ;;  %v11246_v57 = vld [vmem:[%s11566_s23 + $0x218] sm:$0xff]  }
 0x167   : > { %v1870_v63 = vld [vmem:[#allocation2 + $0x8] sm:$0xff]  ;;  %v10165_v0 = vpop.f32.mrf.mxu0  ;;  %v3082_v5 = vshrl.u32 %v11246_v57, 16 }
 0x168   : > { %v2253_v6 = vadd.f32 %v2120_v59, %v1870_v63  ;;  %1803 = vst.msk [vmem:[#allocation2 + $0x18] sm:$0xff] %vm172_vm2, %v1769_v60  ;;  %v2125_v10 = vpop.f32.mrf.mxu1  ;;  %10401 = vmatmul.mubr.msk.bf16.gmra.mxu1 %vm172_vm2, %v3053_v2  ;;  %v1287_v60 = vld [vmem:[#allocation2 + $0x40] sm:$0xff]  ;;  %v2504_v0 = vrot.slane %v12201_v52, 1  ;;  %v3079_v4 = vor.u32 %v3078_v56, %v3075_v55 }
 0x169   : > { %v1647_v9 = vpop.f32.mrf.mxu0  ;;  %10335 = vmatmul.mubr.msk.bf16.gmra.mxu0 %vm172_vm2, %v2499_v61  ;;  %10404 = vmatprep.mubr.msk.bf16.mxu1 %vm11444_vm1, %v11443_v1 }
 0x16a   : > { %2287 = vst.msk [vmem:[#allocation2 + $0x8] sm:$0xff] %vm172_vm2, %v2253_v6  ;;  %v1770_v11 = vadd.f32 %v1647_v9, %v1283_v8  ;;  %10338 = vmatprep.mubr.msk.bf16.mxu0 %vm11444_vm1, %v11443_v1  ;;  %v10234_v19 = vpop.f32.mrf.mxu1  ;;  %v3085_v6 = vshll.u32 %v11246_v57, 16  ;;  %v1288_v9 = vld [vmem:[#allocation2 + $0x48] sm:$0xff]  ;;  %v3080_v17 = vsel %vm2964_vm5, %v3070_v42, %v3079_v4 }
 0x16b   : > { %v1871_v13 = vld [vmem:[#allocation2 + $0x10] sm:$0xff]  ;;  %v10168_v14 = vpop.f32.mrf.mxu0 }
 0x16c   : > { %v2254_v18 = vadd.f32 %v2125_v10, %v1871_v13  ;;  %1804 = vst.msk [vmem:[#allocation2 + $0x20] sm:$0xff] %vm172_vm2, %v1770_v11  ;;  %v2128_v22 = vpop.f32.mrf.mxu1  ;;  %v2505_v13 = vsel %vm1993_vm4, %v2502_v39, %v2504_v0  ;;  %v12218_v14 = vld [vmem:[%s11566_s23 + $0x190] sm:$0xff]   ;;  %v3087_v19 = vrot.slane %v3085_v6, 2 }
 0x16d   : > { %v1650_v21 = vpop.f32.mrf.mxu0 }
 0x16e   : > { %2288 = vst.msk [vmem:[#allocation2 + $0x10] sm:$0xff] %vm172_vm2, %v2254_v18  ;;  %v1771_v23 = vadd.f32 %v1650_v21, %v1284_v20  ;;  %v10235_v33 = vpop.f32.mrf.mxu1  ;;  %v3084_v18 = vrot.slane %v3082_v5, 1  ;;  %v11248_v20 = vld [vmem:[%s11566_s23 + $0x220] sm:$0xff]  }
 0x16f   : > { %v1872_v26 = vld [vmem:[#allocation2 + $0x18] sm:$0xff]  ;;  %v10169_v27 = vpop.f32.mrf.mxu0  ;;  %v3091_v31 = vshrl.u32 %v11248_v20, 16 }
 0x170   : > { %v2255_v32 = vadd.f32 %v2128_v22, %v1872_v26  ;;  %1805 = vst.msk [vmem:[#allocation2 + $0x28] sm:$0xff] %vm172_vm2, %v1771_v23  ;;  %v2133_v36 = vpop.f32.mrf.mxu1  ;;  %10405 = vmatmul.mubr.msk.bf16.gmra.mxu1 %vm172_vm2, %v3062_v28  ;;  %v1289_v23 = vld [vmem:[#allocation2 + $0x50] sm:$0xff]  ;;  %v2506_v27 = vrot.slane %v12218_v14, 1  ;;  %v3088_v30 = vor.u32 %v3087_v19, %v3084_v18 }
 0x171   : > { %v1655_v35 = vpop.f32.mrf.mxu0  ;;  %10339 = vmatmul.mubr.msk.bf16.gmra.mxu0 %vm172_vm2, %v2501_v24  ;;  %10408 = vmatprep.mubr.msk.bf16.mxu1 %vm11444_vm1, %v11443_v1 }
 0x172   : > { %2289 = vst.msk [vmem:[#allocation2 + $0x18] sm:$0xff] %vm172_vm2, %v2255_v32  ;;  %v1772_v37 = vadd.f32 %v1655_v35, %v1285_v34  ;;  %10342 = vmatprep.mubr.msk.bf16.mxu0 %vm11444_vm1, %v11443_v1  ;;  %v10238_v46 = vpop.f32.mrf.mxu1  ;;  %v3094_v32 = vshll.u32 %v11248_v20, 16  ;;  %v1290_v35 = vld [vmem:[#allocation2 + $0x58] sm:$0xff]  ;;  %v3089_v44 = vsel %vm2964_vm5, %v3079_v4, %v3088_v30 }
 0x173   : > { %v1873_v40 = vld [vmem:[#allocation2 + $0x20] sm:$0xff]  ;;  %v10172_v41 = vpop.f32.mrf.mxu0 }
 0x174   : > { %v2256_v45 = vadd.f32 %v2133_v36, %v1873_v40  ;;  %1806 = vst.msk [vmem:[#allocation2 + $0x30] sm:$0xff] %vm172_vm2, %v1772_v37  ;;  %v2136_v49 = vpop.f32.mrf.mxu1  ;;  %v2507_v40 = vsel %vm1993_vm4, %v2504_v0, %v2506_v27  ;;  %v12235_v41 = vld [vmem:[%s11566_s23 + $0x198] sm:$0xff]   ;;  %v3096_v46 = vrot.slane %v3094_v32, 2 }
 0x175   : > { %v1658_v48 = vpop.f32.mrf.mxu0 }
 0x176   : > { %2290 = vst.msk [vmem:[#allocation2 + $0x20] sm:$0xff] %vm172_vm2, %v2256_v45  ;;  %v1773_v50 = vadd.f32 %v1658_v48, %v1286_v47  ;;  %v10239_v59 = vpop.f32.mrf.mxu1  ;;  %v3093_v45 = vrot.slane %v3091_v31, 1  ;;  %v11250_v47 = vld [vmem:[%s11566_s23 + $0x228] sm:$0xff]  }
 0x177   : > { %v1874_v53 = vld [vmem:[#allocation2 + $0x28] sm:$0xff]  ;;  %v10173_v54 = vpop.f32.mrf.mxu0  ;;  %v3100_v57 = vshrl.u32 %v11250_v47, 16 }
 0x178   : > { %v2257_v58 = vadd.f32 %v2136_v49, %v1874_v53  ;;  %1807 = vst.msk [vmem:[#allocation2 + $0x38] sm:$0xff] %vm172_vm2, %v1773_v50  ;;  %v2141_v62 = vpop.f32.mrf.mxu1  ;;  %10409 = vmatmul.mubr.msk.bf16.gmra.mxu1 %vm172_vm2, %v3071_v38  ;;  %v1291_v50 = vld [vmem:[#allocation2 + $0x60] sm:$0xff]  ;;  %v2508_v54 = vrot.slane %v12235_v41, 1  ;;  %v3097_v56 = vor.u32 %v3096_v46, %v3093_v45  ;;  %v11256_v31 = vld [vmem:[%s11566_s23 + $0x128] sm:$0xff]  }
 0x179   : > { %v1663_v61 = vpop.f32.mrf.mxu0  ;;  %10343 = vmatmul.mubr.msk.bf16.gmra.mxu0 %vm172_vm2, %v2503_v51  ;;  %10412 = vmatprep.mubr.msk.bf16.mxu1 %vm11444_vm1, %v11443_v1  ;;  %v1295_v41 = vld [vmem:[#allocation2 + $0x80] sm:$0xff] }
 0x17a   : > { %2291 = vst.msk [vmem:[#allocation2 + $0x28] sm:$0xff] %vm172_vm2, %v2257_v58  ;;  %v1774_v63 = vadd.f32 %v1663_v61, %v1287_v60  ;;  %10346 = vmatprep.mubr.msk.bf16.mxu0 %vm11444_vm1, %v11443_v1  ;;  %v10242_v8 = vpop.f32.mrf.mxu1  ;;  %v3103_v58 = vshll.u32 %v11250_v47, 16  ;;  %v1292_v61 = vld [vmem:[#allocation2 + $0x68] sm:$0xff]  ;;  %v3098_v6 = vsel %vm2964_vm5, %v3088_v30, %v3097_v56 }
 0x17b   : > { %v1875_v2 = vld [vmem:[#allocation2 + $0x30] sm:$0xff]  ;;  %v10176_v3 = vpop.f32.mrf.mxu0  ;;  %v11253_v30 = vld [vmem:[%s11566_s23 + $0x1a8] ss:$0 sps:$4 sm:$0x11]  }
 0x17c   : > { %v2258_v7 = vadd.f32 %v2141_v62, %v1875_v2  ;;  %1808 = vst.msk [vmem:[#allocation2 + $0x40] sm:$0xff] %vm172_vm2, %v1774_v63  ;;  %v2144_v11 = vpop.f32.mrf.mxu1  ;;  %v2509_v2 = vsel %vm1993_vm4, %v2506_v27, %v2508_v54  ;;  %v12252_v3 = vld [vmem:[%s11566_s23 + $0x1a0] sm:$0xff]   ;;  %v3105_v8 = vrot.slane %v3103_v58, 2  ;;  %v2512_v47 = vrot.slane %v11253_v30, 1 }
 0x17d   : > { %v1666_v10 = vpop.f32.mrf.mxu0 }
 0x17e   : > { %2292 = vst.msk [vmem:[#allocation2 + $0x30] sm:$0xff] %vm172_vm2, %v2258_v7  ;;  %v1775_v12 = vadd.f32 %v1666_v10, %v1288_v9  ;;  %v10243_v22 = vpop.f32.mrf.mxu1  ;;  %v3102_v7 = vrot.slane %v3100_v57, 1  ;;  %v11252_v9 = vld [vmem:[%s11566_s23 + $0x230] sm:$0xff]  }
 0x17f   : > { %v1876_v15 = vld [vmem:[#allocation2 + $0x38] sm:$0xff]  ;;  %v10177_v16 = vpop.f32.mrf.mxu0  ;;  %v3109_v20 = vshrl.u32 %v11252_v9, 16 }
 0x180   : > { %v2259_v21 = vadd.f32 %v2144_v11, %v1876_v15  ;;  %1809 = vst.msk [vmem:[#allocation2 + $0x48] sm:$0xff] %vm172_vm2, %v1775_v12  ;;  %v2149_v25 = vpop.f32.mrf.mxu1  ;;  %10413 = vmatmul.mubr.msk.bf16.gmra.mxu1 %vm172_vm2, %v3080_v17  ;;  %v1293_v12 = vld [vmem:[#allocation2 + $0x70] sm:$0xff]  ;;  %v2510_v16 = vrot.slane %v12252_v3, 1  ;;  %v3106_v19 = vor.u32 %v3105_v8, %v3102_v7 }
 0x181   : > { %v1671_v24 = vpop.f32.mrf.mxu0  ;;  %10347 = vmatmul.mubr.msk.bf16.gmra.mxu0 %vm172_vm2, %v2505_v13  ;;  %10416 = vmatprep.mubr.msk.bf16.mxu1 %vm11444_vm1, %v11443_v1 }
 0x182   : > { %2293 = vst.msk [vmem:[#allocation2 + $0x38] sm:$0xff] %vm172_vm2, %v2259_v21  ;;  %v1776_v26 = vadd.f32 %v1671_v24, %v1289_v23  ;;  %10350 = vmatprep.mubr.msk.bf16.mxu0 %vm11444_vm1, %v11443_v1  ;;  %v10246_v34 = vpop.f32.mrf.mxu1  ;;  %v3112_v21 = vshll.u32 %v11252_v9, 16  ;;  %v1294_v24 = vld [vmem:[#allocation2 + $0x78] sm:$0xff] }
 0x183   : > { %v1877_v28 = vld [vmem:[#allocation2 + $0x40] sm:$0xff]  ;;  %v10180_v29 = vpop.f32.mrf.mxu0  ;;  %v3107_v34 = vsel %vm2964_vm5, %v3097_v56, %v3106_v19  ;;  %v1296_v56 = vld [vmem:[#allocation2 + $0x88] sm:$0xff] }
 0x184   : > { %v2260_v33 = vadd.f32 %v2149_v25, %v1877_v28  ;;  %1810 = vst.msk [vmem:[#allocation2 + $0x50] sm:$0xff] %vm172_vm2, %v1776_v26  ;;  %v2152_v37 = vpop.f32.mrf.mxu1  ;;  %v11255_v26 = vld [vmem:[%s11566_s23 + $0x120] sm:$0xfe]   ;;  %v2511_v29 = vsel %vm1993_vm4, %v2508_v54, %v2510_v16 }
 0x185   : > { %v1674_v36 = vpop.f32.mrf.mxu0 }
 0x186   : > { %2294 = vst.msk [vmem:[#allocation2 + $0x40] sm:$0xff] %vm172_vm2, %v2260_v33  ;;  %v1777_v39 = vadd.f32 %v1674_v36, %v1290_v35  ;;  %v10247_v49 = vpop.f32.mrf.mxu1  ;;  %v3111_v35 = vrot.slane %v3109_v20, 1  ;;  %v3114_v36 = vrot.slane %v3112_v21, 2 }
 0x187   : > { %v1878_v42 = vld [vmem:[#allocation2 + $0x48] sm:$0xff]  ;;  %v10181_v43 = vpop.f32.mrf.mxu0  ;;  %v3588_v49 = vshll.u32 %v11256_v31, 16 }
 0x188   : > { %v2261_v48 = vadd.f32 %v2152_v37, %v1878_v42  ;;  %1811 = vst.msk [vmem:[#allocation2 + $0x58] sm:$0xff] %vm172_vm2, %v1777_v39  ;;  %v2157_v52 = vpop.f32.mrf.mxu1  ;;  %10417 = vmatmul.mubr.msk.bf16.gmra.mxu1 %vm172_vm2, %v3089_v44  ;;  %v11254_v37 = vld [vmem:[%s11566_s23 + $0x238] ss:$0 sps:$4 sm:$0x33]   ;;  %v3577_v43 = vshrl.u32 %v11255_v26, 16  ;;  %v3580_v44 = vshll.u32 %v11255_v26, 16 }
 0x189   : > { %v1679_v51 = vpop.f32.mrf.mxu0  ;;  %10351 = vmatmul.mubr.msk.bf16.gmra.mxu0 %vm172_vm2, %v2507_v40  ;;  %10420 = vmatprep.mubr.msk.bf16.mxu1 %vm11444_vm1, %v11443_v1  ;;  %v3121_v54 = vshll.u32 %v11254_v37, 16 }
 0x18a   : > { %2295 = vst.msk [vmem:[#allocation2 + $0x48] sm:$0xff] %vm172_vm2, %v2261_v48  ;;  %v1778_v53 = vadd.f32 %v1679_v51, %v1291_v50  ;;  %10354 = vmatprep.mubr.msk.bf16.mxu0 %vm11444_vm1, %v11443_v1  ;;  %v10250_v60 = vpop.f32.mrf.mxu1  ;;  %v3585_v48 = vshrl.u32 %v11256_v31, 16  ;;  %v3579_v58 = vrot.slane %v3577_v43, 1  ;;  %v11261_v31 = vld [vmem:[%s11566_s23 + $0x138] sm:$0xff]  }
 0x18b   : > { %v1879_v38 = vld [vmem:[#allocation2 + $0x50] sm:$0xff]  ;;  %v10184_v55 = vpop.f32.mrf.mxu0  ;;  %v3123_v7 = vrot.slane %v3121_v54, 2  ;;  %v1300_v54 = vld [vmem:[#allocation2 + $0xa8] sm:$0xff] }
 0x18c   : > { %v2262_v59 = vadd.f32 %v2157_v52, %v1879_v38  ;;  %1812 = vst.msk [vmem:[#allocation2 + $0x60] sm:$0xff] %vm172_vm2, %v1778_v53  ;;  %v2160_v63 = vpop.f32.mrf.mxu1  ;;  %v3115_v52 = vor.u32 %v3114_v36, %v3111_v35  ;;  %v3118_v53 = vshrl.u32 %v11254_v37, 16  ;;  %v11257_v36 = vld [vmem:[%s11566_s23 + $0x1b0] sm:$0xfc]   ;;  %v12305_v37 = vld [vmem:[%s11566_s23 + $0x1b8] sm:$0xff]  }
 0x18d   : > { %v1682_v62 = vpop.f32.mrf.mxu0 }
 0x18e   : > { %2296 = vst.msk [vmem:[#allocation2 + $0x50] sm:$0xff] %vm172_vm2, %v2262_v59  ;;  %v1779_v0 = vadd.f32 %v1682_v62, %v1292_v61  ;;  %v10251_v11 = vpop.f32.mrf.mxu1  ;;  %v3582_v59 = vrot.slane %v3580_v44, 2  ;;  %v2513_v62 = vsel %vm1993_vm4, %v2510_v16, %v2512_v47  ;;  %v3606_v47 = vshll.u32 %v11261_v31, 16 }
 0x18f   : > { %v1880_v4 = vld [vmem:[#allocation2 + $0x58] sm:$0xff]  ;;  %v10185_v5 = vpop.f32.mrf.mxu0 }
 0x190   : > { %v2263_v10 = vadd.f32 %v2160_v63, %v1880_v4  ;;  %1813 = vst.msk [vmem:[#allocation2 + $0x68] sm:$0xff] %vm172_vm2, %v1779_v0  ;;  %v2165_v14 = vpop.f32.mrf.mxu1  ;;  %10421 = vmatmul.mubr.msk.bf16.gmra.mxu1 %vm172_vm2, %v3098_v6  ;;  %v3587_v63 = vrot.slane %v3585_v48, 1  ;;  %v3590_v0 = vrot.slane %v3588_v49, 2  ;;  %v3116_v5 = vsel %vm2964_vm5, %v3106_v19, %v3115_v52 }
 0x191   : > { %v1687_v13 = vpop.f32.mrf.mxu0  ;;  %10355 = vmatmul.mubr.msk.bf16.gmra.mxu0 %vm172_vm2, %v2509_v2  ;;  %10424 = vmatprep.mubr.msk.bf16.mxu1 %vm11444_vm1, %v11443_v1  ;;  %v11259_v2 = vld [vmem:[%s11566_s23 + $0x130] sm:$0xff]   ;;  %v3120_v6 = vrot.slane %v3118_v53, 1 }
 0x192   : > { %2297 = vst.msk [vmem:[#allocation2 + $0x58] sm:$0xff] %vm172_vm2, %v2263_v10  ;;  %v1780_v15 = vadd.f32 %v1687_v13, %v1293_v12  ;;  %10358 = vmatprep.mubr.msk.bf16.mxu0 %vm11444_vm1, %v11443_v1  ;;  %v10254_v23 = vpop.f32.mrf.mxu1  ;;  %v1297_v10 = vld [vmem:[#allocation2 + $0x90] sm:$0xff]  ;;  %v3583_v12 = vor.u32 %v3582_v59, %v3579_v58  ;;  %v3594_v16 = vshrl.u32 %v11259_v2, 16 }
 0x193   : > { %v1881_v17 = vld [vmem:[#allocation2 + $0x60] sm:$0xff]  ;;  %v10188_v18 = vpop.f32.mrf.mxu0  ;;  %v3124_v20 = vor.u32 %v3123_v7, %v3120_v6  ;;  %v1301_v6 = vld [vmem:[#allocation2 + $0xb0] sm:$0xff] }
 0x194   : > { %v2264_v22 = vadd.f32 %v2165_v14, %v1881_v17  ;;  %1814 = vst.msk [vmem:[#allocation2 + $0x70] sm:$0xff] %vm172_vm2, %v1780_v15  ;;  %v2168_v27 = vpop.f32.mrf.mxu1  ;;  %v3591_v15 = vor.u32 %v3590_v0, %v3587_v63  ;;  %v3597_v17 = vshll.u32 %v11259_v2, 16  ;;  %v9437_v23 = vld [vmem:[%s14052_s1 + $0x20] sm:$0xf] }
 0x195   : > { %v1690_v25 = vpop.f32.mrf.mxu0  ;;  %v4865_v35 = vsel %vm412_vm0, %v9437_v23, 0  ;;  %v12326_v2 = vld [vmem:[%s11566_s23 + $0x1c0] sm:$0xff]  }
 0x196   : > { %2298 = vst.msk [vmem:[#allocation2 + $0x60] sm:$0xff] %vm172_vm2, %v2264_v22  ;;  %v1781_v28 = vadd.f32 %v1690_v25, %v1294_v24  ;;  %v10255_v40 = vpop.f32.mrf.mxu1  ;;  %v1298_v24 = vld [vmem:[#allocation2 + $0x98] sm:$0xff]  ;;  %v3599_v30 = vrot.slane %v3597_v17, 2 }
 0x197   : > { %v1882_v32 = vld [vmem:[#allocation2 + $0x68] sm:$0xff]  ;;  %v10189_v33 = vpop.f32.mrf.mxu0 }
 0x198   : > { %v2265_v39 = vadd.f32 %v2168_v27, %v1882_v32  ;;  %1815 = vst.msk [vmem:[#allocation2 + $0x78] sm:$0xff] %vm172_vm2, %v1781_v28  ;;  %v2173_v45 = vpop.f32.mrf.mxu1  ;;  %10425 = vmatmul.mubr.msk.bf16.gmra.mxu1 %vm172_vm2, %v3107_v34  ;;  %v3592_v28 = vsel %vm2964_vm5, %v3583_v12, %v3591_v15  ;;  %v3125_v34 = vsel %vm2964_vm5, %v3115_v52, %v3124_v20 }
 0x199   : > { %v1695_v42 = vpop.f32.mrf.mxu0  ;;  %10359 = vmatmul.mubr.msk.bf16.gmra.mxu0 %vm172_vm2, %v2511_v29  ;;  %10428 = vmatprep.mubr.msk.bf16.mxu1 %vm11444_vm1, %v11443_v1  ;;  %v3596_v29 = vrot.slane %v3594_v16, 1 }
 0x19a   : > { %2299 = vst.msk [vmem:[#allocation2 + $0x68] sm:$0xff] %vm172_vm2, %v2265_v39  ;;  %v1782_v46 = vadd.f32 %v1695_v42, %v1295_v41  ;;  %10362 = vmatprep.mubr.msk.bf16.mxu0 %vm11444_vm1, %v11443_v1  ;;  %v10258_v55 = vpop.f32.mrf.mxu1  ;;  %v1299_v41 = vld [vmem:[#allocation2 + $0xa0] sm:$0xff] }
 0x19b   : > { %v1883_v50 = vld [vmem:[#allocation2 + $0x70] sm:$0xff]  ;;  %v10192_v51 = vpop.f32.mrf.mxu0  ;;  %v9473_v55 = vld [vmem:[%s14052_s1 + $0x24] sm:$0xf] }
 0x19c   : > { %v2266_v38 = vadd.f32 %v2173_v45, %v1883_v50  ;;  %1816 = vst.msk [vmem:[#allocation2 + $0x80] sm:$0xff] %vm172_vm2, %v1782_v46  ;;  %v2176_v60 = vpop.f32.mrf.mxu1  ;;  %v3600_v45 = vor.u32 %v3599_v30, %v3596_v29  ;;  %v3603_v46 = vshrl.u32 %v11261_v31, 16  ;;  %v4188_v50 = vrot.slane %v11257_v36, 2  ;;  %v12345_v29 = vld [vmem:[%s11566_s23 + $0x1c8] sm:$0xff]  }
 0x19d   : > { %v1698_v57 = vpop.f32.mrf.mxu0  ;;  %v4189_v51 = vrot.slane %v12305_v37, 2 }
 0x19e   : > { %2300 = vst.msk [vmem:[#allocation2 + $0x70] sm:$0xff] %vm172_vm2, %v2266_v38  ;;  %v1783_v61 = vadd.f32 %v1698_v57, %v1296_v56  ;;  %v10259_v9 = vpop.f32.mrf.mxu1  ;;  %v3601_v58 = vsel %vm2964_vm5, %v3591_v15, %v3600_v45  ;;  %v3605_v59 = vrot.slane %v3603_v46, 1  ;;  %v4191_v15 = vrot.slane %v12326_v2, 2 }
 0x19f   : > { %v1884_v3 = vld [vmem:[#allocation2 + $0x78] sm:$0xff]  ;;  %v10193_v4 = vpop.f32.mrf.mxu0  ;;  %v4190_v0 = vsel %vm4187_vm6, %v4188_v50, %v4189_v51 }
 0x1a0   : > { %v2267_v8 = vadd.f32 %v2176_v60, %v1884_v3  ;;  %1817 = vst.msk [vmem:[#allocation2 + $0x88] sm:$0xff] %vm172_vm2, %v1783_v61  ;;  %v2181_v13 = vpop.f32.mrf.mxu1  ;;  %10429 = vmatmul.mubr.msk.bf16.gmra.mxu1 %vm172_vm2, %v3116_v5  ;;  %v3608_v60 = vrot.slane %v3606_v47, 2  ;;  %v11263_v61 = vld [vmem:[%s11566_s23 + $0x140] sm:$0xff]   ;;  %v5350_v5 = vsel %vm412_vm0, %v9473_v55, 0  ;;  %v12362_v55 = vld [vmem:[%s11566_s23 + $0x1d0] sm:$0xff]  }
 0x1a1   : > { %v1703_v11 = vpop.f32.mrf.mxu0  ;;  %10363 = vmatmul.mubr.msk.bf16.gmra.mxu0 %vm172_vm2, %v2513_v62  ;;  %10432 = vmatprep.mubr.msk.bf16.mxu1 %vm11444_vm1, %v11443_v1  ;;  %v3615_v12 = vshll.u32 %v11263_v61, 16 }
 0x1a2   : > { %2301 = vst.msk [vmem:[#allocation2 + $0x78] sm:$0xff] %vm172_vm2, %v2267_v8  ;;  %v1784_v14 = vadd.f32 %v1703_v11, %v1297_v10  ;;  %10438 = vmatprep.mubr.msk.bf16.mxu0 %vm11444_vm1, %v11443_v1  ;;  %v10262_v22 = vpop.f32.mrf.mxu1  ;;  %v3609_v10 = vor.u32 %v3608_v60, %v3605_v59  ;;  %v3612_v11 = vshrl.u32 %v11263_v61, 16 }
 0x1a3   : > { %v1885_v18 = vld [vmem:[#allocation2 + $0x80] sm:$0xff]  ;;  %v10196_v19 = vpop.f32.mrf.mxu0 }
 0x1a4   : > { %v2268_v21 = vadd.f32 %v2181_v13, %v1885_v18  ;;  %1818 = vst.msk [vmem:[#allocation2 + $0x90] sm:$0xff] %vm172_vm2, %v1784_v14  ;;  %v2184_v26 = vpop.f32.mrf.mxu1  ;;  %v1302_v18 = vld [vmem:[#allocation2 + $0xb8] sm:$0xff]  ;;  %v3610_v22 = vsel %vm2964_vm5, %v3600_v45, %v3609_v10  ;;  %v3614_v23 = vrot.slane %v3612_v11, 1  ;;  %v1304_v45 = vld [vmem:[#allocation2 + $0xc8] sm:$0xff] }
 0x1a5   : > { %v1706_v25 = vpop.f32.mrf.mxu0 }
 0x1a6   : > { %2302 = vst.msk [vmem:[#allocation2 + $0x80] sm:$0xff] %vm172_vm2, %v2268_v21  ;;  %v1785_v27 = vadd.f32 %v1706_v25, %v1298_v24  ;;  %v10263_v40 = vpop.f32.mrf.mxu1  ;;  %v3617_v24 = vrot.slane %v3615_v12, 2  ;;  %v11265_v25 = vld [vmem:[%s11566_s23 + $0x148] sm:$0xff]  }
 0x1a7   : > { %v1886_v32 = vld [vmem:[#allocation2 + $0x88] sm:$0xff]  ;;  %v10197_v33 = vpop.f32.mrf.mxu0  ;;  %v3621_v37 = vshrl.u32 %v11265_v25, 16 }
 0x1a8   : > { %v2269_v39 = vadd.f32 %v2184_v26, %v1886_v32  ;;  %1819 = vst.msk [vmem:[#allocation2 + $0x98] sm:$0xff] %vm172_vm2, %v1785_v27  ;;  %v2189_v43 = vpop.f32.mrf.mxu1  ;;  %10433 = vmatmul.mubr.msk.bf16.gmra.mxu1 %vm172_vm2, %v3125_v34  ;;  %v1303_v32 = vld [vmem:[#allocation2 + $0xc0] sm:$0xff]  ;;  %v3618_v36 = vor.u32 %v3617_v24, %v3614_v23 }
 0x1a9   : > { %v1711_v42 = vpop.f32.mrf.mxu0  ;;  %10439 = vmatmul.mubr.msk.bf16.vlgmr.msra.gmra.mxu0 %vm172_vm2, %v3592_v28  ;;  %10508 = vmatprep.mubr.msk.bf16.mxu1 %vm11444_vm1, %v11443_v1  ;;  %v4192_v28 = vsel %vm4187_vm6, %v4189_v51, %v4191_v15  ;;  %v3623_v50 = vrot.slane %v3621_v37, 1 }
 0x1aa   : > { %2303 = vst.msk [vmem:[#allocation2 + $0x88] sm:$0xff] %vm172_vm2, %v2269_v39  ;;  %v1786_v44 = vadd.f32 %v1711_v42, %v1299_v41  ;;  %10577 = vmatpush3.bf16.msra.mxu0 %v4865_v35  ;;  %10442 = vmatprep.mubr.msk.bf16.mxu0 %vm11444_vm1, %v11443_v1  ;;  %v10266_v53 = vpop.f32.mrf.mxu1  ;;  %v3624_v39 = vshll.u32 %v11265_v25, 16  ;;  %v4193_v42 = vrot.slane %v12345_v29, 2 }
 0x1ab   : > { %v1887_v48 = vld [vmem:[#allocation2 + $0x90] sm:$0xff]  ;;  %v10200_v49 = vpop.f32.mrf.mxu0  ;;  %10716 = vmatprep.subr.bf16.mxu0 %v11443_v1 }
 0x1ac   : > { %v2270_v52 = vadd.f32 %v2189_v43, %v1887_v48  ;;  %1820 = vst.msk [vmem:[#allocation2 + $0xa0] sm:$0xff] %vm172_vm2, %v1786_v44  ;;  %v2192_v56 = vpop.f32.mrf.mxu1  ;;  %v3619_v49 = vsel %vm2964_vm5, %v3609_v10, %v3618_v36  ;;  %v3626_v51 = vrot.slane %v3624_v39, 2 }
 0x1ad   : > { %v1714_v38 = vpop.f32.mrf.mxu0 }
 0x1ae   : > { %2304 = vst.msk [vmem:[#allocation2 + $0x90] sm:$0xff] %vm172_vm2, %v2270_v52  ;;  %v1787_v57 = vadd.f32 %v1714_v38, %v1300_v54  ;;  %v10267_v4 = vpop.f32.mrf.mxu1  ;;  %v11267_v52 = vld [vmem:[%s11566_s23 + $0x150] sm:$0xff]   ;;  %v4194_v38 = vsel %vm4187_vm6, %v4191_v15, %v4193_v42 }
 0x1af   : > { %v1888_v62 = vld [vmem:[#allocation2 + $0x98] sm:$0xff]  ;;  %v10201_v63 = vpop.f32.mrf.mxu0  ;;  %v4195_v4 = vrot.slane %v12362_v55, 2 }
 0x1b0   : > { %v2271_v3 = vadd.f32 %v2192_v56, %v1888_v62  ;;  %1821 = vst.msk [vmem:[#allocation2 + $0xa8] sm:$0xff] %vm172_vm2, %v1787_v57  ;;  %v2197_v8 = vpop.f32.mrf.mxu1  ;;  %10509 = vmatmul.mubr.msk.bf16.vlgmr.msra.gmra.mxu1 %vm172_vm2, %v4190_v0  ;;  %v3627_v62 = vor.u32 %v3626_v51, %v3623_v50  ;;  %v3630_v63 = vshrl.u32 %v11267_v52, 16  ;;  %v3633_v0 = vshll.u32 %v11267_v52, 16 }
 0x1b1   : > { %v1719_v7 = vpop.f32.mrf.mxu0  ;;  %10443 = vmatmul.mubr.msk.bf16.gmra.mxu0 %vm172_vm2, %v3601_v58  ;;  %10647 = vmatpush3.bf16.msra.mxu1 %v5350_v5  ;;  %v1305_v58 = vld [vmem:[#allocation2 + $0xd0] sm:$0xff] }
 0x1b2   : > { %2305 = vst.msk [vmem:[#allocation2 + $0x98] sm:$0xff] %vm172_vm2, %v2271_v3  ;;  %v1788_v9 = vadd.f32 %v1719_v7, %v1301_v6  ;;  %10446 = vmatprep.mubr.msk.bf16.mxu0 %vm11444_vm1, %v11443_v1  ;;  %10512 = vmatprep.mubr.msk.bf16.mxu1 %vm11444_vm1, %v11443_v1  ;;  %v10270_v17 = vpop.f32.mrf.mxu1  ;;  %v1306_v7 = vld [vmem:[#allocation2 + $0xd8] sm:$0xff]  ;;  %v3628_v11 = vsel %vm2964_vm5, %v3618_v36, %v3627_v62  ;;  %v3632_v12 = vrot.slane %v3630_v63, 1 }
 0x1b3   : > { %v1889_v13 = vld [vmem:[#allocation2 + $0xa0] sm:$0xff]  ;;  %v10204_v14 = vpop.f32.mrf.mxu0  ;;  %10786 = vmatprep.subr.bf16.mxu1 %v11443_v1  ;;  %v4196_v17 = vsel %vm4187_vm6, %v4193_v42, %v4195_v4 }
 0x1b4   : > { %v2272_v16 = vadd.f32 %v2197_v8, %v1889_v13  ;;  %1822 = vst.msk [vmem:[#allocation2 + $0xb0] sm:$0xff] %vm172_vm2, %v1788_v9  ;;  %v2200_v20 = vpop.f32.mrf.mxu1  ;;  %v3635_v13 = vrot.slane %v3633_v0, 2  ;;  %v11269_v14 = vld [vmem:[%s11566_s23 + $0x158] sm:$0xff]  }
 0x1b5   : > { %v1722_v19 = vpop.f32.mrf.mxu0 }
 0x1b6   : > { %2306 = vst.msk [vmem:[#allocation2 + $0xa0] sm:$0xff] %vm172_vm2, %v2272_v16  ;;  %v1789_v21 = vadd.f32 %v1722_v19, %v1302_v18  ;;  %v10271_v31 = vpop.f32.mrf.mxu1  ;;  %v12379_v18 = vld [vmem:[%s11566_s23 + $0x1d8] sm:$0xff]   ;;  %v3636_v25 = vor.u32 %v3635_v13, %v3632_v12 }
 0x1b7   : > { %v1890_v26 = vld [vmem:[#allocation2 + $0xa8] sm:$0xff]  ;;  %v10205_v27 = vpop.f32.mrf.mxu0 }
 0x1b8   : > { %v2273_v30 = vadd.f32 %v2200_v20, %v1890_v26  ;;  %1823 = vst.msk [vmem:[#allocation2 + $0xb8] sm:$0xff] %vm172_vm2, %v1789_v21  ;;  %v2205_v34 = vpop.f32.mrf.mxu1  ;;  %10513 = vmatmul.mubr.msk.bf16.gmra.mxu1 %vm172_vm2, %v4192_v28  ;;  %v1307_v21 = vld [vmem:[#allocation2 + $0xe0] sm:$0xff]  ;;  %v3639_v26 = vshrl.u32 %v11269_v14, 16  ;;  %v3642_v27 = vshll.u32 %v11269_v14, 16  ;;  %v3637_v37 = vsel %vm2964_vm5, %v3627_v62, %v3636_v25 }
 0x1b9   : > { %v1727_v33 = vpop.f32.mrf.mxu0  ;;  %10447 = vmatmul.mubr.msk.bf16.gmra.mxu0 %vm172_vm2, %v3610_v22  ;;  %10516 = vmatprep.mubr.msk.bf16.mxu1 %vm11444_vm1, %v11443_v1 }
 0x1ba   : > { %2307 = vst.msk [vmem:[#allocation2 + $0xa8] sm:$0xff] %vm172_vm2, %v2273_v30  ;;  %v1790_v35 = vadd.f32 %v1727_v33, %v1303_v32  ;;  %10450 = vmatprep.mubr.msk.bf16.mxu0 %vm11444_vm1, %v11443_v1  ;;  %v10274_v44 = vpop.f32.mrf.mxu1  ;;  %v4197_v30 = vrot.slane %v12379_v18, 2  ;;  %v1308_v33 = vld [vmem:[#allocation2 + $0xe8] sm:$0xff]  ;;  %v3641_v39 = vrot.slane %v3639_v26, 1 }
 0x1bb   : > { %v1891_v40 = vld [vmem:[#allocation2 + $0xb0] sm:$0xff]  ;;  %v10208_v41 = vpop.f32.mrf.mxu0 }
 0x1bc   : > { %v2274_v43 = vadd.f32 %v2205_v34, %v1891_v40  ;;  %1824 = vst.msk [vmem:[#allocation2 + $0xc0] sm:$0xff] %vm172_vm2, %v1790_v35  ;;  %v2208_v47 = vpop.f32.mrf.mxu1  ;;  %v3644_v40 = vrot.slane %v3642_v27, 2  ;;  %v11271_v41 = vld [vmem:[%s11566_s23 + $0x160] sm:$0xff]   ;;  %v4198_v44 = vsel %vm4187_vm6, %v4195_v4, %v4197_v30 }
 0x1bd   : > { %v1730_v46 = vpop.f32.mrf.mxu0 }
 0x1be   : > { %2308 = vst.msk [vmem:[#allocation2 + $0xb0] sm:$0xff] %vm172_vm2, %v2274_v43  ;;  %v1791_v48 = vadd.f32 %v1730_v46, %v1304_v45  ;;  %v10275_v57 = vpop.f32.mrf.mxu1  ;;  %v12396_v45 = vld [vmem:[%s11566_s23 + $0x1e0] sm:$0xff]   ;;  %v3645_v52 = vor.u32 %v3644_v40, %v3641_v39 }
 0x1bf   : > { %v1892_v53 = vld [vmem:[#allocation2 + $0xb8] sm:$0xff]  ;;  %v10209_v54 = vpop.f32.mrf.mxu0 }
 0x1c0   : > { %v2275_v56 = vadd.f32 %v2208_v47, %v1892_v53  ;;  %1825 = vst.msk [vmem:[#allocation2 + $0xc8] sm:$0xff] %vm172_vm2, %v1791_v48  ;;  %v2213_v60 = vpop.f32.mrf.mxu1  ;;  %10517 = vmatmul.mubr.msk.bf16.gmra.mxu1 %vm172_vm2, %v4194_v38  ;;  %v1309_v48 = vld [vmem:[#allocation2 + $0xf0] sm:$0xff]  ;;  %v3648_v53 = vshrl.u32 %v11271_v41, 16  ;;  %v3651_v54 = vshll.u32 %v11271_v41, 16  ;;  %v3646_v63 = vsel %vm2964_vm5, %v3636_v25, %v3645_v52 }
 0x1c1   : > { %v1735_v59 = vpop.f32.mrf.mxu0  ;;  %10451 = vmatmul.mubr.msk.bf16.gmra.mxu0 %vm172_vm2, %v3619_v49  ;;  %10520 = vmatprep.mubr.msk.bf16.mxu1 %vm11444_vm1, %v11443_v1 }
 0x1c2   : > { %2309 = vst.msk [vmem:[#allocation2 + $0xb8] sm:$0xff] %vm172_vm2, %v2275_v56  ;;  %v1792_v61 = vadd.f32 %v1735_v59, %v1305_v58  ;;  %10454 = vmatprep.mubr.msk.bf16.mxu0 %vm11444_vm1, %v11443_v1  ;;  %v10278_v6 = vpop.f32.mrf.mxu1  ;;  %v4199_v56 = vrot.slane %v12396_v45, 2  ;;  %v1310_v59 = vld [vmem:[#allocation2 + $0xf8] sm:$0xff]  ;;  %v3650_v0 = vrot.slane %v3648_v53, 1 }
 0x1c3   : > { %v1893_v2 = vld [vmem:[#allocation2 + $0xc0] sm:$0xff]  ;;  %v10212_v3 = vpop.f32.mrf.mxu0 }
 0x1c4   : > { %v2276_v5 = vadd.f32 %v2213_v60, %v1893_v2  ;;  %1826 = vst.msk [vmem:[#allocation2 + $0xd0] sm:$0xff] %vm172_vm2, %v1792_v61  ;;  %v2216_v9 = vpop.f32.mrf.mxu1  ;;  %v3653_v2 = vrot.slane %v3651_v54, 2  ;;  %v11273_v3 = vld [vmem:[%s11566_s23 + $0x168] sm:$0xff]   ;;  %v4200_v6 = vsel %vm4187_vm6, %v4197_v30, %v4199_v56 }
 0x1c5   : > { %v1738_v8 = vpop.f32.mrf.mxu0 }
 0x1c6   : > { %2310 = vst.msk [vmem:[#allocation2 + $0xc0] sm:$0xff] %vm172_vm2, %v2276_v5  ;;  %v1793_v10 = vadd.f32 %v1738_v8, %v1306_v7  ;;  %v10279_v20 = vpop.f32.mrf.mxu1  ;;  %v12413_v7 = vld [vmem:[%s11566_s23 + $0x1e8] sm:$0xff]   ;;  %v3654_v14 = vor.u32 %v3653_v2, %v3650_v0 }
 0x1c7   : > { %v1894_v15 = vld [vmem:[#allocation2 + $0xc8] sm:$0xff]  ;;  %v10213_v16 = vpop.f32.mrf.mxu0 }
 0x1c8   : > { %v2277_v19 = vadd.f32 %v2216_v9, %v1894_v15  ;;  %1827 = vst.msk [vmem:[#allocation2 + $0xd8] sm:$0xff] %vm172_vm2, %v1793_v10  ;;  %v2221_v23 = vpop.f32.mrf.mxu1  ;;  %10521 = vmatmul.mubr.msk.bf16.gmra.mxu1 %vm172_vm2, %v4196_v17  ;;  %v1311_v10 = vld [vmem:[#allocation2 + $0x100] sm:$0xff]  ;;  %v3657_v15 = vshrl.u32 %v11273_v3, 16  ;;  %v3660_v16 = vshll.u32 %v11273_v3, 16  ;;  %v3655_v26 = vsel %vm2964_vm5, %v3645_v52, %v3654_v14 }
 0x1c9   : > { %v1743_v22 = vpop.f32.mrf.mxu0  ;;  %10455 = vmatmul.mubr.msk.bf16.gmra.mxu0 %vm172_vm2, %v3628_v11  ;;  %10524 = vmatprep.mubr.msk.bf16.mxu1 %vm11444_vm1, %v11443_v1 }
 0x1ca   : > { %2311 = vst.msk [vmem:[#allocation2 + $0xc8] sm:$0xff] %vm172_vm2, %v2277_v19  ;;  %v1794_v24 = vadd.f32 %v1743_v22, %v1307_v21  ;;  %10458 = vmatprep.mubr.msk.bf16.mxu0 %vm11444_vm1, %v11443_v1  ;;  %v10282_v32 = vpop.f32.mrf.mxu1  ;;  %v4201_v19 = vrot.slane %v12413_v7, 2  ;;  %v1312_v22 = vld [vmem:[#allocation2 + $0x108] sm:$0xff]  ;;  %v3659_v27 = vrot.slane %v3657_v15, 1 }
 0x1cb   : > { %v1895_v28 = vld [vmem:[#allocation2 + $0xd0] sm:$0xff]  ;;  %v10216_v29 = vpop.f32.mrf.mxu0 }
 0x1cc   : > { %v2278_v31 = vadd.f32 %v2221_v23, %v1895_v28  ;;  %1828 = vst.msk [vmem:[#allocation2 + $0xe0] sm:$0xff] %vm172_vm2, %v1794_v24  ;;  %v2224_v35 = vpop.f32.mrf.mxu1  ;;  %v3662_v28 = vrot.slane %v3660_v16, 2  ;;  %v11275_v29 = vld [vmem:[%s11566_s23 + $0x170] sm:$0xff]   ;;  %v4202_v32 = vsel %vm4187_vm6, %v4199_v56, %v4201_v19 }
 0x1cd   : > { %v1746_v34 = vpop.f32.mrf.mxu0 }
 0x1ce   : > { %2312 = vst.msk [vmem:[#allocation2 + $0xd0] sm:$0xff] %vm172_vm2, %v2278_v31  ;;  %v1795_v36 = vadd.f32 %v1746_v34, %v1308_v33  ;;  %v10283_v47 = vpop.f32.mrf.mxu1  ;;  %v12430_v33 = vld [vmem:[%s11566_s23 + $0x1f0] sm:$0xff]   ;;  %v3663_v41 = vor.u32 %v3662_v28, %v3659_v27 }
 0x1cf   : > { %v1896_v42 = vld [vmem:[#allocation2 + $0xd8] sm:$0xff]  ;;  %v10217_v43 = vpop.f32.mrf.mxu0 }
 0x1d0   : > { %v2279_v46 = vadd.f32 %v2224_v35, %v1896_v42  ;;  %1829 = vst.msk [vmem:[#allocation2 + $0xe8] sm:$0xff] %vm172_vm2, %v1795_v36  ;;  %v2229_v50 = vpop.f32.mrf.mxu1  ;;  %10525 = vmatmul.mubr.msk.bf16.gmra.mxu1 %vm172_vm2, %v4198_v44  ;;  %v2355_v36 = vld [vmem:[#allocation2] sm:$0xff]  ;;  %v3666_v42 = vshrl.u32 %v11275_v29, 16  ;;  %v3669_v43 = vshll.u32 %v11275_v29, 16  ;;  %v3664_v53 = vsel %vm2964_vm5, %v3654_v14, %v3663_v41 }
 0x1d1   : > { %v1751_v49 = vpop.f32.mrf.mxu0  ;;  %10459 = vmatmul.mubr.msk.bf16.gmra.mxu0 %vm172_vm2, %v3637_v37  ;;  %10528 = vmatprep.mubr.msk.bf16.mxu1 %vm11444_vm1, %v11443_v1 }
 0x1d2   : > { %2313 = vst.msk [vmem:[#allocation2 + $0xd8] sm:$0xff] %vm172_vm2, %v2279_v46  ;;  %v1796_v51 = vadd.f32 %v1751_v49, %v1309_v48  ;;  %10462 = vmatprep.mubr.msk.bf16.mxu0 %vm11444_vm1, %v11443_v1  ;;  %v10286_v58 = vpop.f32.mrf.mxu1  ;;  %v4203_v46 = vrot.slane %v12430_v33, 2  ;;  %v2356_v49 = vld [vmem:[#allocation2 + $0x8] sm:$0xff]  ;;  %v3668_v54 = vrot.slane %v3666_v42, 1 }
 0x1d3   : > { %v1897_v38 = vld [vmem:[#allocation2 + $0xe0] sm:$0xff]  ;;  %v10220_v55 = vpop.f32.mrf.mxu0 }
 0x1d4   : > { %v2280_v57 = vadd.f32 %v2229_v50, %v1897_v38  ;;  %1830 = vst.msk [vmem:[#allocation2 + $0xf0] sm:$0xff] %vm172_vm2, %v1796_v51  ;;  %v2232_v61 = vpop.f32.mrf.mxu1  ;;  %v3671_v38 = vrot.slane %v3669_v43, 2  ;;  %v11277_v55 = vld [vmem:[%s11566_s23 + $0x178] sm:$0xff]   ;;  %v4204_v58 = vsel %vm4187_vm6, %v4201_v19, %v4203_v46 }
 0x1d5   : > { %v1754_v60 = vpop.f32.mrf.mxu0 }
 0x1d6   : > { %2314 = vst.msk [vmem:[#allocation2 + $0xe0] sm:$0xff] %vm172_vm2, %v2280_v57  ;;  %v1797_v62 = vadd.f32 %v1754_v60, %v1310_v59  ;;  %v10287_v9 = vpop.f32.mrf.mxu1  ;;  %v12447_v59 = vld [vmem:[%s11566_s23 + $0x1f8] sm:$0xff]   ;;  %v3672_v3 = vor.u32 %v3671_v38, %v3668_v54 }
 0x1d7   : > { %v1898_v4 = vld [vmem:[#allocation2 + $0xe8] sm:$0xff]  ;;  %v10221_v5 = vpop.f32.mrf.mxu0 }
 0x1d8   : > { %v2281_v8 = vadd.f32 %v2232_v61, %v1898_v4  ;;  %1831 = vst.msk [vmem:[#allocation2 + $0xf8] sm:$0xff] %vm172_vm2, %v1797_v62  ;;  %v2237_v12 = vpop.f32.mrf.mxu1  ;;  %10529 = vmatmul.mubr.msk.bf16.gmra.mxu1 %vm172_vm2, %v4200_v6  ;;  %v2357_v62 = vld [vmem:[#allocation2 + $0x10] sm:$0xff]  ;;  %v3675_v4 = vshrl.u32 %v11277_v55, 16  ;;  %v3678_v5 = vshll.u32 %v11277_v55, 16  ;;  %v3673_v15 = vsel %vm2964_vm5, %v3663_v41, %v3672_v3 }
 0x1d9   : > { %v1759_v11 = vpop.f32.mrf.mxu0  ;;  %10463 = vmatmul.mubr.msk.bf16.gmra.mxu0 %vm172_vm2, %v3646_v63  ;;  %10532 = vmatprep.mubr.msk.bf16.mxu1 %vm11444_vm1, %v11443_v1 }
 0x1da   : > { %2315 = vst.msk [vmem:[#allocation2 + $0xe8] sm:$0xff] %vm172_vm2, %v2281_v8  ;;  %v1798_v13 = vadd.f32 %v1759_v11, %v1311_v10  ;;  %10466 = vmatprep.mubr.msk.bf16.mxu0 %vm11444_vm1, %v11443_v1  ;;  %v10290_v21 = vpop.f32.mrf.mxu1  ;;  %v4205_v8 = vrot.slane %v12447_v59, 2  ;;  %v2358_v11 = vld [vmem:[#allocation2 + $0x18] sm:$0xff]  ;;  %v3677_v16 = vrot.slane %v3675_v4, 1 }
 0x1db   : > { %v1899_v17 = vld [vmem:[#allocation2 + $0xf0] sm:$0xff]  ;;  %v10224_v18 = vpop.f32.mrf.mxu0 }
 0x1dc   : > { %v2282_v20 = vadd.f32 %v2237_v12, %v1899_v17  ;;  %1832 = vst.msk [vmem:[#allocation2 + $0x100] sm:$0xff] %vm172_vm2, %v1798_v13  ;;  %v2240_v24 = vpop.f32.mrf.mxu1  ;;  %v3680_v17 = vrot.slane %v3678_v5, 2  ;;  %v11279_v18 = vld [vmem:[%s11566_s23 + $0x180] sm:$0xff]   ;;  %v4206_v21 = vsel %vm4187_vm6, %v4203_v46, %v4205_v8 }
 0x1dd   : > { %v1762_v23 = vpop.f32.mrf.mxu0 }
 0x1de   : > { %2316 = vst.msk [vmem:[#allocation2 + $0xf0] sm:$0xff] %vm172_vm2, %v2282_v20  ;;  %v1799_v25 = vadd.f32 %v1762_v23, %v1312_v22  ;;  %v10291_v35 = vpop.f32.mrf.mxu1  ;;  %v12464_v22 = vld [vmem:[%s11566_s23 + $0x200] sm:$0xff]   ;;  %v3681_v29 = vor.u32 %v3680_v17, %v3677_v16 }
 0x1df   : > { %v1900_v30 = vld [vmem:[#allocation2 + $0xf8] sm:$0xff]  ;;  %v10225_v31 = vpop.f32.mrf.mxu0 }
 0x1e0   : > { %v2283_v34 = vadd.f32 %v2240_v24, %v1900_v30  ;;  %1833 = vst.msk [vmem:[#allocation2 + $0x108] sm:$0xff] %vm172_vm2, %v1799_v25  ;;  %v2245_v39 = vpop.f32.mrf.mxu1  ;;  %10533 = vmatmul.mubr.msk.bf16.gmra.mxu1 %vm172_vm2, %v4202_v32  ;;  %v2359_v25 = vld [vmem:[#allocation2 + $0x20] sm:$0xff]  ;;  %v3684_v30 = vshrl.u32 %v11279_v18, 16  ;;  %v3687_v31 = vshll.u32 %v11279_v18, 16  ;;  %v3682_v42 = vsel %vm2964_vm5, %v3672_v3, %v3681_v29 }
 0x1e1   : > { %v2602_v37 = vpop.f32.mrf.mxu0  ;;  %10467 = vmatmul.mubr.msk.bf16.gmra.mxu0 %vm172_vm2, %v3655_v26  ;;  %10536 = vmatprep.mubr.msk.bf16.mxu1 %vm11444_vm1, %v11443_v1 }
 0x1e2   : > { %2317 = vst.msk [vmem:[#allocation2 + $0xf8] sm:$0xff] %vm172_vm2, %v2283_v34  ;;  %v2737_v40 = vadd.f32 %v2602_v37, %v2355_v36  ;;  %10470 = vmatprep.mubr.msk.bf16.mxu0 %vm11444_vm1, %v11443_v1  ;;  %v10294_v48 = vpop.f32.mrf.mxu1  ;;  %v4207_v34 = vrot.slane %v12464_v22, 2  ;;  %v2360_v37 = vld [vmem:[#allocation2 + $0x28] sm:$0xff]  ;;  %v3686_v43 = vrot.slane %v3684_v30, 1 }
 0x1e3   : > { %v1901_v44 = vld [vmem:[#allocation2 + $0x100] sm:$0xff]  ;;  %v10300_v45 = vpop.f32.mrf.mxu0 }
 0x1e4   : > { %v2284_v47 = vadd.f32 %v2245_v39, %v1901_v44  ;;  %2771 = vst.msk [vmem:[#allocation2] sm:$0xff] %vm172_vm2, %v2737_v40  ;;  %v2248_v51 = vpop.f32.mrf.mxu1  ;;  %v3689_v44 = vrot.slane %v3687_v31, 2  ;;  %v11281_v45 = vld [vmem:[%s11566_s23 + $0x188] sm:$0xff]   ;;  %v4208_v48 = vsel %vm4187_vm6, %v4205_v8, %v4207_v34 }
 0x1e5   : > { %v2605_v50 = vpop.f32.mrf.mxu0 }
 0x1e6   : > { %2318 = vst.msk [vmem:[#allocation2 + $0x100] sm:$0xff] %vm172_vm2, %v2284_v47  ;;  %v2738_v52 = vadd.f32 %v2605_v50, %v2356_v49  ;;  %v10295_v61 = vpop.f32.mrf.mxu1  ;;  %v12481_v49 = vld [vmem:[%s11566_s23 + $0x208] sm:$0xff]   ;;  %v3690_v55 = vor.u32 %v3689_v44, %v3686_v43 }
 0x1e7   : > { %v1902_v56 = vld [vmem:[#allocation2 + $0x108] sm:$0xff]  ;;  %v10301_v57 = vpop.f32.mrf.mxu0 }
 0x1e8   : > { %v2285_v60 = vadd.f32 %v2248_v51, %v1902_v56  ;;  %2772 = vst.msk [vmem:[#allocation2 + $0x8] sm:$0xff] %vm172_vm2, %v2738_v52  ;;  %v3214_v0 = vpop.f32.mrf.mxu1  ;;  %10537 = vmatmul.mubr.msk.bf16.gmra.mxu1 %vm172_vm2, %v4204_v58  ;;  %v2361_v52 = vld [vmem:[#allocation2 + $0x30] sm:$0xff]  ;;  %v3693_v56 = vshrl.u32 %v11281_v45, 16  ;;  %v3696_v57 = vshll.u32 %v11281_v45, 16  ;;  %v3691_v4 = vsel %vm2964_vm5, %v3681_v29, %v3690_v55 }
 0x1e9   : > { %v2610_v63 = vpop.f32.mrf.mxu0  ;;  %10471 = vmatmul.mubr.msk.bf16.gmra.mxu0 %vm172_vm2, %v3664_v53  ;;  %10540 = vmatprep.mubr.msk.bf16.mxu1 %vm11444_vm1, %v11443_v1 }
 0x1ea   : > { %2319 = vst.msk [vmem:[#allocation2 + $0x108] sm:$0xff] %vm172_vm2, %v2285_v60  ;;  %v2739_v2 = vadd.f32 %v2610_v63, %v2357_v62  ;;  %10474 = vmatprep.mubr.msk.bf16.mxu0 %vm11444_vm1, %v11443_v1  ;;  %v10370_v10 = vpop.f32.mrf.mxu1  ;;  %v4209_v60 = vrot.slane %v12481_v49, 2  ;;  %v2362_v63 = vld [vmem:[#allocation2 + $0x38] sm:$0xff]  ;;  %v3695_v5 = vrot.slane %v3693_v56, 1 }
 0x1eb   : > { %v2840_v6 = vld [vmem:[#allocation2] sm:$0xff]  ;;  %v10304_v7 = vpop.f32.mrf.mxu0 }
 0x1ec   : > { %v3349_v9 = vadd.f32 %v3214_v0, %v2840_v6  ;;  %2773 = vst.msk [vmem:[#allocation2 + $0x10] sm:$0xff] %vm172_vm2, %v2739_v2  ;;  %v3217_v13 = vpop.f32.mrf.mxu1  ;;  %v3698_v6 = vrot.slane %v3696_v57, 2  ;;  %v11283_v7 = vld [vmem:[%s11566_s23 + $0x190] sm:$0xff]   ;;  %v4210_v10 = vsel %vm4187_vm6, %v4207_v34, %v4209_v60 }
 0x1ed   : > { %v2613_v12 = vpop.f32.mrf.mxu0 }
 0x1ee   : > { %3383 = vst.msk [vmem:[#allocation2] sm:$0xff] %vm172_vm2, %v3349_v9  ;;  %v2740_v14 = vadd.f32 %v2613_v12, %v2358_v11  ;;  %v10371_v24 = vpop.f32.mrf.mxu1  ;;  %v12498_v11 = vld [vmem:[%s11566_s23 + $0x210] sm:$0xff]   ;;  %v3699_v18 = vor.u32 %v3698_v6, %v3695_v5 }
 0x1ef   : > { %v2841_v19 = vld [vmem:[#allocation2 + $0x8] sm:$0xff]  ;;  %v10305_v20 = vpop.f32.mrf.mxu0 }
 0x1f0   : > { %v3350_v23 = vadd.f32 %v3217_v13, %v2841_v19  ;;  %2774 = vst.msk [vmem:[#allocation2 + $0x18] sm:$0xff] %vm172_vm2, %v2740_v14  ;;  %v3222_v27 = vpop.f32.mrf.mxu1  ;;  %10541 = vmatmul.mubr.msk.bf16.gmra.mxu1 %vm172_vm2, %v4206_v21  ;;  %v2363_v14 = vld [vmem:[#allocation2 + $0x40] sm:$0xff]  ;;  %v3702_v19 = vshrl.u32 %v11283_v7, 16  ;;  %v3705_v20 = vshll.u32 %v11283_v7, 16  ;;  %v3700_v30 = vsel %vm2964_vm5, %v3690_v55, %v3699_v18 }
 0x1f1   : > { %v2618_v26 = vpop.f32.mrf.mxu0  ;;  %10475 = vmatmul.mubr.msk.bf16.gmra.mxu0 %vm172_vm2, %v3673_v15  ;;  %10544 = vmatprep.mubr.msk.bf16.mxu1 %vm11444_vm1, %v11443_v1 }
 0x1f2   : > { %3384 = vst.msk [vmem:[#allocation2 + $0x8] sm:$0xff] %vm172_vm2, %v3350_v23  ;;  %v2741_v28 = vadd.f32 %v2618_v26, %v2359_v25  ;;  %10478 = vmatprep.mubr.msk.bf16.mxu0 %vm11444_vm1, %v11443_v1  ;;  %v10374_v36 = vpop.f32.mrf.mxu1  ;;  %v4211_v23 = vrot.slane %v12498_v11, 2  ;;  %v2364_v26 = vld [vmem:[#allocation2 + $0x48] sm:$0xff]  ;;  %v3704_v31 = vrot.slane %v3702_v19, 1 }
 0x1f3   : > { %v2842_v32 = vld [vmem:[#allocation2 + $0x10] sm:$0xff]  ;;  %v10308_v33 = vpop.f32.mrf.mxu0 }
 0x1f4   : > { %v3351_v35 = vadd.f32 %v3222_v27, %v2842_v32  ;;  %2775 = vst.msk [vmem:[#allocation2 + $0x20] sm:$0xff] %vm172_vm2, %v2741_v28  ;;  %v3225_v40 = vpop.f32.mrf.mxu1  ;;  %v3707_v32 = vrot.slane %v3705_v20, 2  ;;  %v11285_v33 = vld [vmem:[%s11566_s23 + $0x198] sm:$0xff]   ;;  %v4212_v36 = vsel %vm4187_vm6, %v4209_v60, %v4211_v23 }
 0x1f5   : > { %v2621_v39 = vpop.f32.mrf.mxu0 }
 0x1f6   : > { %3385 = vst.msk [vmem:[#allocation2 + $0x10] sm:$0xff] %vm172_vm2, %v3351_v35  ;;  %v2742_v41 = vadd.f32 %v2621_v39, %v2360_v37  ;;  %v10375_v51 = vpop.f32.mrf.mxu1  ;;  %v12515_v37 = vld [vmem:[%s11566_s23 + $0x218] sm:$0xff]   ;;  %v3708_v45 = vor.u32 %v3707_v32, %v3704_v31 }
 0x1f7   : > { %v2843_v46 = vld [vmem:[#allocation2 + $0x18] sm:$0xff]  ;;  %v10309_v47 = vpop.f32.mrf.mxu0 }
 0x1f8   : > { %v3352_v50 = vadd.f32 %v3225_v40, %v2843_v46  ;;  %2776 = vst.msk [vmem:[#allocation2 + $0x28] sm:$0xff] %vm172_vm2, %v2742_v41  ;;  %v3230_v54 = vpop.f32.mrf.mxu1  ;;  %10545 = vmatmul.mubr.msk.bf16.gmra.mxu1 %vm172_vm2, %v4208_v48  ;;  %v2365_v41 = vld [vmem:[#allocation2 + $0x50] sm:$0xff]  ;;  %v3711_v46 = vshrl.u32 %v11285_v33, 16  ;;  %v3714_v47 = vshll.u32 %v11285_v33, 16  ;;  %v3709_v56 = vsel %vm2964_vm5, %v3699_v18, %v3708_v45 }
 0x1f9   : > { %v2626_v53 = vpop.f32.mrf.mxu0  ;;  %10479 = vmatmul.mubr.msk.bf16.gmra.mxu0 %vm172_vm2, %v3682_v42  ;;  %10548 = vmatprep.mubr.msk.bf16.mxu1 %vm11444_vm1, %v11443_v1 }
 0x1fa   : > { %3386 = vst.msk [vmem:[#allocation2 + $0x18] sm:$0xff] %vm172_vm2, %v3352_v50  ;;  %v2743_v38 = vadd.f32 %v2626_v53, %v2361_v52  ;;  %10482 = vmatprep.mubr.msk.bf16.mxu0 %vm11444_vm1, %v11443_v1  ;;  %v10378_v62 = vpop.f32.mrf.mxu1  ;;  %v4213_v50 = vrot.slane %v12515_v37, 2  ;;  %v2366_v53 = vld [vmem:[#allocation2 + $0x58] sm:$0xff]  ;;  %v3713_v57 = vrot.slane %v3711_v46, 1 }
 0x1fb   : > { %v2844_v58 = vld [vmem:[#allocation2 + $0x20] sm:$0xff]  ;;  %v10312_v59 = vpop.f32.mrf.mxu0 }
 0x1fc   : > { %v3353_v61 = vadd.f32 %v3230_v54, %v2844_v58  ;;  %2777 = vst.msk [vmem:[#allocation2 + $0x30] sm:$0xff] %vm172_vm2, %v2743_v38  ;;  %v3233_v2 = vpop.f32.mrf.mxu1  ;;  %v3716_v58 = vrot.slane %v3714_v47, 2  ;;  %v11287_v59 = vld [vmem:[%s11566_s23 + $0x1a0] sm:$0xff]   ;;  %v4214_v62 = vsel %vm4187_vm6, %v4211_v23, %v4213_v50 }
 0x1fd   : > { %v2629_v0 = vpop.f32.mrf.mxu0 }
 0x1fe   : > { %3387 = vst.msk [vmem:[#allocation2 + $0x20] sm:$0xff] %vm172_vm2, %v3353_v61  ;;  %v2744_v3 = vadd.f32 %v2629_v0, %v2362_v63  ;;  %v10379_v13 = vpop.f32.mrf.mxu1  ;;  %v12532_v63 = vld [vmem:[%s11566_s23 + $0x220] sm:$0xff]   ;;  %v3717_v7 = vor.u32 %v3716_v58, %v3713_v57 }
 0x1ff   : > { %v2845_v8 = vld [vmem:[#allocation2 + $0x28] sm:$0xff]  ;;  %v10313_v9 = vpop.f32.mrf.mxu0 }
 0x200   : > { %v3354_v12 = vadd.f32 %v3233_v2, %v2845_v8  ;;  %2778 = vst.msk [vmem:[#allocation2 + $0x38] sm:$0xff] %vm172_vm2, %v2744_v3  ;;  %v3238_v16 = vpop.f32.mrf.mxu1  ;;  %10549 = vmatmul.mubr.msk.bf16.gmra.mxu1 %vm172_vm2, %v4210_v10  ;;  %v2367_v3 = vld [vmem:[#allocation2 + $0x60] sm:$0xff]  ;;  %v3720_v8 = vshrl.u32 %v11287_v59, 16  ;;  %v3723_v9 = vshll.u32 %v11287_v59, 16  ;;  %v3718_v20 = vsel %vm2964_vm5, %v3708_v45, %v3717_v7 }
 0x201   : > { %v2634_v15 = vpop.f32.mrf.mxu0  ;;  %10483 = vmatmul.mubr.msk.bf16.gmra.mxu0 %vm172_vm2, %v3691_v4  ;;  %10552 = vmatprep.mubr.msk.bf16.mxu1 %vm11444_vm1, %v11443_v1 }
 0x202   : > { %3388 = vst.msk [vmem:[#allocation2 + $0x28] sm:$0xff] %vm172_vm2, %v3354_v12  ;;  %v2745_v17 = vadd.f32 %v2634_v15, %v2363_v14  ;;  %10486 = vmatprep.mubr.msk.bf16.mxu0 %vm11444_vm1, %v11443_v1  ;;  %v10382_v25 = vpop.f32.mrf.mxu1  ;;  %v4215_v12 = vrot.slane %v12532_v63, 2  ;;  %v2368_v15 = vld [vmem:[#allocation2 + $0x68] sm:$0xff] }
 0x203   : > { %v2846_v21 = vld [vmem:[#allocation2 + $0x30] sm:$0xff]  ;;  %v10316_v22 = vpop.f32.mrf.mxu0 }
 0x204   : > { %v3355_v24 = vadd.f32 %v3238_v16, %v2846_v21  ;;  %2779 = vst.msk [vmem:[#allocation2 + $0x40] sm:$0xff] %vm172_vm2, %v2745_v17  ;;  %v3241_v28 = vpop.f32.mrf.mxu1  ;;  %v11289_v17 = vld [vmem:[%s11566_s23 + $0x1a8] ss:$0 sps:$4 sm:$0x33]   ;;  %v3722_v21 = vrot.slane %v3720_v8, 1  ;;  %v3725_v22 = vrot.slane %v3723_v9, 2  ;;  %v4216_v25 = vsel %vm4187_vm6, %v4213_v50, %v4215_v12 }
 0x205   : > { %v2637_v27 = vpop.f32.mrf.mxu0  ;;  %v3729_v31 = vshrl.u32 %v11289_v17, 16  ;;  %v3732_v32 = vshll.u32 %v11289_v17, 16 }
 0x206   : > { %3389 = vst.msk [vmem:[#allocation2 + $0x30] sm:$0xff] %vm172_vm2, %v3355_v24  ;;  %v2746_v29 = vadd.f32 %v2637_v27, %v2364_v26  ;;  %v10383_v40 = vpop.f32.mrf.mxu1  ;;  %v12549_v26 = vld [vmem:[%s11566_s23 + $0x228] sm:$0xff]  }
 0x207   : > { %v2847_v34 = vld [vmem:[#allocation2 + $0x38] sm:$0xff]  ;;  %v10317_v35 = vpop.f32.mrf.mxu0  ;;  %v3734_v45 = vrot.slane %v3732_v32, 2 }
 0x208   : > { %v3356_v39 = vadd.f32 %v3241_v28, %v2847_v34  ;;  %2780 = vst.msk [vmem:[#allocation2 + $0x48] sm:$0xff] %vm172_vm2, %v2746_v29  ;;  %v3246_v43 = vpop.f32.mrf.mxu1  ;;  %10553 = vmatmul.mubr.msk.bf16.gmra.mxu1 %vm172_vm2, %v4212_v36  ;;  %v2369_v29 = vld [vmem:[#allocation2 + $0x70] sm:$0xff]  ;;  %v3726_v35 = vor.u32 %v3725_v22, %v3722_v21 }
 0x209   : > { %v2642_v42 = vpop.f32.mrf.mxu0  ;;  %10487 = vmatmul.mubr.msk.bf16.gmra.mxu0 %vm172_vm2, %v3700_v30  ;;  %10556 = vmatprep.mubr.msk.bf16.mxu1 %vm11444_vm1, %v11443_v1 }
 0x20a   : > { %3390 = vst.msk [vmem:[#allocation2 + $0x38] sm:$0xff] %vm172_vm2, %v3356_v39  ;;  %v2747_v44 = vadd.f32 %v2642_v42, %v2365_v41  ;;  %10490 = vmatprep.mubr.msk.bf16.mxu0 %vm11444_vm1, %v11443_v1  ;;  %v10386_v52 = vpop.f32.mrf.mxu1  ;;  %v4217_v39 = vrot.slane %v12549_v26, 2  ;;  %v2370_v42 = vld [vmem:[#allocation2 + $0x78] sm:$0xff] }
 0x20b   : > { %v2848_v48 = vld [vmem:[#allocation2 + $0x40] sm:$0xff]  ;;  %v10320_v49 = vpop.f32.mrf.mxu0 }
 0x20c   : > { %v3357_v51 = vadd.f32 %v3246_v43, %v2848_v48  ;;  %2781 = vst.msk [vmem:[#allocation2 + $0x50] sm:$0xff] %vm172_vm2, %v2747_v44  ;;  %v3249_v38 = vpop.f32.mrf.mxu1  ;;  %v3731_v44 = vrot.slane %v3729_v31, 1  ;;  %v3727_v48 = vsel %vm2964_vm5, %v3717_v7, %v3726_v35  ;;  %v11291_v49 = vld [vmem:[%s11566_s23 + $0x8] sm:$0xff]   ;;  %v4218_v52 = vsel %vm4187_vm6, %v4215_v12, %v4217_v39  ;;  %v2374_v31 = vld [vmem:[#allocation2 + $0x98] sm:$0xff] }
 0x20d   : > { %v2645_v54 = vpop.f32.mrf.mxu0  ;;  %v4674_v9 = vshrl.u32 %v11291_v49, 16 }
 0x20e   : > { %3391 = vst.msk [vmem:[#allocation2 + $0x40] sm:$0xff] %vm172_vm2, %v3357_v51  ;;  %v2748_v55 = vadd.f32 %v2645_v54, %v2366_v53  ;;  %v10387_v2 = vpop.f32.mrf.mxu1  ;;  %v12566_v53 = vld [vmem:[%s11566_s23 + $0x230] sm:$0xff]   ;;  %v3735_v57 = vor.u32 %v3734_v45, %v3731_v44  ;;  %v12609_v44 = vld [vmem:[%s11566_s23 + $0xa0] sm:$0xff]  }
 0x20f   : > { %v2849_v60 = vld [vmem:[#allocation2 + $0x48] sm:$0xff]  ;;  %v10321_v61 = vpop.f32.mrf.mxu0 }
 0x210   : > { %v3358_v0 = vadd.f32 %v3249_v38, %v2849_v60  ;;  %2782 = vst.msk [vmem:[#allocation2 + $0x58] sm:$0xff] %vm172_vm2, %v2748_v55  ;;  %v3254_v5 = vpop.f32.mrf.mxu1  ;;  %10557 = vmatmul.mubr.msk.bf16.gmra.mxu1 %vm172_vm2, %v4214_v62  ;;  %v2371_v55 = vld [vmem:[#allocation2 + $0x80] sm:$0xff]  ;;  %v12575_v60 = vld [vmem:[%s11566_s23 + $0x10] sm:$0xff]   ;;  %v4676_v61 = vshll.u32 %v11291_v49, 16 }
 0x211   : > { %v2650_v4 = vpop.f32.mrf.mxu0  ;;  %10491 = vmatmul.mubr.msk.bf16.gmra.mxu0 %vm172_vm2, %v3709_v56  ;;  %10560 = vmatprep.mubr.msk.bf16.mxu1 %vm11444_vm1, %v11443_v1 }
 0x212   : > { %3392 = vst.msk [vmem:[#allocation2 + $0x48] sm:$0xff] %vm172_vm2, %v3358_v0  ;;  %v2749_v6 = vadd.f32 %v2650_v4, %v2367_v3  ;;  %10494 = vmatprep.mubr.msk.bf16.mxu0 %vm11444_vm1, %v11443_v1  ;;  %v10390_v14 = vpop.f32.mrf.mxu1  ;;  %v4219_v0 = vrot.slane %v12566_v53, 2  ;;  %v2372_v4 = vld [vmem:[#allocation2 + $0x88] sm:$0xff]  ;;  %v12616_v53 = vld [vmem:[%s11566_s23 + $0x20] sm:$0xff]  }
 0x213   : > { %v2850_v10 = vld [vmem:[#allocation2 + $0x50] sm:$0xff]  ;;  %v10324_v11 = vpop.f32.mrf.mxu0 }
 0x214   : > { %v3359_v13 = vadd.f32 %v3254_v5, %v2850_v10  ;;  %2783 = vst.msk [vmem:[#allocation2 + $0x60] sm:$0xff] %vm172_vm2, %v2749_v6  ;;  %v3257_v18 = vpop.f32.mrf.mxu1  ;;  %v3736_v6 = vsel %vm2964_vm5, %v3726_v35, %v3735_v57  ;;  %v4678_v10 = vrot.slane %v4676_v61, 1  ;;  %v4681_v11 = vshll.u32 %v12575_v60, 16  ;;  %v9545_v61 = vld [vmem:[%s14052_s1 + $0x2c] sm:$0xf] }
 0x215   : > { %v2653_v16 = vpop.f32.mrf.mxu0  ;;  %v4220_v14 = vsel %vm4187_vm6, %v4217_v39, %v4219_v0 }
 0x216   : > { %3393 = vst.msk [vmem:[#allocation2 + $0x50] sm:$0xff] %vm172_vm2, %v3359_v13  ;;  %v2750_v19 = vadd.f32 %v2653_v16, %v2368_v15  ;;  %v10391_v28 = vpop.f32.mrf.mxu1  ;;  %v11290_v15 = vld [vmem:[%s11566_s23 + $0x238] ss:$0 sps:$4 sm:$0x33]   ;;  %v4679_v22 = vor.u32 %v4678_v10, %v4674_v9  ;;  %v6446_v10 = vsel %vm412_vm0, %v9545_v61, 0  ;;  %v2381_v61 = vld [vmem:[#allocation2 + $0xd0] sm:$0xff] }
 0x217   : > { %v2851_v23 = vld [vmem:[#allocation2 + $0x58] sm:$0xff]  ;;  %v10325_v24 = vpop.f32.mrf.mxu0 }
 0x218   : > { %v3360_v27 = vadd.f32 %v3257_v18, %v2851_v23  ;;  %2784 = vst.msk [vmem:[#allocation2 + $0x68] sm:$0xff] %vm172_vm2, %v2750_v19  ;;  %v3262_v33 = vpop.f32.mrf.mxu1  ;;  %10561 = vmatmul.mubr.msk.bf16.gmra.mxu1 %vm172_vm2, %v4216_v25  ;;  %v2373_v18 = vld [vmem:[#allocation2 + $0x90] sm:$0xff]  ;;  %v4683_v23 = vrot.slane %v4681_v11, 1  ;;  %v12593_v24 = vld [vmem:[%s11566_s23 + $0x18] sm:$0xff]  }
 0x219   : > { %v2658_v30 = vpop.f32.mrf.mxu0  ;;  %10495 = vmatmul.mubr.msk.bf16.gmra.mxu0 %vm172_vm2, %v3718_v20  ;;  %10564 = vmatprep.mubr.msk.bf16.mxu1 %vm11444_vm1, %v11443_v1  ;;  %v2377_v11 = vld [vmem:[#allocation2 + $0xb0] sm:$0xff] }
 0x21a   : > { %3394 = vst.msk [vmem:[#allocation2 + $0x58] sm:$0xff] %vm172_vm2, %v3360_v27  ;;  %v2751_v34 = vadd.f32 %v2658_v30, %v2369_v29  ;;  %10498 = vmatprep.mubr.msk.bf16.mxu0 %vm11444_vm1, %v11443_v1  ;;  %v10394_v41 = vpop.f32.mrf.mxu1  ;;  %v4221_v27 = vrot.slane %v11290_v15, 2  ;;  %v9509_v30 = vld [vmem:[%s14052_s1 + $0x28] sm:$0xf]  ;;  %v4684_v35 = vsel %vm812_vm3, %v4679_v22, %v4683_v23 }
 0x21b   : > { %v2852_v36 = vld [vmem:[#allocation2 + $0x60] sm:$0xff]  ;;  %v10328_v37 = vpop.f32.mrf.mxu0 }
 0x21c   : > { %v3361_v40 = vadd.f32 %v3262_v33, %v2852_v36  ;;  %2785 = vst.msk [vmem:[#allocation2 + $0x70] sm:$0xff] %vm172_vm2, %v2751_v34  ;;  %v3265_v46 = vpop.f32.mrf.mxu1  ;;  %v4685_v36 = vshrl.u32 %v12575_v60, 16  ;;  %v4689_v37 = vshll.u32 %v12593_v24, 16  ;;  %v4222_v41 = vsel %vm4187_vm6, %v4219_v0, %v4221_v27 }
 0x21d   : > { %v2661_v43 = vpop.f32.mrf.mxu0 }
 0x21e   : > { %3395 = vst.msk [vmem:[#allocation2 + $0x60] sm:$0xff] %vm172_vm2, %v3361_v40  ;;  %v2752_v47 = vadd.f32 %v2661_v43, %v2370_v42  ;;  %v10395_v38 = vpop.f32.mrf.mxu1  ;;  %v5835_v42 = vsel %vm412_vm0, %v9509_v30, 0  ;;  %v11293_v43 = vld [vmem:[%s11566_s23 + $0x98] sm:$0xfe]  }
 0x21f   : > { %v2853_v50 = vld [vmem:[#allocation2 + $0x68] sm:$0xff]  ;;  %v10329_v51 = vpop.f32.mrf.mxu0 }
 0x220   : > { %v3362_v54 = vadd.f32 %v3265_v46, %v2853_v50  ;;  %2786 = vst.msk [vmem:[#allocation2 + $0x78] sm:$0xff] %vm172_vm2, %v2752_v47  ;;  %v3270_v58 = vpop.f32.mrf.mxu1  ;;  %10565 = vmatmul.mubr.msk.bf16.gmra.mxu1 %vm172_vm2, %v4218_v52  ;;  %v2375_v47 = vld [vmem:[#allocation2 + $0xa0] sm:$0xff]  ;;  %v4687_v51 = vor.u32 %v4685_v36, %v4683_v23  ;;  %v4691_v52 = vrot.slane %v4689_v37, 1  ;;  %v2378_v23 = vld [vmem:[#allocation2 + $0xb8] sm:$0xff] }
 0x221   : > { %v2666_v56 = vpop.f32.mrf.mxu0  ;;  %10499 = vmatmul.mubr.msk.bf16.gmra.mxu0 %vm172_vm2, %v3727_v48  ;;  %10568 = vmatprep.mubr.msk.bf16.mxu1 %vm11444_vm1, %v11443_v1  ;;  %v2379_v36 = vld [vmem:[#allocation2 + $0xc0] sm:$0xff] }
 0x222   : > { %3396 = vst.msk [vmem:[#allocation2 + $0x68] sm:$0xff] %vm172_vm2, %v3362_v54  ;;  %v2753_v59 = vadd.f32 %v2666_v56, %v2371_v55  ;;  %10502 = vmatprep.mubr.msk.bf16.mxu0 %vm11444_vm1, %v11443_v1  ;;  %v10398_v3 = vpop.f32.mrf.mxu1  ;;  %v5263_v55 = vrot.slane %v11293_v43, 1  ;;  %v5264_v56 = vrot.slane %v12609_v44, 1  ;;  %v4692_v0 = vsel %vm812_vm3, %v4687_v51, %v4691_v52  ;;  %v12666_v43 = vld [vmem:[%s11566_s23 + $0x30] sm:$0xff]  }
 0x223   : > { %v2854_v62 = vld [vmem:[#allocation2 + $0x70] sm:$0xff]  ;;  %v10332_v63 = vpop.f32.mrf.mxu0  ;;  %v4697_v3 = vshll.u32 %v12616_v53, 16 }
 0x224   : > { %v3363_v2 = vadd.f32 %v3270_v58, %v2854_v62  ;;  %2787 = vst.msk [vmem:[#allocation2 + $0x80] sm:$0xff] %vm172_vm2, %v2753_v59  ;;  %v3273_v7 = vpop.f32.mrf.mxu1  ;;  %v2376_v59 = vld [vmem:[#allocation2 + $0xa8] sm:$0xff] }
 0x225   : > { %v2669_v5 = vpop.f32.mrf.mxu0 }
 0x226   : > { %3397 = vst.msk [vmem:[#allocation2 + $0x70] sm:$0xff] %vm172_vm2, %v3363_v2  ;;  %v2754_v8 = vadd.f32 %v2669_v5, %v2372_v4  ;;  %v10399_v17 = vpop.f32.mrf.mxu1  ;;  %v4693_v2 = vshrl.u32 %v12593_v24, 16 }
 0x227   : > { %v2855_v12 = vld [vmem:[#allocation2 + $0x78] sm:$0xff]  ;;  %v10333_v13 = vpop.f32.mrf.mxu0  ;;  %v12644_v17 = vld [vmem:[%s11566_s23 + $0x28] sm:$0xff]  }
 0x228   : > { %v3364_v16 = vadd.f32 %v3273_v7, %v2855_v12  ;;  %2788 = vst.msk [vmem:[#allocation2 + $0x88] sm:$0xff] %vm172_vm2, %v2754_v8  ;;  %v3278_v20 = vpop.f32.mrf.mxu1  ;;  %10569 = vmatmul.mubr.msk.bf16.gmra.mxu1 %vm172_vm2, %v4220_v14  ;;  %v12634_v7 = vld [vmem:[%s11566_s23 + $0xa8] sm:$0xff]   ;;  %v4695_v15 = vor.u32 %v4693_v2, %v4691_v52 }
 0x229   : > { %v2674_v19 = vpop.f32.mrf.mxu0  ;;  %10503 = vmatmul.mubr.msk.bf16.gmra.mxu0 %vm172_vm2, %v3736_v6  ;;  %10572 = vmatprep.mubr.msk.bf16.mxu1 %vm11444_vm1, %v11443_v1  ;;  %v5265_v6 = vsel %vm1993_vm4, %v5263_v55, %v5264_v56 }
 0x22a   : > { %3398 = vst.msk [vmem:[#allocation2 + $0x78] sm:$0xff] %vm172_vm2, %v3364_v16  ;;  %v2755_v21 = vadd.f32 %v2674_v19, %v2373_v18  ;;  %10578 = vmatprep.mubr.msk.bf16.mxu0 %vm11444_vm1, %v11443_v1  ;;  %v10402_v29 = vpop.f32.mrf.mxu1  ;;  %v4699_v16 = vrot.slane %v4697_v3, 1 }
 0x22b   : > { %v2856_v25 = vld [vmem:[#allocation2 + $0x80] sm:$0xff]  ;;  %v10336_v26 = vpop.f32.mrf.mxu0  ;;  %v4705_v29 = vshll.u32 %v12644_v17, 16 }
 0x22c   : > { %v3365_v28 = vadd.f32 %v3278_v20, %v2856_v25  ;;  %2789 = vst.msk [vmem:[#allocation2 + $0x90] sm:$0xff] %vm172_vm2, %v2755_v21  ;;  %v3281_v33 = vpop.f32.mrf.mxu1  ;;  %v5266_v20 = vrot.slane %v12634_v7, 1  ;;  %v4700_v27 = vsel %vm812_vm3, %v4695_v15, %v4699_v16  ;;  %v4717_v15 = vshrl.u32 %v12666_v43, 16 }
 0x22d   : > { %v2677_v32 = vpop.f32.mrf.mxu0 }
 0x22e   : > { %3399 = vst.msk [vmem:[#allocation2 + $0x80] sm:$0xff] %vm172_vm2, %v3365_v28  ;;  %v2756_v34 = vadd.f32 %v2677_v32, %v2374_v31  ;;  %v10403_v46 = vpop.f32.mrf.mxu1  ;;  %v4701_v28 = vshrl.u32 %v12616_v53, 16  ;;  %v5267_v32 = vsel %vm1993_vm4, %v5264_v56, %v5266_v20 }
 0x22f   : > { %v2857_v39 = vld [vmem:[#allocation2 + $0x88] sm:$0xff]  ;;  %v10337_v40 = vpop.f32.mrf.mxu0 }
 0x230   : > { %v3366_v45 = vadd.f32 %v3281_v33, %v2857_v39  ;;  %2790 = vst.msk [vmem:[#allocation2 + $0x98] sm:$0xff] %vm172_vm2, %v2756_v34  ;;  %v3286_v49 = vpop.f32.mrf.mxu1  ;;  %10573 = vmatmul.mubr.msk.bf16.gmra.mxu1 %vm172_vm2, %v4222_v41  ;;  %v12657_v33 = vld [vmem:[%s11566_s23 + $0xb0] sm:$0xff]   ;;  %v4703_v41 = vor.u32 %v4701_v28, %v4699_v16 }
 0x231   : > { %v2682_v48 = vpop.f32.mrf.mxu0  ;;  %10579 = vmatmul.mubr.msk.bf16.vlgmr.msra.gmra.mxu0 %vm172_vm2, %v4684_v35  ;;  %10648 = vmatprep.mubr.msk.bf16.mxu1 %vm11444_vm1, %v11443_v1  ;;  %v5268_v46 = vrot.slane %v12657_v33, 1 }
 0x232   : > { %3400 = vst.msk [vmem:[#allocation2 + $0x88] sm:$0xff] %vm172_vm2, %v3366_v45  ;;  %v2757_v50 = vadd.f32 %v2682_v48, %v2375_v47  ;;  %10717 = vmatpush3.bf16.msra.mxu0 %v5835_v42  ;;  %10582 = vmatprep.mubr.msk.bf16.mxu0 %vm11444_vm1, %v11443_v1  ;;  %v10406_v58 = vpop.f32.mrf.mxu1  ;;  %v4707_v42 = vrot.slane %v4705_v29, 1  ;;  %v12708_v29 = vld [vmem:[%s11566_s23 + $0x40] sm:$0xff]  }
 0x233   : > { %v2858_v54 = vld [vmem:[#allocation2 + $0x90] sm:$0xff]  ;;  %v10340_v38 = vpop.f32.mrf.mxu0  ;;  %10856 = vmatprep.subr.bf16.mxu0 %v11443_v1  ;;  %v12678_v58 = vld [vmem:[%s11566_s23 + $0xb8] sm:$0xff]  }
 0x234   : > { %v3367_v57 = vadd.f32 %v3286_v49, %v2858_v54  ;;  %2791 = vst.msk [vmem:[#allocation2 + $0xa0] sm:$0xff] %vm172_vm2, %v2757_v50  ;;  %v3289_v62 = vpop.f32.mrf.mxu1  ;;  %v2380_v49 = vld [vmem:[#allocation2 + $0xc8] sm:$0xff]  ;;  %v4708_v53 = vsel %vm812_vm3, %v4703_v41, %v4707_v42  ;;  %v4709_v54 = vshrl.u32 %v12644_v17, 16  ;;  %v4713_v38 = vshll.u32 %v12666_v43, 16 }
 0x235   : > { %v2685_v60 = vpop.f32.mrf.mxu0  ;;  %v5270_v7 = vrot.slane %v12678_v58, 1 }
 0x236   : > { %3401 = vst.msk [vmem:[#allocation2 + $0x90] sm:$0xff] %vm172_vm2, %v3367_v57  ;;  %v2758_v63 = vadd.f32 %v2685_v60, %v2376_v59  ;;  %v10407_v9 = vpop.f32.mrf.mxu1  ;;  %v5269_v57 = vsel %vm1993_vm4, %v5266_v20, %v5268_v46  ;;  %v4711_v2 = vor.u32 %v4709_v54, %v4707_v42  ;;  %v4715_v3 = vrot.slane %v4713_v38, 1  ;;  %v12699_v20 = vld [vmem:[%s11566_s23 + $0xc0] sm:$0xff]   ;;  %v12729_v38 = vld [vmem:[%s11566_s23 + $0x48] sm:$0xff]  }
 0x237   : > { %v2859_v4 = vld [vmem:[#allocation2 + $0x98] sm:$0xff]  ;;  %v10341_v5 = vpop.f32.mrf.mxu0  ;;  %v4729_v42 = vshll.u32 %v12708_v29, 16 }
 0x238   : > { %v3368_v8 = vadd.f32 %v3289_v62, %v2859_v4  ;;  %2792 = vst.msk [vmem:[#allocation2 + $0xa8] sm:$0xff] %vm172_vm2, %v2758_v63  ;;  %v3294_v13 = vpop.f32.mrf.mxu1  ;;  %10649 = vmatmul.mubr.msk.bf16.vlgmr.msra.gmra.mxu1 %vm172_vm2, %v5265_v6  ;;  %v12687_v4 = vld [vmem:[%s11566_s23 + $0x38] sm:$0xff]  }
 0x239   : > { %v2690_v12 = vpop.f32.mrf.mxu0  ;;  %10583 = vmatmul.mubr.msk.bf16.gmra.mxu0 %vm172_vm2, %v4692_v0  ;;  %10787 = vmatpush3.bf16.msra.mxu1 %v6446_v10  ;;  %v2382_v10 = vld [vmem:[#allocation2 + $0xd8] sm:$0xff]  ;;  %v4721_v16 = vshll.u32 %v12687_v4, 16  ;;  %v4725_v41 = vshrl.u32 %v12687_v4, 16  ;;  %v4731_v54 = vrot.slane %v4729_v42, 1 }
 0x23a   : > { %3402 = vst.msk [vmem:[#allocation2 + $0x98] sm:$0xff] %vm172_vm2, %v3368_v8  ;;  %v2759_v14 = vadd.f32 %v2690_v12, %v2377_v11  ;;  %10586 = vmatprep.mubr.msk.bf16.mxu0 %vm11444_vm1, %v11443_v1  ;;  %10652 = vmatprep.mubr.msk.bf16.mxu1 %vm11444_vm1, %v11443_v1  ;;  %v10410_v22 = vpop.f32.mrf.mxu1  ;;  %v12771_v42 = vld [vmem:[%s11566_s23 + $0x58] sm:$0xff]  }
 0x23b   : > { %v2860_v18 = vld [vmem:[#allocation2 + $0xa0] sm:$0xff]  ;;  %v10344_v19 = vpop.f32.mrf.mxu0  ;;  %10926 = vmatprep.subr.bf16.mxu1 %v11443_v1  ;;  %v4723_v28 = vrot.slane %v4721_v16, 1  ;;  %v12750_v16 = vld [vmem:[%s11566_s23 + $0x50] sm:$0xff]  }
 0x23c   : > { %v3369_v21 = vadd.f32 %v3294_v13, %v2860_v18  ;;  %2793 = vst.msk [vmem:[#allocation2 + $0xb0] sm:$0xff] %vm172_vm2, %v2759_v14  ;;  %v3297_v25 = vpop.f32.mrf.mxu1  ;;  %v4716_v14 = vsel %vm812_vm3, %v4711_v2, %v4715_v3  ;;  %v5271_v19 = vsel %vm1993_vm4, %v5268_v46, %v5270_v7  ;;  %v12720_v46 = vld [vmem:[%s11566_s23 + $0xc8] sm:$0xff]   ;;  %v4733_v2 = vshrl.u32 %v12708_v29, 16 }
 0x23d   : > { %v2693_v24 = vpop.f32.mrf.mxu0 }
 0x23e   : > { %3403 = vst.msk [vmem:[#allocation2 + $0xa0] sm:$0xff] %vm172_vm2, %v3369_v21  ;;  %v2760_v26 = vadd.f32 %v2693_v24, %v2378_v23  ;;  %v10411_v35 = vpop.f32.mrf.mxu1  ;;  %v2383_v23 = vld [vmem:[#allocation2 + $0xe0] sm:$0xff] }
 0x23f   : > { %v2861_v30 = vld [vmem:[#allocation2 + $0xa8] sm:$0xff]  ;;  %v10345_v31 = vpop.f32.mrf.mxu0 }
 0x240   : > { %v3370_v34 = vadd.f32 %v3297_v25, %v2861_v30  ;;  %2794 = vst.msk [vmem:[#allocation2 + $0xb8] sm:$0xff] %vm172_vm2, %v2760_v26  ;;  %v3302_v39 = vpop.f32.mrf.mxu1  ;;  %10653 = vmatmul.mubr.msk.bf16.gmra.mxu1 %vm172_vm2, %v5267_v32  ;;  %v5272_v32 = vrot.slane %v12699_v20, 1  ;;  %v2384_v35 = vld [vmem:[#allocation2 + $0xe8] sm:$0xff] }
 0x241   : > { %v2698_v37 = vpop.f32.mrf.mxu0  ;;  %10587 = vmatmul.mubr.msk.bf16.gmra.mxu0 %vm172_vm2, %v4700_v27  ;;  %10656 = vmatprep.mubr.msk.bf16.mxu1 %vm11444_vm1, %v11443_v1  ;;  %v4719_v27 = vor.u32 %v4717_v15, %v4715_v3  ;;  %v4737_v3 = vshll.u32 %v12729_v38, 16 }
 0x242   : > { %3404 = vst.msk [vmem:[#allocation2 + $0xa8] sm:$0xff] %vm172_vm2, %v3370_v34  ;;  %v2761_v40 = vadd.f32 %v2698_v37, %v2379_v36  ;;  %10590 = vmatprep.mubr.msk.bf16.mxu0 %vm11444_vm1, %v11443_v1  ;;  %v10414_v48 = vpop.f32.mrf.mxu1 }
 0x243   : > { %v2862_v44 = vld [vmem:[#allocation2 + $0xb0] sm:$0xff]  ;;  %v10348_v45 = vpop.f32.mrf.mxu0  ;;  %v4739_v15 = vrot.slane %v4737_v3, 1  ;;  %v12792_v3 = vld [vmem:[%s11566_s23 + $0x60] sm:$0xff]  }
 0x244   : > { %v3371_v47 = vadd.f32 %v3302_v39, %v2862_v44  ;;  %2795 = vst.msk [vmem:[#allocation2 + $0xc0] sm:$0xff] %vm172_vm2, %v2761_v40  ;;  %v3305_v51 = vpop.f32.mrf.mxu1  ;;  %v4724_v40 = vsel %vm812_vm3, %v4719_v27, %v4723_v28  ;;  %v5273_v45 = vsel %vm1993_vm4, %v5270_v7, %v5272_v32  ;;  %v12741_v7 = vld [vmem:[%s11566_s23 + $0xd0] sm:$0xff]   ;;  %v4741_v27 = vshrl.u32 %v12729_v38, 16 }
 0x245   : > { %v2701_v50 = vpop.f32.mrf.mxu0 }
 0x246   : > { %3405 = vst.msk [vmem:[#allocation2 + $0xb0] sm:$0xff] %vm172_vm2, %v3371_v47  ;;  %v2762_v52 = vadd.f32 %v2701_v50, %v2380_v49  ;;  %v10415_v60 = vpop.f32.mrf.mxu1  ;;  %v2385_v49 = vld [vmem:[#allocation2 + $0xf0] sm:$0xff] }
 0x247   : > { %v2863_v55 = vld [vmem:[#allocation2 + $0xb8] sm:$0xff]  ;;  %v10349_v56 = vpop.f32.mrf.mxu0 }
 0x248   : > { %v3372_v59 = vadd.f32 %v3305_v51, %v2863_v55  ;;  %2796 = vst.msk [vmem:[#allocation2 + $0xc8] sm:$0xff] %vm172_vm2, %v2762_v52  ;;  %v3310_v63 = vpop.f32.mrf.mxu1  ;;  %10657 = vmatmul.mubr.msk.bf16.gmra.mxu1 %vm172_vm2, %v5269_v57  ;;  %v5274_v57 = vrot.slane %v12720_v46, 1  ;;  %v2386_v60 = vld [vmem:[#allocation2 + $0xf8] sm:$0xff] }
 0x249   : > { %v2706_v62 = vpop.f32.mrf.mxu0  ;;  %10591 = vmatmul.mubr.msk.bf16.gmra.mxu0 %vm172_vm2, %v4708_v53  ;;  %10660 = vmatprep.mubr.msk.bf16.mxu1 %vm11444_vm1, %v11443_v1  ;;  %v4727_v53 = vor.u32 %v4725_v41, %v4723_v28  ;;  %v4745_v28 = vshll.u32 %v12750_v16, 16 }
 0x24a   : > { %3406 = vst.msk [vmem:[#allocation2 + $0xb8] sm:$0xff] %vm172_vm2, %v3372_v59  ;;  %v2763_v0 = vadd.f32 %v2706_v62, %v2381_v61  ;;  %10594 = vmatprep.mubr.msk.bf16.mxu0 %vm11444_vm1, %v11443_v1  ;;  %v10418_v9 = vpop.f32.mrf.mxu1 }
 0x24b   : > { %v2864_v5 = vld [vmem:[#allocation2 + $0xc0] sm:$0xff]  ;;  %v10352_v6 = vpop.f32.mrf.mxu0  ;;  %v4747_v41 = vrot.slane %v4745_v28, 1  ;;  %v12813_v28 = vld [vmem:[%s11566_s23 + $0x68] sm:$0xff]  }
 0x24c   : > { %v3373_v8 = vadd.f32 %v3310_v63, %v2864_v5  ;;  %2797 = vst.msk [vmem:[#allocation2 + $0xd0] sm:$0xff] %vm172_vm2, %v2763_v0  ;;  %v3313_v12 = vpop.f32.mrf.mxu1  ;;  %v4732_v0 = vsel %vm812_vm3, %v4727_v53, %v4731_v54  ;;  %v5275_v6 = vsel %vm1993_vm4, %v5272_v32, %v5274_v57  ;;  %v12762_v32 = vld [vmem:[%s11566_s23 + $0xd8] sm:$0xff]   ;;  %v4749_v53 = vshrl.u32 %v12750_v16, 16 }
 0x24d   : > { %v2709_v11 = vpop.f32.mrf.mxu0 }
 0x24e   : > { %3407 = vst.msk [vmem:[#allocation2 + $0xc0] sm:$0xff] %vm172_vm2, %v3373_v8  ;;  %v2764_v13 = vadd.f32 %v2709_v11, %v2382_v10  ;;  %v10419_v22 = vpop.f32.mrf.mxu1  ;;  %v2387_v10 = vld [vmem:[#allocation2 + $0x100] sm:$0xff] }
 0x24f   : > { %v2865_v17 = vld [vmem:[#allocation2 + $0xc8] sm:$0xff]  ;;  %v10353_v18 = vpop.f32.mrf.mxu0 }
 0x250   : > { %v3374_v21 = vadd.f32 %v3313_v12, %v2865_v17  ;;  %2798 = vst.msk [vmem:[#allocation2 + $0xd8] sm:$0xff] %vm172_vm2, %v2764_v13  ;;  %v3318_v25 = vpop.f32.mrf.mxu1  ;;  %10661 = vmatmul.mubr.msk.bf16.gmra.mxu1 %vm172_vm2, %v5271_v19  ;;  %v5276_v19 = vrot.slane %v12741_v7, 1  ;;  %v2388_v22 = vld [vmem:[#allocation2 + $0x108] sm:$0xff] }
 0x251   : > { %v2714_v24 = vpop.f32.mrf.mxu0  ;;  %10595 = vmatmul.mubr.msk.bf16.gmra.mxu0 %vm172_vm2, %v4716_v14  ;;  %10664 = vmatprep.mubr.msk.bf16.mxu1 %vm11444_vm1, %v11443_v1  ;;  %v4735_v14 = vor.u32 %v4733_v2, %v4731_v54  ;;  %v4753_v54 = vshll.u32 %v12771_v42, 16 }
 0x252   : > { %3408 = vst.msk [vmem:[#allocation2 + $0xc8] sm:$0xff] %vm172_vm2, %v3374_v21  ;;  %v2765_v26 = vadd.f32 %v2714_v24, %v2383_v23  ;;  %10598 = vmatprep.mubr.msk.bf16.mxu0 %vm11444_vm1, %v11443_v1  ;;  %v10422_v34 = vpop.f32.mrf.mxu1 }
 0x253   : > { %v2866_v30 = vld [vmem:[#allocation2 + $0xd0] sm:$0xff]  ;;  %v10356_v31 = vpop.f32.mrf.mxu0  ;;  %v4755_v2 = vrot.slane %v4753_v54, 1 }
 0x254   : > { %v3375_v33 = vadd.f32 %v3318_v25, %v2866_v30  ;;  %2799 = vst.msk [vmem:[#allocation2 + $0xe0] sm:$0xff] %vm172_vm2, %v2765_v26  ;;  %v3321_v37 = vpop.f32.mrf.mxu1  ;;  %v4740_v26 = vsel %vm812_vm3, %v4735_v14, %v4739_v15  ;;  %v5277_v31 = vsel %vm1993_vm4, %v5274_v57, %v5276_v19  ;;  %v12783_v57 = vld [vmem:[%s11566_s23 + $0xe0] sm:$0xff]   ;;  %v4757_v14 = vshrl.u32 %v12771_v42, 16  ;;  %v12834_v54 = vld [vmem:[%s11566_s23 + $0x70] sm:$0xff]  }
 0x255   : > { %v2717_v36 = vpop.f32.mrf.mxu0 }
 0x256   : > { %3409 = vst.msk [vmem:[#allocation2 + $0xd0] sm:$0xff] %vm172_vm2, %v3375_v33  ;;  %v2766_v39 = vadd.f32 %v2717_v36, %v2384_v35  ;;  %v10423_v48 = vpop.f32.mrf.mxu1  ;;  %v3452_v35 = vld [vmem:[#allocation2] sm:$0xff] }
 0x257   : > { %v2867_v43 = vld [vmem:[#allocation2 + $0xd8] sm:$0xff]  ;;  %v10357_v44 = vpop.f32.mrf.mxu0  ;;  %v3453_v48 = vld [vmem:[#allocation2 + $0x8] sm:$0xff] }
 0x258   : > { %v3376_v47 = vadd.f32 %v3321_v37, %v2867_v43  ;;  %2800 = vst.msk [vmem:[#allocation2 + $0xe8] sm:$0xff] %vm172_vm2, %v2766_v39  ;;  %v3326_v51 = vpop.f32.mrf.mxu1  ;;  %10665 = vmatmul.mubr.msk.bf16.gmra.mxu1 %vm172_vm2, %v5273_v45  ;;  %v5278_v45 = vrot.slane %v12762_v32, 1 }
 0x259   : > { %v2722_v50 = vpop.f32.mrf.mxu0  ;;  %10599 = vmatmul.mubr.msk.bf16.gmra.mxu0 %vm172_vm2, %v4724_v40  ;;  %10668 = vmatprep.mubr.msk.bf16.mxu1 %vm11444_vm1, %v11443_v1  ;;  %v4743_v40 = vor.u32 %v4741_v27, %v4739_v15  ;;  %v4761_v15 = vshll.u32 %v12792_v3, 16 }
 0x25a   : > { %3410 = vst.msk [vmem:[#allocation2 + $0xd8] sm:$0xff] %vm172_vm2, %v3376_v47  ;;  %v2767_v52 = vadd.f32 %v2722_v50, %v2385_v49  ;;  %10602 = vmatprep.mubr.msk.bf16.mxu0 %vm11444_vm1, %v11443_v1  ;;  %v10426_v59 = vpop.f32.mrf.mxu1 }
 0x25b   : > { %v2868_v55 = vld [vmem:[#allocation2 + $0xe0] sm:$0xff]  ;;  %v10360_v56 = vpop.f32.mrf.mxu0  ;;  %v4763_v27 = vrot.slane %v4761_v15, 1  ;;  %v12855_v15 = vld [vmem:[%s11566_s23 + $0x78] sm:$0xff]  }
 0x25c   : > { %v3377_v58 = vadd.f32 %v3326_v51, %v2868_v55  ;;  %2801 = vst.msk [vmem:[#allocation2 + $0xf0] sm:$0xff] %vm172_vm2, %v2767_v52  ;;  %v3329_v62 = vpop.f32.mrf.mxu1  ;;  %v4748_v52 = vsel %vm812_vm3, %v4743_v40, %v4747_v41  ;;  %v5279_v56 = vsel %vm1993_vm4, %v5276_v19, %v5278_v45  ;;  %v12804_v19 = vld [vmem:[%s11566_s23 + $0xe8] sm:$0xff]   ;;  %v4765_v40 = vshrl.u32 %v12792_v3, 16 }
 0x25d   : > { %v2725_v61 = vpop.f32.mrf.mxu0 }
 0x25e   : > { %3411 = vst.msk [vmem:[#allocation2 + $0xe0] sm:$0xff] %vm172_vm2, %v3377_v58  ;;  %v2768_v63 = vadd.f32 %v2725_v61, %v2386_v60  ;;  %v10427_v9 = vpop.f32.mrf.mxu1  ;;  %v3454_v60 = vld [vmem:[#allocation2 + $0x10] sm:$0xff] }
 0x25f   : > { %v2869_v4 = vld [vmem:[#allocation2 + $0xe8] sm:$0xff]  ;;  %v10361_v5 = vpop.f32.mrf.mxu0  ;;  %v3455_v9 = vld [vmem:[#allocation2 + $0x18] sm:$0xff] }
 0x260   : > { %v3378_v8 = vadd.f32 %v3329_v62, %v2869_v4  ;;  %2802 = vst.msk [vmem:[#allocation2 + $0xf8] sm:$0xff] %vm172_vm2, %v2768_v63  ;;  %v3334_v12 = vpop.f32.mrf.mxu1  ;;  %10669 = vmatmul.mubr.msk.bf16.gmra.mxu1 %vm172_vm2, %v5275_v6  ;;  %v5280_v6 = vrot.slane %v12783_v57, 1 }
 0x261   : > { %v2730_v11 = vpop.f32.mrf.mxu0  ;;  %10603 = vmatmul.mubr.msk.bf16.gmra.mxu0 %vm172_vm2, %v4732_v0  ;;  %10672 = vmatprep.mubr.msk.bf16.mxu1 %vm11444_vm1, %v11443_v1  ;;  %v4751_v0 = vor.u32 %v4749_v53, %v4747_v41  ;;  %v4769_v41 = vshll.u32 %v12813_v28, 16 }
 0x262   : > { %3412 = vst.msk [vmem:[#allocation2 + $0xe8] sm:$0xff] %vm172_vm2, %v3378_v8  ;;  %v2769_v13 = vadd.f32 %v2730_v11, %v2387_v10  ;;  %10606 = vmatprep.mubr.msk.bf16.mxu0 %vm11444_vm1, %v11443_v1  ;;  %v10430_v21 = vpop.f32.mrf.mxu1 }
 0x263   : > { %v2870_v17 = vld [vmem:[#allocation2 + $0xf0] sm:$0xff]  ;;  %v10364_v18 = vpop.f32.mrf.mxu0  ;;  %v4771_v53 = vrot.slane %v4769_v41, 1  ;;  %v12876_v41 = vld [vmem:[%s11566_s23 + $0x80] sm:$0xff]  }
 0x264   : > { %v3379_v20 = vadd.f32 %v3334_v12, %v2870_v17  ;;  %2803 = vst.msk [vmem:[#allocation2 + $0x100] sm:$0xff] %vm172_vm2, %v2769_v13  ;;  %v3337_v24 = vpop.f32.mrf.mxu1  ;;  %v4756_v13 = vsel %vm812_vm3, %v4751_v0, %v4755_v2  ;;  %v5281_v18 = vsel %vm1993_vm4, %v5278_v45, %v5280_v6  ;;  %v12825_v45 = vld [vmem:[%s11566_s23 + $0xf0] sm:$0xff]   ;;  %v4773_v0 = vshrl.u32 %v12813_v28, 16 }
 0x265   : > { %v2733_v23 = vpop.f32.mrf.mxu0 }
 0x266   : > { %3413 = vst.msk [vmem:[#allocation2 + $0xf0] sm:$0xff] %vm172_vm2, %v3379_v20  ;;  %v2770_v25 = vadd.f32 %v2733_v23, %v2388_v22  ;;  %v10431_v34 = vpop.f32.mrf.mxu1  ;;  %v3456_v22 = vld [vmem:[#allocation2 + $0x20] sm:$0xff] }
 0x267   : > { %v2871_v29 = vld [vmem:[#allocation2 + $0xf8] sm:$0xff]  ;;  %v10365_v30 = vpop.f32.mrf.mxu0  ;;  %v3457_v34 = vld [vmem:[#allocation2 + $0x28] sm:$0xff] }
 0x268   : > { %v3380_v33 = vadd.f32 %v3337_v24, %v2871_v29  ;;  %2804 = vst.msk [vmem:[#allocation2 + $0x108] sm:$0xff] %vm172_vm2, %v2770_v25  ;;  %v3342_v37 = vpop.f32.mrf.mxu1  ;;  %10673 = vmatmul.mubr.msk.bf16.gmra.mxu1 %vm172_vm2, %v5277_v31  ;;  %v5282_v31 = vrot.slane %v12804_v19, 1 }
 0x269   : > { %v3825_v36 = vpop.f32.mrf.mxu0  ;;  %10607 = vmatmul.mubr.msk.bf16.gmra.mxu0 %vm172_vm2, %v4740_v26  ;;  %10676 = vmatprep.mubr.msk.bf16.mxu1 %vm11444_vm1, %v11443_v1  ;;  %v4759_v26 = vor.u32 %v4757_v14, %v4755_v2  ;;  %v4777_v2 = vshll.u32 %v12834_v54, 16 }
 0x26a   : > { %3414 = vst.msk [vmem:[#allocation2 + $0xf8] sm:$0xff] %vm172_vm2, %v3380_v33  ;;  %v3960_v39 = vadd.f32 %v3825_v36, %v3452_v35  ;;  %10610 = vmatprep.mubr.msk.bf16.mxu0 %vm11444_vm1, %v11443_v1  ;;  %v10434_v47 = vpop.f32.mrf.mxu1 }
 0x26b   : > { %v2872_v43 = vld [vmem:[#allocation2 + $0x100] sm:$0xff]  ;;  %v10440_v44 = vpop.f32.mrf.mxu0  ;;  %v4779_v14 = vrot.slane %v4777_v2, 1  ;;  %v12897_v2 = vld [vmem:[%s11566_s23 + $0x88] sm:$0xff]  }
 0x26c   : > { %v3381_v46 = vadd.f32 %v3342_v37, %v2872_v43  ;;  %3994 = vst.msk [vmem:[#allocation2] sm:$0xff] %vm172_vm2, %v3960_v39  ;;  %v3345_v50 = vpop.f32.mrf.mxu1  ;;  %v4764_v39 = vsel %vm812_vm3, %v4759_v26, %v4763_v27  ;;  %v5283_v44 = vsel %vm1993_vm4, %v5280_v6, %v5282_v31  ;;  %v12846_v6 = vld [vmem:[%s11566_s23 + $0xf8] sm:$0xff]   ;;  %v4781_v26 = vshrl.u32 %v12834_v54, 16 }
 0x26d   : > { %v3828_v49 = vpop.f32.mrf.mxu0 }
 0x26e   : > { %3415 = vst.msk [vmem:[#allocation2 + $0x100] sm:$0xff] %vm172_vm2, %v3381_v46  ;;  %v3961_v51 = vadd.f32 %v3828_v49, %v3453_v48  ;;  %v10435_v59 = vpop.f32.mrf.mxu1  ;;  %v3458_v48 = vld [vmem:[#allocation2 + $0x30] sm:$0xff] }
 0x26f   : > { %v2873_v38 = vld [vmem:[#allocation2 + $0x108] sm:$0xff]  ;;  %v10441_v55 = vpop.f32.mrf.mxu0  ;;  %v3459_v59 = vld [vmem:[#allocation2 + $0x38] sm:$0xff] }
 0x270   : > { %v3382_v58 = vadd.f32 %v3345_v50, %v2873_v38  ;;  %3995 = vst.msk [vmem:[#allocation2 + $0x8] sm:$0xff] %vm172_vm2, %v3961_v51  ;;  %v4311_v62 = vpop.f32.mrf.mxu1  ;;  %10677 = vmatmul.mubr.msk.bf16.gmra.mxu1 %vm172_vm2, %v5279_v56  ;;  %v5284_v56 = vrot.slane %v12825_v45, 1 }
 0x271   : > { %v3833_v61 = vpop.f32.mrf.mxu0  ;;  %10611 = vmatmul.mubr.msk.bf16.gmra.mxu0 %vm172_vm2, %v4748_v52  ;;  %10680 = vmatprep.mubr.msk.bf16.mxu1 %vm11444_vm1, %v11443_v1  ;;  %v4767_v52 = vor.u32 %v4765_v40, %v4763_v27  ;;  %v4785_v27 = vshll.u32 %v12855_v15, 16 }
 0x272   : > { %3416 = vst.msk [vmem:[#allocation2 + $0x108] sm:$0xff] %vm172_vm2, %v3382_v58  ;;  %v3962_v63 = vadd.f32 %v3833_v61, %v3454_v60  ;;  %10614 = vmatprep.mubr.msk.bf16.mxu0 %vm11444_vm1, %v11443_v1  ;;  %v10510_v8 = vpop.f32.mrf.mxu1 }
 0x273   : > { %v4063_v4 = vld [vmem:[#allocation2] sm:$0xff]  ;;  %v10444_v5 = vpop.f32.mrf.mxu0  ;;  %v4787_v40 = vrot.slane %v4785_v27, 1  ;;  %v11325_v27 = vld [vmem:[%s11566_s23 + $0x90] ss:$0 sps:$4 sm:$0x11]  }
 0x274   : > { %v4446_v7 = vadd.f32 %v4311_v62, %v4063_v4  ;;  %3996 = vst.msk [vmem:[#allocation2 + $0x10] sm:$0xff] %vm172_vm2, %v3962_v63  ;;  %v4314_v11 = vpop.f32.mrf.mxu1  ;;  %v4772_v63 = vsel %vm812_vm3, %v4767_v52, %v4771_v53  ;;  %v5285_v5 = vsel %vm1993_vm4, %v5282_v31, %v5284_v56  ;;  %v12867_v31 = vld [vmem:[%s11566_s23 + $0x100] sm:$0xff]   ;;  %v4789_v52 = vshrl.u32 %v12855_v15, 16 }
 0x275   : > { %v3836_v10 = vpop.f32.mrf.mxu0 }
 0x276   : > { %4480 = vst.msk [vmem:[#allocation2] sm:$0xff] %vm172_vm2, %v4446_v7  ;;  %v3963_v12 = vadd.f32 %v3836_v10, %v3455_v9  ;;  %v10511_v21 = vpop.f32.mrf.mxu1  ;;  %v3460_v9 = vld [vmem:[#allocation2 + $0x40] sm:$0xff] }
 0x277   : > { %v4064_v16 = vld [vmem:[#allocation2 + $0x8] sm:$0xff]  ;;  %v10445_v17 = vpop.f32.mrf.mxu0 }
 0x278   : > { %v4447_v20 = vadd.f32 %v4314_v11, %v4064_v16  ;;  %3997 = vst.msk [vmem:[#allocation2 + $0x18] sm:$0xff] %vm172_vm2, %v3963_v12  ;;  %v4319_v24 = vpop.f32.mrf.mxu1  ;;  %10681 = vmatmul.mubr.msk.bf16.gmra.mxu1 %vm172_vm2, %v5281_v18  ;;  %v5286_v18 = vrot.slane %v12846_v6, 1  ;;  %v3461_v21 = vld [vmem:[#allocation2 + $0x48] sm:$0xff] }
 0x279   : > { %v3841_v23 = vpop.f32.mrf.mxu0  ;;  %10615 = vmatmul.mubr.msk.bf16.gmra.mxu0 %vm172_vm2, %v4756_v13  ;;  %10684 = vmatprep.mubr.msk.bf16.mxu1 %vm11444_vm1, %v11443_v1  ;;  %v4775_v13 = vor.u32 %v4773_v0, %v4771_v53  ;;  %v4793_v53 = vshll.u32 %v12876_v41, 16 }
 0x27a   : > { %4481 = vst.msk [vmem:[#allocation2 + $0x8] sm:$0xff] %vm172_vm2, %v4447_v20  ;;  %v3964_v25 = vadd.f32 %v3841_v23, %v3456_v22  ;;  %10618 = vmatprep.mubr.msk.bf16.mxu0 %vm11444_vm1, %v11443_v1  ;;  %v10514_v33 = vpop.f32.mrf.mxu1 }
 0x27b   : > { %v4065_v29 = vld [vmem:[#allocation2 + $0x10] sm:$0xff]  ;;  %v10448_v30 = vpop.f32.mrf.mxu0  ;;  %v4795_v0 = vrot.slane %v4793_v53, 1 }
 0x27c   : > { %v4448_v32 = vadd.f32 %v4319_v24, %v4065_v29  ;;  %3998 = vst.msk [vmem:[#allocation2 + $0x20] sm:$0xff] %vm172_vm2, %v3964_v25  ;;  %v4322_v36 = vpop.f32.mrf.mxu1  ;;  %v4780_v25 = vsel %vm812_vm3, %v4775_v13, %v4779_v14  ;;  %v5287_v30 = vsel %vm1993_vm4, %v5284_v56, %v5286_v18  ;;  %v12888_v56 = vld [vmem:[%s11566_s23 + $0x108] sm:$0xff]   ;;  %v4797_v13 = vshrl.u32 %v12876_v41, 16 }
 0x27d   : > { %v3844_v35 = vpop.f32.mrf.mxu0 }
 0x27e   : > { %4482 = vst.msk [vmem:[#allocation2 + $0x10] sm:$0xff] %vm172_vm2, %v4448_v32  ;;  %v3965_v37 = vadd.f32 %v3844_v35, %v3457_v34  ;;  %v10515_v47 = vpop.f32.mrf.mxu1  ;;  %v3462_v34 = vld [vmem:[#allocation2 + $0x50] sm:$0xff] }
 0x27f   : > { %v4066_v42 = vld [vmem:[#allocation2 + $0x18] sm:$0xff]  ;;  %v10449_v43 = vpop.f32.mrf.mxu0 }
 0x280   : > { %v4449_v46 = vadd.f32 %v4322_v36, %v4066_v42  ;;  %3999 = vst.msk [vmem:[#allocation2 + $0x28] sm:$0xff] %vm172_vm2, %v3965_v37  ;;  %v4327_v50 = vpop.f32.mrf.mxu1  ;;  %10685 = vmatmul.mubr.msk.bf16.gmra.mxu1 %vm172_vm2, %v5283_v44  ;;  %v5288_v44 = vrot.slane %v12867_v31, 1  ;;  %v3463_v47 = vld [vmem:[#allocation2 + $0x58] sm:$0xff] }
 0x281   : > { %v3849_v49 = vpop.f32.mrf.mxu0  ;;  %10619 = vmatmul.mubr.msk.bf16.gmra.mxu0 %vm172_vm2, %v4764_v39  ;;  %10688 = vmatprep.mubr.msk.bf16.mxu1 %vm11444_vm1, %v11443_v1  ;;  %v4783_v39 = vor.u32 %v4781_v26, %v4779_v14  ;;  %v4801_v14 = vshll.u32 %v12897_v2, 16 }
 0x282   : > { %4483 = vst.msk [vmem:[#allocation2 + $0x18] sm:$0xff] %vm172_vm2, %v4449_v46  ;;  %v3966_v51 = vadd.f32 %v3849_v49, %v3458_v48  ;;  %10622 = vmatprep.mubr.msk.bf16.mxu0 %vm11444_vm1, %v11443_v1  ;;  %v10518_v58 = vpop.f32.mrf.mxu1 }
 0x283   : > { %v4067_v38 = vld [vmem:[#allocation2 + $0x20] sm:$0xff]  ;;  %v10452_v55 = vpop.f32.mrf.mxu0  ;;  %v4803_v26 = vrot.slane %v4801_v14, 1 }
 0x284   : > { %v4450_v57 = vadd.f32 %v4327_v50, %v4067_v38  ;;  %4000 = vst.msk [vmem:[#allocation2 + $0x30] sm:$0xff] %vm172_vm2, %v3966_v51  ;;  %v4330_v61 = vpop.f32.mrf.mxu1  ;;  %v4788_v51 = vsel %vm812_vm3, %v4783_v39, %v4787_v40  ;;  %v5289_v55 = vsel %vm1993_vm4, %v5286_v18, %v5288_v44  ;;  %v12909_v18 = vld [vmem:[%s11566_s23 + $0x110] sm:$0xff]   ;;  %v4805_v39 = vshrl.u32 %v12897_v2, 16  ;;  %v11329_v2 = vld [vmem:[%s11566_s23 + $0x98] sm:$0xfe]  }
 0x285   : > { %v3852_v60 = vpop.f32.mrf.mxu0 }
 0x286   : > { %4484 = vst.msk [vmem:[#allocation2 + $0x20] sm:$0xff] %vm172_vm2, %v4450_v57  ;;  %v3967_v62 = vadd.f32 %v3852_v60, %v3459_v59  ;;  %v10519_v8 = vpop.f32.mrf.mxu1  ;;  %v3464_v59 = vld [vmem:[#allocation2 + $0x60] sm:$0xff] }
 0x287   : > { %v4068_v3 = vld [vmem:[#allocation2 + $0x28] sm:$0xff]  ;;  %v10453_v4 = vpop.f32.mrf.mxu0 }
 0x288   : > { %v4451_v7 = vadd.f32 %v4330_v61, %v4068_v3  ;;  %4001 = vst.msk [vmem:[#allocation2 + $0x38] sm:$0xff] %vm172_vm2, %v3967_v62  ;;  %v4335_v11 = vpop.f32.mrf.mxu1  ;;  %10689 = vmatmul.mubr.msk.bf16.gmra.mxu1 %vm172_vm2, %v5285_v5  ;;  %v5290_v5 = vrot.slane %v12888_v56, 1  ;;  %v3465_v8 = vld [vmem:[#allocation2 + $0x68] sm:$0xff] }
 0x289   : > { %v3857_v10 = vpop.f32.mrf.mxu0  ;;  %10623 = vmatmul.mubr.msk.bf16.gmra.mxu0 %vm172_vm2, %v4772_v63  ;;  %10692 = vmatprep.mubr.msk.bf16.mxu1 %vm11444_vm1, %v11443_v1  ;;  %v4791_v63 = vor.u32 %v4789_v52, %v4787_v40  ;;  %v4809_v40 = vshll.u32 %v11325_v27, 16 }
 0x28a   : > { %4485 = vst.msk [vmem:[#allocation2 + $0x28] sm:$0xff] %vm172_vm2, %v4451_v7  ;;  %v3968_v12 = vadd.f32 %v3857_v10, %v3460_v9  ;;  %10626 = vmatprep.mubr.msk.bf16.mxu0 %vm11444_vm1, %v11443_v1  ;;  %v10522_v20 = vpop.f32.mrf.mxu1 }
 0x28b   : > { %v4069_v16 = vld [vmem:[#allocation2 + $0x30] sm:$0xff]  ;;  %v10456_v17 = vpop.f32.mrf.mxu0  ;;  %v4811_v52 = vrot.slane %v4809_v40, 1  ;;  %v11332_v40 = vld [vmem:[%s11566_s23 + $0xa8] sm:$0xff]  }
 0x28c   : > { %v4452_v19 = vadd.f32 %v4335_v11, %v4069_v16  ;;  %4002 = vst.msk [vmem:[#allocation2 + $0x40] sm:$0xff] %vm172_vm2, %v3968_v12  ;;  %v4338_v23 = vpop.f32.mrf.mxu1  ;;  %v4796_v12 = vsel %vm812_vm3, %v4791_v63, %v4795_v0  ;;  %v5291_v17 = vsel %vm1993_vm4, %v5288_v44, %v5290_v5  ;;  %v12927_v44 = vld [vmem:[%s11566_s23 + $0x118] sm:$0xff]   ;;  %v11327_v63 = vld [vmem:[%s11566_s23 + $0x8] sm:$0xfe]  }
 0x28d   : > { %v3860_v22 = vpop.f32.mrf.mxu0  ;;  %v5748_v14 = vrot.slane %v11327_v63, 1 }
 0x28e   : > { %4486 = vst.msk [vmem:[#allocation2 + $0x30] sm:$0xff] %vm172_vm2, %v4452_v19  ;;  %v3969_v24 = vadd.f32 %v3860_v22, %v3461_v21  ;;  %v10523_v33 = vpop.f32.mrf.mxu1  ;;  %v3466_v21 = vld [vmem:[#allocation2 + $0x70] sm:$0xff] }
 0x28f   : > { %v4070_v28 = vld [vmem:[#allocation2 + $0x38] sm:$0xff]  ;;  %v10457_v29 = vpop.f32.mrf.mxu0 }
 0x290   : > { %v4453_v32 = vadd.f32 %v4338_v23, %v4070_v28  ;;  %4003 = vst.msk [vmem:[#allocation2 + $0x48] sm:$0xff] %vm172_vm2, %v3969_v24  ;;  %v4343_v36 = vpop.f32.mrf.mxu1  ;;  %10693 = vmatmul.mubr.msk.bf16.gmra.mxu1 %vm172_vm2, %v5287_v30  ;;  %v5292_v30 = vrot.slane %v12909_v18, 1  ;;  %v3467_v33 = vld [vmem:[#allocation2 + $0x78] sm:$0xff] }
 0x291   : > { %v3865_v35 = vpop.f32.mrf.mxu0  ;;  %10627 = vmatmul.mubr.msk.bf16.gmra.mxu0 %vm172_vm2, %v4780_v25  ;;  %10696 = vmatprep.mubr.msk.bf16.mxu1 %vm11444_vm1, %v11443_v1  ;;  %v4799_v25 = vor.u32 %v4797_v13, %v4795_v0  ;;  %v12944_v0 = vld [vmem:[%s11566_s23 + $0x10] sm:$0xff]  }
 0x292   : > { %4487 = vst.msk [vmem:[#allocation2 + $0x38] sm:$0xff] %vm172_vm2, %v4453_v32  ;;  %v3970_v37 = vadd.f32 %v3865_v35, %v3462_v34  ;;  %10630 = vmatprep.mubr.msk.bf16.mxu0 %vm11444_vm1, %v11443_v1  ;;  %v10526_v46 = vpop.f32.mrf.mxu1 }
 0x293   : > { %v4071_v42 = vld [vmem:[#allocation2 + $0x40] sm:$0xff]  ;;  %v10460_v43 = vpop.f32.mrf.mxu0 }
 0x294   : > { %v4454_v45 = vadd.f32 %v4343_v36, %v4071_v42  ;;  %4004 = vst.msk [vmem:[#allocation2 + $0x50] sm:$0xff] %vm172_vm2, %v3970_v37  ;;  %v4346_v49 = vpop.f32.mrf.mxu1  ;;  %v4804_v37 = vsel %vm812_vm3, %v4799_v25, %v4803_v26  ;;  %v5293_v43 = vsel %vm1993_vm4, %v5290_v5, %v5292_v30  ;;  %v3471_v25 = vld [vmem:[#allocation2 + $0x98] sm:$0xff] }
 0x295   : > { %v3868_v48 = vpop.f32.mrf.mxu0 }
 0x296   : > { %4488 = vst.msk [vmem:[#allocation2 + $0x40] sm:$0xff] %vm172_vm2, %v4454_v45  ;;  %v3971_v50 = vadd.f32 %v3868_v48, %v3463_v47  ;;  %v10527_v58 = vpop.f32.mrf.mxu1  ;;  %v3468_v47 = vld [vmem:[#allocation2 + $0x80] sm:$0xff] }
 0x297   : > { %v4072_v54 = vld [vmem:[#allocation2 + $0x48] sm:$0xff]  ;;  %v10461_v38 = vpop.f32.mrf.mxu0 }
 0x298   : > { %v4455_v57 = vadd.f32 %v4346_v49, %v4072_v54  ;;  %4005 = vst.msk [vmem:[#allocation2 + $0x58] sm:$0xff] %vm172_vm2, %v3971_v50  ;;  %v4351_v61 = vpop.f32.mrf.mxu1  ;;  %10697 = vmatmul.mubr.msk.bf16.gmra.mxu1 %vm172_vm2, %v5289_v55  ;;  %v5294_v38 = vrot.slane %v12927_v44, 1 }
 0x299   : > { %v3873_v60 = vpop.f32.mrf.mxu0  ;;  %10631 = vmatmul.mubr.msk.bf16.gmra.mxu0 %vm172_vm2, %v4788_v51  ;;  %10700 = vmatprep.mubr.msk.bf16.mxu1 %vm11444_vm1, %v11443_v1  ;;  %v4807_v51 = vor.u32 %v4805_v39, %v4803_v26 }
 0x29a   : > { %4489 = vst.msk [vmem:[#allocation2 + $0x48] sm:$0xff] %vm172_vm2, %v4455_v57  ;;  %v3972_v62 = vadd.f32 %v3873_v60, %v3464_v59  ;;  %10634 = vmatprep.mubr.msk.bf16.mxu0 %vm11444_vm1, %v11443_v1  ;;  %v10530_v7 = vpop.f32.mrf.mxu1  ;;  %v3469_v57 = vld [vmem:[#allocation2 + $0x88] sm:$0xff]  ;;  %v11326_v59 = vld [vmem:[%s11566_s23 + $0x120] ss:$0 sps:$4 sm:$0x11]   ;;  %v5295_v5 = vsel %vm1993_vm4, %v5292_v30, %v5294_v38 }
 0x29b   : > { %v4073_v3 = vld [vmem:[#allocation2 + $0x50] sm:$0xff]  ;;  %v10464_v4 = vpop.f32.mrf.mxu0 }
 0x29c   : > { %v4456_v6 = vadd.f32 %v4351_v61, %v4073_v3  ;;  %4006 = vst.msk [vmem:[#allocation2 + $0x60] sm:$0xff] %vm172_vm2, %v3972_v62  ;;  %v4354_v10 = vpop.f32.mrf.mxu1  ;;  %v4812_v62 = vsel %vm812_vm3, %v4807_v51, %v4811_v52  ;;  %v6251_v52 = vshrl.u32 %v11332_v40, 16 }
 0x29d   : > { %v3876_v9 = vpop.f32.mrf.mxu0 }
 0x29e   : > { %4490 = vst.msk [vmem:[#allocation2 + $0x50] sm:$0xff] %vm172_vm2, %v4456_v6  ;;  %v3973_v11 = vadd.f32 %v3876_v9, %v3465_v8  ;;  %v10531_v20 = vpop.f32.mrf.mxu1  ;;  %v11330_v6 = vld [vmem:[%s11566_s23 + $0xa0] sm:$0xff]   ;;  %v3470_v9 = vld [vmem:[#allocation2 + $0x90] sm:$0xff] }
 0x29f   : > { %v4074_v15 = vld [vmem:[#allocation2 + $0x58] sm:$0xff]  ;;  %v10465_v16 = vpop.f32.mrf.mxu0  ;;  %v6242_v20 = vshrl.u32 %v11330_v6, 16 }
 0x2a0   : > { %v4457_v19 = vadd.f32 %v4354_v10, %v4074_v15  ;;  %4007 = vst.msk [vmem:[#allocation2 + $0x68] sm:$0xff] %vm172_vm2, %v3973_v11  ;;  %v4359_v23 = vpop.f32.mrf.mxu1  ;;  %10701 = vmatmul.mubr.msk.bf16.gmra.mxu1 %vm172_vm2, %v5291_v17  ;;  %v5296_v11 = vrot.slane %v11326_v59, 1  ;;  %v5749_v15 = vrot.slane %v12944_v0, 1  ;;  %v6234_v16 = vshrl.u32 %v11329_v2, 16 }
 0x2a1   : > { %v3881_v22 = vpop.f32.mrf.mxu0  ;;  %10635 = vmatmul.mubr.msk.bf16.gmra.mxu0 %vm172_vm2, %v4796_v12  ;;  %10704 = vmatprep.mubr.msk.bf16.mxu1 %vm11444_vm1, %v11443_v1 }
 0x2a2   : > { %4491 = vst.msk [vmem:[#allocation2 + $0x58] sm:$0xff] %vm172_vm2, %v4457_v19  ;;  %v3974_v24 = vadd.f32 %v3881_v22, %v3466_v21  ;;  %10638 = vmatprep.mubr.msk.bf16.mxu0 %vm11444_vm1, %v11443_v1  ;;  %v10534_v32 = vpop.f32.mrf.mxu1  ;;  %v6237_v19 = vshll.u32 %v11329_v2, 16  ;;  %v6245_v21 = vshll.u32 %v11330_v6, 16  ;;  %v5750_v30 = vsel %vm1993_vm4, %v5748_v14, %v5749_v15 }
 0x2a3   : > { %v4075_v28 = vld [vmem:[#allocation2 + $0x60] sm:$0xff]  ;;  %v10468_v29 = vpop.f32.mrf.mxu0  ;;  %v12966_v32 = vld [vmem:[%s11566_s23 + $0x18] sm:$0xff]   ;;  %v6253_v2 = vrot.slane %v6251_v52, 1  ;;  %v13023_v52 = vld [vmem:[%s11566_s23 + $0x30] sm:$0xff]  }
 0x2a4   : > { %v4458_v31 = vadd.f32 %v4359_v23, %v4075_v28  ;;  %4008 = vst.msk [vmem:[#allocation2 + $0x70] sm:$0xff] %vm172_vm2, %v3974_v24  ;;  %v4362_v35 = vpop.f32.mrf.mxu1  ;;  %v9581_v24 = vld [vmem:[%s14052_s1 + $0x30] sm:$0xf]  ;;  %v5297_v29 = vsel %vm1993_vm4, %v5294_v38, %v5296_v11  ;;  %v6247_v39 = vrot.slane %v6245_v21, 2 }
 0x2a5   : > { %v3884_v34 = vpop.f32.mrf.mxu0 }
 0x2a6   : > { %4492 = vst.msk [vmem:[#allocation2 + $0x60] sm:$0xff] %vm172_vm2, %v4458_v31  ;;  %v3975_v36 = vadd.f32 %v3884_v34, %v3467_v33  ;;  %v10535_v46 = vpop.f32.mrf.mxu1  ;;  %v6236_v31 = vrot.slane %v6234_v16, 1 }
 0x2a7   : > { %v4076_v41 = vld [vmem:[#allocation2 + $0x68] sm:$0xff]  ;;  %v10469_v42 = vpop.f32.mrf.mxu0 }
 0x2a8   : > { %v4459_v45 = vadd.f32 %v4362_v35, %v4076_v41  ;;  %4009 = vst.msk [vmem:[#allocation2 + $0x78] sm:$0xff] %vm172_vm2, %v3975_v36  ;;  %v4367_v49 = vpop.f32.mrf.mxu1  ;;  %10705 = vmatmul.mubr.msk.bf16.gmra.mxu1 %vm172_vm2, %v5293_v43  ;;  %v7057_v35 = vsel %vm412_vm0, %v9581_v24, 0  ;;  %v6239_v36 = vrot.slane %v6237_v19, 2  ;;  %v3472_v43 = vld [vmem:[#allocation2 + $0xa0] sm:$0xff] }
 0x2a9   : > { %v3889_v48 = vpop.f32.mrf.mxu0  ;;  %10639 = vmatmul.mubr.msk.bf16.gmra.mxu0 %vm172_vm2, %v4804_v37  ;;  %10708 = vmatprep.mubr.msk.bf16.mxu1 %vm11444_vm1, %v11443_v1  ;;  %v6244_v37 = vrot.slane %v6242_v20, 1  ;;  %v3475_v20 = vld [vmem:[#allocation2 + $0xb8] sm:$0xff] }
 0x2aa   : > { %4493 = vst.msk [vmem:[#allocation2 + $0x68] sm:$0xff] %vm172_vm2, %v4459_v45  ;;  %v3976_v50 = vadd.f32 %v3889_v48, %v3468_v47  ;;  %10642 = vmatprep.mubr.msk.bf16.mxu0 %vm11444_vm1, %v11443_v1  ;;  %v10538_v56 = vpop.f32.mrf.mxu1  ;;  %v5751_v47 = vrot.slane %v12966_v32, 1 }
 0x2ab   : > { %v4077_v53 = vld [vmem:[#allocation2 + $0x70] sm:$0xff]  ;;  %v10472_v54 = vpop.f32.mrf.mxu0  ;;  %v6248_v51 = vor.u32 %v6247_v39, %v6244_v37 }
 0x2ac   : > { %v4460_v55 = vadd.f32 %v4367_v49, %v4077_v53  ;;  %4010 = vst.msk [vmem:[#allocation2 + $0x80] sm:$0xff] %vm172_vm2, %v3976_v50  ;;  %v4370_v60 = vpop.f32.mrf.mxu1  ;;  %v6240_v50 = vor.u32 %v6239_v36, %v6236_v31  ;;  %v6254_v53 = vshll.u32 %v11332_v40, 16  ;;  %v11336_v31 = vld [vmem:[%s11566_s23 + $0xb8] sm:$0xff]  }
 0x2ad   : > { %v3892_v58 = vpop.f32.mrf.mxu0 }
 0x2ae   : > { %4494 = vst.msk [vmem:[#allocation2 + $0x70] sm:$0xff] %vm172_vm2, %v4460_v55  ;;  %v3977_v61 = vadd.f32 %v3892_v58, %v3469_v57  ;;  %v10539_v8 = vpop.f32.mrf.mxu1  ;;  %v3473_v55 = vld [vmem:[#allocation2 + $0xa8] sm:$0xff]  ;;  %v9617_v57 = vld [vmem:[%s14052_s1 + $0x34] sm:$0xf]  ;;  %v6249_v0 = vsel %vm2964_vm5, %v6240_v50, %v6248_v51 }
 0x2af   : > { %v4078_v3 = vld [vmem:[#allocation2 + $0x78] sm:$0xff]  ;;  %v10473_v4 = vpop.f32.mrf.mxu0  ;;  %v3474_v8 = vld [vmem:[#allocation2 + $0xb0] sm:$0xff] }
 0x2b0   : > { %v4461_v7 = vadd.f32 %v4370_v60, %v4078_v3  ;;  %4011 = vst.msk [vmem:[#allocation2 + $0x88] sm:$0xff] %vm172_vm2, %v3977_v61  ;;  %v4375_v12 = vpop.f32.mrf.mxu1  ;;  %10709 = vmatmul.mubr.msk.bf16.gmra.mxu1 %vm172_vm2, %v5295_v5  ;;  %v5752_v60 = vsel %vm1993_vm4, %v5749_v15, %v5751_v47  ;;  %v12987_v61 = vld [vmem:[%s11566_s23 + $0x20] sm:$0xff]   ;;  %v6256_v3 = vrot.slane %v6254_v53, 2  ;;  %v11334_v4 = vld [vmem:[%s11566_s23 + $0xb0] sm:$0xff]  }
 0x2b1   : > { %v3897_v10 = vpop.f32.mrf.mxu0  ;;  %10643 = vmatmul.mubr.msk.bf16.gmra.mxu0 %vm172_vm2, %v4812_v62  ;;  %10712 = vmatprep.mubr.msk.bf16.mxu1 %vm11444_vm1, %v11443_v1  ;;  %v6260_v16 = vshrl.u32 %v11334_v4, 16 }
 0x2b2   : > { %4495 = vst.msk [vmem:[#allocation2 + $0x78] sm:$0xff] %vm172_vm2, %v4461_v7  ;;  %v3978_v13 = vadd.f32 %v3897_v10, %v3470_v9  ;;  %10718 = vmatprep.mubr.msk.bf16.mxu0 %vm11444_vm1, %v11443_v1  ;;  %v10542_v23 = vpop.f32.mrf.mxu1  ;;  %v7542_v7 = vsel %vm412_vm0, %v9617_v57, 0  ;;  %v6257_v15 = vor.u32 %v6256_v3, %v6253_v2  ;;  %v11338_v57 = vld [vmem:[%s11566_s23 + $0xc0] sm:$0xff]  }
 0x2b3   : > { %v4079_v17 = vld [vmem:[#allocation2 + $0x80] sm:$0xff]  ;;  %v10476_v18 = vpop.f32.mrf.mxu0 }
 0x2b4   : > { %v4462_v22 = vadd.f32 %v4375_v12, %v4079_v17  ;;  %4012 = vst.msk [vmem:[#allocation2 + $0x90] sm:$0xff] %vm172_vm2, %v3978_v13  ;;  %v4378_v27 = vpop.f32.mrf.mxu1  ;;  %v5753_v12 = vrot.slane %v12987_v61, 1  ;;  %v6263_v17 = vshll.u32 %v11334_v4, 16 }
 0x2b5   : > { %v3900_v26 = vpop.f32.mrf.mxu0 }
 0x2b6   : > { %4496 = vst.msk [vmem:[#allocation2 + $0x80] sm:$0xff] %vm172_vm2, %v4462_v22  ;;  %v3979_v28 = vadd.f32 %v3900_v26, %v3471_v25  ;;  %v10543_v42 = vpop.f32.mrf.mxu1  ;;  %v5754_v24 = vsel %vm1993_vm4, %v5751_v47, %v5753_v12  ;;  %v13006_v25 = vld [vmem:[%s11566_s23 + $0x28] sm:$0xff]  }
 0x2b7   : > { %v4080_v33 = vld [vmem:[#allocation2 + $0x88] sm:$0xff]  ;;  %v10477_v34 = vpop.f32.mrf.mxu0  ;;  %v5755_v39 = vrot.slane %v13006_v25, 1 }
 0x2b8   : > { %v4463_v41 = vadd.f32 %v4378_v27, %v4080_v33  ;;  %4013 = vst.msk [vmem:[#allocation2 + $0x98] sm:$0xff] %vm172_vm2, %v3979_v28  ;;  %v4383_v45 = vpop.f32.mrf.mxu1  ;;  %10713 = vmatmul.mubr.msk.bf16.gmra.mxu1 %vm172_vm2, %v5297_v29  ;;  %v6258_v28 = vsel %vm2964_vm5, %v6248_v51, %v6257_v15  ;;  %v6262_v29 = vrot.slane %v6260_v16, 1  ;;  %v3476_v34 = vld [vmem:[#allocation2 + $0xc0] sm:$0xff]  ;;  %v3477_v47 = vld [vmem:[#allocation2 + $0xc8] sm:$0xff] }
 0x2b9   : > { %v3905_v44 = vpop.f32.mrf.mxu0  ;;  %10719 = vmatmul.mubr.msk.bf16.vlgmr.msra.gmra.mxu0 %vm172_vm2, %v5750_v30  ;;  %10788 = vmatprep.mubr.msk.bf16.mxu1 %vm11444_vm1, %v11443_v1  ;;  %v6265_v30 = vrot.slane %v6263_v17, 2  ;;  %v5756_v51 = vsel %vm1993_vm4, %v5753_v12, %v5755_v39 }
 0x2ba   : > { %4497 = vst.msk [vmem:[#allocation2 + $0x88] sm:$0xff] %vm172_vm2, %v4463_v41  ;;  %v3980_v46 = vadd.f32 %v3905_v44, %v3472_v43  ;;  %10857 = vmatpush3.bf16.msra.mxu0 %v7057_v35  ;;  %10722 = vmatprep.mubr.msk.bf16.mxu0 %vm11444_vm1, %v11443_v1  ;;  %v10546_v38 = vpop.f32.mrf.mxu1  ;;  %v6269_v43 = vshrl.u32 %v11336_v31, 16  ;;  %v6272_v44 = vshll.u32 %v11336_v31, 16 }
 0x2bb   : > { %v4081_v48 = vld [vmem:[#allocation2 + $0x90] sm:$0xff]  ;;  %v10480_v49 = vpop.f32.mrf.mxu0  ;;  %10996 = vmatprep.subr.bf16.mxu0 %v11443_v1  ;;  %v6266_v42 = vor.u32 %v6265_v30, %v6262_v29 }
 0x2bc   : > { %v4464_v54 = vadd.f32 %v4383_v45, %v4081_v48  ;;  %4014 = vst.msk [vmem:[#allocation2 + $0xa0] sm:$0xff] %vm172_vm2, %v3980_v46  ;;  %v4386_v58 = vpop.f32.mrf.mxu1 }
 0x2bd   : > { %v3908_v56 = vpop.f32.mrf.mxu0  ;;  %v6267_v38 = vsel %vm2964_vm5, %v6257_v15, %v6266_v42 }
 0x2be   : > { %4498 = vst.msk [vmem:[#allocation2 + $0x90] sm:$0xff] %vm172_vm2, %v4464_v54  ;;  %v3981_v59 = vadd.f32 %v3908_v56, %v3473_v55  ;;  %v10547_v6 = vpop.f32.mrf.mxu1  ;;  %v6271_v55 = vrot.slane %v6269_v43, 1  ;;  %v6274_v56 = vrot.slane %v6272_v44, 2 }
 0x2bf   : > { %v4082_v62 = vld [vmem:[#allocation2 + $0x98] sm:$0xff]  ;;  %v10481_v63 = vpop.f32.mrf.mxu0  ;;  %v6281_v6 = vshll.u32 %v11338_v57, 16 }
 0x2c0   : > { %v4465_v5 = vadd.f32 %v4386_v58, %v4082_v62  ;;  %4015 = vst.msk [vmem:[#allocation2 + $0xa8] sm:$0xff] %vm172_vm2, %v3981_v59  ;;  %v4391_v10 = vpop.f32.mrf.mxu1  ;;  %10789 = vmatmul.mubr.msk.bf16.vlgmr.msra.gmra.mxu1 %vm172_vm2, %v6249_v0  ;;  %v5757_v0 = vrot.slane %v13023_v52, 1  ;;  %v6275_v4 = vor.u32 %v6274_v56, %v6271_v55 }
 0x2c1   : > { %v3913_v9 = vpop.f32.mrf.mxu0  ;;  %10723 = vmatmul.mubr.msk.bf16.gmra.mxu0 %vm172_vm2, %v5752_v60  ;;  %10927 = vmatpush3.bf16.msra.mxu1 %v7542_v7  ;;  %v3478_v60 = vld [vmem:[#allocation2 + $0xd0] sm:$0xff] }
 0x2c2   : > { %4499 = vst.msk [vmem:[#allocation2 + $0x98] sm:$0xff] %vm172_vm2, %v4465_v5  ;;  %v3982_v11 = vadd.f32 %v3913_v9, %v3474_v8  ;;  %10726 = vmatprep.mubr.msk.bf16.mxu0 %vm11444_vm1, %v11443_v1  ;;  %10792 = vmatprep.mubr.msk.bf16.mxu1 %vm11444_vm1, %v11443_v1  ;;  %v10550_v19 = vpop.f32.mrf.mxu1  ;;  %v6278_v5 = vshrl.u32 %v11338_v57, 16  ;;  %v3479_v9 = vld [vmem:[#allocation2 + $0xd8] sm:$0xff]  ;;  %v6276_v17 = vsel %vm2964_vm5, %v6266_v42, %v6275_v4 }
 0x2c3   : > { %v4083_v13 = vld [vmem:[#allocation2 + $0xa0] sm:$0xff]  ;;  %v10484_v14 = vpop.f32.mrf.mxu0  ;;  %11066 = vmatprep.subr.bf16.mxu1 %v11443_v1  ;;  %v6283_v19 = vrot.slane %v6281_v6, 2 }
 0x2c4   : > { %v4466_v18 = vadd.f32 %v4391_v10, %v4083_v13  ;;  %4016 = vst.msk [vmem:[#allocation2 + $0xb0] sm:$0xff] %vm172_vm2, %v3982_v11  ;;  %v4394_v22 = vpop.f32.mrf.mxu1  ;;  %v5758_v13 = vsel %vm1993_vm4, %v5755_v39, %v5757_v0  ;;  %v13040_v14 = vld [vmem:[%s11566_s23 + $0x38] sm:$0xff]  }
 0x2c5   : > { %v3916_v21 = vpop.f32.mrf.mxu0 }
 0x2c6   : > { %4500 = vst.msk [vmem:[#allocation2 + $0xa0] sm:$0xff] %vm172_vm2, %v4466_v18  ;;  %v3983_v23 = vadd.f32 %v3916_v21, %v3475_v20  ;;  %v10551_v33 = vpop.f32.mrf.mxu1  ;;  %v6280_v18 = vrot.slane %v6278_v5, 1  ;;  %v11340_v20 = vld [vmem:[%s11566_s23 + $0xc8] sm:$0xff]  }
 0x2c7   : > { %v4084_v26 = vld [vmem:[#allocation2 + $0xa8] sm:$0xff]  ;;  %v10485_v27 = vpop.f32.mrf.mxu0  ;;  %v6287_v31 = vshrl.u32 %v11340_v20, 16 }
 0x2c8   : > { %v4467_v32 = vadd.f32 %v4394_v22, %v4084_v26  ;;  %4017 = vst.msk [vmem:[#allocation2 + $0xb8] sm:$0xff] %vm172_vm2, %v3983_v23  ;;  %v4399_v36 = vpop.f32.mrf.mxu1  ;;  %10793 = vmatmul.mubr.msk.bf16.gmra.mxu1 %vm172_vm2, %v6258_v28  ;;  %v3480_v23 = vld [vmem:[#allocation2 + $0xe0] sm:$0xff]  ;;  %v5759_v27 = vrot.slane %v13040_v14, 1  ;;  %v6284_v30 = vor.u32 %v6283_v19, %v6280_v18 }
 0x2c9   : > { %v3921_v35 = vpop.f32.mrf.mxu0  ;;  %10727 = vmatmul.mubr.msk.bf16.gmra.mxu0 %vm172_vm2, %v5754_v24  ;;  %10796 = vmatprep.mubr.msk.bf16.mxu1 %vm11444_vm1, %v11443_v1 }
 0x2ca   : > { %4501 = vst.msk [vmem:[#allocation2 + $0xa8] sm:$0xff] %vm172_vm2, %v4467_v32  ;;  %v3984_v37 = vadd.f32 %v3921_v35, %v3476_v34  ;;  %10730 = vmatprep.mubr.msk.bf16.mxu0 %vm11444_vm1, %v11443_v1  ;;  %v10554_v46 = vpop.f32.mrf.mxu1  ;;  %v6290_v32 = vshll.u32 %v11340_v20, 16  ;;  %v3481_v35 = vld [vmem:[#allocation2 + $0xe8] sm:$0xff]  ;;  %v6285_v44 = vsel %vm2964_vm5, %v6275_v4, %v6284_v30 }
 0x2cb   : > { %v4085_v40 = vld [vmem:[#allocation2 + $0xb0] sm:$0xff]  ;;  %v10488_v41 = vpop.f32.mrf.mxu0 }
 0x2cc   : > { %v4468_v45 = vadd.f32 %v4399_v36, %v4085_v40  ;;  %4018 = vst.msk [vmem:[#allocation2 + $0xc0] sm:$0xff] %vm172_vm2, %v3984_v37  ;;  %v4402_v49 = vpop.f32.mrf.mxu1  ;;  %v5760_v40 = vsel %vm1993_vm4, %v5757_v0, %v5759_v27  ;;  %v13057_v41 = vld [vmem:[%s11566_s23 + $0x40] sm:$0xff]   ;;  %v6292_v46 = vrot.slane %v6290_v32, 2 }
 0x2cd   : > { %v3924_v48 = vpop.f32.mrf.mxu0 }
 0x2ce   : > { %4502 = vst.msk [vmem:[#allocation2 + $0xb0] sm:$0xff] %vm172_vm2, %v4468_v45  ;;  %v3985_v50 = vadd.f32 %v3924_v48, %v3477_v47  ;;  %v10555_v59 = vpop.f32.mrf.mxu1  ;;  %v6289_v45 = vrot.slane %v6287_v31, 1  ;;  %v11342_v47 = vld [vmem:[%s11566_s23 + $0xd0] sm:$0xff]  }
 0x2cf   : > { %v4086_v53 = vld [vmem:[#allocation2 + $0xb8] sm:$0xff]  ;;  %v10489_v54 = vpop.f32.mrf.mxu0  ;;  %v6296_v57 = vshrl.u32 %v11342_v47, 16 }
 0x2d0   : > { %v4469_v58 = vadd.f32 %v4402_v49, %v4086_v53  ;;  %4019 = vst.msk [vmem:[#allocation2 + $0xc8] sm:$0xff] %vm172_vm2, %v3985_v50  ;;  %v4407_v62 = vpop.f32.mrf.mxu1  ;;  %10797 = vmatmul.mubr.msk.bf16.gmra.mxu1 %vm172_vm2, %v6267_v38  ;;  %v3482_v50 = vld [vmem:[#allocation2 + $0xf0] sm:$0xff]  ;;  %v5761_v54 = vrot.slane %v13057_v41, 1  ;;  %v6293_v56 = vor.u32 %v6292_v46, %v6289_v45 }
 0x2d1   : > { %v3929_v61 = vpop.f32.mrf.mxu0  ;;  %10731 = vmatmul.mubr.msk.bf16.gmra.mxu0 %vm172_vm2, %v5756_v51  ;;  %10800 = vmatprep.mubr.msk.bf16.mxu1 %vm11444_vm1, %v11443_v1 }
 0x2d2   : > { %4503 = vst.msk [vmem:[#allocation2 + $0xb8] sm:$0xff] %vm172_vm2, %v4469_v58  ;;  %v3986_v63 = vadd.f32 %v3929_v61, %v3478_v60  ;;  %10734 = vmatprep.mubr.msk.bf16.mxu0 %vm11444_vm1, %v11443_v1  ;;  %v10558_v8 = vpop.f32.mrf.mxu1  ;;  %v6299_v58 = vshll.u32 %v11342_v47, 16  ;;  %v3483_v61 = vld [vmem:[#allocation2 + $0xf8] sm:$0xff]  ;;  %v6294_v6 = vsel %vm2964_vm5, %v6284_v30, %v6293_v56 }
 0x2d3   : > { %v4087_v2 = vld [vmem:[#allocation2 + $0xc0] sm:$0xff]  ;;  %v10492_v3 = vpop.f32.mrf.mxu0 }
 0x2d4   : > { %v4470_v7 = vadd.f32 %v4407_v62, %v4087_v2  ;;  %4020 = vst.msk [vmem:[#allocation2 + $0xd0] sm:$0xff] %vm172_vm2, %v3986_v63  ;;  %v4410_v11 = vpop.f32.mrf.mxu1  ;;  %v5762_v2 = vsel %vm1993_vm4, %v5759_v27, %v5761_v54  ;;  %v13074_v3 = vld [vmem:[%s11566_s23 + $0x48] sm:$0xff]   ;;  %v6301_v8 = vrot.slane %v6299_v58, 2 }
 0x2d5   : > { %v3932_v10 = vpop.f32.mrf.mxu0 }
 0x2d6   : > { %4504 = vst.msk [vmem:[#allocation2 + $0xc0] sm:$0xff] %vm172_vm2, %v4470_v7  ;;  %v3987_v12 = vadd.f32 %v3932_v10, %v3479_v9  ;;  %v10559_v22 = vpop.f32.mrf.mxu1  ;;  %v6298_v7 = vrot.slane %v6296_v57, 1  ;;  %v11344_v9 = vld [vmem:[%s11566_s23 + $0xd8] sm:$0xff]  }
 0x2d7   : > { %v4088_v15 = vld [vmem:[#allocation2 + $0xc8] sm:$0xff]  ;;  %v10493_v16 = vpop.f32.mrf.mxu0  ;;  %v6305_v20 = vshrl.u32 %v11344_v9, 16 }
 0x2d8   : > { %v4471_v21 = vadd.f32 %v4410_v11, %v4088_v15  ;;  %4021 = vst.msk [vmem:[#allocation2 + $0xd8] sm:$0xff] %vm172_vm2, %v3987_v12  ;;  %v4415_v25 = vpop.f32.mrf.mxu1  ;;  %10801 = vmatmul.mubr.msk.bf16.gmra.mxu1 %vm172_vm2, %v6276_v17  ;;  %v3484_v12 = vld [vmem:[#allocation2 + $0x100] sm:$0xff]  ;;  %v5763_v16 = vrot.slane %v13074_v3, 1  ;;  %v6302_v19 = vor.u32 %v6301_v8, %v6298_v7 }
 0x2d9   : > { %v3937_v24 = vpop.f32.mrf.mxu0  ;;  %10735 = vmatmul.mubr.msk.bf16.gmra.mxu0 %vm172_vm2, %v5758_v13  ;;  %10804 = vmatprep.mubr.msk.bf16.mxu1 %vm11444_vm1, %v11443_v1 }
 0x2da   : > { %4505 = vst.msk [vmem:[#allocation2 + $0xc8] sm:$0xff] %vm172_vm2, %v4471_v21  ;;  %v3988_v26 = vadd.f32 %v3937_v24, %v3480_v23  ;;  %10738 = vmatprep.mubr.msk.bf16.mxu0 %vm11444_vm1, %v11443_v1  ;;  %v10562_v34 = vpop.f32.mrf.mxu1  ;;  %v6308_v21 = vshll.u32 %v11344_v9, 16  ;;  %v3485_v24 = vld [vmem:[#allocation2 + $0x108] sm:$0xff]  ;;  %v6303_v32 = vsel %vm2964_vm5, %v6293_v56, %v6302_v19 }
 0x2db   : > { %v4089_v28 = vld [vmem:[#allocation2 + $0xd0] sm:$0xff]  ;;  %v10496_v29 = vpop.f32.mrf.mxu0 }
 0x2dc   : > { %v4472_v33 = vadd.f32 %v4415_v25, %v4089_v28  ;;  %4022 = vst.msk [vmem:[#allocation2 + $0xe0] sm:$0xff] %vm172_vm2, %v3988_v26  ;;  %v4418_v37 = vpop.f32.mrf.mxu1  ;;  %v5764_v28 = vsel %vm1993_vm4, %v5761_v54, %v5763_v16  ;;  %v13091_v29 = vld [vmem:[%s11566_s23 + $0x50] sm:$0xff]   ;;  %v6310_v34 = vrot.slane %v6308_v21, 2 }
 0x2dd   : > { %v3940_v36 = vpop.f32.mrf.mxu0 }
 0x2de   : > { %4506 = vst.msk [vmem:[#allocation2 + $0xd0] sm:$0xff] %vm172_vm2, %v4472_v33  ;;  %v3989_v39 = vadd.f32 %v3940_v36, %v3481_v35  ;;  %v10563_v49 = vpop.f32.mrf.mxu1  ;;  %v6307_v33 = vrot.slane %v6305_v20, 1  ;;  %v11346_v35 = vld [vmem:[%s11566_s23 + $0xe0] sm:$0xff]  }
 0x2df   : > { %v4090_v42 = vld [vmem:[#allocation2 + $0xd8] sm:$0xff]  ;;  %v10497_v43 = vpop.f32.mrf.mxu0  ;;  %v6314_v47 = vshrl.u32 %v11346_v35, 16 }
 0x2e0   : > { %v4473_v48 = vadd.f32 %v4418_v37, %v4090_v42  ;;  %4023 = vst.msk [vmem:[#allocation2 + $0xe8] sm:$0xff] %vm172_vm2, %v3989_v39  ;;  %v4423_v52 = vpop.f32.mrf.mxu1  ;;  %10805 = vmatmul.mubr.msk.bf16.gmra.mxu1 %vm172_vm2, %v6285_v44  ;;  %v4549_v39 = vld [vmem:[#allocation2] sm:$0xff]  ;;  %v5765_v43 = vrot.slane %v13091_v29, 1  ;;  %v6311_v46 = vor.u32 %v6310_v34, %v6307_v33 }
 0x2e1   : > { %v3945_v51 = vpop.f32.mrf.mxu0  ;;  %10739 = vmatmul.mubr.msk.bf16.gmra.mxu0 %vm172_vm2, %v5760_v40  ;;  %10808 = vmatprep.mubr.msk.bf16.mxu1 %vm11444_vm1, %v11443_v1 }
 0x2e2   : > { %4507 = vst.msk [vmem:[#allocation2 + $0xd8] sm:$0xff] %vm172_vm2, %v4473_v48  ;;  %v3990_v53 = vadd.f32 %v3945_v51, %v3482_v50  ;;  %10742 = vmatprep.mubr.msk.bf16.mxu0 %vm11444_vm1, %v11443_v1  ;;  %v10566_v60 = vpop.f32.mrf.mxu1  ;;  %v6317_v48 = vshll.u32 %v11346_v35, 16  ;;  %v4550_v51 = vld [vmem:[#allocation2 + $0x8] sm:$0xff]  ;;  %v6312_v58 = vsel %vm2964_vm5, %v6302_v19, %v6311_v46 }
 0x2e3   : > { %v4091_v38 = vld [vmem:[#allocation2 + $0xe0] sm:$0xff]  ;;  %v10500_v55 = vpop.f32.mrf.mxu0 }
 0x2e4   : > { %v4474_v59 = vadd.f32 %v4423_v52, %v4091_v38  ;;  %4024 = vst.msk [vmem:[#allocation2 + $0xf0] sm:$0xff] %vm172_vm2, %v3990_v53  ;;  %v4426_v63 = vpop.f32.mrf.mxu1  ;;  %v5766_v38 = vsel %vm1993_vm4, %v5763_v16, %v5765_v43  ;;  %v13108_v55 = vld [vmem:[%s11566_s23 + $0x58] sm:$0xff]   ;;  %v6319_v60 = vrot.slane %v6317_v48, 2 }
 0x2e5   : > { %v3948_v62 = vpop.f32.mrf.mxu0 }
 0x2e6   : > { %4508 = vst.msk [vmem:[#allocation2 + $0xe0] sm:$0xff] %vm172_vm2, %v4474_v59  ;;  %v3991_v0 = vadd.f32 %v3948_v62, %v3483_v61  ;;  %v10567_v11 = vpop.f32.mrf.mxu1  ;;  %v6316_v59 = vrot.slane %v6314_v47, 1  ;;  %v11348_v61 = vld [vmem:[%s11566_s23 + $0xe8] sm:$0xff]  }
 0x2e7   : > { %v4092_v4 = vld [vmem:[#allocation2 + $0xe8] sm:$0xff]  ;;  %v10501_v5 = vpop.f32.mrf.mxu0  ;;  %v6323_v9 = vshrl.u32 %v11348_v61, 16 }
 0x2e8   : > { %v4475_v10 = vadd.f32 %v4426_v63, %v4092_v4  ;;  %4025 = vst.msk [vmem:[#allocation2 + $0xf8] sm:$0xff] %vm172_vm2, %v3991_v0  ;;  %v4431_v14 = vpop.f32.mrf.mxu1  ;;  %10809 = vmatmul.mubr.msk.bf16.gmra.mxu1 %vm172_vm2, %v6294_v6  ;;  %v4551_v0 = vld [vmem:[#allocation2 + $0x10] sm:$0xff]  ;;  %v5767_v5 = vrot.slane %v13108_v55, 1  ;;  %v6320_v8 = vor.u32 %v6319_v60, %v6316_v59 }
 0x2e9   : > { %v3953_v13 = vpop.f32.mrf.mxu0  ;;  %10743 = vmatmul.mubr.msk.bf16.gmra.mxu0 %vm172_vm2, %v5762_v2  ;;  %10812 = vmatprep.mubr.msk.bf16.mxu1 %vm11444_vm1, %v11443_v1 }
 0x2ea   : > { %4509 = vst.msk [vmem:[#allocation2 + $0xe8] sm:$0xff] %vm172_vm2, %v4475_v10  ;;  %v3992_v15 = vadd.f32 %v3953_v13, %v3484_v12  ;;  %10746 = vmatprep.mubr.msk.bf16.mxu0 %vm11444_vm1, %v11443_v1  ;;  %v10570_v23 = vpop.f32.mrf.mxu1  ;;  %v6326_v10 = vshll.u32 %v11348_v61, 16  ;;  %v4552_v13 = vld [vmem:[#allocation2 + $0x18] sm:$0xff]  ;;  %v6321_v21 = vsel %vm2964_vm5, %v6311_v46, %v6320_v8 }
 0x2eb   : > { %v4093_v17 = vld [vmem:[#allocation2 + $0xf0] sm:$0xff]  ;;  %v10504_v18 = vpop.f32.mrf.mxu0 }
 0x2ec   : > { %v4476_v22 = vadd.f32 %v4431_v14, %v4093_v17  ;;  %4026 = vst.msk [vmem:[#allocation2 + $0x100] sm:$0xff] %vm172_vm2, %v3992_v15  ;;  %v4434_v26 = vpop.f32.mrf.mxu1  ;;  %v5768_v17 = vsel %vm1993_vm4, %v5765_v43, %v5767_v5  ;;  %v13125_v18 = vld [vmem:[%s11566_s23 + $0x60] sm:$0xff]   ;;  %v6328_v23 = vrot.slane %v6326_v10, 2 }
 0x2ed   : > { %v3956_v25 = vpop.f32.mrf.mxu0 }
 0x2ee   : > { %4510 = vst.msk [vmem:[#allocation2 + $0xf0] sm:$0xff] %vm172_vm2, %v4476_v22  ;;  %v3993_v27 = vadd.f32 %v3956_v25, %v3485_v24  ;;  %v10571_v37 = vpop.f32.mrf.mxu1  ;;  %v6325_v22 = vrot.slane %v6323_v9, 1  ;;  %v11350_v24 = vld [vmem:[%s11566_s23 + $0xf0] sm:$0xff]  }
 0x2ef   : > { %v4094_v30 = vld [vmem:[#allocation2 + $0xf8] sm:$0xff]  ;;  %v10505_v31 = vpop.f32.mrf.mxu0  ;;  %v6332_v35 = vshrl.u32 %v11350_v24, 16 }
 0x2f0   : > { %v4477_v36 = vadd.f32 %v4434_v26, %v4094_v30  ;;  %4027 = vst.msk [vmem:[#allocation2 + $0x108] sm:$0xff] %vm172_vm2, %v3993_v27  ;;  %v4439_v41 = vpop.f32.mrf.mxu1  ;;  %10813 = vmatmul.mubr.msk.bf16.gmra.mxu1 %vm172_vm2, %v6303_v32  ;;  %v4553_v27 = vld [vmem:[#allocation2 + $0x20] sm:$0xff]  ;;  %v5769_v31 = vrot.slane %v13125_v18, 1  ;;  %v6329_v34 = vor.u32 %v6328_v23, %v6325_v22 }
 0x2f1   : > { %v4901_v40 = vpop.f32.mrf.mxu0  ;;  %10747 = vmatmul.mubr.msk.bf16.gmra.mxu0 %vm172_vm2, %v5764_v28  ;;  %10816 = vmatprep.mubr.msk.bf16.mxu1 %vm11444_vm1, %v11443_v1 }
 0x2f2   : > { %4511 = vst.msk [vmem:[#allocation2 + $0xf8] sm:$0xff] %vm172_vm2, %v4477_v36  ;;  %v5036_v42 = vadd.f32 %v4901_v40, %v4549_v39  ;;  %10750 = vmatprep.mubr.msk.bf16.mxu0 %vm11444_vm1, %v11443_v1  ;;  %v10574_v50 = vpop.f32.mrf.mxu1  ;;  %v6335_v36 = vshll.u32 %v11350_v24, 16  ;;  %v4554_v40 = vld [vmem:[#allocation2 + $0x28] sm:$0xff]  ;;  %v6330_v48 = vsel %vm2964_vm5, %v6320_v8, %v6329_v34 }
 0x2f3   : > { %v4095_v44 = vld [vmem:[#allocation2 + $0x100] sm:$0xff]  ;;  %v10580_v45 = vpop.f32.mrf.mxu0 }
 0x2f4   : > { %v4478_v49 = vadd.f32 %v4439_v41, %v4095_v44  ;;  %5070 = vst.msk [vmem:[#allocation2] sm:$0xff] %vm172_vm2, %v5036_v42  ;;  %v4442_v53 = vpop.f32.mrf.mxu1  ;;  %v5770_v44 = vsel %vm1993_vm4, %v5767_v5, %v5769_v31  ;;  %v13142_v45 = vld [vmem:[%s11566_s23 + $0x68] sm:$0xff]   ;;  %v6337_v50 = vrot.slane %v6335_v36, 2 }
 0x2f5   : > { %v4904_v52 = vpop.f32.mrf.mxu0 }
 0x2f6   : > { %4512 = vst.msk [vmem:[#allocation2 + $0x100] sm:$0xff] %vm172_vm2, %v4478_v49  ;;  %v5037_v54 = vadd.f32 %v4904_v52, %v4550_v51  ;;  %v10575_v63 = vpop.f32.mrf.mxu1  ;;  %v6334_v49 = vrot.slane %v6332_v35, 1  ;;  %v11352_v51 = vld [vmem:[%s11566_s23 + $0xf8] sm:$0xff]  }
 0x2f7   : > { %v4096_v56 = vld [vmem:[#allocation2 + $0x108] sm:$0xff]  ;;  %v10581_v57 = vpop.f32.mrf.mxu0  ;;  %v6341_v61 = vshrl.u32 %v11352_v51, 16 }
 0x2f8   : > { %v4479_v62 = vadd.f32 %v4442_v53, %v4096_v56  ;;  %5071 = vst.msk [vmem:[#allocation2 + $0x8] sm:$0xff] %vm172_vm2, %v5037_v54  ;;  %v5386_v3 = vpop.f32.mrf.mxu1  ;;  %10817 = vmatmul.mubr.msk.bf16.gmra.mxu1 %vm172_vm2, %v6312_v58  ;;  %v4555_v54 = vld [vmem:[#allocation2 + $0x30] sm:$0xff]  ;;  %v5771_v57 = vrot.slane %v13142_v45, 1  ;;  %v6338_v60 = vor.u32 %v6337_v50, %v6334_v49 }
 0x2f9   : > { %v4909_v2 = vpop.f32.mrf.mxu0  ;;  %10751 = vmatmul.mubr.msk.bf16.gmra.mxu0 %vm172_vm2, %v5766_v38  ;;  %10820 = vmatprep.mubr.msk.bf16.mxu1 %vm11444_vm1, %v11443_v1 }
 0x2fa   : > { %4513 = vst.msk [vmem:[#allocation2 + $0x108] sm:$0xff] %vm172_vm2, %v4479_v62  ;;  %v5038_v4 = vadd.f32 %v4909_v2, %v4551_v0  ;;  %10754 = vmatprep.mubr.msk.bf16.mxu0 %vm11444_vm1, %v11443_v1  ;;  %v10650_v12 = vpop.f32.mrf.mxu1  ;;  %v6344_v62 = vshll.u32 %v11352_v51, 16  ;;  %v4556_v2 = vld [vmem:[#allocation2 + $0x38] sm:$0xff]  ;;  %v6339_v10 = vsel %vm2964_vm5, %v6329_v34, %v6338_v60 }
 0x2fb   : > { %v5139_v6 = vld [vmem:[#allocation2] sm:$0xff]  ;;  %v10584_v7 = vpop.f32.mrf.mxu0 }
 0x2fc   : > { %v5521_v11 = vadd.f32 %v5386_v3, %v5139_v6  ;;  %5072 = vst.msk [vmem:[#allocation2 + $0x10] sm:$0xff] %vm172_vm2, %v5038_v4  ;;  %v5389_v15 = vpop.f32.mrf.mxu1  ;;  %v5772_v6 = vsel %vm1993_vm4, %v5769_v31, %v5771_v57  ;;  %v13159_v7 = vld [vmem:[%s11566_s23 + $0x70] sm:$0xff]   ;;  %v6346_v12 = vrot.slane %v6344_v62, 2 }
 0x2fd   : > { %v4912_v14 = vpop.f32.mrf.mxu0 }
 0x2fe   : > { %5555 = vst.msk [vmem:[#allocation2] sm:$0xff] %vm172_vm2, %v5521_v11  ;;  %v5039_v16 = vadd.f32 %v4912_v14, %v4552_v13  ;;  %v10651_v26 = vpop.f32.mrf.mxu1  ;;  %v6343_v11 = vrot.slane %v6341_v61, 1  ;;  %v11354_v13 = vld [vmem:[%s11566_s23 + $0x100] sm:$0xff]  }
 0x2ff   : > { %v5140_v19 = vld [vmem:[#allocation2 + $0x8] sm:$0xff]  ;;  %v10585_v20 = vpop.f32.mrf.mxu0  ;;  %v6350_v24 = vshrl.u32 %v11354_v13, 16 }
 0x300   : > { %v5522_v25 = vadd.f32 %v5389_v15, %v5140_v19  ;;  %5073 = vst.msk [vmem:[#allocation2 + $0x18] sm:$0xff] %vm172_vm2, %v5039_v16  ;;  %v5394_v29 = vpop.f32.mrf.mxu1  ;;  %10821 = vmatmul.mubr.msk.bf16.gmra.mxu1 %vm172_vm2, %v6321_v21  ;;  %v4557_v16 = vld [vmem:[#allocation2 + $0x40] sm:$0xff]  ;;  %v5773_v20 = vrot.slane %v13159_v7, 1  ;;  %v6347_v23 = vor.u32 %v6346_v12, %v6343_v11 }
 0x301   : > { %v4917_v28 = vpop.f32.mrf.mxu0  ;;  %10755 = vmatmul.mubr.msk.bf16.gmra.mxu0 %vm172_vm2, %v5768_v17  ;;  %10824 = vmatprep.mubr.msk.bf16.mxu1 %vm11444_vm1, %v11443_v1 }
 0x302   : > { %5556 = vst.msk [vmem:[#allocation2 + $0x8] sm:$0xff] %vm172_vm2, %v5522_v25  ;;  %v5040_v30 = vadd.f32 %v4917_v28, %v4553_v27  ;;  %10758 = vmatprep.mubr.msk.bf16.mxu0 %vm11444_vm1, %v11443_v1  ;;  %v10654_v39 = vpop.f32.mrf.mxu1  ;;  %v6353_v25 = vshll.u32 %v11354_v13, 16  ;;  %v4558_v28 = vld [vmem:[#allocation2 + $0x48] sm:$0xff]  ;;  %v6348_v36 = vsel %vm2964_vm5, %v6338_v60, %v6347_v23 }
 0x303   : > { %v5141_v32 = vld [vmem:[#allocation2 + $0x10] sm:$0xff]  ;;  %v10588_v33 = vpop.f32.mrf.mxu0 }
 0x304   : > { %v5523_v37 = vadd.f32 %v5394_v29, %v5141_v32  ;;  %5074 = vst.msk [vmem:[#allocation2 + $0x20] sm:$0xff] %vm172_vm2, %v5040_v30  ;;  %v5397_v42 = vpop.f32.mrf.mxu1  ;;  %v5774_v32 = vsel %vm1993_vm4, %v5771_v57, %v5773_v20  ;;  %v13176_v33 = vld [vmem:[%s11566_s23 + $0x78] sm:$0xff]   ;;  %v6355_v39 = vrot.slane %v6353_v25, 2 }
 0x305   : > { %v4920_v41 = vpop.f32.mrf.mxu0 }
 0x306   : > { %5557 = vst.msk [vmem:[#allocation2 + $0x10] sm:$0xff] %vm172_vm2, %v5523_v37  ;;  %v5041_v43 = vadd.f32 %v4920_v41, %v4554_v40  ;;  %v10655_v53 = vpop.f32.mrf.mxu1  ;;  %v6352_v37 = vrot.slane %v6350_v24, 1  ;;  %v11356_v40 = vld [vmem:[%s11566_s23 + $0x108] sm:$0xff]  }
 0x307   : > { %v5142_v46 = vld [vmem:[#allocation2 + $0x18] sm:$0xff]  ;;  %v10589_v47 = vpop.f32.mrf.mxu0  ;;  %v6359_v51 = vshrl.u32 %v11356_v40, 16 }
 0x308   : > { %v5524_v52 = vadd.f32 %v5397_v42, %v5142_v46  ;;  %5075 = vst.msk [vmem:[#allocation2 + $0x28] sm:$0xff] %vm172_vm2, %v5041_v43  ;;  %v5402_v55 = vpop.f32.mrf.mxu1  ;;  %10825 = vmatmul.mubr.msk.bf16.gmra.mxu1 %vm172_vm2, %v6330_v48  ;;  %v4559_v43 = vld [vmem:[#allocation2 + $0x50] sm:$0xff]  ;;  %v5775_v47 = vrot.slane %v13176_v33, 1  ;;  %v6356_v50 = vor.u32 %v6355_v39, %v6352_v37 }
 0x309   : > { %v4925_v38 = vpop.f32.mrf.mxu0  ;;  %10759 = vmatmul.mubr.msk.bf16.gmra.mxu0 %vm172_vm2, %v5770_v44  ;;  %10828 = vmatprep.mubr.msk.bf16.mxu1 %vm11444_vm1, %v11443_v1 }
 0x30a   : > { %5558 = vst.msk [vmem:[#allocation2 + $0x18] sm:$0xff] %vm172_vm2, %v5524_v52  ;;  %v5042_v56 = vadd.f32 %v4925_v38, %v4555_v54  ;;  %10762 = vmatprep.mubr.msk.bf16.mxu0 %vm11444_vm1, %v11443_v1  ;;  %v10658_v0 = vpop.f32.mrf.mxu1  ;;  %v6362_v52 = vshll.u32 %v11356_v40, 16  ;;  %v4560_v38 = vld [vmem:[#allocation2 + $0x58] sm:$0xff]  ;;  %v6357_v62 = vsel %vm2964_vm5, %v6347_v23, %v6356_v50 }
 0x30b   : > { %v5143_v58 = vld [vmem:[#allocation2 + $0x20] sm:$0xff]  ;;  %v10592_v59 = vpop.f32.mrf.mxu0 }
 0x30c   : > { %v5525_v63 = vadd.f32 %v5402_v55, %v5143_v58  ;;  %5076 = vst.msk [vmem:[#allocation2 + $0x30] sm:$0xff] %vm172_vm2, %v5042_v56  ;;  %v5405_v4 = vpop.f32.mrf.mxu1  ;;  %v5776_v58 = vsel %vm1993_vm4, %v5773_v20, %v5775_v47  ;;  %v13193_v59 = vld [vmem:[%s11566_s23 + $0x80] sm:$0xff]   ;;  %v6364_v0 = vrot.slane %v6362_v52, 2 }
 0x30d   : > { %v4928_v3 = vpop.f32.mrf.mxu0 }
 0x30e   : > { %5559 = vst.msk [vmem:[#allocation2 + $0x20] sm:$0xff] %vm172_vm2, %v5525_v63  ;;  %v5043_v5 = vadd.f32 %v4928_v3, %v4556_v2  ;;  %v10659_v15 = vpop.f32.mrf.mxu1  ;;  %v6361_v63 = vrot.slane %v6359_v51, 1  ;;  %v11358_v2 = vld [vmem:[%s11566_s23 + $0x110] sm:$0xff]  }
 0x30f   : > { %v5144_v8 = vld [vmem:[#allocation2 + $0x28] sm:$0xff]  ;;  %v10593_v9 = vpop.f32.mrf.mxu0  ;;  %v6368_v13 = vshrl.u32 %v11358_v2, 16  ;;  %v11364_v51 = vld [vmem:[%s11566_s23 + $0x130] sm:$0xff]  }
 0x310   : > { %v5526_v14 = vadd.f32 %v5405_v4, %v5144_v8  ;;  %5077 = vst.msk [vmem:[#allocation2 + $0x38] sm:$0xff] %vm172_vm2, %v5043_v5  ;;  %v5410_v18 = vpop.f32.mrf.mxu1  ;;  %10829 = vmatmul.mubr.msk.bf16.gmra.mxu1 %vm172_vm2, %v6339_v10  ;;  %v4561_v5 = vld [vmem:[#allocation2 + $0x60] sm:$0xff]  ;;  %v5777_v9 = vrot.slane %v13193_v59, 1  ;;  %v6365_v12 = vor.u32 %v6364_v0, %v6361_v63 }
 0x311   : > { %v4933_v17 = vpop.f32.mrf.mxu0  ;;  %10763 = vmatmul.mubr.msk.bf16.gmra.mxu0 %vm172_vm2, %v5772_v6  ;;  %10832 = vmatprep.mubr.msk.bf16.mxu1 %vm11444_vm1, %v11443_v1  ;;  %v4565_v59 = vld [vmem:[#allocation2 + $0x80] sm:$0xff] }
 0x312   : > { %5560 = vst.msk [vmem:[#allocation2 + $0x28] sm:$0xff] %vm172_vm2, %v5526_v14  ;;  %v5044_v19 = vadd.f32 %v4933_v17, %v4557_v16  ;;  %10766 = vmatprep.mubr.msk.bf16.mxu0 %vm11444_vm1, %v11443_v1  ;;  %v10662_v27 = vpop.f32.mrf.mxu1  ;;  %v6371_v14 = vshll.u32 %v11358_v2, 16  ;;  %v4562_v17 = vld [vmem:[#allocation2 + $0x68] sm:$0xff]  ;;  %v6366_v25 = vsel %vm2964_vm5, %v6356_v50, %v6365_v12  ;;  %v11361_v50 = vld [vmem:[%s11566_s23 + $0x90] ss:$0 sps:$4 sm:$0x11]  }
 0x313   : > { %v5145_v21 = vld [vmem:[#allocation2 + $0x30] sm:$0xff]  ;;  %v10596_v22 = vpop.f32.mrf.mxu0  ;;  %v5781_v2 = vrot.slane %v11361_v50, 1 }
 0x314   : > { %v5527_v26 = vadd.f32 %v5410_v18, %v5145_v21  ;;  %5078 = vst.msk [vmem:[#allocation2 + $0x40] sm:$0xff] %vm172_vm2, %v5044_v19  ;;  %v5413_v30 = vpop.f32.mrf.mxu1  ;;  %v5778_v21 = vsel %vm1993_vm4, %v5775_v47, %v5777_v9  ;;  %v13210_v22 = vld [vmem:[%s11566_s23 + $0x88] sm:$0xff]   ;;  %v6373_v27 = vrot.slane %v6371_v14, 2 }
 0x315   : > { %v4936_v29 = vpop.f32.mrf.mxu0 }
 0x316   : > { %5561 = vst.msk [vmem:[#allocation2 + $0x30] sm:$0xff] %vm172_vm2, %v5527_v26  ;;  %v5045_v31 = vadd.f32 %v4936_v29, %v4558_v28  ;;  %v10663_v42 = vpop.f32.mrf.mxu1  ;;  %v6370_v26 = vrot.slane %v6368_v13, 1  ;;  %v11360_v28 = vld [vmem:[%s11566_s23 + $0x118] sm:$0xff]  }
 0x317   : > { %v5146_v34 = vld [vmem:[#allocation2 + $0x38] sm:$0xff]  ;;  %v10597_v35 = vpop.f32.mrf.mxu0  ;;  %v6377_v40 = vshrl.u32 %v11360_v28, 16 }
 0x318   : > { %v5528_v41 = vadd.f32 %v5413_v30, %v5146_v34  ;;  %5079 = vst.msk [vmem:[#allocation2 + $0x48] sm:$0xff] %vm172_vm2, %v5045_v31  ;;  %v5418_v45 = vpop.f32.mrf.mxu1  ;;  %10833 = vmatmul.mubr.msk.bf16.gmra.mxu1 %vm172_vm2, %v6348_v36  ;;  %v4563_v31 = vld [vmem:[#allocation2 + $0x70] sm:$0xff]  ;;  %v5779_v35 = vrot.slane %v13210_v22, 1  ;;  %v6374_v39 = vor.u32 %v6373_v27, %v6370_v26 }
 0x319   : > { %v4941_v44 = vpop.f32.mrf.mxu0  ;;  %10767 = vmatmul.mubr.msk.bf16.gmra.mxu0 %vm172_vm2, %v5774_v32  ;;  %10836 = vmatprep.mubr.msk.bf16.mxu1 %vm11444_vm1, %v11443_v1 }
 0x31a   : > { %5562 = vst.msk [vmem:[#allocation2 + $0x38] sm:$0xff] %vm172_vm2, %v5528_v41  ;;  %v5046_v46 = vadd.f32 %v4941_v44, %v4559_v43  ;;  %10770 = vmatprep.mubr.msk.bf16.mxu0 %vm11444_vm1, %v11443_v1  ;;  %v10666_v54 = vpop.f32.mrf.mxu1  ;;  %v6380_v41 = vshll.u32 %v11360_v28, 16  ;;  %v4564_v44 = vld [vmem:[#allocation2 + $0x78] sm:$0xff] }
 0x31b   : > { %v5147_v48 = vld [vmem:[#allocation2 + $0x40] sm:$0xff]  ;;  %v10600_v49 = vpop.f32.mrf.mxu0  ;;  %v6375_v54 = vsel %vm2964_vm5, %v6365_v12, %v6374_v39  ;;  %v4566_v12 = vld [vmem:[#allocation2 + $0x88] sm:$0xff] }
 0x31c   : > { %v5529_v53 = vadd.f32 %v5418_v45, %v5147_v48  ;;  %5080 = vst.msk [vmem:[#allocation2 + $0x50] sm:$0xff] %vm172_vm2, %v5046_v46  ;;  %v5421_v56 = vpop.f32.mrf.mxu1  ;;  %v11363_v46 = vld [vmem:[%s11566_s23 + $0x128] sm:$0xfe]   ;;  %v5780_v49 = vsel %vm1993_vm4, %v5777_v9, %v5779_v35 }
 0x31d   : > { %v4944_v55 = vpop.f32.mrf.mxu0 }
 0x31e   : > { %5563 = vst.msk [vmem:[#allocation2 + $0x40] sm:$0xff] %vm172_vm2, %v5529_v53  ;;  %v5047_v57 = vadd.f32 %v4944_v55, %v4560_v38  ;;  %v10667_v4 = vpop.f32.mrf.mxu1  ;;  %v6379_v38 = vrot.slane %v6377_v40, 1  ;;  %v6382_v55 = vrot.slane %v6380_v41, 2 }
 0x31f   : > { %v5148_v60 = vld [vmem:[#allocation2 + $0x48] sm:$0xff]  ;;  %v10601_v61 = vpop.f32.mrf.mxu0  ;;  %v6856_v4 = vshll.u32 %v11364_v51, 16 }
 0x320   : > { %v5530_v3 = vadd.f32 %v5421_v56, %v5148_v60  ;;  %5081 = vst.msk [vmem:[#allocation2 + $0x58] sm:$0xff] %vm172_vm2, %v5047_v57  ;;  %v5426_v7 = vpop.f32.mrf.mxu1  ;;  %10837 = vmatmul.mubr.msk.bf16.gmra.mxu1 %vm172_vm2, %v6357_v62  ;;  %v11362_v56 = vld [vmem:[%s11566_s23 + $0x120] ss:$0 sps:$4 sm:$0x33]   ;;  %v6845_v61 = vshrl.u32 %v11363_v46, 16  ;;  %v6848_v62 = vshll.u32 %v11363_v46, 16 }
 0x321   : > { %v4949_v6 = vpop.f32.mrf.mxu0  ;;  %10771 = vmatmul.mubr.msk.bf16.gmra.mxu0 %vm172_vm2, %v5776_v58  ;;  %10840 = vmatprep.mubr.msk.bf16.mxu1 %vm11444_vm1, %v11443_v1  ;;  %v6389_v9 = vshll.u32 %v11362_v56, 16 }
 0x322   : > { %5564 = vst.msk [vmem:[#allocation2 + $0x48] sm:$0xff] %vm172_vm2, %v5530_v3  ;;  %v5048_v8 = vadd.f32 %v4949_v6, %v4561_v5  ;;  %10774 = vmatprep.mubr.msk.bf16.mxu0 %vm11444_vm1, %v11443_v1  ;;  %v10670_v16 = vpop.f32.mrf.mxu1  ;;  %v6853_v3 = vshrl.u32 %v11364_v51, 16  ;;  %v6847_v14 = vrot.slane %v6845_v61, 1  ;;  %v11369_v51 = vld [vmem:[%s11566_s23 + $0x140] sm:$0xff]  }
 0x323   : > { %v5149_v10 = vld [vmem:[#allocation2 + $0x50] sm:$0xff]  ;;  %v10604_v11 = vpop.f32.mrf.mxu0  ;;  %v6391_v26 = vrot.slane %v6389_v9, 2  ;;  %v4570_v9 = vld [vmem:[#allocation2 + $0xa8] sm:$0xff] }
 0x324   : > { %v5531_v15 = vadd.f32 %v5426_v7, %v5149_v10  ;;  %5082 = vst.msk [vmem:[#allocation2 + $0x60] sm:$0xff] %vm172_vm2, %v5048_v8  ;;  %v5429_v19 = vpop.f32.mrf.mxu1  ;;  %v6383_v7 = vor.u32 %v6382_v55, %v6379_v38  ;;  %v6386_v8 = vshrl.u32 %v11362_v56, 16  ;;  %v11365_v55 = vld [vmem:[%s11566_s23 + $0x1b8] sm:$0xfc]   ;;  %v13263_v56 = vld [vmem:[%s11566_s23 + $0x1c0] sm:$0xff]  }
 0x325   : > { %v4952_v18 = vpop.f32.mrf.mxu0 }
 0x326   : > { %5565 = vst.msk [vmem:[#allocation2 + $0x50] sm:$0xff] %vm172_vm2, %v5531_v15  ;;  %v5049_v20 = vadd.f32 %v4952_v18, %v4562_v17  ;;  %v10671_v30 = vpop.f32.mrf.mxu1  ;;  %v6850_v15 = vrot.slane %v6848_v62, 2  ;;  %v5782_v18 = vsel %vm1993_vm4, %v5779_v35, %v5781_v2  ;;  %v6874_v2 = vshll.u32 %v11369_v51, 16 }
 0x327   : > { %v5150_v23 = vld [vmem:[#allocation2 + $0x58] sm:$0xff]  ;;  %v10605_v24 = vpop.f32.mrf.mxu0 }
 0x328   : > { %v5532_v29 = vadd.f32 %v5429_v19, %v5150_v23  ;;  %5083 = vst.msk [vmem:[#allocation2 + $0x68] sm:$0xff] %vm172_vm2, %v5049_v20  ;;  %v5434_v33 = vpop.f32.mrf.mxu1  ;;  %10841 = vmatmul.mubr.msk.bf16.gmra.mxu1 %vm172_vm2, %v6366_v25  ;;  %v6855_v19 = vrot.slane %v6853_v3, 1  ;;  %v6858_v20 = vrot.slane %v6856_v4, 2  ;;  %v6384_v24 = vsel %vm2964_vm5, %v6374_v39, %v6383_v7 }
 0x329   : > { %v4957_v32 = vpop.f32.mrf.mxu0  ;;  %10775 = vmatmul.mubr.msk.bf16.gmra.mxu0 %vm172_vm2, %v5778_v21  ;;  %10844 = vmatprep.mubr.msk.bf16.mxu1 %vm11444_vm1, %v11443_v1  ;;  %v11367_v21 = vld [vmem:[%s11566_s23 + $0x138] sm:$0xff]   ;;  %v6388_v25 = vrot.slane %v6386_v8, 1 }
 0x32a   : > { %5566 = vst.msk [vmem:[#allocation2 + $0x58] sm:$0xff] %vm172_vm2, %v5532_v29  ;;  %v5050_v34 = vadd.f32 %v4957_v32, %v4563_v31  ;;  %10778 = vmatprep.mubr.msk.bf16.mxu0 %vm11444_vm1, %v11443_v1  ;;  %v10674_v43 = vpop.f32.mrf.mxu1  ;;  %v4567_v29 = vld [vmem:[#allocation2 + $0x90] sm:$0xff]  ;;  %v6851_v31 = vor.u32 %v6850_v15, %v6847_v14  ;;  %v6862_v35 = vshrl.u32 %v11367_v21, 16 }
 0x32b   : > { %v5151_v36 = vld [vmem:[#allocation2 + $0x60] sm:$0xff]  ;;  %v10608_v37 = vpop.f32.mrf.mxu0  ;;  %v6392_v40 = vor.u32 %v6391_v26, %v6388_v25  ;;  %v9653_v43 = vld [vmem:[%s14052_s1 + $0x38] sm:$0xf]  ;;  %v4571_v25 = vld [vmem:[#allocation2 + $0xb0] sm:$0xff] }
 0x32c   : > { %v5533_v42 = vadd.f32 %v5434_v33, %v5151_v36  ;;  %5084 = vst.msk [vmem:[#allocation2 + $0x70] sm:$0xff] %vm172_vm2, %v5050_v34  ;;  %v5437_v47 = vpop.f32.mrf.mxu1  ;;  %v6859_v34 = vor.u32 %v6858_v20, %v6855_v19  ;;  %v6865_v36 = vshll.u32 %v11367_v21, 16  ;;  %v8027_v38 = vsel %vm412_vm0, %v9653_v43, 0  ;;  %v13283_v21 = vld [vmem:[%s11566_s23 + $0x1c8] sm:$0xff]  }
 0x32d   : > { %v4960_v45 = vpop.f32.mrf.mxu0 }
 0x32e   : > { %5567 = vst.msk [vmem:[#allocation2 + $0x60] sm:$0xff] %vm172_vm2, %v5533_v42  ;;  %v5051_v48 = vadd.f32 %v4960_v45, %v4564_v44  ;;  %v10675_v58 = vpop.f32.mrf.mxu1  ;;  %v4568_v44 = vld [vmem:[#allocation2 + $0x98] sm:$0xff]  ;;  %v6867_v50 = vrot.slane %v6865_v36, 2 }
 0x32f   : > { %v5152_v52 = vld [vmem:[#allocation2 + $0x68] sm:$0xff]  ;;  %v10609_v53 = vpop.f32.mrf.mxu0 }
 0x330   : > { %v5534_v57 = vadd.f32 %v5437_v47, %v5152_v52  ;;  %5085 = vst.msk [vmem:[#allocation2 + $0x78] sm:$0xff] %vm172_vm2, %v5051_v48  ;;  %v5442_v63 = vpop.f32.mrf.mxu1  ;;  %10845 = vmatmul.mubr.msk.bf16.gmra.mxu1 %vm172_vm2, %v6375_v54  ;;  %v6860_v48 = vsel %vm2964_vm5, %v6851_v31, %v6859_v34  ;;  %v6393_v54 = vsel %vm2964_vm5, %v6383_v7, %v6392_v40 }
 0x331   : > { %v4965_v60 = vpop.f32.mrf.mxu0  ;;  %10779 = vmatmul.mubr.msk.bf16.gmra.mxu0 %vm172_vm2, %v5780_v49  ;;  %10848 = vmatprep.mubr.msk.bf16.mxu1 %vm11444_vm1, %v11443_v1  ;;  %v6864_v49 = vrot.slane %v6862_v35, 1 }
 0x332   : > { %5568 = vst.msk [vmem:[#allocation2 + $0x68] sm:$0xff] %vm172_vm2, %v5534_v57  ;;  %v5052_v0 = vadd.f32 %v4965_v60, %v4565_v59  ;;  %10782 = vmatprep.mubr.msk.bf16.mxu0 %vm11444_vm1, %v11443_v1  ;;  %v10678_v11 = vpop.f32.mrf.mxu1  ;;  %v4569_v59 = vld [vmem:[#allocation2 + $0xa0] sm:$0xff] }
 0x333   : > { %v5153_v5 = vld [vmem:[#allocation2 + $0x70] sm:$0xff]  ;;  %v10612_v6 = vpop.f32.mrf.mxu0  ;;  %v9689_v11 = vld [vmem:[%s14052_s1 + $0x3c] sm:$0xf] }
 0x334   : > { %v5535_v10 = vadd.f32 %v5442_v63, %v5153_v5  ;;  %5086 = vst.msk [vmem:[#allocation2 + $0x80] sm:$0xff] %vm172_vm2, %v5052_v0  ;;  %v5445_v16 = vpop.f32.mrf.mxu1  ;;  %v6868_v63 = vor.u32 %v6867_v50, %v6864_v49  ;;  %v6871_v0 = vshrl.u32 %v11369_v51, 16  ;;  %v7455_v5 = vrot.slane %v11365_v55, 2  ;;  %v13301_v49 = vld [vmem:[%s11566_s23 + $0x1d0] sm:$0xff]  }
 0x335   : > { %v4968_v13 = vpop.f32.mrf.mxu0  ;;  %v7456_v6 = vrot.slane %v13263_v56, 2 }
 0x336   : > { %5569 = vst.msk [vmem:[#allocation2 + $0x70] sm:$0xff] %vm172_vm2, %v5535_v10  ;;  %v5053_v17 = vadd.f32 %v4968_v13, %v4566_v12  ;;  %v10679_v28 = vpop.f32.mrf.mxu1  ;;  %v6869_v14 = vsel %vm2964_vm5, %v6859_v34, %v6868_v63  ;;  %v6873_v15 = vrot.slane %v6871_v0, 1  ;;  %v7458_v34 = vrot.slane %v13283_v21, 2 }
 0x337   : > { %v5154_v22 = vld [vmem:[#allocation2 + $0x78] sm:$0xff]  ;;  %v10613_v23 = vpop.f32.mrf.mxu0  ;;  %v7457_v20 = vsel %vm4187_vm6, %v7455_v5, %v7456_v6 }
 0x338   : > { %v5536_v27 = vadd.f32 %v5445_v16, %v5154_v22  ;;  %5087 = vst.msk [vmem:[#allocation2 + $0x88] sm:$0xff] %vm172_vm2, %v5053_v17  ;;  %v5450_v32 = vpop.f32.mrf.mxu1  ;;  %10849 = vmatmul.mubr.msk.bf16.gmra.mxu1 %vm172_vm2, %v6384_v24  ;;  %v6876_v16 = vrot.slane %v6874_v2, 2  ;;  %v11371_v17 = vld [vmem:[%s11566_s23 + $0x148] sm:$0xff]   ;;  %v8639_v24 = vsel %vm412_vm0, %v9689_v11, 0  ;;  %v13318_v11 = vld [vmem:[%s11566_s23 + $0x1d8] sm:$0xff]  }
 0x339   : > { %v4973_v30 = vpop.f32.mrf.mxu0  ;;  %10783 = vmatmul.mubr.msk.bf16.gmra.mxu0 %vm172_vm2, %v5782_v18  ;;  %10852 = vmatprep.mubr.msk.bf16.mxu1 %vm11444_vm1, %v11443_v1  ;;  %v6883_v31 = vshll.u32 %v11371_v17, 16 }
 0x33a   : > { %5570 = vst.msk [vmem:[#allocation2 + $0x78] sm:$0xff] %vm172_vm2, %v5536_v27  ;;  %v5054_v33 = vadd.f32 %v4973_v30, %v4567_v29  ;;  %10858 = vmatprep.mubr.msk.bf16.mxu0 %vm11444_vm1, %v11443_v1  ;;  %v10682_v42 = vpop.f32.mrf.mxu1  ;;  %v6877_v29 = vor.u32 %v6876_v16, %v6873_v15  ;;  %v6880_v30 = vshrl.u32 %v11371_v17, 16 }
 0x33b   : > { %v5155_v37 = vld [vmem:[#allocation2 + $0x80] sm:$0xff]  ;;  %v10616_v39 = vpop.f32.mrf.mxu0 }
 0x33c   : > { %v5537_v41 = vadd.f32 %v5450_v32, %v5155_v37  ;;  %5088 = vst.msk [vmem:[#allocation2 + $0x90] sm:$0xff] %vm172_vm2, %v5054_v33  ;;  %v5453_v46 = vpop.f32.mrf.mxu1  ;;  %v4572_v37 = vld [vmem:[#allocation2 + $0xb8] sm:$0xff]  ;;  %v6878_v42 = vsel %vm2964_vm5, %v6868_v63, %v6877_v29  ;;  %v6882_v43 = vrot.slane %v6880_v30, 1  ;;  %v4574_v63 = vld [vmem:[#allocation2 + $0xc8] sm:$0xff] }
 0x33d   : > { %v4976_v45 = vpop.f32.mrf.mxu0 }
 0x33e   : > { %5571 = vst.msk [vmem:[#allocation2 + $0x80] sm:$0xff] %vm172_vm2, %v5537_v41  ;;  %v5055_v47 = vadd.f32 %v4976_v45, %v4568_v44  ;;  %v10683_v58 = vpop.f32.mrf.mxu1  ;;  %v6885_v44 = vrot.slane %v6883_v31, 2  ;;  %v11373_v45 = vld [vmem:[%s11566_s23 + $0x150] sm:$0xff]  }
 0x33f   : > { %v5156_v52 = vld [vmem:[#allocation2 + $0x88] sm:$0xff]  ;;  %v10617_v53 = vpop.f32.mrf.mxu0  ;;  %v6889_v56 = vshrl.u32 %v11373_v45, 16 }
 0x340   : > { %v5538_v57 = vadd.f32 %v5453_v46, %v5156_v52  ;;  %5089 = vst.msk [vmem:[#allocation2 + $0x98] sm:$0xff] %vm172_vm2, %v5055_v47  ;;  %v5458_v61 = vpop.f32.mrf.mxu1  ;;  %10853 = vmatmul.mubr.msk.bf16.gmra.mxu1 %vm172_vm2, %v6393_v54  ;;  %v4573_v52 = vld [vmem:[#allocation2 + $0xc0] sm:$0xff]  ;;  %v6886_v55 = vor.u32 %v6885_v44, %v6882_v43 }
 0x341   : > { %v4981_v60 = vpop.f32.mrf.mxu0  ;;  %10859 = vmatmul.mubr.msk.bf16.vlgmr.msra.gmra.mxu0 %vm172_vm2, %v6860_v48  ;;  %10928 = vmatprep.mubr.msk.bf16.mxu1 %vm11444_vm1, %v11443_v1  ;;  %v7459_v48 = vsel %vm4187_vm6, %v7456_v6, %v7458_v34  ;;  %v6891_v5 = vrot.slane %v6889_v56, 1 }
 0x342   : > { %5572 = vst.msk [vmem:[#allocation2 + $0x88] sm:$0xff] %vm172_vm2, %v5538_v57  ;;  %v5056_v62 = vadd.f32 %v4981_v60, %v4569_v59  ;;  %10997 = vmatpush3.bf16.msra.mxu0 %v8027_v38  ;;  %10862 = vmatprep.mubr.msk.bf16.mxu0 %vm11444_vm1, %v11443_v1  ;;  %v10686_v8 = vpop.f32.mrf.mxu1  ;;  %v6892_v57 = vshll.u32 %v11373_v45, 16  ;;  %v7460_v60 = vrot.slane %v13301_v49, 2 }
 0x343   : > { %v5157_v3 = vld [vmem:[#allocation2 + $0x90] sm:$0xff]  ;;  %v10620_v4 = vpop.f32.mrf.mxu0 }
 0x344   : > { %v5539_v7 = vadd.f32 %v5458_v61, %v5157_v3  ;;  %5090 = vst.msk [vmem:[#allocation2 + $0xa0] sm:$0xff] %vm172_vm2, %v5056_v62  ;;  %v5461_v12 = vpop.f32.mrf.mxu1  ;;  %v6887_v4 = vsel %vm2964_vm5, %v6877_v29, %v6886_v55  ;;  %v6894_v6 = vrot.slane %v6892_v57, 2 }
 0x345   : > { %v4984_v10 = vpop.f32.mrf.mxu0 }
 0x346   : > { %5573 = vst.msk [vmem:[#allocation2 + $0x90] sm:$0xff] %vm172_vm2, %v5539_v7  ;;  %v5057_v13 = vadd.f32 %v4984_v10, %v4570_v9  ;;  %v10687_v23 = vpop.f32.mrf.mxu1  ;;  %v11375_v7 = vld [vmem:[%s11566_s23 + $0x158] sm:$0xff]   ;;  %v7461_v10 = vsel %vm4187_vm6, %v7458_v34, %v7460_v60 }
 0x347   : > { %v5158_v18 = vld [vmem:[#allocation2 + $0x98] sm:$0xff]  ;;  %v10621_v19 = vpop.f32.mrf.mxu0  ;;  %v7462_v23 = vrot.slane %v13318_v11, 2 }
 0x348   : > { %v5540_v22 = vadd.f32 %v5461_v12, %v5158_v18  ;;  %5091 = vst.msk [vmem:[#allocation2 + $0xa8] sm:$0xff] %vm172_vm2, %v5057_v13  ;;  %v5466_v27 = vpop.f32.mrf.mxu1  ;;  %10929 = vmatmul.mubr.msk.bf16.vlgmr.msra.gmra.mxu1 %vm172_vm2, %v7457_v20  ;;  %v6895_v18 = vor.u32 %v6894_v6, %v6891_v5  ;;  %v6898_v19 = vshrl.u32 %v11375_v7, 16  ;;  %v6901_v20 = vshll.u32 %v11375_v7, 16 }
 0x349   : > { %v4989_v26 = vpop.f32.mrf.mxu0  ;;  %10863 = vmatmul.mubr.msk.bf16.gmra.mxu0 %vm172_vm2, %v6869_v14  ;;  %11067 = vmatpush3.bf16.msra.mxu1 %v8639_v24  ;;  %v4575_v14 = vld [vmem:[#allocation2 + $0xd0] sm:$0xff] }
 0x34a   : > { %5574 = vst.msk [vmem:[#allocation2 + $0x98] sm:$0xff] %vm172_vm2, %v5540_v22  ;;  %v5058_v28 = vadd.f32 %v4989_v26, %v4571_v25  ;;  %10866 = vmatprep.mubr.msk.bf16.mxu0 %vm11444_vm1, %v11443_v1  ;;  %10932 = vmatprep.mubr.msk.bf16.mxu1 %vm11444_vm1, %v11443_v1  ;;  %v10690_v36 = vpop.f32.mrf.mxu1  ;;  %v4576_v26 = vld [vmem:[#allocation2 + $0xd8] sm:$0xff]  ;;  %v6896_v30 = vsel %vm2964_vm5, %v6886_v55, %v6895_v18  ;;  %v6900_v31 = vrot.slane %v6898_v19, 1 }
 0x34b   : > { %v5159_v32 = vld [vmem:[#allocation2 + $0xa0] sm:$0xff]  ;;  %v10624_v33 = vpop.f32.mrf.mxu0  ;;  %v7463_v36 = vsel %vm4187_vm6, %v7460_v60, %v7462_v23 }
 0x34c   : > { %v5541_v35 = vadd.f32 %v5466_v27, %v5159_v32  ;;  %5092 = vst.msk [vmem:[#allocation2 + $0xb0] sm:$0xff] %vm172_vm2, %v5058_v28  ;;  %v5469_v40 = vpop.f32.mrf.mxu1  ;;  %v6903_v32 = vrot.slane %v6901_v20, 2  ;;  %v11377_v33 = vld [vmem:[%s11566_s23 + $0x160] sm:$0xff]  }
 0x34d   : > { %v4992_v39 = vpop.f32.mrf.mxu0 }
 0x34e   : > { %5575 = vst.msk [vmem:[#allocation2 + $0xa0] sm:$0xff] %vm172_vm2, %v5541_v35  ;;  %v5059_v41 = vadd.f32 %v4992_v39, %v4572_v37  ;;  %v10691_v51 = vpop.f32.mrf.mxu1  ;;  %v13335_v37 = vld [vmem:[%s11566_s23 + $0x1e0] sm:$0xff]   ;;  %v6904_v45 = vor.u32 %v6903_v32, %v6900_v31 }
 0x34f   : > { %v5160_v46 = vld [vmem:[#allocation2 + $0xa8] sm:$0xff]  ;;  %v10625_v47 = vpop.f32.mrf.mxu0 }
 0x350   : > { %v5542_v50 = vadd.f32 %v5469_v40, %v5160_v46  ;;  %5093 = vst.msk [vmem:[#allocation2 + $0xb8] sm:$0xff] %vm172_vm2, %v5059_v41  ;;  %v5474_v54 = vpop.f32.mrf.mxu1  ;;  %10933 = vmatmul.mubr.msk.bf16.gmra.mxu1 %vm172_vm2, %v7459_v48  ;;  %v4577_v41 = vld [vmem:[#allocation2 + $0xe0] sm:$0xff]  ;;  %v6907_v46 = vshrl.u32 %v11377_v33, 16  ;;  %v6910_v47 = vshll.u32 %v11377_v33, 16  ;;  %v6905_v56 = vsel %vm2964_vm5, %v6895_v18, %v6904_v45 }
 0x351   : > { %v4997_v53 = vpop.f32.mrf.mxu0  ;;  %10867 = vmatmul.mubr.msk.bf16.gmra.mxu0 %vm172_vm2, %v6878_v42  ;;  %10936 = vmatprep.mubr.msk.bf16.mxu1 %vm11444_vm1, %v11443_v1 }
 0x352   : > { %5576 = vst.msk [vmem:[#allocation2 + $0xa8] sm:$0xff] %vm172_vm2, %v5542_v50  ;;  %v5060_v38 = vadd.f32 %v4997_v53, %v4573_v52  ;;  %10870 = vmatprep.mubr.msk.bf16.mxu0 %vm11444_vm1, %v11443_v1  ;;  %v10694_v62 = vpop.f32.mrf.mxu1  ;;  %v7464_v50 = vrot.slane %v13335_v37, 2  ;;  %v4578_v53 = vld [vmem:[#allocation2 + $0xe8] sm:$0xff]  ;;  %v6909_v57 = vrot.slane %v6907_v46, 1 }
 0x353   : > { %v5161_v58 = vld [vmem:[#allocation2 + $0xb0] sm:$0xff]  ;;  %v10628_v59 = vpop.f32.mrf.mxu0 }
 0x354   : > { %v5543_v61 = vadd.f32 %v5474_v54, %v5161_v58  ;;  %5094 = vst.msk [vmem:[#allocation2 + $0xc0] sm:$0xff] %vm172_vm2, %v5060_v38  ;;  %v5477_v2 = vpop.f32.mrf.mxu1  ;;  %v6912_v58 = vrot.slane %v6910_v47, 2  ;;  %v11379_v59 = vld [vmem:[%s11566_s23 + $0x168] sm:$0xff]   ;;  %v7465_v62 = vsel %vm4187_vm6, %v7462_v23, %v7464_v50 }
 0x355   : > { %v5000_v0 = vpop.f32.mrf.mxu0 }
 0x356   : > { %5577 = vst.msk [vmem:[#allocation2 + $0xb0] sm:$0xff] %vm172_vm2, %v5543_v61  ;;  %v5061_v3 = vadd.f32 %v5000_v0, %v4574_v63  ;;  %v10695_v13 = vpop.f32.mrf.mxu1  ;;  %v13352_v63 = vld [vmem:[%s11566_s23 + $0x1e8] sm:$0xff]   ;;  %v6913_v7 = vor.u32 %v6912_v58, %v6909_v57 }
 0x357   : > { %v5162_v8 = vld [vmem:[#allocation2 + $0xb8] sm:$0xff]  ;;  %v10629_v9 = vpop.f32.mrf.mxu0 }
 0x358   : > { %v5544_v12 = vadd.f32 %v5477_v2, %v5162_v8  ;;  %5095 = vst.msk [vmem:[#allocation2 + $0xc8] sm:$0xff] %vm172_vm2, %v5061_v3  ;;  %v5482_v16 = vpop.f32.mrf.mxu1  ;;  %10937 = vmatmul.mubr.msk.bf16.gmra.mxu1 %vm172_vm2, %v7461_v10  ;;  %v4579_v3 = vld [vmem:[#allocation2 + $0xf0] sm:$0xff]  ;;  %v6916_v8 = vshrl.u32 %v11379_v59, 16  ;;  %v6919_v9 = vshll.u32 %v11379_v59, 16  ;;  %v6914_v19 = vsel %vm2964_vm5, %v6904_v45, %v6913_v7 }
 0x359   : > { %v5005_v15 = vpop.f32.mrf.mxu0  ;;  %10871 = vmatmul.mubr.msk.bf16.gmra.mxu0 %vm172_vm2, %v6887_v4  ;;  %10940 = vmatprep.mubr.msk.bf16.mxu1 %vm11444_vm1, %v11443_v1 }
 0x35a   : > { %5578 = vst.msk [vmem:[#allocation2 + $0xb8] sm:$0xff] %vm172_vm2, %v5544_v12  ;;  %v5062_v17 = vadd.f32 %v5005_v15, %v4575_v14  ;;  %10874 = vmatprep.mubr.msk.bf16.mxu0 %vm11444_vm1, %v11443_v1  ;;  %v10698_v25 = vpop.f32.mrf.mxu1  ;;  %v7466_v12 = vrot.slane %v13352_v63, 2  ;;  %v4580_v15 = vld [vmem:[#allocation2 + $0xf8] sm:$0xff]  ;;  %v6918_v20 = vrot.slane %v6916_v8, 1 }
 0x35b   : > { %v5163_v21 = vld [vmem:[#allocation2 + $0xc0] sm:$0xff]  ;;  %v10632_v22 = vpop.f32.mrf.mxu0 }
 0x35c   : > { %v5545_v24 = vadd.f32 %v5482_v16, %v5163_v21  ;;  %5096 = vst.msk [vmem:[#allocation2 + $0xd0] sm:$0xff] %vm172_vm2, %v5062_v17  ;;  %v5485_v28 = vpop.f32.mrf.mxu1  ;;  %v6921_v21 = vrot.slane %v6919_v9, 2  ;;  %v11381_v22 = vld [vmem:[%s11566_s23 + $0x170] sm:$0xff]   ;;  %v7467_v25 = vsel %vm4187_vm6, %v7464_v50, %v7466_v12 }
 0x35d   : > { %v5008_v27 = vpop.f32.mrf.mxu0 }
 0x35e   : > { %5579 = vst.msk [vmem:[#allocation2 + $0xc0] sm:$0xff] %vm172_vm2, %v5545_v24  ;;  %v5063_v29 = vadd.f32 %v5008_v27, %v4576_v26  ;;  %v10699_v40 = vpop.f32.mrf.mxu1  ;;  %v13369_v26 = vld [vmem:[%s11566_s23 + $0x1f0] sm:$0xff]   ;;  %v6922_v33 = vor.u32 %v6921_v21, %v6918_v20 }
 0x35f   : > { %v5164_v34 = vld [vmem:[#allocation2 + $0xc8] sm:$0xff]  ;;  %v10633_v35 = vpop.f32.mrf.mxu0 }
 0x360   : > { %v5546_v39 = vadd.f32 %v5485_v28, %v5164_v34  ;;  %5097 = vst.msk [vmem:[#allocation2 + $0xd8] sm:$0xff] %vm172_vm2, %v5063_v29  ;;  %v5490_v43 = vpop.f32.mrf.mxu1  ;;  %10941 = vmatmul.mubr.msk.bf16.gmra.mxu1 %vm172_vm2, %v7463_v36  ;;  %v4581_v29 = vld [vmem:[#allocation2 + $0x100] sm:$0xff]  ;;  %v6925_v34 = vshrl.u32 %v11381_v22, 16  ;;  %v6928_v35 = vshll.u32 %v11381_v22, 16  ;;  %v6923_v46 = vsel %vm2964_vm5, %v6913_v7, %v6922_v33 }
 0x361   : > { %v5013_v42 = vpop.f32.mrf.mxu0  ;;  %10875 = vmatmul.mubr.msk.bf16.gmra.mxu0 %vm172_vm2, %v6896_v30  ;;  %10944 = vmatprep.mubr.msk.bf16.mxu1 %vm11444_vm1, %v11443_v1 }
 0x362   : > { %5580 = vst.msk [vmem:[#allocation2 + $0xc8] sm:$0xff] %vm172_vm2, %v5546_v39  ;;  %v5064_v44 = vadd.f32 %v5013_v42, %v4577_v41  ;;  %10878 = vmatprep.mubr.msk.bf16.mxu0 %vm11444_vm1, %v11443_v1  ;;  %v10702_v52 = vpop.f32.mrf.mxu1  ;;  %v7468_v39 = vrot.slane %v13369_v26, 2  ;;  %v4582_v42 = vld [vmem:[#allocation2 + $0x108] sm:$0xff]  ;;  %v6927_v47 = vrot.slane %v6925_v34, 1 }
 0x363   : > { %v5165_v48 = vld [vmem:[#allocation2 + $0xd0] sm:$0xff]  ;;  %v10636_v49 = vpop.f32.mrf.mxu0 }
 0x364   : > { %v5547_v51 = vadd.f32 %v5490_v43, %v5165_v48  ;;  %5098 = vst.msk [vmem:[#allocation2 + $0xe0] sm:$0xff] %vm172_vm2, %v5064_v44  ;;  %v5493_v38 = vpop.f32.mrf.mxu1  ;;  %v6930_v48 = vrot.slane %v6928_v35, 2  ;;  %v11383_v49 = vld [vmem:[%s11566_s23 + $0x178] sm:$0xff]   ;;  %v7469_v52 = vsel %vm4187_vm6, %v7466_v12, %v7468_v39 }
 0x365   : > { %v5016_v54 = vpop.f32.mrf.mxu0 }
 0x366   : > { %5581 = vst.msk [vmem:[#allocation2 + $0xd0] sm:$0xff] %vm172_vm2, %v5547_v51  ;;  %v5065_v55 = vadd.f32 %v5016_v54, %v4578_v53  ;;  %v10703_v2 = vpop.f32.mrf.mxu1  ;;  %v13386_v53 = vld [vmem:[%s11566_s23 + $0x1f8] sm:$0xff]   ;;  %v6931_v59 = vor.u32 %v6930_v48, %v6927_v47 }
 0x367   : > { %v5166_v60 = vld [vmem:[#allocation2 + $0xd8] sm:$0xff]  ;;  %v10637_v61 = vpop.f32.mrf.mxu0 }
 0x368   : > { %v5548_v0 = vadd.f32 %v5493_v38, %v5166_v60  ;;  %5099 = vst.msk [vmem:[#allocation2 + $0xe8] sm:$0xff] %vm172_vm2, %v5065_v55  ;;  %v5498_v5 = vpop.f32.mrf.mxu1  ;;  %10945 = vmatmul.mubr.msk.bf16.gmra.mxu1 %vm172_vm2, %v7465_v62  ;;  %v5624_v55 = vld [vmem:[#allocation2] sm:$0xff]  ;;  %v6934_v60 = vshrl.u32 %v11383_v49, 16  ;;  %v6937_v61 = vshll.u32 %v11383_v49, 16  ;;  %v6932_v8 = vsel %vm2964_vm5, %v6922_v33, %v6931_v59 }
 0x369   : > { %v5021_v4 = vpop.f32.mrf.mxu0  ;;  %10879 = vmatmul.mubr.msk.bf16.gmra.mxu0 %vm172_vm2, %v6905_v56  ;;  %10948 = vmatprep.mubr.msk.bf16.mxu1 %vm11444_vm1, %v11443_v1 }
 0x36a   : > { %5582 = vst.msk [vmem:[#allocation2 + $0xd8] sm:$0xff] %vm172_vm2, %v5548_v0  ;;  %v5066_v6 = vadd.f32 %v5021_v4, %v4579_v3  ;;  %10882 = vmatprep.mubr.msk.bf16.mxu0 %vm11444_vm1, %v11443_v1  ;;  %v10706_v14 = vpop.f32.mrf.mxu1  ;;  %v7470_v0 = vrot.slane %v13386_v53, 2  ;;  %v5625_v4 = vld [vmem:[#allocation2 + $0x8] sm:$0xff]  ;;  %v6936_v9 = vrot.slane %v6934_v60, 1 }
 0x36b   : > { %v5167_v10 = vld [vmem:[#allocation2 + $0xe0] sm:$0xff]  ;;  %v10640_v11 = vpop.f32.mrf.mxu0 }
 0x36c   : > { %v5549_v13 = vadd.f32 %v5498_v5, %v5167_v10  ;;  %5100 = vst.msk [vmem:[#allocation2 + $0xf0] sm:$0xff] %vm172_vm2, %v5066_v6  ;;  %v5501_v17 = vpop.f32.mrf.mxu1  ;;  %v6939_v10 = vrot.slane %v6937_v61, 2  ;;  %v11385_v11 = vld [vmem:[%s11566_s23 + $0x180] sm:$0xff]   ;;  %v7471_v14 = vsel %vm4187_vm6, %v7468_v39, %v7470_v0 }
 0x36d   : > { %v5024_v16 = vpop.f32.mrf.mxu0 }
 0x36e   : > { %5583 = vst.msk [vmem:[#allocation2 + $0xe0] sm:$0xff] %vm172_vm2, %v5549_v13  ;;  %v5067_v18 = vadd.f32 %v5024_v16, %v4580_v15  ;;  %v10707_v28 = vpop.f32.mrf.mxu1  ;;  %v13403_v15 = vld [vmem:[%s11566_s23 + $0x200] sm:$0xff]   ;;  %v6940_v22 = vor.u32 %v6939_v10, %v6936_v9 }
 0x36f   : > { %v5168_v23 = vld [vmem:[#allocation2 + $0xe8] sm:$0xff]  ;;  %v10641_v24 = vpop.f32.mrf.mxu0 }
 0x370   : > { %v5550_v27 = vadd.f32 %v5501_v17, %v5168_v23  ;;  %5101 = vst.msk [vmem:[#allocation2 + $0xf8] sm:$0xff] %vm172_vm2, %v5067_v18  ;;  %v5506_v31 = vpop.f32.mrf.mxu1  ;;  %10949 = vmatmul.mubr.msk.bf16.gmra.mxu1 %vm172_vm2, %v7467_v25  ;;  %v5626_v18 = vld [vmem:[#allocation2 + $0x10] sm:$0xff]  ;;  %v6943_v23 = vshrl.u32 %v11385_v11, 16  ;;  %v6946_v24 = vshll.u32 %v11385_v11, 16  ;;  %v6941_v34 = vsel %vm2964_vm5, %v6931_v59, %v6940_v22 }
 0x371   : > { %v5029_v30 = vpop.f32.mrf.mxu0  ;;  %10883 = vmatmul.mubr.msk.bf16.gmra.mxu0 %vm172_vm2, %v6914_v19  ;;  %10952 = vmatprep.mubr.msk.bf16.mxu1 %vm11444_vm1, %v11443_v1 }
 0x372   : > { %5584 = vst.msk [vmem:[#allocation2 + $0xe8] sm:$0xff] %vm172_vm2, %v5550_v27  ;;  %v5068_v32 = vadd.f32 %v5029_v30, %v4581_v29  ;;  %10886 = vmatprep.mubr.msk.bf16.mxu0 %vm11444_vm1, %v11443_v1  ;;  %v10710_v41 = vpop.f32.mrf.mxu1  ;;  %v7472_v27 = vrot.slane %v13403_v15, 2  ;;  %v5627_v30 = vld [vmem:[#allocation2 + $0x18] sm:$0xff]  ;;  %v6945_v35 = vrot.slane %v6943_v23, 1 }
 0x373   : > { %v5169_v36 = vld [vmem:[#allocation2 + $0xf0] sm:$0xff]  ;;  %v10644_v37 = vpop.f32.mrf.mxu0 }
 0x374   : > { %v5551_v40 = vadd.f32 %v5506_v31, %v5169_v36  ;;  %5102 = vst.msk [vmem:[#allocation2 + $0x100] sm:$0xff] %vm172_vm2, %v5068_v32  ;;  %v5509_v44 = vpop.f32.mrf.mxu1  ;;  %v6948_v36 = vrot.slane %v6946_v24, 2  ;;  %v11387_v37 = vld [vmem:[%s11566_s23 + $0x188] sm:$0xff]   ;;  %v7473_v41 = vsel %vm4187_vm6, %v7470_v0, %v7472_v27 }
 0x375   : > { %v5032_v43 = vpop.f32.mrf.mxu0 }
 0x376   : > { %5585 = vst.msk [vmem:[#allocation2 + $0xf0] sm:$0xff] %vm172_vm2, %v5551_v40  ;;  %v5069_v45 = vadd.f32 %v5032_v43, %v4582_v42  ;;  %v10711_v38 = vpop.f32.mrf.mxu1  ;;  %v13420_v42 = vld [vmem:[%s11566_s23 + $0x208] sm:$0xff]   ;;  %v6949_v49 = vor.u32 %v6948_v36, %v6945_v35 }
 0x377   : > { %v5170_v50 = vld [vmem:[#allocation2 + $0xf8] sm:$0xff]  ;;  %v10645_v51 = vpop.f32.mrf.mxu0 }
 0x378   : > { %v5552_v54 = vadd.f32 %v5509_v44, %v5170_v50  ;;  %5103 = vst.msk [vmem:[#allocation2 + $0x108] sm:$0xff] %vm172_vm2, %v5069_v45  ;;  %v5514_v57 = vpop.f32.mrf.mxu1  ;;  %10953 = vmatmul.mubr.msk.bf16.gmra.mxu1 %vm172_vm2, %v7469_v52  ;;  %v5628_v45 = vld [vmem:[#allocation2 + $0x20] sm:$0xff]  ;;  %v6952_v50 = vshrl.u32 %v11387_v37, 16  ;;  %v6955_v51 = vshll.u32 %v11387_v37, 16  ;;  %v6950_v60 = vsel %vm2964_vm5, %v6940_v22, %v6949_v49 }
 0x379   : > { %v5871_v56 = vpop.f32.mrf.mxu0  ;;  %10887 = vmatmul.mubr.msk.bf16.gmra.mxu0 %vm172_vm2, %v6923_v46  ;;  %10956 = vmatprep.mubr.msk.bf16.mxu1 %vm11444_vm1, %v11443_v1 }
 0x37a   : > { %5586 = vst.msk [vmem:[#allocation2 + $0xf8] sm:$0xff] %vm172_vm2, %v5552_v54  ;;  %v6006_v58 = vadd.f32 %v5871_v56, %v5624_v55  ;;  %10890 = vmatprep.mubr.msk.bf16.mxu0 %vm11444_vm1, %v11443_v1  ;;  %v10714_v3 = vpop.f32.mrf.mxu1  ;;  %v7474_v54 = vrot.slane %v13420_v42, 2  ;;  %v5629_v56 = vld [vmem:[#allocation2 + $0x28] sm:$0xff]  ;;  %v6954_v61 = vrot.slane %v6952_v50, 1 }
 0x37b   : > { %v5171_v62 = vld [vmem:[#allocation2 + $0x100] sm:$0xff]  ;;  %v10720_v63 = vpop.f32.mrf.mxu0 }
 0x37c   : > { %v5553_v2 = vadd.f32 %v5514_v57, %v5171_v62  ;;  %6040 = vst.msk [vmem:[#allocation2] sm:$0xff] %vm172_vm2, %v6006_v58  ;;  %v5517_v6 = vpop.f32.mrf.mxu1  ;;  %v6957_v62 = vrot.slane %v6955_v51, 2  ;;  %v11389_v63 = vld [vmem:[%s11566_s23 + $0x190] sm:$0xff]   ;;  %v7475_v3 = vsel %vm4187_vm6, %v7472_v27, %v7474_v54 }
 0x37d   : > { %v5874_v5 = vpop.f32.mrf.mxu0 }
 0x37e   : > { %5587 = vst.msk [vmem:[#allocation2 + $0x100] sm:$0xff] %vm172_vm2, %v5553_v2  ;;  %v6007_v7 = vadd.f32 %v5874_v5, %v5625_v4  ;;  %v10715_v17 = vpop.f32.mrf.mxu1  ;;  %v13437_v4 = vld [vmem:[%s11566_s23 + $0x210] sm:$0xff]   ;;  %v6958_v11 = vor.u32 %v6957_v62, %v6954_v61 }
 0x37f   : > { %v5172_v12 = vld [vmem:[#allocation2 + $0x108] sm:$0xff]  ;;  %v10721_v13 = vpop.f32.mrf.mxu0 }
 0x380   : > { %v5554_v16 = vadd.f32 %v5517_v6, %v5172_v12  ;;  %6041 = vst.msk [vmem:[#allocation2 + $0x8] sm:$0xff] %vm172_vm2, %v6007_v7  ;;  %v6482_v20 = vpop.f32.mrf.mxu1  ;;  %10957 = vmatmul.mubr.msk.bf16.gmra.mxu1 %vm172_vm2, %v7471_v14  ;;  %v5630_v7 = vld [vmem:[#allocation2 + $0x30] sm:$0xff]  ;;  %v6961_v12 = vshrl.u32 %v11389_v63, 16  ;;  %v6964_v13 = vshll.u32 %v11389_v63, 16  ;;  %v6959_v23 = vsel %vm2964_vm5, %v6949_v49, %v6958_v11 }
 0x381   : > { %v5879_v19 = vpop.f32.mrf.mxu0  ;;  %10891 = vmatmul.mubr.msk.bf16.gmra.mxu0 %vm172_vm2, %v6932_v8  ;;  %10960 = vmatprep.mubr.msk.bf16.mxu1 %vm11444_vm1, %v11443_v1 }
 0x382   : > { %5588 = vst.msk [vmem:[#allocation2 + $0x108] sm:$0xff] %vm172_vm2, %v5554_v16  ;;  %v6008_v21 = vadd.f32 %v5879_v19, %v5626_v18  ;;  %10894 = vmatprep.mubr.msk.bf16.mxu0 %vm11444_vm1, %v11443_v1  ;;  %v10790_v29 = vpop.f32.mrf.mxu1  ;;  %v7476_v16 = vrot.slane %v13437_v4, 2  ;;  %v5631_v19 = vld [vmem:[#allocation2 + $0x38] sm:$0xff]  ;;  %v6963_v24 = vrot.slane %v6961_v12, 1 }
 0x383   : > { %v6109_v25 = vld [vmem:[#allocation2] sm:$0xff]  ;;  %v10724_v26 = vpop.f32.mrf.mxu0 }
 0x384   : > { %v6617_v28 = vadd.f32 %v6482_v20, %v6109_v25  ;;  %6042 = vst.msk [vmem:[#allocation2 + $0x10] sm:$0xff] %vm172_vm2, %v6008_v21  ;;  %v6485_v32 = vpop.f32.mrf.mxu1  ;;  %v6966_v25 = vrot.slane %v6964_v13, 2  ;;  %v11391_v26 = vld [vmem:[%s11566_s23 + $0x198] sm:$0xff]   ;;  %v7477_v29 = vsel %vm4187_vm6, %v7474_v54, %v7476_v16 }
 0x385   : > { %v5882_v31 = vpop.f32.mrf.mxu0 }
 0x386   : > { %6651 = vst.msk [vmem:[#allocation2] sm:$0xff] %vm172_vm2, %v6617_v28  ;;  %v6009_v33 = vadd.f32 %v5882_v31, %v5627_v30  ;;  %v10791_v44 = vpop.f32.mrf.mxu1  ;;  %v13454_v30 = vld [vmem:[%s11566_s23 + $0x218] sm:$0xff]   ;;  %v6967_v37 = vor.u32 %v6966_v25, %v6963_v24 }
 0x387   : > { %v6110_v39 = vld [vmem:[#allocation2 + $0x8] sm:$0xff]  ;;  %v10725_v40 = vpop.f32.mrf.mxu0 }
 0x388   : > { %v6618_v43 = vadd.f32 %v6485_v32, %v6110_v39  ;;  %6043 = vst.msk [vmem:[#allocation2 + $0x18] sm:$0xff] %vm172_vm2, %v6009_v33  ;;  %v6490_v47 = vpop.f32.mrf.mxu1  ;;  %10961 = vmatmul.mubr.msk.bf16.gmra.mxu1 %vm172_vm2, %v7473_v41  ;;  %v5632_v33 = vld [vmem:[#allocation2 + $0x40] sm:$0xff]  ;;  %v6970_v39 = vshrl.u32 %v11391_v26, 16  ;;  %v6973_v40 = vshll.u32 %v11391_v26, 16  ;;  %v6968_v50 = vsel %vm2964_vm5, %v6958_v11, %v6967_v37 }
 0x389   : > { %v5887_v46 = vpop.f32.mrf.mxu0  ;;  %10895 = vmatmul.mubr.msk.bf16.gmra.mxu0 %vm172_vm2, %v6941_v34  ;;  %10964 = vmatprep.mubr.msk.bf16.mxu1 %vm11444_vm1, %v11443_v1 }
 0x38a   : > { %6652 = vst.msk [vmem:[#allocation2 + $0x8] sm:$0xff] %vm172_vm2, %v6618_v43  ;;  %v6010_v48 = vadd.f32 %v5887_v46, %v5628_v45  ;;  %10898 = vmatprep.mubr.msk.bf16.mxu0 %vm11444_vm1, %v11443_v1  ;;  %v10794_v55 = vpop.f32.mrf.mxu1  ;;  %v7478_v43 = vrot.slane %v13454_v30, 2  ;;  %v5633_v46 = vld [vmem:[#allocation2 + $0x48] sm:$0xff]  ;;  %v6972_v51 = vrot.slane %v6970_v39, 1 }
 0x38b   : > { %v6111_v52 = vld [vmem:[#allocation2 + $0x10] sm:$0xff]  ;;  %v10728_v53 = vpop.f32.mrf.mxu0 }
 0x38c   : > { %v6619_v38 = vadd.f32 %v6490_v47, %v6111_v52  ;;  %6044 = vst.msk [vmem:[#allocation2 + $0x20] sm:$0xff] %vm172_vm2, %v6010_v48  ;;  %v6493_v58 = vpop.f32.mrf.mxu1  ;;  %v6975_v52 = vrot.slane %v6973_v40, 2  ;;  %v11393_v53 = vld [vmem:[%s11566_s23 + $0x1a0] sm:$0xff]   ;;  %v7479_v55 = vsel %vm4187_vm6, %v7476_v16, %v7478_v43 }
 0x38d   : > { %v5890_v57 = vpop.f32.mrf.mxu0 }
 0x38e   : > { %6653 = vst.msk [vmem:[#allocation2 + $0x10] sm:$0xff] %vm172_vm2, %v6619_v38  ;;  %v6011_v59 = vadd.f32 %v5890_v57, %v5629_v56  ;;  %v10795_v6 = vpop.f32.mrf.mxu1  ;;  %v13471_v56 = vld [vmem:[%s11566_s23 + $0x220] sm:$0xff]   ;;  %v6976_v63 = vor.u32 %v6975_v52, %v6972_v51 }
 0x38f   : > { %v6112_v0 = vld [vmem:[#allocation2 + $0x18] sm:$0xff]  ;;  %v10729_v2 = vpop.f32.mrf.mxu0 }
 0x390   : > { %v6620_v5 = vadd.f32 %v6493_v58, %v6112_v0  ;;  %6045 = vst.msk [vmem:[#allocation2 + $0x28] sm:$0xff] %vm172_vm2, %v6011_v59  ;;  %v6498_v9 = vpop.f32.mrf.mxu1  ;;  %10965 = vmatmul.mubr.msk.bf16.gmra.mxu1 %vm172_vm2, %v7475_v3  ;;  %v5634_v59 = vld [vmem:[#allocation2 + $0x50] sm:$0xff]  ;;  %v6979_v0 = vshrl.u32 %v11393_v53, 16  ;;  %v6982_v2 = vshll.u32 %v11393_v53, 16  ;;  %v6977_v12 = vsel %vm2964_vm5, %v6967_v37, %v6976_v63 }
 0x391   : > { %v5895_v8 = vpop.f32.mrf.mxu0  ;;  %10899 = vmatmul.mubr.msk.bf16.gmra.mxu0 %vm172_vm2, %v6950_v60  ;;  %10968 = vmatprep.mubr.msk.bf16.mxu1 %vm11444_vm1, %v11443_v1 }
 0x392   : > { %6654 = vst.msk [vmem:[#allocation2 + $0x18] sm:$0xff] %vm172_vm2, %v6620_v5  ;;  %v6012_v10 = vadd.f32 %v5895_v8, %v5630_v7  ;;  %10902 = vmatprep.mubr.msk.bf16.mxu0 %vm11444_vm1, %v11443_v1  ;;  %v10798_v18 = vpop.f32.mrf.mxu1  ;;  %v7480_v5 = vrot.slane %v13471_v56, 2  ;;  %v5635_v8 = vld [vmem:[#allocation2 + $0x58] sm:$0xff]  ;;  %v6981_v13 = vrot.slane %v6979_v0, 1 }
 0x393   : > { %v6113_v14 = vld [vmem:[#allocation2 + $0x20] sm:$0xff]  ;;  %v10732_v15 = vpop.f32.mrf.mxu0 }
 0x394   : > { %v6621_v17 = vadd.f32 %v6498_v9, %v6113_v14  ;;  %6046 = vst.msk [vmem:[#allocation2 + $0x30] sm:$0xff] %vm172_vm2, %v6012_v10  ;;  %v6501_v21 = vpop.f32.mrf.mxu1  ;;  %v6984_v14 = vrot.slane %v6982_v2, 2  ;;  %v11395_v15 = vld [vmem:[%s11566_s23 + $0x1a8] sm:$0xff]   ;;  %v7481_v18 = vsel %vm4187_vm6, %v7478_v43, %v7480_v5 }
 0x395   : > { %v5898_v20 = vpop.f32.mrf.mxu0 }
 0x396   : > { %6655 = vst.msk [vmem:[#allocation2 + $0x20] sm:$0xff] %vm172_vm2, %v6621_v17  ;;  %v6013_v22 = vadd.f32 %v5898_v20, %v5631_v19  ;;  %v10799_v32 = vpop.f32.mrf.mxu1  ;;  %v13488_v19 = vld [vmem:[%s11566_s23 + $0x228] sm:$0xff]   ;;  %v6985_v26 = vor.u32 %v6984_v14, %v6981_v13 }
 0x397   : > { %v6114_v27 = vld [vmem:[#allocation2 + $0x28] sm:$0xff]  ;;  %v10733_v28 = vpop.f32.mrf.mxu0 }
 0x398   : > { %v6622_v31 = vadd.f32 %v6501_v21, %v6114_v27  ;;  %6047 = vst.msk [vmem:[#allocation2 + $0x38] sm:$0xff] %vm172_vm2, %v6013_v22  ;;  %v6506_v35 = vpop.f32.mrf.mxu1  ;;  %10969 = vmatmul.mubr.msk.bf16.gmra.mxu1 %vm172_vm2, %v7477_v29  ;;  %v5636_v22 = vld [vmem:[#allocation2 + $0x60] sm:$0xff]  ;;  %v6988_v27 = vshrl.u32 %v11395_v15, 16  ;;  %v6991_v28 = vshll.u32 %v11395_v15, 16  ;;  %v6986_v39 = vsel %vm2964_vm5, %v6976_v63, %v6985_v26 }
 0x399   : > { %v5903_v34 = vpop.f32.mrf.mxu0  ;;  %10903 = vmatmul.mubr.msk.bf16.gmra.mxu0 %vm172_vm2, %v6959_v23  ;;  %10972 = vmatprep.mubr.msk.bf16.mxu1 %vm11444_vm1, %v11443_v1 }
 0x39a   : > { %6656 = vst.msk [vmem:[#allocation2 + $0x28] sm:$0xff] %vm172_vm2, %v6622_v31  ;;  %v6014_v36 = vadd.f32 %v5903_v34, %v5632_v33  ;;  %10906 = vmatprep.mubr.msk.bf16.mxu0 %vm11444_vm1, %v11443_v1  ;;  %v10802_v45 = vpop.f32.mrf.mxu1  ;;  %v7482_v31 = vrot.slane %v13488_v19, 2  ;;  %v5637_v34 = vld [vmem:[#allocation2 + $0x68] sm:$0xff]  ;;  %v6990_v40 = vrot.slane %v6988_v27, 1  ;;  %v13538_v27 = vld [vmem:[%s11566_s23 + $0x130] sm:$0xff]  }
 0x39b   : > { %v6115_v41 = vld [vmem:[#allocation2 + $0x30] sm:$0xff]  ;;  %v10736_v42 = vpop.f32.mrf.mxu0 }
 0x39c   : > { %v6623_v44 = vadd.f32 %v6506_v35, %v6115_v41  ;;  %6048 = vst.msk [vmem:[#allocation2 + $0x40] sm:$0xff] %vm172_vm2, %v6014_v36  ;;  %v6509_v48 = vpop.f32.mrf.mxu1  ;;  %v6993_v41 = vrot.slane %v6991_v28, 2  ;;  %v11397_v42 = vld [vmem:[%s11566_s23 + $0x1b0] ss:$0 sps:$4 sm:$0x33]   ;;  %v7483_v45 = vsel %vm4187_vm6, %v7480_v5, %v7482_v31 }
 0x39d   : > { %v5906_v47 = vpop.f32.mrf.mxu0 }
 0x39e   : > { %6657 = vst.msk [vmem:[#allocation2 + $0x30] sm:$0xff] %vm172_vm2, %v6623_v44  ;;  %v6015_v49 = vadd.f32 %v5906_v47, %v5633_v46  ;;  %v10803_v58 = vpop.f32.mrf.mxu1  ;;  %v13505_v46 = vld [vmem:[%s11566_s23 + $0x230] sm:$0xff]   ;;  %v6994_v53 = vor.u32 %v6993_v41, %v6990_v40 }
 0x39f   : > { %v6116_v54 = vld [vmem:[#allocation2 + $0x38] sm:$0xff]  ;;  %v10737_v38 = vpop.f32.mrf.mxu0 }
 0x3a0   : > { %v6624_v57 = vadd.f32 %v6509_v48, %v6116_v54  ;;  %6049 = vst.msk [vmem:[#allocation2 + $0x48] sm:$0xff] %vm172_vm2, %v6015_v49  ;;  %v6514_v61 = vpop.f32.mrf.mxu1  ;;  %10973 = vmatmul.mubr.msk.bf16.gmra.mxu1 %vm172_vm2, %v7479_v55  ;;  %v5638_v49 = vld [vmem:[#allocation2 + $0x70] sm:$0xff]  ;;  %v6997_v54 = vshrl.u32 %v11397_v42, 16  ;;  %v7000_v38 = vshll.u32 %v11397_v42, 16  ;;  %v6995_v0 = vsel %vm2964_vm5, %v6985_v26, %v6994_v53  ;;  %v11399_v26 = vld [vmem:[%s11566_s23 + $0x128] sm:$0xfc]  }
 0x3a1   : > { %v5911_v60 = vpop.f32.mrf.mxu0  ;;  %10907 = vmatmul.mubr.msk.bf16.gmra.mxu0 %vm172_vm2, %v6968_v50  ;;  %10976 = vmatprep.mubr.msk.bf16.mxu1 %vm11444_vm1, %v11443_v1  ;;  %v7940_v41 = vrot.slane %v11399_v26, 2  ;;  %v7941_v42 = vrot.slane %v13538_v27, 2  ;;  %v11406_v27 = vld [vmem:[%s11566_s23 + $0x1d0] sm:$0xff]  }
 0x3a2   : > { %6658 = vst.msk [vmem:[#allocation2 + $0x38] sm:$0xff] %vm172_vm2, %v6624_v57  ;;  %v6016_v62 = vadd.f32 %v5911_v60, %v5634_v59  ;;  %10910 = vmatprep.mubr.msk.bf16.mxu0 %vm11444_vm1, %v11443_v1  ;;  %v10806_v7 = vpop.f32.mrf.mxu1  ;;  %v7484_v57 = vrot.slane %v13505_v46, 2  ;;  %v5639_v60 = vld [vmem:[#allocation2 + $0x78] sm:$0xff]  ;;  %v6999_v2 = vrot.slane %v6997_v54, 1 }
 0x3a3   : > { %v6117_v3 = vld [vmem:[#allocation2 + $0x40] sm:$0xff]  ;;  %v10740_v4 = vpop.f32.mrf.mxu0  ;;  %v13521_v7 = vld [vmem:[%s11566_s23 + $0x238] sm:$0xff]  }
 0x3a4   : > { %v6625_v6 = vadd.f32 %v6514_v61, %v6117_v3  ;;  %6050 = vst.msk [vmem:[#allocation2 + $0x50] sm:$0xff] %vm172_vm2, %v6016_v62  ;;  %v6517_v10 = vpop.f32.mrf.mxu1  ;;  %v7002_v3 = vrot.slane %v7000_v38, 2 }
 0x3a5   : > { %v5914_v9 = vpop.f32.mrf.mxu0 }
 0x3a6   : > { %6659 = vst.msk [vmem:[#allocation2 + $0x40] sm:$0xff] %vm172_vm2, %v6625_v6  ;;  %v6017_v11 = vadd.f32 %v5914_v9, %v5635_v8  ;;  %v10807_v21 = vpop.f32.mrf.mxu1  ;;  %v7485_v6 = vsel %vm4187_vm6, %v7482_v31, %v7484_v57  ;;  %v7003_v14 = vor.u32 %v7002_v3, %v6999_v2  ;;  %v11401_v31 = vld [vmem:[%s11566_s23 + $0x1b8] sm:$0xfc]   ;;  %v5644_v3 = vld [vmem:[#allocation2 + $0xa0] sm:$0xff] }
 0x3a7   : > { %v6118_v16 = vld [vmem:[#allocation2 + $0x48] sm:$0xff]  ;;  %v10741_v17 = vpop.f32.mrf.mxu0  ;;  %v8430_v46 = vshll.u32 %v11401_v31, 16 }
 0x3a8   : > { %v6626_v20 = vadd.f32 %v6517_v10, %v6118_v16  ;;  %6051 = vst.msk [vmem:[#allocation2 + $0x58] sm:$0xff] %vm172_vm2, %v6017_v11  ;;  %v6522_v24 = vpop.f32.mrf.mxu1  ;;  %10977 = vmatmul.mubr.msk.bf16.gmra.mxu1 %vm172_vm2, %v7481_v18  ;;  %v5640_v10 = vld [vmem:[#allocation2 + $0x80] sm:$0xff]  ;;  %v7486_v17 = vrot.slane %v13521_v7, 2 }
 0x3a9   : > { %v5919_v23 = vpop.f32.mrf.mxu0  ;;  %10911 = vmatmul.mubr.msk.bf16.gmra.mxu0 %vm172_vm2, %v6977_v12  ;;  %10980 = vmatprep.mubr.msk.bf16.mxu1 %vm11444_vm1, %v11443_v1 }
 0x3aa   : > { %6660 = vst.msk [vmem:[#allocation2 + $0x48] sm:$0xff] %vm172_vm2, %v6626_v20  ;;  %v6018_v25 = vadd.f32 %v5919_v23, %v5636_v22  ;;  %10914 = vmatprep.mubr.msk.bf16.mxu0 %vm11444_vm1, %v11443_v1  ;;  %v10810_v33 = vpop.f32.mrf.mxu1  ;;  %v5641_v20 = vld [vmem:[#allocation2 + $0x88] sm:$0xff] }
 0x3ab   : > { %v6119_v29 = vld [vmem:[#allocation2 + $0x50] sm:$0xff]  ;;  %v10744_v30 = vpop.f32.mrf.mxu0 }
 0x3ac   : > { %v6627_v32 = vadd.f32 %v6522_v24, %v6119_v29  ;;  %6052 = vst.msk [vmem:[#allocation2 + $0x60] sm:$0xff] %vm172_vm2, %v6018_v25  ;;  %v6525_v36 = vpop.f32.mrf.mxu1  ;;  %v7004_v24 = vsel %vm2964_vm5, %v6994_v53, %v7003_v14  ;;  %v11398_v25 = vld [vmem:[%s11566_s23 + $0x240] ss:$0 sps:$4 sm:$0x33]   ;;  %v7487_v30 = vsel %vm4187_vm6, %v7484_v57, %v7486_v17 }
 0x3ad   : > { %v5922_v35 = vpop.f32.mrf.mxu0  ;;  %v7488_v40 = vrot.slane %v11398_v25, 2 }
 0x3ae   : > { %6661 = vst.msk [vmem:[#allocation2 + $0x50] sm:$0xff] %vm172_vm2, %v6627_v32  ;;  %v6019_v37 = vadd.f32 %v5922_v35, %v5637_v34  ;;  %v10811_v48 = vpop.f32.mrf.mxu1  ;;  %v11402_v32 = vld [vmem:[%s11566_s23 + $0x1c0] sm:$0xff]   ;;  %v5642_v35 = vld [vmem:[#allocation2 + $0x90] sm:$0xff] }
 0x3af   : > { %v6120_v43 = vld [vmem:[#allocation2 + $0x58] sm:$0xff]  ;;  %v10745_v44 = vpop.f32.mrf.mxu0  ;;  %v8438_v48 = vshll.u32 %v11402_v32, 16  ;;  %v7489_v38 = vsel %vm4187_vm6, %v7486_v17, %v7488_v40  ;;  %v8456_v40 = vshll.u32 %v11406_v27, 16 }
 0x3b0   : > { %v6628_v47 = vadd.f32 %v6525_v36, %v6120_v43  ;;  %6053 = vst.msk [vmem:[#allocation2 + $0x68] sm:$0xff] %vm172_vm2, %v6019_v37  ;;  %v6530_v51 = vpop.f32.mrf.mxu1  ;;  %10981 = vmatmul.mubr.msk.bf16.gmra.mxu1 %vm172_vm2, %v7483_v45  ;;  %v8427_v45 = vshrl.u32 %v11401_v31, 16 }
 0x3b1   : > { %v5927_v50 = vpop.f32.mrf.mxu0  ;;  %10915 = vmatmul.mubr.msk.bf16.gmra.mxu0 %vm172_vm2, %v6986_v39  ;;  %10984 = vmatprep.mubr.msk.bf16.mxu1 %vm11444_vm1, %v11443_v1 }
 0x3b2   : > { %6662 = vst.msk [vmem:[#allocation2 + $0x58] sm:$0xff] %vm172_vm2, %v6628_v47  ;;  %v6020_v52 = vadd.f32 %v5927_v50, %v5638_v49  ;;  %10918 = vmatprep.mubr.msk.bf16.mxu0 %vm11444_vm1, %v11443_v1  ;;  %v10814_v59 = vpop.f32.mrf.mxu1  ;;  %v8435_v47 = vshrl.u32 %v11402_v32, 16 }
 0x3b3   : > { %v6121_v55 = vld [vmem:[#allocation2 + $0x60] sm:$0xff]  ;;  %v10748_v56 = vpop.f32.mrf.mxu0  ;;  %v8429_v59 = vrot.slane %v8427_v45, 2 }
 0x3b4   : > { %v6629_v58 = vadd.f32 %v6530_v51, %v6121_v55  ;;  %6054 = vst.msk [vmem:[#allocation2 + $0x70] sm:$0xff] %vm172_vm2, %v6020_v52  ;;  %v6533_v62 = vpop.f32.mrf.mxu1  ;;  %v5643_v51 = vld [vmem:[#allocation2 + $0x98] sm:$0xff]  ;;  %v7942_v55 = vsel %vm4187_vm6, %v7940_v41, %v7941_v42 }
 0x3b5   : > { %v5930_v61 = vpop.f32.mrf.mxu0  ;;  %v13557_v56 = vld [vmem:[%s11566_s23 + $0x138] sm:$0xff]  }
 0x3b6   : > { %6663 = vst.msk [vmem:[#allocation2 + $0x60] sm:$0xff] %vm172_vm2, %v6629_v58  ;;  %v6021_v63 = vadd.f32 %v5930_v61, %v5639_v60  ;;  %v10815_v9 = vpop.f32.mrf.mxu1  ;;  %v8432_v60 = vrot.slane %v8430_v46, 3  ;;  %v8437_v61 = vrot.slane %v8435_v47, 2  ;;  %v7943_v7 = vrot.slane %v13557_v56, 2  ;;  %v5648_v56 = vld [vmem:[#allocation2 + $0xc0] sm:$0xff] }
 0x3b7   : > { %v6122_v4 = vld [vmem:[#allocation2 + $0x68] sm:$0xff]  ;;  %v10749_v5 = vpop.f32.mrf.mxu0 }
 0x3b8   : > { %v6630_v8 = vadd.f32 %v6533_v62, %v6122_v4  ;;  %6055 = vst.msk [vmem:[#allocation2 + $0x78] sm:$0xff] %vm172_vm2, %v6021_v63  ;;  %v6538_v12 = vpop.f32.mrf.mxu1  ;;  %10985 = vmatmul.mubr.msk.bf16.gmra.mxu1 %vm172_vm2, %v7485_v6  ;;  %v8440_v62 = vrot.slane %v8438_v48, 3  ;;  %v11404_v63 = vld [vmem:[%s11566_s23 + $0x1c8] sm:$0xff]  }
 0x3b9   : > { %v5935_v11 = vpop.f32.mrf.mxu0  ;;  %10919 = vmatmul.mubr.msk.bf16.gmra.mxu0 %vm172_vm2, %v6995_v0  ;;  %10988 = vmatprep.mubr.msk.bf16.mxu1 %vm11444_vm1, %v11443_v1  ;;  %v13590_v48 = vld [vmem:[%s11566_s23 + $0x148] sm:$0xff]  }
 0x3ba   : > { %6664 = vst.msk [vmem:[#allocation2 + $0x68] sm:$0xff] %vm172_vm2, %v6630_v8  ;;  %v6022_v13 = vadd.f32 %v5935_v11, %v5640_v10  ;;  %10922 = vmatprep.mubr.msk.bf16.mxu0 %vm11444_vm1, %v11443_v1  ;;  %v10818_v19 = vpop.f32.mrf.mxu1  ;;  %v8433_v10 = vor.u32 %v8432_v60, %v8429_v59  ;;  %v8441_v11 = vor.u32 %v8440_v62, %v8437_v61  ;;  %v7947_v60 = vrot.slane %v13590_v48, 2 }
 0x3bb   : > { %v6123_v15 = vld [vmem:[#allocation2 + $0x70] sm:$0xff]  ;;  %v10752_v16 = vpop.f32.mrf.mxu0 }
 0x3bc   : > { %v6631_v18 = vadd.f32 %v6538_v12, %v6123_v15  ;;  %6056 = vst.msk [vmem:[#allocation2 + $0x80] sm:$0xff] %vm172_vm2, %v6022_v13  ;;  %v6541_v22 = vpop.f32.mrf.mxu1  ;;  %v8444_v12 = vshrl.u32 %v11404_v63, 16  ;;  %v8447_v13 = vshll.u32 %v11404_v63, 16  ;;  %v5645_v16 = vld [vmem:[#allocation2 + $0xa8] sm:$0xff] }
 0x3bd   : > { %v5938_v21 = vpop.f32.mrf.mxu0 }
 0x3be   : > { %6665 = vst.msk [vmem:[#allocation2 + $0x70] sm:$0xff] %vm172_vm2, %v6631_v18  ;;  %v6023_v23 = vadd.f32 %v5938_v21, %v5641_v20  ;;  %v10819_v34 = vpop.f32.mrf.mxu1  ;;  %v7944_v20 = vsel %vm4187_vm6, %v7941_v42, %v7943_v7  ;;  %v13573_v21 = vld [vmem:[%s11566_s23 + $0x140] sm:$0xff]   ;;  %v8446_v25 = vrot.slane %v8444_v12, 2  ;;  %v8449_v26 = vrot.slane %v8447_v13, 3 }
 0x3bf   : > { %v6124_v28 = vld [vmem:[#allocation2 + $0x78] sm:$0xff]  ;;  %v10753_v29 = vpop.f32.mrf.mxu0  ;;  %v7945_v34 = vrot.slane %v13573_v21, 2 }
 0x3c0   : > { %v6632_v33 = vadd.f32 %v6541_v22, %v6124_v28  ;;  %6057 = vst.msk [vmem:[#allocation2 + $0x88] sm:$0xff] %vm172_vm2, %v6023_v23  ;;  %v6546_v37 = vpop.f32.mrf.mxu1  ;;  %10989 = vmatmul.mubr.msk.bf16.gmra.mxu1 %vm172_vm2, %v7487_v30  ;;  %v5646_v30 = vld [vmem:[#allocation2 + $0xb0] sm:$0xff] }
 0x3c1   : > { %v5943_v36 = vpop.f32.mrf.mxu0  ;;  %10923 = vmatmul.mubr.msk.bf16.gmra.mxu0 %vm172_vm2, %v7004_v24  ;;  %10992 = vmatprep.mubr.msk.bf16.mxu1 %vm11444_vm1, %v11443_v1  ;;  %v8442_v24 = vsel %vm8425_vm7, %v8433_v10, %v8441_v11  ;;  %v7946_v47 = vsel %vm4187_vm6, %v7943_v7, %v7945_v34  ;;  %v13607_v10 = vld [vmem:[%s11566_s23 + $0x150] sm:$0xff]  }
 0x3c2   : > { %6666 = vst.msk [vmem:[#allocation2 + $0x78] sm:$0xff] %vm172_vm2, %v6632_v33  ;;  %v6024_v39 = vadd.f32 %v5943_v36, %v5642_v35  ;;  %10998 = vmatprep.mubr.msk.bf16.mxu0 %vm11444_vm1, %v11443_v1  ;;  %v10822_v50 = vpop.f32.mrf.mxu1 }
 0x3c3   : > { %v6125_v43 = vld [vmem:[#allocation2 + $0x80] sm:$0xff]  ;;  %v10756_v44 = vpop.f32.mrf.mxu0 }
 0x3c4   : > { %v6633_v49 = vadd.f32 %v6546_v37, %v6125_v43  ;;  %6058 = vst.msk [vmem:[#allocation2 + $0x90] sm:$0xff] %vm172_vm2, %v6024_v39  ;;  %v6549_v53 = vpop.f32.mrf.mxu1  ;;  %v8450_v37 = vor.u32 %v8449_v26, %v8446_v25  ;;  %v8453_v39 = vshrl.u32 %v11406_v27, 16  ;;  %v5647_v43 = vld [vmem:[#allocation2 + $0xb8] sm:$0xff] }
 0x3c5   : > { %v5946_v52 = vpop.f32.mrf.mxu0 }
 0x3c6   : > { %6667 = vst.msk [vmem:[#allocation2 + $0x80] sm:$0xff] %vm172_vm2, %v6633_v49  ;;  %v6025_v54 = vadd.f32 %v5946_v52, %v5643_v51  ;;  %v10823_v2 = vpop.f32.mrf.mxu1  ;;  %v8451_v51 = vsel %vm8425_vm7, %v8441_v11, %v8450_v37  ;;  %v8455_v52 = vrot.slane %v8453_v39, 2 }
 0x3c7   : > { %v6126_v57 = vld [vmem:[#allocation2 + $0x88] sm:$0xff]  ;;  %v10757_v58 = vpop.f32.mrf.mxu0 }
 0x3c8   : > { %v6634_v0 = vadd.f32 %v6549_v53, %v6126_v57  ;;  %6059 = vst.msk [vmem:[#allocation2 + $0x98] sm:$0xff] %vm172_vm2, %v6025_v54  ;;  %v6554_v5 = vpop.f32.mrf.mxu1  ;;  %10993 = vmatmul.mubr.msk.bf16.gmra.mxu1 %vm172_vm2, %v7489_v38  ;;  %v8458_v53 = vrot.slane %v8456_v40, 3  ;;  %v11408_v54 = vld [vmem:[%s11566_s23 + $0x1d8] sm:$0xff]  }
 0x3c9   : > { %v5951_v4 = vpop.f32.mrf.mxu0  ;;  %10999 = vmatmul.mubr.msk.bf16.vlgmr.msra.gmra.mxu0 %vm172_vm2, %v7942_v55  ;;  %11068 = vmatprep.mubr.msk.bf16.mxu1 %vm11444_vm1, %v11443_v1  ;;  %v8465_v2 = vshll.u32 %v11408_v54, 16 }
 0x3ca   : > { %6668 = vst.msk [vmem:[#allocation2 + $0x88] sm:$0xff] %vm172_vm2, %v6634_v0  ;;  %v6026_v6 = vadd.f32 %v5951_v4, %v5644_v3  ;;  %11002 = vmatprep.mubr.msk.bf16.mxu0 %vm11444_vm1, %v11443_v1  ;;  %v10826_v15 = vpop.f32.mrf.mxu1  ;;  %v8459_v63 = vor.u32 %v8458_v53, %v8455_v52  ;;  %v8462_v0 = vshrl.u32 %v11408_v54, 16 }
 0x3cb   : > { %v6127_v8 = vld [vmem:[#allocation2 + $0x90] sm:$0xff]  ;;  %v10760_v9 = vpop.f32.mrf.mxu0  ;;  %v8467_v15 = vrot.slane %v8465_v2, 3 }
 0x3cc   : > { %v6635_v14 = vadd.f32 %v6554_v5, %v6127_v8  ;;  %6060 = vst.msk [vmem:[#allocation2 + $0xa0] sm:$0xff] %vm172_vm2, %v6026_v6  ;;  %v6557_v18 = vpop.f32.mrf.mxu1  ;;  %v5649_v5 = vld [vmem:[#allocation2 + $0xc8] sm:$0xff]  ;;  %v7948_v9 = vsel %vm4187_vm6, %v7945_v34, %v7947_v60  ;;  %v8460_v13 = vsel %vm8425_vm7, %v8450_v37, %v8459_v63 }
 0x3cd   : > { %v5954_v17 = vpop.f32.mrf.mxu0 }
 0x3ce   : > { %6669 = vst.msk [vmem:[#allocation2 + $0x90] sm:$0xff] %vm172_vm2, %v6635_v14  ;;  %v6027_v19 = vadd.f32 %v5954_v17, %v5645_v16  ;;  %v10827_v29 = vpop.f32.mrf.mxu1  ;;  %v8464_v14 = vrot.slane %v8462_v0, 2  ;;  %v11410_v16 = vld [vmem:[%s11566_s23 + $0x1e0] sm:$0xff]  }
 0x3cf   : > { %v6128_v22 = vld [vmem:[#allocation2 + $0x98] sm:$0xff]  ;;  %v10761_v23 = vpop.f32.mrf.mxu0  ;;  %v8471_v27 = vshrl.u32 %v11410_v16, 16 }
 0x3d0   : > { %v6636_v28 = vadd.f32 %v6557_v18, %v6128_v22  ;;  %6061 = vst.msk [vmem:[#allocation2 + $0xa8] sm:$0xff] %vm172_vm2, %v6027_v19  ;;  %v6562_v32 = vpop.f32.mrf.mxu1  ;;  %11069 = vmatmul.mubr.msk.bf16.vlgmr.msra.gmra.mxu1 %vm172_vm2, %v8442_v24  ;;  %v5650_v19 = vld [vmem:[#allocation2 + $0xd0] sm:$0xff]  ;;  %v7949_v23 = vrot.slane %v13607_v10, 2  ;;  %v8468_v26 = vor.u32 %v8467_v15, %v8464_v14 }
 0x3d1   : > { %v5959_v31 = vpop.f32.mrf.mxu0  ;;  %11003 = vmatmul.mubr.msk.bf16.gmra.mxu0 %vm172_vm2, %v7944_v20  ;;  %11072 = vmatprep.mubr.msk.bf16.mxu1 %vm11444_vm1, %v11443_v1 }
 0x3d2   : > { %6670 = vst.msk [vmem:[#allocation2 + $0x98] sm:$0xff] %vm172_vm2, %v6636_v28  ;;  %v6028_v33 = vadd.f32 %v5959_v31, %v5646_v30  ;;  %11006 = vmatprep.mubr.msk.bf16.mxu0 %vm11444_vm1, %v11443_v1  ;;  %v10830_v42 = vpop.f32.mrf.mxu1  ;;  %v8474_v28 = vshll.u32 %v11410_v16, 16  ;;  %v5651_v31 = vld [vmem:[#allocation2 + $0xd8] sm:$0xff]  ;;  %v8469_v40 = vsel %vm8425_vm7, %v8459_v63, %v8468_v26 }
 0x3d3   : > { %v6129_v35 = vld [vmem:[#allocation2 + $0xa0] sm:$0xff]  ;;  %v10764_v36 = vpop.f32.mrf.mxu0 }
 0x3d4   : > { %v6637_v41 = vadd.f32 %v6562_v32, %v6129_v35  ;;  %6062 = vst.msk [vmem:[#allocation2 + $0xb0] sm:$0xff] %vm172_vm2, %v6028_v33  ;;  %v6565_v45 = vpop.f32.mrf.mxu1  ;;  %v7950_v35 = vsel %vm4187_vm6, %v7947_v60, %v7949_v23  ;;  %v13624_v36 = vld [vmem:[%s11566_s23 + $0x158] sm:$0xff]   ;;  %v8476_v42 = vrot.slane %v8474_v28, 3 }
 0x3d5   : > { %v5962_v44 = vpop.f32.mrf.mxu0 }
 0x3d6   : > { %6671 = vst.msk [vmem:[#allocation2 + $0xa0] sm:$0xff] %vm172_vm2, %v6637_v41  ;;  %v6029_v46 = vadd.f32 %v5962_v44, %v5647_v43  ;;  %v10831_v55 = vpop.f32.mrf.mxu1  ;;  %v8473_v41 = vrot.slane %v8471_v27, 2  ;;  %v11412_v43 = vld [vmem:[%s11566_s23 + $0x1e8] sm:$0xff]  }
 0x3d7   : > { %v6130_v49 = vld [vmem:[#allocation2 + $0xa8] sm:$0xff]  ;;  %v10765_v50 = vpop.f32.mrf.mxu0  ;;  %v8480_v54 = vshrl.u32 %v11412_v43, 16 }
 0x3d8   : > { %v6638_v38 = vadd.f32 %v6565_v45, %v6130_v49  ;;  %6063 = vst.msk [vmem:[#allocation2 + $0xb8] sm:$0xff] %vm172_vm2, %v6029_v46  ;;  %v6570_v58 = vpop.f32.mrf.mxu1  ;;  %11073 = vmatmul.mubr.msk.bf16.gmra.mxu1 %vm172_vm2, %v8451_v51  ;;  %v5652_v46 = vld [vmem:[#allocation2 + $0xe0] sm:$0xff]  ;;  %v7951_v50 = vrot.slane %v13624_v36, 2  ;;  %v8477_v53 = vor.u32 %v8476_v42, %v8473_v41 }
 0x3d9   : > { %v5967_v57 = vpop.f32.mrf.mxu0  ;;  %11007 = vmatmul.mubr.msk.bf16.gmra.mxu0 %vm172_vm2, %v7946_v47  ;;  %11076 = vmatprep.mubr.msk.bf16.mxu1 %vm11444_vm1, %v11443_v1 }
 0x3da   : > { %6672 = vst.msk [vmem:[#allocation2 + $0xa8] sm:$0xff] %vm172_vm2, %v6638_v38  ;;  %v6030_v59 = vadd.f32 %v5967_v57, %v5648_v56  ;;  %11010 = vmatprep.mubr.msk.bf16.mxu0 %vm11444_vm1, %v11443_v1  ;;  %v10834_v4 = vpop.f32.mrf.mxu1  ;;  %v8483_v38 = vshll.u32 %v11412_v43, 16  ;;  %v5653_v57 = vld [vmem:[#allocation2 + $0xe8] sm:$0xff]  ;;  %v8478_v2 = vsel %vm8425_vm7, %v8468_v26, %v8477_v53 }
 0x3db   : > { %v6131_v61 = vld [vmem:[#allocation2 + $0xb0] sm:$0xff]  ;;  %v10768_v62 = vpop.f32.mrf.mxu0 }
 0x3dc   : > { %v6639_v3 = vadd.f32 %v6570_v58, %v6131_v61  ;;  %6064 = vst.msk [vmem:[#allocation2 + $0xc0] sm:$0xff] %vm172_vm2, %v6030_v59  ;;  %v6573_v7 = vpop.f32.mrf.mxu1  ;;  %v7952_v61 = vsel %vm4187_vm6, %v7949_v23, %v7951_v50  ;;  %v13641_v62 = vld [vmem:[%s11566_s23 + $0x160] sm:$0xff]   ;;  %v8485_v4 = vrot.slane %v8483_v38, 3 }
 0x3dd   : > { %v5970_v6 = vpop.f32.mrf.mxu0 }
 0x3de   : > { %6673 = vst.msk [vmem:[#allocation2 + $0xb0] sm:$0xff] %vm172_vm2, %v6639_v3  ;;  %v6031_v8 = vadd.f32 %v5970_v6, %v5649_v5  ;;  %v10835_v18 = vpop.f32.mrf.mxu1  ;;  %v8482_v3 = vrot.slane %v8480_v54, 2  ;;  %v11414_v5 = vld [vmem:[%s11566_s23 + $0x1f0] sm:$0xff]  }
 0x3df   : > { %v6132_v11 = vld [vmem:[#allocation2 + $0xb8] sm:$0xff]  ;;  %v10769_v12 = vpop.f32.mrf.mxu0  ;;  %v8489_v16 = vshrl.u32 %v11414_v5, 16 }
 0x3e0   : > { %v6640_v17 = vadd.f32 %v6573_v7, %v6132_v11  ;;  %6065 = vst.msk [vmem:[#allocation2 + $0xc8] sm:$0xff] %vm172_vm2, %v6031_v8  ;;  %v6578_v21 = vpop.f32.mrf.mxu1  ;;  %11077 = vmatmul.mubr.msk.bf16.gmra.mxu1 %vm172_vm2, %v8460_v13  ;;  %v5654_v8 = vld [vmem:[#allocation2 + $0xf0] sm:$0xff]  ;;  %v7953_v12 = vrot.slane %v13641_v62, 2  ;;  %v8486_v15 = vor.u32 %v8485_v4, %v8482_v3 }
 0x3e1   : > { %v5975_v20 = vpop.f32.mrf.mxu0  ;;  %11011 = vmatmul.mubr.msk.bf16.gmra.mxu0 %vm172_vm2, %v7948_v9  ;;  %11080 = vmatprep.mubr.msk.bf16.mxu1 %vm11444_vm1, %v11443_v1 }
 0x3e2   : > { %6674 = vst.msk [vmem:[#allocation2 + $0xb8] sm:$0xff] %vm172_vm2, %v6640_v17  ;;  %v6032_v22 = vadd.f32 %v5975_v20, %v5650_v19  ;;  %11014 = vmatprep.mubr.msk.bf16.mxu0 %vm11444_vm1, %v11443_v1  ;;  %v10838_v30 = vpop.f32.mrf.mxu1  ;;  %v8492_v17 = vshll.u32 %v11414_v5, 16  ;;  %v5655_v20 = vld [vmem:[#allocation2 + $0xf8] sm:$0xff]  ;;  %v8487_v28 = vsel %vm8425_vm7, %v8477_v53, %v8486_v15 }
 0x3e3   : > { %v6133_v24 = vld [vmem:[#allocation2 + $0xc0] sm:$0xff]  ;;  %v10772_v25 = vpop.f32.mrf.mxu0 }
 0x3e4   : > { %v6641_v29 = vadd.f32 %v6578_v21, %v6133_v24  ;;  %6066 = vst.msk [vmem:[#allocation2 + $0xd0] sm:$0xff] %vm172_vm2, %v6032_v22  ;;  %v6581_v33 = vpop.f32.mrf.mxu1  ;;  %v7954_v24 = vsel %vm4187_vm6, %v7951_v50, %v7953_v12  ;;  %v13658_v25 = vld [vmem:[%s11566_s23 + $0x168] sm:$0xff]   ;;  %v8494_v30 = vrot.slane %v8492_v17, 3 }
 0x3e5   : > { %v5978_v32 = vpop.f32.mrf.mxu0 }
 0x3e6   : > { %6675 = vst.msk [vmem:[#allocation2 + $0xc0] sm:$0xff] %vm172_vm2, %v6641_v29  ;;  %v6033_v34 = vadd.f32 %v5978_v32, %v5651_v31  ;;  %v10839_v45 = vpop.f32.mrf.mxu1  ;;  %v8491_v29 = vrot.slane %v8489_v16, 2  ;;  %v11416_v31 = vld [vmem:[%s11566_s23 + $0x1f8] sm:$0xff]  }
 0x3e7   : > { %v6134_v37 = vld [vmem:[#allocation2 + $0xc8] sm:$0xff]  ;;  %v10773_v39 = vpop.f32.mrf.mxu0  ;;  %v8498_v43 = vshrl.u32 %v11416_v31, 16 }
 0x3e8   : > { %v6642_v44 = vadd.f32 %v6581_v33, %v6134_v37  ;;  %6067 = vst.msk [vmem:[#allocation2 + $0xd8] sm:$0xff] %vm172_vm2, %v6033_v34  ;;  %v6586_v48 = vpop.f32.mrf.mxu1  ;;  %11081 = vmatmul.mubr.msk.bf16.gmra.mxu1 %vm172_vm2, %v8469_v40  ;;  %v5656_v34 = vld [vmem:[#allocation2 + $0x100] sm:$0xff]  ;;  %v7955_v39 = vrot.slane %v13658_v25, 2  ;;  %v8495_v42 = vor.u32 %v8494_v30, %v8491_v29 }
 0x3e9   : > { %v5983_v47 = vpop.f32.mrf.mxu0  ;;  %11015 = vmatmul.mubr.msk.bf16.gmra.mxu0 %vm172_vm2, %v7950_v35  ;;  %11084 = vmatprep.mubr.msk.bf16.mxu1 %vm11444_vm1, %v11443_v1 }
 0x3ea   : > { %6676 = vst.msk [vmem:[#allocation2 + $0xc8] sm:$0xff] %vm172_vm2, %v6642_v44  ;;  %v6034_v49 = vadd.f32 %v5983_v47, %v5652_v46  ;;  %11018 = vmatprep.mubr.msk.bf16.mxu0 %vm11444_vm1, %v11443_v1  ;;  %v10842_v56 = vpop.f32.mrf.mxu1  ;;  %v8501_v44 = vshll.u32 %v11416_v31, 16  ;;  %v5657_v47 = vld [vmem:[#allocation2 + $0x108] sm:$0xff]  ;;  %v8496_v38 = vsel %vm8425_vm7, %v8486_v15, %v8495_v42 }
 0x3eb   : > { %v6135_v51 = vld [vmem:[#allocation2 + $0xd0] sm:$0xff]  ;;  %v10776_v52 = vpop.f32.mrf.mxu0 }
 0x3ec   : > { %v6643_v55 = vadd.f32 %v6586_v48, %v6135_v51  ;;  %6068 = vst.msk [vmem:[#allocation2 + $0xe0] sm:$0xff] %vm172_vm2, %v6034_v49  ;;  %v6589_v59 = vpop.f32.mrf.mxu1  ;;  %v7956_v51 = vsel %vm4187_vm6, %v7953_v12, %v7955_v39  ;;  %v13675_v52 = vld [vmem:[%s11566_s23 + $0x170] sm:$0xff]   ;;  %v8503_v56 = vrot.slane %v8501_v44, 3 }
 0x3ed   : > { %v5986_v58 = vpop.f32.mrf.mxu0 }
 0x3ee   : > { %6677 = vst.msk [vmem:[#allocation2 + $0xd0] sm:$0xff] %vm172_vm2, %v6643_v55  ;;  %v6035_v60 = vadd.f32 %v5986_v58, %v5653_v57  ;;  %v10843_v7 = vpop.f32.mrf.mxu1  ;;  %v8500_v55 = vrot.slane %v8498_v43, 2  ;;  %v11418_v57 = vld [vmem:[%s11566_s23 + $0x200] sm:$0xff]  }
 0x3ef   : > { %v6136_v63 = vld [vmem:[#allocation2 + $0xd8] sm:$0xff]  ;;  %v10777_v0 = vpop.f32.mrf.mxu0  ;;  %v8507_v5 = vshrl.u32 %v11418_v57, 16 }
 0x3f0   : > { %v6644_v6 = vadd.f32 %v6589_v59, %v6136_v63  ;;  %6069 = vst.msk [vmem:[#allocation2 + $0xe8] sm:$0xff] %vm172_vm2, %v6035_v60  ;;  %v6594_v10 = vpop.f32.mrf.mxu1  ;;  %11085 = vmatmul.mubr.msk.bf16.gmra.mxu1 %vm172_vm2, %v8478_v2  ;;  %v6720_v60 = vld [vmem:[#allocation2] sm:$0xff]  ;;  %v7957_v0 = vrot.slane %v13675_v52, 2  ;;  %v8504_v4 = vor.u32 %v8503_v56, %v8500_v55 }
 0x3f1   : > { %v5991_v9 = vpop.f32.mrf.mxu0  ;;  %11019 = vmatmul.mubr.msk.bf16.gmra.mxu0 %vm172_vm2, %v7952_v61  ;;  %11088 = vmatprep.mubr.msk.bf16.mxu1 %vm11444_vm1, %v11443_v1 }
 0x3f2   : > { %6678 = vst.msk [vmem:[#allocation2 + $0xd8] sm:$0xff] %vm172_vm2, %v6644_v6  ;;  %v6036_v11 = vadd.f32 %v5991_v9, %v5654_v8  ;;  %11022 = vmatprep.mubr.msk.bf16.mxu0 %vm11444_vm1, %v11443_v1  ;;  %v10846_v19 = vpop.f32.mrf.mxu1  ;;  %v8510_v6 = vshll.u32 %v11418_v57, 16  ;;  %v6721_v9 = vld [vmem:[#allocation2 + $0x8] sm:$0xff]  ;;  %v8505_v17 = vsel %vm8425_vm7, %v8495_v42, %v8504_v4 }
 0x3f3   : > { %v6137_v13 = vld [vmem:[#allocation2 + $0xe0] sm:$0xff]  ;;  %v10780_v14 = vpop.f32.mrf.mxu0 }
 0x3f4   : > { %v6645_v18 = vadd.f32 %v6594_v10, %v6137_v13  ;;  %6070 = vst.msk [vmem:[#allocation2 + $0xf0] sm:$0xff] %vm172_vm2, %v6036_v11  ;;  %v6597_v22 = vpop.f32.mrf.mxu1  ;;  %v7958_v13 = vsel %vm4187_vm6, %v7955_v39, %v7957_v0  ;;  %v13692_v14 = vld [vmem:[%s11566_s23 + $0x178] sm:$0xff]   ;;  %v8512_v19 = vrot.slane %v8510_v6, 3 }
 0x3f5   : > { %v5994_v21 = vpop.f32.mrf.mxu0 }
 0x3f6   : > { %6679 = vst.msk [vmem:[#allocation2 + $0xe0] sm:$0xff] %vm172_vm2, %v6645_v18  ;;  %v6037_v23 = vadd.f32 %v5994_v21, %v5655_v20  ;;  %v10847_v33 = vpop.f32.mrf.mxu1  ;;  %v8509_v18 = vrot.slane %v8507_v5, 2  ;;  %v11420_v20 = vld [vmem:[%s11566_s23 + $0x208] sm:$0xff]  }
 0x3f7   : > { %v6138_v26 = vld [vmem:[#allocation2 + $0xe8] sm:$0xff]  ;;  %v10781_v27 = vpop.f32.mrf.mxu0  ;;  %v8516_v31 = vshrl.u32 %v11420_v20, 16 }
 0x3f8   : > { %v6646_v32 = vadd.f32 %v6597_v22, %v6138_v26  ;;  %6071 = vst.msk [vmem:[#allocation2 + $0xf8] sm:$0xff] %vm172_vm2, %v6037_v23  ;;  %v6602_v36 = vpop.f32.mrf.mxu1  ;;  %11089 = vmatmul.mubr.msk.bf16.gmra.mxu1 %vm172_vm2, %v8487_v28  ;;  %v6722_v23 = vld [vmem:[#allocation2 + $0x10] sm:$0xff]  ;;  %v7959_v27 = vrot.slane %v13692_v14, 2  ;;  %v8513_v30 = vor.u32 %v8512_v19, %v8509_v18 }
 0x3f9   : > { %v5999_v35 = vpop.f32.mrf.mxu0  ;;  %11023 = vmatmul.mubr.msk.bf16.gmra.mxu0 %vm172_vm2, %v7954_v24  ;;  %11092 = vmatprep.mubr.msk.bf16.mxu1 %vm11444_vm1, %v11443_v1 }
 0x3fa   : > { %6680 = vst.msk [vmem:[#allocation2 + $0xe8] sm:$0xff] %vm172_vm2, %v6646_v32  ;;  %v6038_v37 = vadd.f32 %v5999_v35, %v5656_v34  ;;  %11026 = vmatprep.mubr.msk.bf16.mxu0 %vm11444_vm1, %v11443_v1  ;;  %v10850_v46 = vpop.f32.mrf.mxu1  ;;  %v8519_v32 = vshll.u32 %v11420_v20, 16  ;;  %v6723_v35 = vld [vmem:[#allocation2 + $0x18] sm:$0xff]  ;;  %v8514_v44 = vsel %vm8425_vm7, %v8504_v4, %v8513_v30 }
 0x3fb   : > { %v6139_v40 = vld [vmem:[#allocation2 + $0xf0] sm:$0xff]  ;;  %v10784_v41 = vpop.f32.mrf.mxu0 }
 0x3fc   : > { %v6647_v45 = vadd.f32 %v6602_v36, %v6139_v40  ;;  %6072 = vst.msk [vmem:[#allocation2 + $0x100] sm:$0xff] %vm172_vm2, %v6038_v37  ;;  %v6605_v49 = vpop.f32.mrf.mxu1  ;;  %v7960_v40 = vsel %vm4187_vm6, %v7957_v0, %v7959_v27  ;;  %v13709_v41 = vld [vmem:[%s11566_s23 + $0x180] sm:$0xff]   ;;  %v8521_v46 = vrot.slane %v8519_v32, 3 }
 0x3fd   : > { %v6002_v48 = vpop.f32.mrf.mxu0 }
 0x3fe   : > { %6681 = vst.msk [vmem:[#allocation2 + $0xf0] sm:$0xff] %vm172_vm2, %v6647_v45  ;;  %v6039_v50 = vadd.f32 %v6002_v48, %v5657_v47  ;;  %v10851_v59 = vpop.f32.mrf.mxu1  ;;  %v8518_v45 = vrot.slane %v8516_v31, 2  ;;  %v11422_v47 = vld [vmem:[%s11566_s23 + $0x210] sm:$0xff]  }
 0x3ff   : > { %v6140_v53 = vld [vmem:[#allocation2 + $0xf8] sm:$0xff]  ;;  %v10785_v54 = vpop.f32.mrf.mxu0  ;;  %v8525_v57 = vshrl.u32 %v11422_v47, 16 }
 0x400   : > { %v6648_v58 = vadd.f32 %v6605_v49, %v6140_v53  ;;  %6073 = vst.msk [vmem:[#allocation2 + $0x108] sm:$0xff] %vm172_vm2, %v6039_v50  ;;  %v6610_v62 = vpop.f32.mrf.mxu1  ;;  %11093 = vmatmul.mubr.msk.bf16.gmra.mxu1 %vm172_vm2, %v8496_v38  ;;  %v6724_v50 = vld [vmem:[#allocation2 + $0x20] sm:$0xff]  ;;  %v7961_v54 = vrot.slane %v13709_v41, 2  ;;  %v8522_v56 = vor.u32 %v8521_v46, %v8518_v45 }
 0x401   : > { %v7093_v61 = vpop.f32.mrf.mxu0  ;;  %11027 = vmatmul.mubr.msk.bf16.gmra.mxu0 %vm172_vm2, %v7956_v51  ;;  %11096 = vmatprep.mubr.msk.bf16.mxu1 %vm11444_vm1, %v11443_v1 }
 0x402   : > { %6682 = vst.msk [vmem:[#allocation2 + $0xf8] sm:$0xff] %vm172_vm2, %v6648_v58  ;;  %v7228_v63 = vadd.f32 %v7093_v61, %v6720_v60  ;;  %11030 = vmatprep.mubr.msk.bf16.mxu0 %vm11444_vm1, %v11443_v1  ;;  %v10854_v8 = vpop.f32.mrf.mxu1  ;;  %v8528_v58 = vshll.u32 %v11422_v47, 16  ;;  %v6725_v61 = vld [vmem:[#allocation2 + $0x28] sm:$0xff]  ;;  %v8523_v6 = vsel %vm8425_vm7, %v8513_v30, %v8522_v56 }
 0x403   : > { %v6141_v2 = vld [vmem:[#allocation2 + $0x100] sm:$0xff]  ;;  %v10860_v3 = vpop.f32.mrf.mxu0 }
 0x404   : > { %v6649_v7 = vadd.f32 %v6610_v62, %v6141_v2  ;;  %7262 = vst.msk [vmem:[#allocation2] sm:$0xff] %vm172_vm2, %v7228_v63  ;;  %v6613_v11 = vpop.f32.mrf.mxu1  ;;  %v7962_v2 = vsel %vm4187_vm6, %v7959_v27, %v7961_v54  ;;  %v13726_v3 = vld [vmem:[%s11566_s23 + $0x188] sm:$0xff]   ;;  %v8530_v8 = vrot.slane %v8528_v58, 3 }
 0x405   : > { %v7096_v10 = vpop.f32.mrf.mxu0 }
 0x406   : > { %6683 = vst.msk [vmem:[#allocation2 + $0x100] sm:$0xff] %vm172_vm2, %v6649_v7  ;;  %v7229_v12 = vadd.f32 %v7096_v10, %v6721_v9  ;;  %v10855_v22 = vpop.f32.mrf.mxu1  ;;  %v8527_v7 = vrot.slane %v8525_v57, 2  ;;  %v11424_v9 = vld [vmem:[%s11566_s23 + $0x218] sm:$0xff]  }
 0x407   : > { %v6142_v15 = vld [vmem:[#allocation2 + $0x108] sm:$0xff]  ;;  %v10861_v16 = vpop.f32.mrf.mxu0  ;;  %v8534_v20 = vshrl.u32 %v11424_v9, 16 }
 0x408   : > { %v6650_v21 = vadd.f32 %v6613_v11, %v6142_v15  ;;  %7263 = vst.msk [vmem:[#allocation2 + $0x8] sm:$0xff] %vm172_vm2, %v7229_v12  ;;  %v7578_v25 = vpop.f32.mrf.mxu1  ;;  %11097 = vmatmul.mubr.msk.bf16.gmra.mxu1 %vm172_vm2, %v8505_v17  ;;  %v6726_v12 = vld [vmem:[#allocation2 + $0x30] sm:$0xff]  ;;  %v7963_v16 = vrot.slane %v13726_v3, 2  ;;  %v8531_v19 = vor.u32 %v8530_v8, %v8527_v7 }
 0x409   : > { %v7101_v24 = vpop.f32.mrf.mxu0  ;;  %11031 = vmatmul.mubr.msk.bf16.gmra.mxu0 %vm172_vm2, %v7958_v13  ;;  %11100 = vmatprep.mubr.msk.bf16.mxu1 %vm11444_vm1, %v11443_v1 }
 0x40a   : > { %6684 = vst.msk [vmem:[#allocation2 + $0x108] sm:$0xff] %vm172_vm2, %v6650_v21  ;;  %v7230_v26 = vadd.f32 %v7101_v24, %v6722_v23  ;;  %11034 = vmatprep.mubr.msk.bf16.mxu0 %vm11444_vm1, %v11443_v1  ;;  %v10930_v34 = vpop.f32.mrf.mxu1  ;;  %v8537_v21 = vshll.u32 %v11424_v9, 16  ;;  %v6727_v24 = vld [vmem:[#allocation2 + $0x38] sm:$0xff]  ;;  %v8532_v32 = vsel %vm8425_vm7, %v8522_v56, %v8531_v19 }
 0x40b   : > { %v7331_v28 = vld [vmem:[#allocation2] sm:$0xff]  ;;  %v10864_v29 = vpop.f32.mrf.mxu0 }
 0x40c   : > { %v7713_v33 = vadd.f32 %v7578_v25, %v7331_v28  ;;  %7264 = vst.msk [vmem:[#allocation2 + $0x10] sm:$0xff] %vm172_vm2, %v7230_v26  ;;  %v7581_v37 = vpop.f32.mrf.mxu1  ;;  %v7964_v28 = vsel %vm4187_vm6, %v7961_v54, %v7963_v16  ;;  %v13743_v29 = vld [vmem:[%s11566_s23 + $0x190] sm:$0xff]   ;;  %v8539_v34 = vrot.slane %v8537_v21, 3 }
 0x40d   : > { %v7104_v36 = vpop.f32.mrf.mxu0 }
 0x40e   : > { %7747 = vst.msk [vmem:[#allocation2] sm:$0xff] %vm172_vm2, %v7713_v33  ;;  %v7231_v39 = vadd.f32 %v7104_v36, %v6723_v35  ;;  %v10931_v49 = vpop.f32.mrf.mxu1  ;;  %v8536_v33 = vrot.slane %v8534_v20, 2  ;;  %v11426_v35 = vld [vmem:[%s11566_s23 + $0x220] sm:$0xff]  }
 0x40f   : > { %v7332_v42 = vld [vmem:[#allocation2 + $0x8] sm:$0xff]  ;;  %v10865_v43 = vpop.f32.mrf.mxu0  ;;  %v8543_v47 = vshrl.u32 %v11426_v35, 16 }
 0x410   : > { %v7714_v48 = vadd.f32 %v7581_v37, %v7332_v42  ;;  %7265 = vst.msk [vmem:[#allocation2 + $0x18] sm:$0xff] %vm172_vm2, %v7231_v39  ;;  %v7586_v52 = vpop.f32.mrf.mxu1  ;;  %11101 = vmatmul.mubr.msk.bf16.gmra.mxu1 %vm172_vm2, %v8514_v44  ;;  %v6728_v39 = vld [vmem:[#allocation2 + $0x40] sm:$0xff]  ;;  %v7965_v43 = vrot.slane %v13743_v29, 2  ;;  %v8540_v46 = vor.u32 %v8539_v34, %v8536_v33 }
 0x411   : > { %v7109_v51 = vpop.f32.mrf.mxu0  ;;  %11035 = vmatmul.mubr.msk.bf16.gmra.mxu0 %vm172_vm2, %v7960_v40  ;;  %11104 = vmatprep.mubr.msk.bf16.mxu1 %vm11444_vm1, %v11443_v1 }
 0x412   : > { %7748 = vst.msk [vmem:[#allocation2 + $0x8] sm:$0xff] %vm172_vm2, %v7714_v48  ;;  %v7232_v53 = vadd.f32 %v7109_v51, %v6724_v50  ;;  %11038 = vmatprep.mubr.msk.bf16.mxu0 %vm11444_vm1, %v11443_v1  ;;  %v10934_v60 = vpop.f32.mrf.mxu1  ;;  %v8546_v48 = vshll.u32 %v11426_v35, 16  ;;  %v6729_v51 = vld [vmem:[#allocation2 + $0x48] sm:$0xff]  ;;  %v8541_v58 = vsel %vm8425_vm7, %v8531_v19, %v8540_v46 }
 0x413   : > { %v7333_v38 = vld [vmem:[#allocation2 + $0x10] sm:$0xff]  ;;  %v10868_v55 = vpop.f32.mrf.mxu0 }
 0x414   : > { %v7715_v59 = vadd.f32 %v7586_v52, %v7333_v38  ;;  %7266 = vst.msk [vmem:[#allocation2 + $0x20] sm:$0xff] %vm172_vm2, %v7232_v53  ;;  %v7589_v63 = vpop.f32.mrf.mxu1  ;;  %v7966_v38 = vsel %vm4187_vm6, %v7963_v16, %v7965_v43  ;;  %v13760_v55 = vld [vmem:[%s11566_s23 + $0x198] sm:$0xff]   ;;  %v8548_v60 = vrot.slane %v8546_v48, 3 }
 0x415   : > { %v7112_v62 = vpop.f32.mrf.mxu0 }
 0x416   : > { %7749 = vst.msk [vmem:[#allocation2 + $0x10] sm:$0xff] %vm172_vm2, %v7715_v59  ;;  %v7233_v0 = vadd.f32 %v7112_v62, %v6725_v61  ;;  %v10935_v11 = vpop.f32.mrf.mxu1  ;;  %v8545_v59 = vrot.slane %v8543_v47, 2  ;;  %v11428_v61 = vld [vmem:[%s11566_s23 + $0x228] sm:$0xff]  }
 0x417   : > { %v7334_v4 = vld [vmem:[#allocation2 + $0x18] sm:$0xff]  ;;  %v10869_v5 = vpop.f32.mrf.mxu0  ;;  %v8552_v9 = vshrl.u32 %v11428_v61, 16 }
 0x418   : > { %v7716_v10 = vadd.f32 %v7589_v63, %v7334_v4  ;;  %7267 = vst.msk [vmem:[#allocation2 + $0x28] sm:$0xff] %vm172_vm2, %v7233_v0  ;;  %v7594_v14 = vpop.f32.mrf.mxu1  ;;  %11105 = vmatmul.mubr.msk.bf16.gmra.mxu1 %vm172_vm2, %v8523_v6  ;;  %v6730_v0 = vld [vmem:[#allocation2 + $0x50] sm:$0xff]  ;;  %v7967_v5 = vrot.slane %v13760_v55, 2  ;;  %v8549_v8 = vor.u32 %v8548_v60, %v8545_v59 }
 0x419   : > { %v7117_v13 = vpop.f32.mrf.mxu0  ;;  %11039 = vmatmul.mubr.msk.bf16.gmra.mxu0 %vm172_vm2, %v7962_v2  ;;  %11108 = vmatprep.mubr.msk.bf16.mxu1 %vm11444_vm1, %v11443_v1 }
 0x41a   : > { %7750 = vst.msk [vmem:[#allocation2 + $0x18] sm:$0xff] %vm172_vm2, %v7716_v10  ;;  %v7234_v15 = vadd.f32 %v7117_v13, %v6726_v12  ;;  %11042 = vmatprep.mubr.msk.bf16.mxu0 %vm11444_vm1, %v11443_v1  ;;  %v10938_v23 = vpop.f32.mrf.mxu1  ;;  %v8555_v10 = vshll.u32 %v11428_v61, 16  ;;  %v6731_v13 = vld [vmem:[#allocation2 + $0x58] sm:$0xff]  ;;  %v8550_v21 = vsel %vm8425_vm7, %v8540_v46, %v8549_v8 }
 0x41b   : > { %v7335_v17 = vld [vmem:[#allocation2 + $0x20] sm:$0xff]  ;;  %v10872_v18 = vpop.f32.mrf.mxu0 }
 0x41c   : > { %v7717_v22 = vadd.f32 %v7594_v14, %v7335_v17  ;;  %7268 = vst.msk [vmem:[#allocation2 + $0x30] sm:$0xff] %vm172_vm2, %v7234_v15  ;;  %v7597_v26 = vpop.f32.mrf.mxu1  ;;  %v7968_v17 = vsel %vm4187_vm6, %v7965_v43, %v7967_v5  ;;  %v13777_v18 = vld [vmem:[%s11566_s23 + $0x1a0] sm:$0xff]   ;;  %v8557_v23 = vrot.slane %v8555_v10, 3 }
 0x41d   : > { %v7120_v25 = vpop.f32.mrf.mxu0 }
 0x41e   : > { %7751 = vst.msk [vmem:[#allocation2 + $0x20] sm:$0xff] %vm172_vm2, %v7717_v22  ;;  %v7235_v27 = vadd.f32 %v7120_v25, %v6727_v24  ;;  %v10939_v37 = vpop.f32.mrf.mxu1  ;;  %v8554_v22 = vrot.slane %v8552_v9, 2  ;;  %v11430_v24 = vld [vmem:[%s11566_s23 + $0x230] sm:$0xff]  }
 0x41f   : > { %v7336_v30 = vld [vmem:[#allocation2 + $0x28] sm:$0xff]  ;;  %v10873_v31 = vpop.f32.mrf.mxu0  ;;  %v8561_v35 = vshrl.u32 %v11430_v24, 16 }
 0x420   : > { %v7718_v36 = vadd.f32 %v7597_v26, %v7336_v30  ;;  %7269 = vst.msk [vmem:[#allocation2 + $0x38] sm:$0xff] %vm172_vm2, %v7235_v27  ;;  %v7602_v41 = vpop.f32.mrf.mxu1  ;;  %11109 = vmatmul.mubr.msk.bf16.gmra.mxu1 %vm172_vm2, %v8532_v32  ;;  %v6732_v27 = vld [vmem:[#allocation2 + $0x60] sm:$0xff]  ;;  %v7969_v31 = vrot.slane %v13777_v18, 2  ;;  %v8558_v34 = vor.u32 %v8557_v23, %v8554_v22 }
 0x421   : > { %v7125_v40 = vpop.f32.mrf.mxu0  ;;  %11043 = vmatmul.mubr.msk.bf16.gmra.mxu0 %vm172_vm2, %v7964_v28  ;;  %11112 = vmatprep.mubr.msk.bf16.mxu1 %vm11444_vm1, %v11443_v1 }
 0x422   : > { %7752 = vst.msk [vmem:[#allocation2 + $0x28] sm:$0xff] %vm172_vm2, %v7718_v36  ;;  %v7236_v42 = vadd.f32 %v7125_v40, %v6728_v39  ;;  %11046 = vmatprep.mubr.msk.bf16.mxu0 %vm11444_vm1, %v11443_v1  ;;  %v10942_v50 = vpop.f32.mrf.mxu1  ;;  %v8564_v36 = vshll.u32 %v11430_v24, 16  ;;  %v6733_v40 = vld [vmem:[#allocation2 + $0x68] sm:$0xff]  ;;  %v8559_v48 = vsel %vm8425_vm7, %v8549_v8, %v8558_v34 }
 0x423   : > { %v7337_v44 = vld [vmem:[#allocation2 + $0x30] sm:$0xff]  ;;  %v10876_v45 = vpop.f32.mrf.mxu0 }
 0x424   : > { %v7719_v49 = vadd.f32 %v7602_v41, %v7337_v44  ;;  %7270 = vst.msk [vmem:[#allocation2 + $0x40] sm:$0xff] %vm172_vm2, %v7236_v42  ;;  %v7605_v53 = vpop.f32.mrf.mxu1  ;;  %v7970_v44 = vsel %vm4187_vm6, %v7967_v5, %v7969_v31  ;;  %v13794_v45 = vld [vmem:[%s11566_s23 + $0x1a8] sm:$0xff]   ;;  %v8566_v50 = vrot.slane %v8564_v36, 3 }
 0x425   : > { %v7128_v52 = vpop.f32.mrf.mxu0 }
 0x426   : > { %7753 = vst.msk [vmem:[#allocation2 + $0x30] sm:$0xff] %vm172_vm2, %v7719_v49  ;;  %v7237_v54 = vadd.f32 %v7128_v52, %v6729_v51  ;;  %v10943_v63 = vpop.f32.mrf.mxu1  ;;  %v8563_v49 = vrot.slane %v8561_v35, 2  ;;  %v11432_v51 = vld [vmem:[%s11566_s23 + $0x238] sm:$0xff]  }
 0x427   : > { %v7338_v56 = vld [vmem:[#allocation2 + $0x38] sm:$0xff]  ;;  %v10877_v57 = vpop.f32.mrf.mxu0  ;;  %v8570_v61 = vshrl.u32 %v11432_v51, 16 }
 0x428   : > { %v7720_v62 = vadd.f32 %v7605_v53, %v7338_v56  ;;  %7271 = vst.msk [vmem:[#allocation2 + $0x48] sm:$0xff] %vm172_vm2, %v7237_v54  ;;  %v7610_v3 = vpop.f32.mrf.mxu1  ;;  %11113 = vmatmul.mubr.msk.bf16.gmra.mxu1 %vm172_vm2, %v8541_v58  ;;  %v6734_v54 = vld [vmem:[#allocation2 + $0x70] sm:$0xff]  ;;  %v7971_v57 = vrot.slane %v13794_v45, 2  ;;  %v8567_v60 = vor.u32 %v8566_v50, %v8563_v49  ;;  %v6739_v50 = vld [vmem:[#allocation2 + $0x98] sm:$0xff] }
 0x429   : > { %v7133_v2 = vpop.f32.mrf.mxu0  ;;  %11047 = vmatmul.mubr.msk.bf16.gmra.mxu0 %vm172_vm2, %v7966_v38  ;;  %11116 = vmatprep.mubr.msk.bf16.mxu1 %vm11444_vm1, %v11443_v1 }
 0x42a   : > { %7754 = vst.msk [vmem:[#allocation2 + $0x38] sm:$0xff] %vm172_vm2, %v7720_v62  ;;  %v7238_v4 = vadd.f32 %v7133_v2, %v6730_v0  ;;  %11050 = vmatprep.mubr.msk.bf16.mxu0 %vm11444_vm1, %v11443_v1  ;;  %v10946_v12 = vpop.f32.mrf.mxu1  ;;  %v8573_v62 = vshll.u32 %v11432_v51, 16  ;;  %v6735_v2 = vld [vmem:[#allocation2 + $0x78] sm:$0xff]  ;;  %v8568_v10 = vsel %vm8425_vm7, %v8558_v34, %v8567_v60 }
 0x42b   : > { %v7339_v6 = vld [vmem:[#allocation2 + $0x40] sm:$0xff]  ;;  %v10880_v7 = vpop.f32.mrf.mxu0 }
 0x42c   : > { %v7721_v11 = vadd.f32 %v7610_v3, %v7339_v6  ;;  %7272 = vst.msk [vmem:[#allocation2 + $0x50] sm:$0xff] %vm172_vm2, %v7238_v4  ;;  %v7613_v15 = vpop.f32.mrf.mxu1  ;;  %v7972_v6 = vsel %vm4187_vm6, %v7969_v31, %v7971_v57  ;;  %v11433_v7 = vld [vmem:[%s11566_s23 + $0x1b0] ss:$0 sps:$4 sm:$0x33]   ;;  %v8575_v12 = vrot.slane %v8573_v62, 3 }
 0x42d   : > { %v7136_v14 = vpop.f32.mrf.mxu0 }
 0x42e   : > { %7755 = vst.msk [vmem:[#allocation2 + $0x40] sm:$0xff] %vm172_vm2, %v7721_v11  ;;  %v7239_v16 = vadd.f32 %v7136_v14, %v6731_v13  ;;  %v10947_v26 = vpop.f32.mrf.mxu1  ;;  %v8572_v11 = vrot.slane %v8570_v61, 2  ;;  %v11434_v13 = vld [vmem:[%s11566_s23 + $0x240] ss:$0 sps:$4 sm:$0x77]  }
 0x42f   : > { %v7340_v19 = vld [vmem:[#allocation2 + $0x48] sm:$0xff]  ;;  %v10881_v20 = vpop.f32.mrf.mxu0  ;;  %v8579_v24 = vshrl.u32 %v11434_v13, 16 }
 0x430   : > { %v7722_v25 = vadd.f32 %v7613_v15, %v7340_v19  ;;  %7273 = vst.msk [vmem:[#allocation2 + $0x58] sm:$0xff] %vm172_vm2, %v7239_v16  ;;  %v7618_v29 = vpop.f32.mrf.mxu1  ;;  %11117 = vmatmul.mubr.msk.bf16.gmra.mxu1 %vm172_vm2, %v8550_v21  ;;  %v6736_v16 = vld [vmem:[#allocation2 + $0x80] sm:$0xff]  ;;  %v7973_v20 = vrot.slane %v11433_v7, 2  ;;  %v8576_v23 = vor.u32 %v8575_v12, %v8572_v11 }
 0x431   : > { %v7141_v28 = vpop.f32.mrf.mxu0  ;;  %11051 = vmatmul.mubr.msk.bf16.gmra.mxu0 %vm172_vm2, %v7968_v17  ;;  %11120 = vmatprep.mubr.msk.bf16.mxu1 %vm11444_vm1, %v11443_v1  ;;  %v8581_v36 = vrot.slane %v8579_v24, 2 }
 0x432   : > { %7756 = vst.msk [vmem:[#allocation2 + $0x48] sm:$0xff] %vm172_vm2, %v7722_v25  ;;  %v7240_v30 = vadd.f32 %v7141_v28, %v6732_v27  ;;  %11054 = vmatprep.mubr.msk.bf16.mxu0 %vm11444_vm1, %v11443_v1  ;;  %v10950_v39 = vpop.f32.mrf.mxu1  ;;  %v8582_v25 = vshll.u32 %v11434_v13, 16  ;;  %v6737_v28 = vld [vmem:[#allocation2 + $0x88] sm:$0xff]  ;;  %v8577_v35 = vsel %vm8425_vm7, %v8567_v60, %v8576_v23 }
 0x433   : > { %v7341_v32 = vld [vmem:[#allocation2 + $0x50] sm:$0xff]  ;;  %v10884_v33 = vpop.f32.mrf.mxu0 }
 0x434   : > { %v7723_v37 = vadd.f32 %v7618_v29, %v7341_v32  ;;  %7274 = vst.msk [vmem:[#allocation2 + $0x60] sm:$0xff] %vm172_vm2, %v7240_v30  ;;  %v7621_v42 = vpop.f32.mrf.mxu1  ;;  %v7974_v32 = vsel %vm4187_vm6, %v7971_v57, %v7973_v20 }
 0x435   : > { %v7144_v41 = vpop.f32.mrf.mxu0 }
 0x436   : > { %7757 = vst.msk [vmem:[#allocation2 + $0x50] sm:$0xff] %vm172_vm2, %v7723_v37  ;;  %v7241_v43 = vadd.f32 %v7144_v41, %v6733_v40  ;;  %v10951_v53 = vpop.f32.mrf.mxu1  ;;  %v8584_v37 = vrot.slane %v8582_v25, 3  ;;  %v6738_v41 = vld [vmem:[#allocation2 + $0x90] sm:$0xff] }
 0x437   : > { %v7342_v46 = vld [vmem:[#allocation2 + $0x58] sm:$0xff]  ;;  %v10885_v47 = vpop.f32.mrf.mxu0 }
 0x438   : > { %v7724_v52 = vadd.f32 %v7621_v42, %v7342_v46  ;;  %7275 = vst.msk [vmem:[#allocation2 + $0x68] sm:$0xff] %vm172_vm2, %v7241_v43  ;;  %v7626_v55 = vpop.f32.mrf.mxu1  ;;  %11121 = vmatmul.mubr.msk.bf16.gmra.mxu1 %vm172_vm2, %v8559_v48  ;;  %v8585_v47 = vor.u32 %v8584_v37, %v8581_v36 }
 0x439   : > { %v7149_v38 = vpop.f32.mrf.mxu0  ;;  %11055 = vmatmul.mubr.msk.bf16.gmra.mxu0 %vm172_vm2, %v7970_v44  ;;  %11124 = vmatprep.mubr.msk.bf16.mxu1 %vm11444_vm1, %v11443_v1 }
 0x43a   : > { %7758 = vst.msk [vmem:[#allocation2 + $0x58] sm:$0xff] %vm172_vm2, %v7724_v52  ;;  %v7242_v56 = vadd.f32 %v7149_v38, %v6734_v54  ;;  %11058 = vmatprep.mubr.msk.bf16.mxu0 %vm11444_vm1, %v11443_v1  ;;  %v10954_v0 = vpop.f32.mrf.mxu1 }
 0x43b   : > { %v7343_v58 = vld [vmem:[#allocation2 + $0x60] sm:$0xff]  ;;  %v10888_v59 = vpop.f32.mrf.mxu0 }
 0x43c   : > { %v7725_v63 = vadd.f32 %v7626_v55, %v7343_v58  ;;  %7276 = vst.msk [vmem:[#allocation2 + $0x70] sm:$0xff] %vm172_vm2, %v7242_v56  ;;  %v7629_v4 = vpop.f32.mrf.mxu1  ;;  %v8586_v55 = vsel %vm8425_vm7, %v8576_v23, %v8585_v47 }
 0x43d   : > { %v7152_v3 = vpop.f32.mrf.mxu0 }
 0x43e   : > { %7759 = vst.msk [vmem:[#allocation2 + $0x60] sm:$0xff] %vm172_vm2, %v7725_v63  ;;  %v7243_v5 = vadd.f32 %v7152_v3, %v6735_v2  ;;  %v10955_v15 = vpop.f32.mrf.mxu1  ;;  %v6741_v2 = vld [vmem:[#allocation2 + $0xa8] sm:$0xff] }
 0x43f   : > { %v7344_v8 = vld [vmem:[#allocation2 + $0x68] sm:$0xff]  ;;  %v10889_v9 = vpop.f32.mrf.mxu0 }
 0x440   : > { %v7726_v14 = vadd.f32 %v7629_v4, %v7344_v8  ;;  %7277 = vst.msk [vmem:[#allocation2 + $0x78] sm:$0xff] %vm172_vm2, %v7243_v5  ;;  %v7634_v18 = vpop.f32.mrf.mxu1  ;;  %11125 = vmatmul.mubr.msk.bf16.gmra.mxu1 %vm172_vm2, %v8568_v10  ;;  %v6742_v10 = vld [vmem:[#allocation2 + $0xb0] sm:$0xff] }
 0x441   : > { %v7157_v17 = vpop.f32.mrf.mxu0  ;;  %11059 = vmatmul.mubr.msk.bf16.gmra.mxu0 %vm172_vm2, %v7972_v6  ;;  %11128 = vmatprep.mubr.msk.bf16.mxu1 %vm11444_vm1, %v11443_v1 }
 0x442   : > { %7760 = vst.msk [vmem:[#allocation2 + $0x68] sm:$0xff] %vm172_vm2, %v7726_v14  ;;  %v7244_v19 = vadd.f32 %v7157_v17, %v6736_v16  ;;  %11062 = vmatprep.mubr.msk.bf16.mxu0 %vm11444_vm1, %v11443_v1  ;;  %v10958_v27 = vpop.f32.mrf.mxu1 }
 0x443   : > { %v7345_v21 = vld [vmem:[#allocation2 + $0x70] sm:$0xff]  ;;  %v10892_v22 = vpop.f32.mrf.mxu0 }
 0x444   : > { %v7727_v26 = vadd.f32 %v7634_v18, %v7345_v21  ;;  %7278 = vst.msk [vmem:[#allocation2 + $0x80] sm:$0xff] %vm172_vm2, %v7244_v19  ;;  %v7637_v30 = vpop.f32.mrf.mxu1  ;;  %v6743_v18 = vld [vmem:[#allocation2 + $0xb8] sm:$0xff] }
 0x445   : > { %v7160_v29 = vpop.f32.mrf.mxu0 }
 0x446   : > { %7761 = vst.msk [vmem:[#allocation2 + $0x70] sm:$0xff] %vm172_vm2, %v7727_v26  ;;  %v7245_v31 = vadd.f32 %v7160_v29, %v6737_v28  ;;  %v10959_v40 = vpop.f32.mrf.mxu1  ;;  %v6744_v26 = vld [vmem:[#allocation2 + $0xc0] sm:$0xff] }
 0x447   : > { %v7346_v33 = vld [vmem:[#allocation2 + $0x78] sm:$0xff]  ;;  %v10893_v34 = vpop.f32.mrf.mxu0 }
 0x448   : > { %v7728_v39 = vadd.f32 %v7637_v30, %v7346_v33  ;;  %7279 = vst.msk [vmem:[#allocation2 + $0x88] sm:$0xff] %vm172_vm2, %v7245_v31  ;;  %v7642_v43 = vpop.f32.mrf.mxu1  ;;  %11129 = vmatmul.mubr.msk.bf16.gmra.mxu1 %vm172_vm2, %v8577_v35  ;;  %v6745_v34 = vld [vmem:[#allocation2 + $0xc8] sm:$0xff] }
 0x449   : > { %v7165_v42 = vpop.f32.mrf.mxu0  ;;  %11063 = vmatmul.mubr.msk.bf16.gmra.mxu0 %vm172_vm2, %v7974_v32  ;;  %11132 = vmatprep.mubr.msk.bf16.mxu1 %vm11444_vm1, %v11443_v1  ;;  %v6740_v1 = vld [vmem:[#allocation2 + $0xa0] sm:$0xff] }
 0x44a   : > { %7762 = vst.msk [vmem:[#allocation2 + $0x78] sm:$0xff] %vm172_vm2, %v7728_v39  ;;  %v7246_v44 = vadd.f32 %v7165_v42, %v6738_v41  ;;  %v10962_v49 = vpop.f32.mrf.mxu1 }
 0x44b   : > { %v7347_v45 = vld [vmem:[#allocation2 + $0x80] sm:$0xff]  ;;  %v10896_v46 = vpop.f32.mrf.mxu0 }
 0x44c   : > { %v7729_v48 = vadd.f32 %v7642_v43, %v7347_v45  ;;  %7280 = vst.msk [vmem:[#allocation2 + $0x90] sm:$0xff] %vm172_vm2, %v7246_v44  ;;  %v7645_v52 = vpop.f32.mrf.mxu1  ;;  %v6746_v43 = vld [vmem:[#allocation2 + $0xd0] sm:$0xff] }
 0x44d   : > { %v7168_v51 = vpop.f32.mrf.mxu0 }
 0x44e   : > { %7763 = vst.msk [vmem:[#allocation2 + $0x80] sm:$0xff] %vm172_vm2, %v7729_v48  ;;  %v7247_v53 = vadd.f32 %v7168_v51, %v6739_v50  ;;  %v10963_v57 = vpop.f32.mrf.mxu1  ;;  %v6747_v51 = vld [vmem:[#allocation2 + $0xd8] sm:$0xff] }
 0x44f   : > { %v7348_v54 = vld [vmem:[#allocation2 + $0x88] sm:$0xff]  ;;  %v10897_v38 = vpop.f32.mrf.mxu0 }
 0x450   : > { %v7730_v56 = vadd.f32 %v7645_v52, %v7348_v54  ;;  %7281 = vst.msk [vmem:[#allocation2 + $0x98] sm:$0xff] %vm172_vm2, %v7247_v53  ;;  %v7650_v59 = vpop.f32.mrf.mxu1  ;;  %11133 = vmatmul.mubr.msk.bf16.gmra.mxu1 %vm172_vm2, %v8586_v55 }
 0x451   : > { %v7173_v58 = vpop.f32.mrf.mxu0 }
 0x452   : > { %7764 = vst.msk [vmem:[#allocation2 + $0x88] sm:$0xff] %vm172_vm2, %v7730_v56  ;;  %v7248_v60 = vadd.f32 %v7173_v58, %v6740_v1  ;;  %v10966_v0 = vpop.f32.mrf.mxu1  ;;  %v6748_v1 = vld [vmem:[#allocation2 + $0xe0] sm:$0xff] }
 0x453   : > { %v7349_v61 = vld [vmem:[#allocation2 + $0x90] sm:$0xff]  ;;  %v10900_v62 = vpop.f32.mrf.mxu0 }
 0x454   : > { %v7731_v63 = vadd.f32 %v7650_v59, %v7349_v61  ;;  %7282 = vst.msk [vmem:[#allocation2 + $0xa0] sm:$0xff] %vm172_vm2, %v7248_v60  ;;  %v7653_v4 = vpop.f32.mrf.mxu1 }
 0x455   : > { %v7176_v3 = vpop.f32.mrf.mxu0 }
 0x456   : > { %7765 = vst.msk [vmem:[#allocation2 + $0x90] sm:$0xff] %vm172_vm2, %v7731_v63  ;;  %v7249_v5 = vadd.f32 %v7176_v3, %v6741_v2  ;;  %v10967_v9 = vpop.f32.mrf.mxu1  ;;  %v6749_v2 = vld [vmem:[#allocation2 + $0xe8] sm:$0xff] }
 0x457   : > { %v7350_v6 = vld [vmem:[#allocation2 + $0x98] sm:$0xff]  ;;  %v10901_v7 = vpop.f32.mrf.mxu0 }
 0x458   : > { %v7732_v8 = vadd.f32 %v7653_v4, %v7350_v6  ;;  %7283 = vst.msk [vmem:[#allocation2 + $0xa8] sm:$0xff] %vm172_vm2, %v7249_v5  ;;  %v7658_v12 = vpop.f32.mrf.mxu1 }
 0x459   : > { %v7181_v11 = vpop.f32.mrf.mxu0 }
 0x45a   : > { %7766 = vst.msk [vmem:[#allocation2 + $0x98] sm:$0xff] %vm172_vm2, %v7732_v8  ;;  %v7250_v13 = vadd.f32 %v7181_v11, %v6742_v10  ;;  %v10970_v17 = vpop.f32.mrf.mxu1  ;;  %v6750_v10 = vld [vmem:[#allocation2 + $0xf0] sm:$0xff] }
 0x45b   : > { %v7351_v14 = vld [vmem:[#allocation2 + $0xa0] sm:$0xff]  ;;  %v10904_v15 = vpop.f32.mrf.mxu0 }
 0x45c   : > { %v7733_v16 = vadd.f32 %v7658_v12, %v7351_v14  ;;  %7284 = vst.msk [vmem:[#allocation2 + $0xb0] sm:$0xff] %vm172_vm2, %v7250_v13  ;;  %v7661_v20 = vpop.f32.mrf.mxu1 }
 0x45d   : > { %v7184_v19 = vpop.f32.mrf.mxu0 }
 0x45e   : > { %7767 = vst.msk [vmem:[#allocation2 + $0xa0] sm:$0xff] %vm172_vm2, %v7733_v16  ;;  %v7251_v21 = vadd.f32 %v7184_v19, %v6743_v18  ;;  %v10971_v25 = vpop.f32.mrf.mxu1  ;;  %v6751_v18 = vld [vmem:[#allocation2 + $0xf8] sm:$0xff] }
 0x45f   : > { %v7352_v22 = vld [vmem:[#allocation2 + $0xa8] sm:$0xff]  ;;  %v10905_v23 = vpop.f32.mrf.mxu0 }
 0x460   : > { %v7734_v24 = vadd.f32 %v7661_v20, %v7352_v22  ;;  %7285 = vst.msk [vmem:[#allocation2 + $0xb8] sm:$0xff] %vm172_vm2, %v7251_v21  ;;  %v7666_v28 = vpop.f32.mrf.mxu1 }
 0x461   : > { %v7189_v27 = vpop.f32.mrf.mxu0 }
 0x462   : > { %7768 = vst.msk [vmem:[#allocation2 + $0xa8] sm:$0xff] %vm172_vm2, %v7734_v24  ;;  %v7252_v29 = vadd.f32 %v7189_v27, %v6744_v26  ;;  %v10974_v33 = vpop.f32.mrf.mxu1  ;;  %v6752_v26 = vld [vmem:[#allocation2 + $0x100] sm:$0xff] }
 0x463   : > { %v7353_v30 = vld [vmem:[#allocation2 + $0xb0] sm:$0xff]  ;;  %v10908_v31 = vpop.f32.mrf.mxu0 }
 0x464   : > { %v7735_v32 = vadd.f32 %v7666_v28, %v7353_v30  ;;  %7286 = vst.msk [vmem:[#allocation2 + $0xc0] sm:$0xff] %vm172_vm2, %v7252_v29  ;;  %v7669_v36 = vpop.f32.mrf.mxu1 }
 0x465   : > { %v7192_v35 = vpop.f32.mrf.mxu0 }
 0x466   : > { %7769 = vst.msk [vmem:[#allocation2 + $0xb0] sm:$0xff] %vm172_vm2, %v7735_v32  ;;  %v7253_v37 = vadd.f32 %v7192_v35, %v6745_v34  ;;  %v10975_v42 = vpop.f32.mrf.mxu1  ;;  %v6753_v34 = vld [vmem:[#allocation2 + $0x108] sm:$0xff] }
 0x467   : > { %v7354_v39 = vld [vmem:[#allocation2 + $0xb8] sm:$0xff]  ;;  %v10909_v40 = vpop.f32.mrf.mxu0 }
 0x468   : > { %v7736_v41 = vadd.f32 %v7669_v36, %v7354_v39  ;;  %7287 = vst.msk [vmem:[#allocation2 + $0xc8] sm:$0xff] %vm172_vm2, %v7253_v37  ;;  %v7674_v45 = vpop.f32.mrf.mxu1 }
 0x469   : > { %v7197_v44 = vpop.f32.mrf.mxu0 }
 0x46a   : > { %7770 = vst.msk [vmem:[#allocation2 + $0xb8] sm:$0xff] %vm172_vm2, %v7736_v41  ;;  %v7254_v46 = vadd.f32 %v7197_v44, %v6746_v43  ;;  %v10978_v50 = vpop.f32.mrf.mxu1  ;;  %v7816_v43 = vld [vmem:[#allocation2] sm:$0xff] }
 0x46b   : > { %v7355_v47 = vld [vmem:[#allocation2 + $0xc0] sm:$0xff]  ;;  %v10912_v48 = vpop.f32.mrf.mxu0 }
 0x46c   : > { %v7737_v49 = vadd.f32 %v7674_v45, %v7355_v47  ;;  %7288 = vst.msk [vmem:[#allocation2 + $0xd0] sm:$0xff] %vm172_vm2, %v7254_v46  ;;  %v7677_v53 = vpop.f32.mrf.mxu1 }
 0x46d   : > { %v7200_v52 = vpop.f32.mrf.mxu0 }
 0x46e   : > { %7771 = vst.msk [vmem:[#allocation2 + $0xc0] sm:$0xff] %vm172_vm2, %v7737_v49  ;;  %v7255_v54 = vadd.f32 %v7200_v52, %v6747_v51  ;;  %v10979_v57 = vpop.f32.mrf.mxu1  ;;  %v7817_v51 = vld [vmem:[#allocation2 + $0x8] sm:$0xff] }
 0x46f   : > { %v7356_v38 = vld [vmem:[#allocation2 + $0xc8] sm:$0xff]  ;;  %v10913_v55 = vpop.f32.mrf.mxu0 }
 0x470   : > { %v7738_v56 = vadd.f32 %v7677_v53, %v7356_v38  ;;  %7289 = vst.msk [vmem:[#allocation2 + $0xd8] sm:$0xff] %vm172_vm2, %v7255_v54  ;;  %v7682_v59 = vpop.f32.mrf.mxu1 }
 0x471   : > { %v7205_v58 = vpop.f32.mrf.mxu0 }
 0x472   : > { %7772 = vst.msk [vmem:[#allocation2 + $0xc8] sm:$0xff] %vm172_vm2, %v7738_v56  ;;  %v7256_v60 = vadd.f32 %v7205_v58, %v6748_v1  ;;  %v10982_v0 = vpop.f32.mrf.mxu1  ;;  %v7818_v1 = vld [vmem:[#allocation2 + $0x10] sm:$0xff] }
 0x473   : > { %v7357_v61 = vld [vmem:[#allocation2 + $0xd0] sm:$0xff]  ;;  %v10916_v62 = vpop.f32.mrf.mxu0 }
 0x474   : > { %v7739_v63 = vadd.f32 %v7682_v59, %v7357_v61  ;;  %7290 = vst.msk [vmem:[#allocation2 + $0xe0] sm:$0xff] %vm172_vm2, %v7256_v60  ;;  %v7685_v4 = vpop.f32.mrf.mxu1 }
 0x475   : > { %v7208_v3 = vpop.f32.mrf.mxu0 }
 0x476   : > { %7773 = vst.msk [vmem:[#allocation2 + $0xd0] sm:$0xff] %vm172_vm2, %v7739_v63  ;;  %v7257_v5 = vadd.f32 %v7208_v3, %v6749_v2  ;;  %v10983_v9 = vpop.f32.mrf.mxu1  ;;  %v7819_v2 = vld [vmem:[#allocation2 + $0x18] sm:$0xff] }
 0x477   : > { %v7358_v6 = vld [vmem:[#allocation2 + $0xd8] sm:$0xff]  ;;  %v10917_v7 = vpop.f32.mrf.mxu0 }
 0x478   : > { %v7740_v8 = vadd.f32 %v7685_v4, %v7358_v6  ;;  %7291 = vst.msk [vmem:[#allocation2 + $0xe8] sm:$0xff] %vm172_vm2, %v7257_v5  ;;  %v7690_v12 = vpop.f32.mrf.mxu1 }
 0x479   : > { %v7213_v11 = vpop.f32.mrf.mxu0 }
 0x47a   : > { %7774 = vst.msk [vmem:[#allocation2 + $0xd8] sm:$0xff] %vm172_vm2, %v7740_v8  ;;  %v7258_v13 = vadd.f32 %v7213_v11, %v6750_v10  ;;  %v10986_v17 = vpop.f32.mrf.mxu1  ;;  %v7820_v10 = vld [vmem:[#allocation2 + $0x20] sm:$0xff] }
 0x47b   : > { %v7359_v14 = vld [vmem:[#allocation2 + $0xe0] sm:$0xff]  ;;  %v10920_v15 = vpop.f32.mrf.mxu0 }
 0x47c   : > { %v7741_v16 = vadd.f32 %v7690_v12, %v7359_v14  ;;  %7292 = vst.msk [vmem:[#allocation2 + $0xf0] sm:$0xff] %vm172_vm2, %v7258_v13  ;;  %v7693_v20 = vpop.f32.mrf.mxu1  ;;  %v13876_v14 = vld [vmem:[%s14053_s2] ss:$0 sm:$0xff] }
 0x47d   : > { %v7216_v19 = vpop.f32.mrf.mxu0 }
 0x47e   : > { %7775 = vst.msk [vmem:[#allocation2 + $0xe0] sm:$0xff] %vm172_vm2, %v7741_v16  ;;  %v7259_v21 = vadd.f32 %v7216_v19, %v6751_v18  ;;  %v10987_v25 = vpop.f32.mrf.mxu1 }
 0x47f   : > { %v7360_v22 = vld [vmem:[#allocation2 + $0xe8] sm:$0xff]  ;;  %v10921_v23 = vpop.f32.mrf.mxu0 }
 0x480   : > { %v7742_v24 = vadd.f32 %v7693_v20, %v7360_v22  ;;  %7293 = vst.msk [vmem:[#allocation2 + $0xf8] sm:$0xff] %vm172_vm2, %v7259_v21  ;;  %v7698_v28 = vpop.f32.mrf.mxu1  ;;  %v7821_v20 = vld [vmem:[#allocation2 + $0x28] sm:$0xff] }
 0x481   : > { %v7221_v27 = vpop.f32.mrf.mxu0 }
 0x482   : > { %7776 = vst.msk [vmem:[#allocation2 + $0xe8] sm:$0xff] %vm172_vm2, %v7742_v24  ;;  %v7260_v29 = vadd.f32 %v7221_v27, %v6752_v26  ;;  %v10990_v33 = vpop.f32.mrf.mxu1 }
 0x483   : > { %v7361_v30 = vld [vmem:[#allocation2 + $0xf0] sm:$0xff]  ;;  %v10924_v31 = vpop.f32.mrf.mxu0 }
 0x484   : > { %v7743_v32 = vadd.f32 %v7698_v28, %v7361_v30  ;;  %7294 = vst.msk [vmem:[#allocation2 + $0x100] sm:$0xff] %vm172_vm2, %v7260_v29  ;;  %v7701_v36 = vpop.f32.mrf.mxu1  ;;  %v7822_v31 = vld [vmem:[#allocation2 + $0x30] sm:$0xff] }
 0x485   : > { %v7224_v35 = vpop.f32.mrf.mxu0 }
 0x486   : > { %7777 = vst.msk [vmem:[#allocation2 + $0xf0] sm:$0xff] %vm172_vm2, %v7743_v32  ;;  %v7261_v37 = vadd.f32 %v7224_v35, %v6753_v34  ;;  %v10991_v42 = vpop.f32.mrf.mxu1 }
 0x487   : > { %v7362_v39 = vld [vmem:[#allocation2 + $0xf8] sm:$0xff]  ;;  %v10925_v40 = vpop.f32.mrf.mxu0 }
 0x488   : > { %v7744_v41 = vadd.f32 %v7701_v36, %v7362_v39  ;;  %7295 = vst.msk [vmem:[#allocation2 + $0x108] sm:$0xff] %vm172_vm2, %v7261_v37  ;;  %v7706_v45 = vpop.f32.mrf.mxu1 }
 0x489   : > { %v8063_v44 = vpop.f32.mrf.mxu0 }
 0x48a   : > { %7778 = vst.msk [vmem:[#allocation2 + $0xf8] sm:$0xff] %vm172_vm2, %v7744_v41  ;;  %v8198_v46 = vadd.f32 %v8063_v44, %v7816_v43  ;;  %v10994_v50 = vpop.f32.mrf.mxu1  ;;  %v7823_v44 = vld [vmem:[#allocation2 + $0x38] sm:$0xff] }
 0x48b   : > { %v7363_v47 = vld [vmem:[#allocation2 + $0x100] sm:$0xff]  ;;  %v11000_v48 = vpop.f32.mrf.mxu0 }
 0x48c   : > { %v7745_v49 = vadd.f32 %v7706_v45, %v7363_v47  ;;  %8232 = vst.msk [vmem:[#allocation2] sm:$0xff] %vm172_vm2, %v8198_v46  ;;  %v7709_v53 = vpop.f32.mrf.mxu1 }
 0x48d   : > { %v8066_v52 = vpop.f32.mrf.mxu0 }
 0x48e   : > { %7779 = vst.msk [vmem:[#allocation2 + $0x100] sm:$0xff] %vm172_vm2, %v7745_v49  ;;  %v8199_v54 = vadd.f32 %v8066_v52, %v7817_v51  ;;  %v10995_v57 = vpop.f32.mrf.mxu1 }
 0x48f   : > { %v7364_v38 = vld [vmem:[#allocation2 + $0x108] sm:$0xff]  ;;  %v11001_v55 = vpop.f32.mrf.mxu0 }
 0x490   : > { %v7746_v56 = vadd.f32 %v7709_v53, %v7364_v38  ;;  %8233 = vst.msk [vmem:[#allocation2 + $0x8] sm:$0xff] %vm172_vm2, %v8199_v54  ;;  %v8675_v59 = vpop.f32.mrf.mxu1  ;;  %v7824_v55 = vld [vmem:[#allocation2 + $0x40] sm:$0xff] }
 0x491   : > { %v8071_v58 = vpop.f32.mrf.mxu0 }
 0x492   : > { %7780 = vst.msk [vmem:[#allocation2 + $0x108] sm:$0xff] %vm172_vm2, %v7746_v56  ;;  %v8200_v60 = vadd.f32 %v8071_v58, %v7818_v1  ;;  %v11070_v0 = vpop.f32.mrf.mxu1 }
 0x493   : > { %v8301_v61 = vld [vmem:[#allocation2] sm:$0xff]  ;;  %v11004_v62 = vpop.f32.mrf.mxu0 }
 0x494   : > { %v8810_v63 = vadd.f32 %v8675_v59, %v8301_v61  ;;  %8234 = vst.msk [vmem:[#allocation2 + $0x10] sm:$0xff] %vm172_vm2, %v8200_v60  ;;  %v8678_v4 = vpop.f32.mrf.mxu1 }
 0x495   : > { %v8074_v3 = vpop.f32.mrf.mxu0 }
 0x496   : > { %8844 = vst.msk [vmem:[#allocation2] sm:$0xff] %vm172_vm2, %v8810_v63  ;;  %v8201_v5 = vadd.f32 %v8074_v3, %v7819_v2  ;;  %v11071_v9 = vpop.f32.mrf.mxu1  ;;  %v7825_v3 = vld [vmem:[#allocation2 + $0x48] sm:$0xff] }
 0x497   : > { %v8302_v6 = vld [vmem:[#allocation2 + $0x8] sm:$0xff]  ;;  %v11005_v7 = vpop.f32.mrf.mxu0 }
 0x498   : > { %v8811_v8 = vadd.f32 %v8678_v4, %v8302_v6  ;;  %8235 = vst.msk [vmem:[#allocation2 + $0x18] sm:$0xff] %vm172_vm2, %v8201_v5  ;;  %v8683_v12 = vpop.f32.mrf.mxu1 }
 0x499   : > { %v8079_v11 = vpop.f32.mrf.mxu0 }
 0x49a   : > { %8845 = vst.msk [vmem:[#allocation2 + $0x8] sm:$0xff] %vm172_vm2, %v8811_v8  ;;  %v8202_v13 = vadd.f32 %v8079_v11, %v7820_v10  ;;  %v11074_v18 = vpop.f32.mrf.mxu1 }
 0x49b   : > { %v8303_v15 = vld [vmem:[#allocation2 + $0x10] sm:$0xff]  ;;  %v11008_v16 = vpop.f32.mrf.mxu0 }
 0x49c   : > { %v8812_v17 = vadd.f32 %v8683_v12, %v8303_v15  ;;  %8236 = vst.msk [vmem:[#allocation2 + $0x20] sm:$0xff] %vm172_vm2, %v8202_v13  ;;  %v8686_v23 = vpop.f32.mrf.mxu1  ;;  %v7826_v16 = vld [vmem:[#allocation2 + $0x50] sm:$0xff] }
 0x49d   : > { %v8878_v19 = vld [vmem:[#allocation2] sm:$0xff]  ;;  %v8082_v21 = vpop.f32.mrf.mxu0 }
 0x49e   : > { %v8919_v22 = vadd.f32 %v13876_v14, %v8878_v19  ;;  %8846 = vst.msk [vmem:[#allocation2 + $0x10] sm:$0xff] %vm172_vm2, %v8812_v17  ;;  %v8203_v24 = vadd.f32 %v8082_v21, %v7821_v20  ;;  %v11075_v29 = vpop.f32.mrf.mxu1 }
 0x49f   : > { %v8304_v25 = vld [vmem:[#allocation2 + $0x18] sm:$0xff]  ;;  %v11009_v26 = vpop.f32.mrf.mxu0 }
 0x4a0   : > { %vm8953_vm8 = vcmp.ge.f32.partialorder %v8919_v22, 0.0  ;;  %v8987_v27 = vmul.f32 0.2, %v8919_v22  ;;  %v8813_v28 = vadd.f32 %v8686_v23, %v8304_v25  ;;  %8237 = vst.msk [vmem:[#allocation2 + $0x28] sm:$0xff] %vm172_vm2, %v8203_v24  ;;  %v8691_v35 = vpop.f32.mrf.mxu1 }
 0x4a1   : > { %v8879_v30 = vld [vmem:[#allocation2 + $0x8] sm:$0xff]  ;;  %v8087_v32 = vpop.f32.mrf.mxu0 }
 0x4a2   : > { %v9021_v33 = vsel %vm8953_vm8, %v8919_v22, %v8987_v27  ;;  %v8920_v34 = vadd.f32 %v13876_v14, %v8879_v30  ;;  %8847 = vst.msk [vmem:[#allocation2 + $0x18] sm:$0xff] %vm172_vm2, %v8813_v28  ;;  %v8204_v36 = vadd.f32 %v8087_v32, %v7822_v31  ;;  %v11078_v42 = vpop.f32.mrf.mxu1  ;;  %v7827_v28 = vld [vmem:[#allocation2 + $0x58] sm:$0xff] }
 0x4a3   : > { %9055 = vst.msk [vmem:[%s13885_s30] sm:$0xff] %vm172_vm2, %v9021_v33  ;;  %v8305_v37 = vld [vmem:[#allocation2 + $0x20] sm:$0xff]  ;;  %v11012_v39 = vpop.f32.mrf.mxu0 }
 0x4a4   : > { %vm8954_vm9 = vcmp.ge.f32.partialorder %v8920_v34, 0.0  ;;  %v8988_v40 = vmul.f32 0.2, %v8920_v34  ;;  %v8814_v41 = vadd.f32 %v8691_v35, %v8305_v37  ;;  %8238 = vst.msk [vmem:[#allocation2 + $0x30] sm:$0xff] %vm172_vm2, %v8204_v36  ;;  %v8694_v48 = vpop.f32.mrf.mxu1 }
 0x4a5   : > { %v8880_v43 = vld [vmem:[#allocation2 + $0x10] sm:$0xff]  ;;  %v8090_v45 = vpop.f32.mrf.mxu0 }
 0x4a6   : > { %v9022_v46 = vsel %vm8954_vm9, %v8920_v34, %v8988_v40  ;;  %v8921_v47 = vadd.f32 %v13876_v14, %v8880_v43  ;;  %8848 = vst.msk [vmem:[#allocation2 + $0x20] sm:$0xff] %vm172_vm2, %v8814_v41  ;;  %v8205_v49 = vadd.f32 %v8090_v45, %v7823_v44  ;;  %v11079_v54 = vpop.f32.mrf.mxu1  ;;  %v7828_v41 = vld [vmem:[#allocation2 + $0x60] sm:$0xff] }
 0x4a7   : > { %9056 = vst.msk [vmem:[%s13885_s30 + $0x8] sm:$0xff] %vm172_vm2, %v9022_v46  ;;  %v8306_v50 = vld [vmem:[#allocation2 + $0x28] sm:$0xff]  ;;  %v11013_v51 = vpop.f32.mrf.mxu0 }
 0x4a8   : > { %vm8955_vm10 = vcmp.ge.f32.partialorder %v8921_v47, 0.0  ;;  %v8989_v52 = vmul.f32 0.2, %v8921_v47  ;;  %v8815_v53 = vadd.f32 %v8694_v48, %v8306_v50  ;;  %8239 = vst.msk [vmem:[#allocation2 + $0x38] sm:$0xff] %vm172_vm2, %v8205_v49  ;;  %v8699_v58 = vpop.f32.mrf.mxu1 }
 0x4a9   : > { %v8881_v38 = vld [vmem:[#allocation2 + $0x18] sm:$0xff]  ;;  %v8095_v56 = vpop.f32.mrf.mxu0 }
 0x4aa   : > { %v9023_v57 = vsel %vm8955_vm10, %v8921_v47, %v8989_v52  ;;  %v8922_v1 = vadd.f32 %v13876_v14, %v8881_v38  ;;  %8849 = vst.msk [vmem:[#allocation2 + $0x28] sm:$0xff] %vm172_vm2, %v8815_v53  ;;  %v8206_v59 = vadd.f32 %v8095_v56, %v7824_v55  ;;  %v11082_v0 = vpop.f32.mrf.mxu1  ;;  %v7829_v53 = vld [vmem:[#allocation2 + $0x68] sm:$0xff] }
 0x4ab   : > { %9057 = vst.msk [vmem:[%s13885_s30 + $0x10] sm:$0xff] %vm172_vm2, %v9023_v57  ;;  %v8307_v60 = vld [vmem:[#allocation2 + $0x30] sm:$0xff]  ;;  %v11016_v61 = vpop.f32.mrf.mxu0 }
 0x4ac   : > { %vm8956_vm11 = vcmp.ge.f32.partialorder %v8922_v1, 0.0  ;;  %v8990_v62 = vmul.f32 0.2, %v8922_v1  ;;  %v8816_v63 = vadd.f32 %v8699_v58, %v8307_v60  ;;  %8240 = vst.msk [vmem:[#allocation2 + $0x40] sm:$0xff] %vm172_vm2, %v8206_v59  ;;  %v8702_v7 = vpop.f32.mrf.mxu1 }
 0x4ad   : > { %v8882_v2 = vld [vmem:[#allocation2 + $0x20] sm:$0xff]  ;;  %v8098_v4 = vpop.f32.mrf.mxu0 }
 0x4ae   : > { %v9024_v5 = vsel %vm8956_vm11, %v8922_v1, %v8990_v62  ;;  %v8923_v6 = vadd.f32 %v13876_v14, %v8882_v2  ;;  %8850 = vst.msk [vmem:[#allocation2 + $0x30] sm:$0xff] %vm172_vm2, %v8816_v63  ;;  %v8207_v8 = vadd.f32 %v8098_v4, %v7825_v3  ;;  %v11083_v13 = vpop.f32.mrf.mxu1  ;;  %v7830_v63 = vld [vmem:[#allocation2 + $0x70] sm:$0xff] }
 0x4af   : > { %9058 = vst.msk [vmem:[%s13885_s30 + $0x18] sm:$0xff] %vm172_vm2, %v9024_v5  ;;  %v8308_v9 = vld [vmem:[#allocation2 + $0x38] sm:$0xff]  ;;  %v11017_v10 = vpop.f32.mrf.mxu0 }
 0x4b0   : > { %vm8957_vm12 = vcmp.ge.f32.partialorder %v8923_v6, 0.0  ;;  %v8991_v11 = vmul.f32 0.2, %v8923_v6  ;;  %v8817_v12 = vadd.f32 %v8702_v7, %v8308_v9  ;;  %8241 = vst.msk [vmem:[#allocation2 + $0x48] sm:$0xff] %vm172_vm2, %v8207_v8  ;;  %v8707_v20 = vpop.f32.mrf.mxu1 }
 0x4b1   : > { %v8883_v15 = vld [vmem:[#allocation2 + $0x28] sm:$0xff]  ;;  %v8103_v17 = vpop.f32.mrf.mxu0 }
 0x4b2   : > { %v9025_v18 = vsel %vm8957_vm12, %v8923_v6, %v8991_v11  ;;  %v8924_v19 = vadd.f32 %v13876_v14, %v8883_v15  ;;  %8851 = vst.msk [vmem:[#allocation2 + $0x38] sm:$0xff] %vm172_vm2, %v8817_v12  ;;  %v8208_v21 = vadd.f32 %v8103_v17, %v7826_v16  ;;  %v11086_v26 = vpop.f32.mrf.mxu1  ;;  %v7831_v12 = vld [vmem:[#allocation2 + $0x78] sm:$0xff] }
 0x4b3   : > { %9059 = vst.msk [vmem:[%s13885_s30 + $0x20] sm:$0xff] %vm172_vm2, %v9025_v18  ;;  %v8309_v22 = vld [vmem:[#allocation2 + $0x40] sm:$0xff]  ;;  %v11020_v23 = vpop.f32.mrf.mxu0 }
 0x4b4   : > { %vm8958_vm13 = vcmp.ge.f32.partialorder %v8924_v19, 0.0  ;;  %v8992_v24 = vmul.f32 0.2, %v8924_v19  ;;  %v8818_v25 = vadd.f32 %v8707_v20, %v8309_v22  ;;  %8242 = vst.msk [vmem:[#allocation2 + $0x50] sm:$0xff] %vm172_vm2, %v8208_v21  ;;  %v8710_v32 = vpop.f32.mrf.mxu1 }
 0x4b5   : > { %v8884_v27 = vld [vmem:[#allocation2 + $0x30] sm:$0xff]  ;;  %v8106_v29 = vpop.f32.mrf.mxu0 }
 0x4b6   : > { %v9026_v30 = vsel %vm8958_vm13, %v8924_v19, %v8992_v24  ;;  %v8925_v31 = vadd.f32 %v13876_v14, %v8884_v27  ;;  %8852 = vst.msk [vmem:[#allocation2 + $0x40] sm:$0xff] %vm172_vm2, %v8818_v25  ;;  %v8209_v33 = vadd.f32 %v8106_v29, %v7827_v28  ;;  %v11087_v39 = vpop.f32.mrf.mxu1  ;;  %v7832_v25 = vld [vmem:[#allocation2 + $0x80] sm:$0xff] }
 0x4b7   : > { %9060 = vst.msk [vmem:[%s13885_s30 + $0x28] sm:$0xff] %vm172_vm2, %v9026_v30  ;;  %v8310_v34 = vld [vmem:[#allocation2 + $0x48] sm:$0xff]  ;;  %v11021_v35 = vpop.f32.mrf.mxu0 }
 0x4b8   : > { %vm8959_vm14 = vcmp.ge.f32.partialorder %v8925_v31, 0.0  ;;  %v8993_v36 = vmul.f32 0.2, %v8925_v31  ;;  %v8819_v37 = vadd.f32 %v8710_v32, %v8310_v34  ;;  %8243 = vst.msk [vmem:[#allocation2 + $0x58] sm:$0xff] %vm172_vm2, %v8209_v33  ;;  %v8715_v45 = vpop.f32.mrf.mxu1 }
 0x4b9   : > { %v8885_v40 = vld [vmem:[#allocation2 + $0x38] sm:$0xff]  ;;  %v8111_v42 = vpop.f32.mrf.mxu0 }
 0x4ba   : > { %v9027_v43 = vsel %vm8959_vm14, %v8925_v31, %v8993_v36  ;;  %v8926_v44 = vadd.f32 %v13876_v14, %v8885_v40  ;;  %8853 = vst.msk [vmem:[#allocation2 + $0x48] sm:$0xff] %vm172_vm2, %v8819_v37  ;;  %v8210_v46 = vadd.f32 %v8111_v42, %v7828_v41  ;;  %v11090_v51 = vpop.f32.mrf.mxu1  ;;  %v7833_v37 = vld [vmem:[#allocation2 + $0x88] sm:$0xff] }
 0x4bb   : > { %9061 = vst.msk [vmem:[%s13885_s30 + $0x30] sm:$0xff] %vm172_vm2, %v9027_v43  ;;  %v8311_v47 = vld [vmem:[#allocation2 + $0x50] sm:$0xff]  ;;  %v11024_v48 = vpop.f32.mrf.mxu0 }
 0x4bc   : > { %vm8960_vm15 = vcmp.ge.f32.partialorder %v8926_v44, 0.0  ;;  %v8994_v49 = vmul.f32 0.2, %v8926_v44  ;;  %v8820_v50 = vadd.f32 %v8715_v45, %v8311_v47  ;;  %8244 = vst.msk [vmem:[#allocation2 + $0x60] sm:$0xff] %vm172_vm2, %v8210_v46  ;;  %v8718_v56 = vpop.f32.mrf.mxu1 }
 0x4bd   : > { %v8886_v52 = vld [vmem:[#allocation2 + $0x40] sm:$0xff]  ;;  %v8114_v54 = vpop.f32.mrf.mxu0 }
 0x4be   : > { %v9028_v38 = vsel %vm8960_vm15, %v8926_v44, %v8994_v49  ;;  %v8927_v55 = vadd.f32 %v13876_v14, %v8886_v52  ;;  %8854 = vst.msk [vmem:[#allocation2 + $0x50] sm:$0xff] %vm172_vm2, %v8820_v50  ;;  %v8211_v57 = vadd.f32 %v8114_v54, %v7829_v53  ;;  %v11091_v61 = vpop.f32.mrf.mxu1  ;;  %v7834_v50 = vld [vmem:[#allocation2 + $0x90] sm:$0xff] }
 0x4bf   : > { %9062 = vst.msk [vmem:[%s13885_s30 + $0x38] sm:$0xff] %vm172_vm2, %v9028_v38  ;;  %v8312_v1 = vld [vmem:[#allocation2 + $0x58] sm:$0xff]  ;;  %v11025_v58 = vpop.f32.mrf.mxu0 }
 0x4c0   : > { %vm8961_vm0 = vcmp.ge.f32.partialorder %v8927_v55, 0.0  ;;  %v8995_v59 = vmul.f32 0.2, %v8927_v55  ;;  %v8821_v60 = vadd.f32 %v8718_v56, %v8312_v1  ;;  %8245 = vst.msk [vmem:[#allocation2 + $0x68] sm:$0xff] %vm172_vm2, %v8211_v57  ;;  %v8723_v4 = vpop.f32.mrf.mxu1 }
 0x4c1   : > { %v8887_v62 = vld [vmem:[#allocation2 + $0x48] sm:$0xff]  ;;  %v8119_v0 = vpop.f32.mrf.mxu0 }
 0x4c2   : > { %v9029_v2 = vsel %vm8961_vm0, %v8927_v55, %v8995_v59  ;;  %v8928_v3 = vadd.f32 %v13876_v14, %v8887_v62  ;;  %8855 = vst.msk [vmem:[#allocation2 + $0x58] sm:$0xff] %vm172_vm2, %v8821_v60  ;;  %v8212_v5 = vadd.f32 %v8119_v0, %v7830_v63  ;;  %v11094_v10 = vpop.f32.mrf.mxu1  ;;  %v7835_v60 = vld [vmem:[#allocation2 + $0x98] sm:$0xff] }
 0x4c3   : > { %9063 = vst.msk [vmem:[%s13885_s30 + $0x40] sm:$0xff] %vm172_vm2, %v9029_v2  ;;  %v8313_v6 = vld [vmem:[#allocation2 + $0x60] sm:$0xff]  ;;  %v11028_v7 = vpop.f32.mrf.mxu0 }
 0x4c4   : > { %vm8962_vm1 = vcmp.ge.f32.partialorder %v8928_v3, 0.0  ;;  %v8996_v8 = vmul.f32 0.2, %v8928_v3  ;;  %v8822_v9 = vadd.f32 %v8723_v4, %v8313_v6  ;;  %8246 = vst.msk [vmem:[#allocation2 + $0x70] sm:$0xff] %vm172_vm2, %v8212_v5  ;;  %v8726_v17 = vpop.f32.mrf.mxu1 }
 0x4c5   : > { %v8888_v11 = vld [vmem:[#allocation2 + $0x50] sm:$0xff]  ;;  %v8122_v13 = vpop.f32.mrf.mxu0 }
 0x4c6   : > { %v9030_v15 = vsel %vm8962_vm1, %v8928_v3, %v8996_v8  ;;  %v8929_v16 = vadd.f32 %v13876_v14, %v8888_v11  ;;  %8856 = vst.msk [vmem:[#allocation2 + $0x60] sm:$0xff] %vm172_vm2, %v8822_v9  ;;  %v8213_v18 = vadd.f32 %v8122_v13, %v7831_v12  ;;  %v11095_v23 = vpop.f32.mrf.mxu1  ;;  %v7836_v9 = vld [vmem:[#allocation2 + $0xa0] sm:$0xff] }
 0x4c7   : > { %9064 = vst.msk [vmem:[%s13885_s30 + $0x48] sm:$0xff] %vm172_vm2, %v9030_v15  ;;  %v8314_v19 = vld [vmem:[#allocation2 + $0x68] sm:$0xff]  ;;  %v11029_v20 = vpop.f32.mrf.mxu0 }
 0x4c8   : > { %vm8963_vm3 = vcmp.ge.f32.partialorder %v8929_v16, 0.0  ;;  %v8997_v21 = vmul.f32 0.2, %v8929_v16  ;;  %v8823_v22 = vadd.f32 %v8726_v17, %v8314_v19  ;;  %8247 = vst.msk [vmem:[#allocation2 + $0x78] sm:$0xff] %vm172_vm2, %v8213_v18  ;;  %v8731_v29 = vpop.f32.mrf.mxu1 }
 0x4c9   : > { %v8889_v24 = vld [vmem:[#allocation2 + $0x58] sm:$0xff]  ;;  %v8127_v26 = vpop.f32.mrf.mxu0 }
 0x4ca   : > { %v9031_v27 = vsel %vm8963_vm3, %v8929_v16, %v8997_v21  ;;  %v8930_v28 = vadd.f32 %v13876_v14, %v8889_v24  ;;  %8857 = vst.msk [vmem:[#allocation2 + $0x68] sm:$0xff] %vm172_vm2, %v8823_v22  ;;  %v8214_v30 = vadd.f32 %v8127_v26, %v7832_v25  ;;  %v11098_v35 = vpop.f32.mrf.mxu1  ;;  %v7837_v22 = vld [vmem:[#allocation2 + $0xa8] sm:$0xff] }
 0x4cb   : > { %9065 = vst.msk [vmem:[%s13885_s30 + $0x50] sm:$0xff] %vm172_vm2, %v9031_v27  ;;  %v8315_v31 = vld [vmem:[#allocation2 + $0x70] sm:$0xff]  ;;  %v11032_v32 = vpop.f32.mrf.mxu0 }
 0x4cc   : > { %vm8964_vm4 = vcmp.ge.f32.partialorder %v8930_v28, 0.0  ;;  %v8998_v33 = vmul.f32 0.2, %v8930_v28  ;;  %v8824_v34 = vadd.f32 %v8731_v29, %v8315_v31  ;;  %8248 = vst.msk [vmem:[#allocation2 + $0x80] sm:$0xff] %vm172_vm2, %v8214_v30  ;;  %v8734_v42 = vpop.f32.mrf.mxu1 }
 0x4cd   : > { %v8890_v36 = vld [vmem:[#allocation2 + $0x60] sm:$0xff]  ;;  %v8130_v39 = vpop.f32.mrf.mxu0 }
 0x4ce   : > { %v9032_v40 = vsel %vm8964_vm4, %v8930_v28, %v8998_v33  ;;  %v8931_v41 = vadd.f32 %v13876_v14, %v8890_v36  ;;  %8858 = vst.msk [vmem:[#allocation2 + $0x70] sm:$0xff] %vm172_vm2, %v8824_v34  ;;  %v8215_v43 = vadd.f32 %v8130_v39, %v7833_v37  ;;  %v11099_v48 = vpop.f32.mrf.mxu1  ;;  %v7838_v34 = vld [vmem:[#allocation2 + $0xb0] sm:$0xff] }
 0x4cf   : > { %9066 = vst.msk [vmem:[%s13885_s30 + $0x58] sm:$0xff] %vm172_vm2, %v9032_v40  ;;  %v8316_v44 = vld [vmem:[#allocation2 + $0x78] sm:$0xff]  ;;  %v11033_v45 = vpop.f32.mrf.mxu0 }
 0x4d0   : > { %vm8965_vm5 = vcmp.ge.f32.partialorder %v8931_v41, 0.0  ;;  %v8999_v46 = vmul.f32 0.2, %v8931_v41  ;;  %v8825_v47 = vadd.f32 %v8734_v42, %v8316_v44  ;;  %8249 = vst.msk [vmem:[#allocation2 + $0x88] sm:$0xff] %vm172_vm2, %v8215_v43  ;;  %v8739_v54 = vpop.f32.mrf.mxu1 }
 0x4d1   : > { %v8891_v49 = vld [vmem:[#allocation2 + $0x68] sm:$0xff]  ;;  %v8135_v51 = vpop.f32.mrf.mxu0 }
 0x4d2   : > { %v9033_v52 = vsel %vm8965_vm5, %v8931_v41, %v8999_v46  ;;  %v8932_v53 = vadd.f32 %v13876_v14, %v8891_v49  ;;  %8859 = vst.msk [vmem:[#allocation2 + $0x78] sm:$0xff] %vm172_vm2, %v8825_v47  ;;  %v8216_v38 = vadd.f32 %v8135_v51, %v7834_v50  ;;  %v11102_v58 = vpop.f32.mrf.mxu1  ;;  %v7839_v47 = vld [vmem:[#allocation2 + $0xb8] sm:$0xff] }
 0x4d3   : > { %9067 = vst.msk [vmem:[%s13885_s30 + $0x60] sm:$0xff] %vm172_vm2, %v9033_v52  ;;  %v8317_v55 = vld [vmem:[#allocation2 + $0x80] sm:$0xff]  ;;  %v11036_v56 = vpop.f32.mrf.mxu0 }
 0x4d4   : > { %vm8966_vm6 = vcmp.ge.f32.partialorder %v8932_v53, 0.0  ;;  %v9000_v57 = vmul.f32 0.2, %v8932_v53  ;;  %v8826_v1 = vadd.f32 %v8739_v54, %v8317_v55  ;;  %8250 = vst.msk [vmem:[#allocation2 + $0x90] sm:$0xff] %vm172_vm2, %v8216_v38  ;;  %v8742_v0 = vpop.f32.mrf.mxu1 }
 0x4d5   : > { %v8892_v59 = vld [vmem:[#allocation2 + $0x70] sm:$0xff]  ;;  %v8138_v61 = vpop.f32.mrf.mxu0 }
 0x4d6   : > { %v9034_v62 = vsel %vm8966_vm6, %v8932_v53, %v9000_v57  ;;  %v8933_v63 = vadd.f32 %v13876_v14, %v8892_v59  ;;  %8860 = vst.msk [vmem:[#allocation2 + $0x80] sm:$0xff] %vm172_vm2, %v8826_v1  ;;  %v8217_v2 = vadd.f32 %v8138_v61, %v7835_v60  ;;  %v11103_v7 = vpop.f32.mrf.mxu1  ;;  %v7840_v1 = vld [vmem:[#allocation2 + $0xc0] sm:$0xff] }
 0x4d7   : > { %9068 = vst.msk [vmem:[%s13885_s30 + $0x68] sm:$0xff] %vm172_vm2, %v9034_v62  ;;  %v8318_v3 = vld [vmem:[#allocation2 + $0x88] sm:$0xff]  ;;  %v11037_v4 = vpop.f32.mrf.mxu0 }
 0x4d8   : > { %vm8967_vm7 = vcmp.ge.f32.partialorder %v8933_v63, 0.0  ;;  %v9001_v5 = vmul.f32 0.2, %v8933_v63  ;;  %v8827_v6 = vadd.f32 %v8742_v0, %v8318_v3  ;;  %8251 = vst.msk [vmem:[#allocation2 + $0x98] sm:$0xff] %vm172_vm2, %v8217_v2  ;;  %v8747_v13 = vpop.f32.mrf.mxu1 }
 0x4d9   : > { %v8893_v8 = vld [vmem:[#allocation2 + $0x78] sm:$0xff]  ;;  %v8143_v10 = vpop.f32.mrf.mxu0 }
 0x4da   : > { %v9035_v11 = vsel %vm8967_vm7, %v8933_v63, %v9001_v5  ;;  %v8934_v12 = vadd.f32 %v13876_v14, %v8893_v8  ;;  %8861 = vst.msk [vmem:[#allocation2 + $0x88] sm:$0xff] %vm172_vm2, %v8827_v6  ;;  %v8218_v15 = vadd.f32 %v8143_v10, %v7836_v9  ;;  %v11106_v20 = vpop.f32.mrf.mxu1  ;;  %v7841_v6 = vld [vmem:[#allocation2 + $0xc8] sm:$0xff] }
 0x4db   : > { %9069 = vst.msk [vmem:[%s13885_s30 + $0x70] sm:$0xff] %vm172_vm2, %v9035_v11  ;;  %v8319_v16 = vld [vmem:[#allocation2 + $0x90] sm:$0xff]  ;;  %v11040_v17 = vpop.f32.mrf.mxu0 }
 0x4dc   : > { %vm8968_vm8 = vcmp.ge.f32.partialorder %v8934_v12, 0.0  ;;  %v9002_v18 = vmul.f32 0.2, %v8934_v12  ;;  %v8828_v19 = vadd.f32 %v8747_v13, %v8319_v16  ;;  %8252 = vst.msk [vmem:[#allocation2 + $0xa0] sm:$0xff] %vm172_vm2, %v8218_v15  ;;  %v8750_v26 = vpop.f32.mrf.mxu1 }
 0x4dd   : > { %v8894_v21 = vld [vmem:[#allocation2 + $0x80] sm:$0xff]  ;;  %v8146_v23 = vpop.f32.mrf.mxu0 }
 0x4de   : > { %v9036_v24 = vsel %vm8968_vm8, %v8934_v12, %v9002_v18  ;;  %v8935_v25 = vadd.f32 %v13876_v14, %v8894_v21  ;;  %8862 = vst.msk [vmem:[#allocation2 + $0x90] sm:$0xff] %vm172_vm2, %v8828_v19  ;;  %v8219_v27 = vadd.f32 %v8146_v23, %v7837_v22  ;;  %v11107_v32 = vpop.f32.mrf.mxu1  ;;  %v7842_v19 = vld [vmem:[#allocation2 + $0xd0] sm:$0xff] }
 0x4df   : > { %9070 = vst.msk [vmem:[%s13885_s30 + $0x78] sm:$0xff] %vm172_vm2, %v9036_v24  ;;  %v8320_v28 = vld [vmem:[#allocation2 + $0x98] sm:$0xff]  ;;  %v11041_v29 = vpop.f32.mrf.mxu0 }
 0x4e0   : > { %vm8969_vm9 = vcmp.ge.f32.partialorder %v8935_v25, 0.0  ;;  %v9003_v30 = vmul.f32 0.2, %v8935_v25  ;;  %v8829_v31 = vadd.f32 %v8750_v26, %v8320_v28  ;;  %8253 = vst.msk [vmem:[#allocation2 + $0xa8] sm:$0xff] %vm172_vm2, %v8219_v27  ;;  %v8755_v39 = vpop.f32.mrf.mxu1 }
 0x4e1   : > { %v8895_v33 = vld [vmem:[#allocation2 + $0x88] sm:$0xff]  ;;  %v8151_v35 = vpop.f32.mrf.mxu0 }
 0x4e2   : > { %v9037_v36 = vsel %vm8969_vm9, %v8935_v25, %v9003_v30  ;;  %v8936_v37 = vadd.f32 %v13876_v14, %v8895_v33  ;;  %8863 = vst.msk [vmem:[#allocation2 + $0x98] sm:$0xff] %vm172_vm2, %v8829_v31  ;;  %v8220_v40 = vadd.f32 %v8151_v35, %v7838_v34  ;;  %v11110_v45 = vpop.f32.mrf.mxu1  ;;  %v7843_v31 = vld [vmem:[#allocation2 + $0xd8] sm:$0xff] }
 0x4e3   : > { %9071 = vst.msk [vmem:[%s13885_s30 + $0x80] sm:$0xff] %vm172_vm2, %v9037_v36  ;;  %v8321_v41 = vld [vmem:[#allocation2 + $0xa0] sm:$0xff]  ;;  %v11044_v42 = vpop.f32.mrf.mxu0 }
 0x4e4   : > { %vm8970_vm10 = vcmp.ge.f32.partialorder %v8936_v37, 0.0  ;;  %v9004_v43 = vmul.f32 0.2, %v8936_v37  ;;  %v8830_v44 = vadd.f32 %v8755_v39, %v8321_v41  ;;  %8254 = vst.msk [vmem:[#allocation2 + $0xb0] sm:$0xff] %vm172_vm2, %v8220_v40  ;;  %v8758_v51 = vpop.f32.mrf.mxu1 }
 0x4e5   : > { %v8896_v46 = vld [vmem:[#allocation2 + $0x90] sm:$0xff]  ;;  %v8154_v48 = vpop.f32.mrf.mxu0 }
 0x4e6   : > { %v9038_v49 = vsel %vm8970_vm10, %v8936_v37, %v9004_v43  ;;  %v8937_v50 = vadd.f32 %v13876_v14, %v8896_v46  ;;  %8864 = vst.msk [vmem:[#allocation2 + $0xa0] sm:$0xff] %vm172_vm2, %v8830_v44  ;;  %v8221_v52 = vadd.f32 %v8154_v48, %v7839_v47  ;;  %v11111_v56 = vpop.f32.mrf.mxu1  ;;  %v7844_v44 = vld [vmem:[#allocation2 + $0xe0] sm:$0xff] }
 0x4e7   : > { %9072 = vst.msk [vmem:[%s13885_s30 + $0x88] sm:$0xff] %vm172_vm2, %v9038_v49  ;;  %v8322_v53 = vld [vmem:[#allocation2 + $0xa8] sm:$0xff]  ;;  %v11045_v54 = vpop.f32.mrf.mxu0 }
 0x4e8   : > { %vm8971_vm11 = vcmp.ge.f32.partialorder %v8937_v50, 0.0  ;;  %v9005_v38 = vmul.f32 0.2, %v8937_v50  ;;  %v8831_v55 = vadd.f32 %v8758_v51, %v8322_v53  ;;  %8255 = vst.msk [vmem:[#allocation2 + $0xb8] sm:$0xff] %vm172_vm2, %v8221_v52  ;;  %v8763_v61 = vpop.f32.mrf.mxu1 }
 0x4e9   : > { %v8897_v57 = vld [vmem:[#allocation2 + $0x98] sm:$0xff]  ;;  %v8159_v58 = vpop.f32.mrf.mxu0 }
 0x4ea   : > { %v9039_v59 = vsel %vm8971_vm11, %v8937_v50, %v9005_v38  ;;  %v8938_v60 = vadd.f32 %v13876_v14, %v8897_v57  ;;  %8865 = vst.msk [vmem:[#allocation2 + $0xa8] sm:$0xff] %vm172_vm2, %v8831_v55  ;;  %v8222_v62 = vadd.f32 %v8159_v58, %v7840_v1  ;;  %v11114_v4 = vpop.f32.mrf.mxu1  ;;  %v7845_v55 = vld [vmem:[#allocation2 + $0xe8] sm:$0xff] }
 0x4eb   : > { %9073 = vst.msk [vmem:[%s13885_s30 + $0x90] sm:$0xff] %vm172_vm2, %v9039_v59  ;;  %v8323_v63 = vld [vmem:[#allocation2 + $0xb0] sm:$0xff]  ;;  %v11048_v0 = vpop.f32.mrf.mxu0 }
 0x4ec   : > { %vm8972_vm12 = vcmp.ge.f32.partialorder %v8938_v60, 0.0  ;;  %v9006_v2 = vmul.f32 0.2, %v8938_v60  ;;  %v8832_v3 = vadd.f32 %v8763_v61, %v8323_v63  ;;  %8256 = vst.msk [vmem:[#allocation2 + $0xc0] sm:$0xff] %vm172_vm2, %v8222_v62  ;;  %v8766_v10 = vpop.f32.mrf.mxu1 }
 0x4ed   : > { %v8898_v5 = vld [vmem:[#allocation2 + $0xa0] sm:$0xff]  ;;  %v8162_v7 = vpop.f32.mrf.mxu0 }
 0x4ee   : > { %v9040_v8 = vsel %vm8972_vm12, %v8938_v60, %v9006_v2  ;;  %v8939_v9 = vadd.f32 %v13876_v14, %v8898_v5  ;;  %8866 = vst.msk [vmem:[#allocation2 + $0xb0] sm:$0xff] %vm172_vm2, %v8832_v3  ;;  %v8223_v11 = vadd.f32 %v8162_v7, %v7841_v6  ;;  %v11115_v17 = vpop.f32.mrf.mxu1  ;;  %v7846_v3 = vld [vmem:[#allocation2 + $0xf0] sm:$0xff] }
 0x4ef   : > { %9074 = vst.msk [vmem:[%s13885_s30 + $0x98] sm:$0xff] %vm172_vm2, %v9040_v8  ;;  %v8324_v12 = vld [vmem:[#allocation2 + $0xb8] sm:$0xff]  ;;  %v11049_v13 = vpop.f32.mrf.mxu0 }
 0x4f0   : > { %vm8973_vm13 = vcmp.ge.f32.partialorder %v8939_v9, 0.0  ;;  %v9007_v15 = vmul.f32 0.2, %v8939_v9  ;;  %v8833_v16 = vadd.f32 %v8766_v10, %v8324_v12  ;;  %8257 = vst.msk [vmem:[#allocation2 + $0xc8] sm:$0xff] %vm172_vm2, %v8223_v11  ;;  %v8771_v23 = vpop.f32.mrf.mxu1 }
 0x4f1   : > { %v8899_v18 = vld [vmem:[#allocation2 + $0xa8] sm:$0xff]  ;;  %v8167_v20 = vpop.f32.mrf.mxu0 }
 0x4f2   : > { %v9041_v21 = vsel %vm8973_vm13, %v8939_v9, %v9007_v15  ;;  %v8940_v22 = vadd.f32 %v13876_v14, %v8899_v18  ;;  %8867 = vst.msk [vmem:[#allocation2 + $0xb8] sm:$0xff] %vm172_vm2, %v8833_v16  ;;  %v8224_v24 = vadd.f32 %v8167_v20, %v7842_v19  ;;  %v11118_v29 = vpop.f32.mrf.mxu1  ;;  %v7847_v16 = vld [vmem:[#allocation2 + $0xf8] sm:$0xff] }
 0x4f3   : > { %9075 = vst.msk [vmem:[%s13885_s30 + $0xa0] sm:$0xff] %vm172_vm2, %v9041_v21  ;;  %v8325_v25 = vld [vmem:[#allocation2 + $0xc0] sm:$0xff]  ;;  %v11052_v26 = vpop.f32.mrf.mxu0 }
 0x4f4   : > { %vm8974_vm14 = vcmp.ge.f32.partialorder %v8940_v22, 0.0  ;;  %v9008_v27 = vmul.f32 0.2, %v8940_v22  ;;  %v8834_v28 = vadd.f32 %v8771_v23, %v8325_v25  ;;  %8258 = vst.msk [vmem:[#allocation2 + $0xd0] sm:$0xff] %vm172_vm2, %v8224_v24  ;;  %v8774_v35 = vpop.f32.mrf.mxu1 }
 0x4f5   : > { %v8900_v30 = vld [vmem:[#allocation2 + $0xb0] sm:$0xff]  ;;  %v8170_v32 = vpop.f32.mrf.mxu0 }
 0x4f6   : > { %v9042_v33 = vsel %vm8974_vm14, %v8940_v22, %v9008_v27  ;;  %v8941_v34 = vadd.f32 %v13876_v14, %v8900_v30  ;;  %8868 = vst.msk [vmem:[#allocation2 + $0xc0] sm:$0xff] %vm172_vm2, %v8834_v28  ;;  %v8225_v36 = vadd.f32 %v8170_v32, %v7843_v31  ;;  %v11119_v42 = vpop.f32.mrf.mxu1  ;;  %v7848_v28 = vld [vmem:[#allocation2 + $0x100] sm:$0xff] }
 0x4f7   : > { %9076 = vst.msk [vmem:[%s13885_s30 + $0xa8] sm:$0xff] %vm172_vm2, %v9042_v33  ;;  %v8326_v37 = vld [vmem:[#allocation2 + $0xc8] sm:$0xff]  ;;  %v11053_v39 = vpop.f32.mrf.mxu0 }
 0x4f8   : > { %vm8975_vm15 = vcmp.ge.f32.partialorder %v8941_v34, 0.0  ;;  %v9009_v40 = vmul.f32 0.2, %v8941_v34  ;;  %v8835_v41 = vadd.f32 %v8774_v35, %v8326_v37  ;;  %8259 = vst.msk [vmem:[#allocation2 + $0xd8] sm:$0xff] %vm172_vm2, %v8225_v36  ;;  %v8779_v48 = vpop.f32.mrf.mxu1 }
 0x4f9   : > { %v8901_v43 = vld [vmem:[#allocation2 + $0xb8] sm:$0xff]  ;;  %v8175_v45 = vpop.f32.mrf.mxu0 }
 0x4fa   : > { %v9043_v46 = vsel %vm8975_vm15, %v8941_v34, %v9009_v40  ;;  %v8942_v47 = vadd.f32 %v13876_v14, %v8901_v43  ;;  %8869 = vst.msk [vmem:[#allocation2 + $0xc8] sm:$0xff] %vm172_vm2, %v8835_v41  ;;  %v8226_v49 = vadd.f32 %v8175_v45, %v7844_v44  ;;  %v11122_v54 = vpop.f32.mrf.mxu1  ;;  %v7849_v41 = vld [vmem:[#allocation2 + $0x108] sm:$0xff] }
 0x4fb   : > { %9077 = vst.msk [vmem:[%s13885_s30 + $0xb0] sm:$0xff] %vm172_vm2, %v9043_v46  ;;  %v8327_v50 = vld [vmem:[#allocation2 + $0xd0] sm:$0xff]  ;;  %v11056_v51 = vpop.f32.mrf.mxu0 }
 0x4fc   : > { %vm8976_vm0 = vcmp.ge.f32.partialorder %v8942_v47, 0.0  ;;  %v9010_v52 = vmul.f32 0.2, %v8942_v47  ;;  %v8836_v53 = vadd.f32 %v8779_v48, %v8327_v50  ;;  %8260 = vst.msk [vmem:[#allocation2 + $0xe0] sm:$0xff] %vm172_vm2, %v8226_v49  ;;  %v8782_v58 = vpop.f32.mrf.mxu1 }
 0x4fd   : > { %v8902_v38 = vld [vmem:[#allocation2 + $0xc0] sm:$0xff]  ;;  %v8178_v56 = vpop.f32.mrf.mxu0 }
 0x4fe   : > { %v9044_v57 = vsel %vm8976_vm0, %v8942_v47, %v9010_v52  ;;  %v8943_v1 = vadd.f32 %v13876_v14, %v8902_v38  ;;  %8870 = vst.msk [vmem:[#allocation2 + $0xd0] sm:$0xff] %vm172_vm2, %v8836_v53  ;;  %v8227_v59 = vadd.f32 %v8178_v56, %v7845_v55  ;;  %v11123_v0 = vpop.f32.mrf.mxu1 }
 0x4ff   : > { %9078 = vst.msk [vmem:[%s13885_s30 + $0xb8] sm:$0xff] %vm172_vm2, %v9044_v57  ;;  %v8328_v60 = vld [vmem:[#allocation2 + $0xd8] sm:$0xff]  ;;  %v11057_v61 = vpop.f32.mrf.mxu0 }
 0x500   : > { %vm8977_vm1 = vcmp.ge.f32.partialorder %v8943_v1, 0.0  ;;  %v9011_v62 = vmul.f32 0.2, %v8943_v1  ;;  %v8837_v63 = vadd.f32 %v8782_v58, %v8328_v60  ;;  %8261 = vst.msk [vmem:[#allocation2 + $0xe8] sm:$0xff] %vm172_vm2, %v8227_v59  ;;  %v8787_v7 = vpop.f32.mrf.mxu1 }
 0x501   : > { %v8903_v2 = vld [vmem:[#allocation2 + $0xc8] sm:$0xff]  ;;  %v8183_v4 = vpop.f32.mrf.mxu0 }
 0x502   : > { %v9045_v5 = vsel %vm8977_vm1, %v8943_v1, %v9011_v62  ;;  %v8944_v6 = vadd.f32 %v13876_v14, %v8903_v2  ;;  %8871 = vst.msk [vmem:[#allocation2 + $0xd8] sm:$0xff] %vm172_vm2, %v8837_v63  ;;  %v8228_v8 = vadd.f32 %v8183_v4, %v7846_v3  ;;  %v11126_v13 = vpop.f32.mrf.mxu1 }
 0x503   : > { %9079 = vst.msk [vmem:[%s13885_s30 + $0xc0] sm:$0xff] %vm172_vm2, %v9045_v5  ;;  %v8329_v9 = vld [vmem:[#allocation2 + $0xe0] sm:$0xff]  ;;  %v11060_v10 = vpop.f32.mrf.mxu0 }
 0x504   : > { %vm8978_vm3 = vcmp.ge.f32.partialorder %v8944_v6, 0.0  ;;  %v9012_v11 = vmul.f32 0.2, %v8944_v6  ;;  %v8838_v12 = vadd.f32 %v8787_v7, %v8329_v9  ;;  %8262 = vst.msk [vmem:[#allocation2 + $0xf0] sm:$0xff] %vm172_vm2, %v8228_v8  ;;  %v8790_v20 = vpop.f32.mrf.mxu1 }
 0x505   : > { %v8904_v15 = vld [vmem:[#allocation2 + $0xd0] sm:$0xff]  ;;  %v8186_v17 = vpop.f32.mrf.mxu0 }
 0x506   : > { %v9046_v18 = vsel %vm8978_vm3, %v8944_v6, %v9012_v11  ;;  %v8945_v19 = vadd.f32 %v13876_v14, %v8904_v15  ;;  %8872 = vst.msk [vmem:[#allocation2 + $0xe0] sm:$0xff] %vm172_vm2, %v8838_v12  ;;  %v8229_v21 = vadd.f32 %v8186_v17, %v7847_v16  ;;  %v11127_v26 = vpop.f32.mrf.mxu1 }
 0x507   : > { %9080 = vst.msk [vmem:[%s13885_s30 + $0xc8] sm:$0xff] %vm172_vm2, %v9046_v18  ;;  %v8330_v22 = vld [vmem:[#allocation2 + $0xe8] sm:$0xff]  ;;  %v11061_v23 = vpop.f32.mrf.mxu0 }
 0x508   : > { %vm8979_vm4 = vcmp.ge.f32.partialorder %v8945_v19, 0.0  ;;  %v9013_v24 = vmul.f32 0.2, %v8945_v19  ;;  %v8839_v25 = vadd.f32 %v8790_v20, %v8330_v22  ;;  %8263 = vst.msk [vmem:[#allocation2 + $0xf8] sm:$0xff] %vm172_vm2, %v8229_v21  ;;  %v8795_v32 = vpop.f32.mrf.mxu1 }
 0x509   : > { %v8905_v27 = vld [vmem:[#allocation2 + $0xd8] sm:$0xff]  ;;  %v8191_v29 = vpop.f32.mrf.mxu0 }
 0x50a   : > { %v9047_v30 = vsel %vm8979_vm4, %v8945_v19, %v9013_v24  ;;  %v8946_v31 = vadd.f32 %v13876_v14, %v8905_v27  ;;  %8873 = vst.msk [vmem:[#allocation2 + $0xe8] sm:$0xff] %vm172_vm2, %v8839_v25  ;;  %v8230_v33 = vadd.f32 %v8191_v29, %v7848_v28  ;;  %v11130_v39 = vpop.f32.mrf.mxu1 }
 0x50b   : > { %9081 = vst.msk [vmem:[%s13885_s30 + $0xd0] sm:$0xff] %vm172_vm2, %v9047_v30  ;;  %v8331_v34 = vld [vmem:[#allocation2 + $0xf0] sm:$0xff]  ;;  %v11064_v35 = vpop.f32.mrf.mxu0 }
 0x50c   : > { %vm8980_vm5 = vcmp.ge.f32.partialorder %v8946_v31, 0.0  ;;  %v9014_v36 = vmul.f32 0.2, %v8946_v31  ;;  %v8840_v37 = vadd.f32 %v8795_v32, %v8331_v34  ;;  %8264 = vst.msk [vmem:[#allocation2 + $0x100] sm:$0xff] %vm172_vm2, %v8230_v33  ;;  %v8798_v45 = vpop.f32.mrf.mxu1 }
 0x50d   : > { %v8906_v40 = vld [vmem:[#allocation2 + $0xe0] sm:$0xff]  ;;  %v8194_v42 = vpop.f32.mrf.mxu0 }
 0x50e   : > { %v9048_v43 = vsel %vm8980_vm5, %v8946_v31, %v9014_v36  ;;  %v8947_v44 = vadd.f32 %v13876_v14, %v8906_v40  ;;  %8874 = vst.msk [vmem:[#allocation2 + $0xf0] sm:$0xff] %vm172_vm2, %v8840_v37  ;;  %v8231_v46 = vadd.f32 %v8194_v42, %v7849_v41  ;;  %v11131_v51 = vpop.f32.mrf.mxu1 }
 0x50f   : > { %9082 = vst.msk [vmem:[%s13885_s30 + $0xd8] sm:$0xff] %vm172_vm2, %v9048_v43  ;;  %v8332_v47 = vld [vmem:[#allocation2 + $0xf8] sm:$0xff]  ;;  %v11065_v48 = vpop.f32.mrf.mxu0 }
 0x510   : > { %vm8981_vm6 = vcmp.ge.f32.partialorder %v8947_v44, 0.0  ;;  %v9015_v49 = vmul.f32 0.2, %v8947_v44  ;;  %v8841_v50 = vadd.f32 %v8798_v45, %v8332_v47  ;;  %8265 = vst.msk [vmem:[#allocation2 + $0x108] sm:$0xff] %vm172_vm2, %v8231_v46  ;;  %v8803_v38 = vpop.f32.mrf.mxu1 }
 0x511   : > { %v8907_v52 = vld [vmem:[#allocation2 + $0xe8] sm:$0xff] }
 0x512   : > { %v9049_v53 = vsel %vm8981_vm6, %v8947_v44, %v9015_v49  ;;  %v8948_v54 = vadd.f32 %v13876_v14, %v8907_v52  ;;  %8875 = vst.msk [vmem:[#allocation2 + $0xf8] sm:$0xff] %vm172_vm2, %v8841_v50  ;;  %v11134_v1 = vpop.f32.mrf.mxu1 }
 0x513   : > { %9083 = vst.msk [vmem:[%s13885_s30 + $0xe0] sm:$0xff] %vm172_vm2, %v9049_v53  ;;  %v8333_v55 = vld [vmem:[#allocation2 + $0x100] sm:$0xff] }
 0x514   : > { %vm8982_vm7 = vcmp.ge.f32.partialorder %v8948_v54, 0.0  ;;  %v9016_v56 = vmul.f32 0.2, %v8948_v54  ;;  %v8842_v57 = vadd.f32 %v8803_v38, %v8333_v55  ;;  %v8806_v61 = vpop.f32.mrf.mxu1 }
 0x515   : > { %v8908_v58 = vld [vmem:[#allocation2 + $0xf0] sm:$0xff] }
 0x516   : > { %v9050_v59 = vsel %vm8982_vm7, %v8948_v54, %v9016_v56  ;;  %v8949_v60 = vadd.f32 %v13876_v14, %v8908_v58  ;;  %8876 = vst.msk [vmem:[#allocation2 + $0x100] sm:$0xff] %vm172_vm2, %v8842_v57  ;;  %v11135_v2 = vpop.f32.mrf.mxu1 }
 0x517   : > { %9084 = vst.msk [vmem:[%s13885_s30 + $0xe8] sm:$0xff] %vm172_vm2, %v9050_v59  ;;  %v8334_v62 = vld [vmem:[#allocation2 + $0x108] sm:$0xff] }
 0x518   : > { %vm8983_vm8 = vcmp.ge.f32.partialorder %v8949_v60, 0.0  ;;  %v9017_v63 = vmul.f32 0.2, %v8949_v60  ;;  %v8843_v0 = vadd.f32 %v8806_v61, %v8334_v62 }
 0x519   : > { %v8909_v3 = vld [vmem:[#allocation2 + $0xf8] sm:$0xff] }
 0x51a   : > { %v9051_v4 = vsel %vm8983_vm8, %v8949_v60, %v9017_v63  ;;  %v8950_v5 = vadd.f32 %v13876_v14, %v8909_v3  ;;  %8877 = vst.msk [vmem:[#allocation2 + $0x108] sm:$0xff] %vm172_vm2, %v8843_v0 }
 0x51b   : > { %9085 = vst.msk [vmem:[%s13885_s30 + $0xf0] sm:$0xff] %vm172_vm2, %v9051_v4 }
 0x51c   : > { %vm8984_vm9 = vcmp.ge.f32.partialorder %v8950_v5, 0.0  ;;  %v9018_v6 = vmul.f32 0.2, %v8950_v5 }
 0x51d   : > { %v8910_v7 = vld [vmem:[#allocation2 + $0x100] sm:$0xff] }
 0x51e   : > { %v9052_v8 = vsel %vm8984_vm9, %v8950_v5, %v9018_v6  ;;  %v8951_v9 = vadd.f32 %v13876_v14, %v8910_v7 }
 0x51f   : > { %9086 = vst.msk [vmem:[%s13885_s30 + $0xf8] sm:$0xff] %vm172_vm2, %v9052_v8 }
 0x520   : > { %vm8985_vm10 = vcmp.ge.f32.partialorder %v8951_v9, 0.0  ;;  %v9019_v10 = vmul.f32 0.2, %v8951_v9 }
 0x521   : > { %v8911_v11 = vld [vmem:[#allocation2 + $0x108] sm:$0xff] }
 0x522   : > { %v9053_v12 = vsel %vm8985_vm10, %v8951_v9, %v9019_v10  ;;  %v8952_v13 = vadd.f32 %v13876_v14, %v8911_v11 }
 0x523   : > { %9087 = vst.msk [vmem:[%s13885_s30 + $0x100] sm:$0xff] %vm172_vm2, %v9053_v12 }
 0x524   : > { %vm8986_vm11 = vcmp.ge.f32.partialorder %v8952_v13, 0.0  ;;  %v9020_v15 = vmul.f32 0.2, %v8952_v13 }
 0x526   : > { %v9054_v16 = vsel %vm8986_vm11, %v8952_v13, %v9020_v15 }
 0x527   : > { %9088 = vst.msk [vmem:[%s13885_s30 + $0x108] sm:$0xff] %vm172_vm2, %v9054_v16 }
 0x528 PF: > { %s13_s12 = sadd.s32 1, %s11441_s12  }
 0x529   : > { %p10_p4 = scmp.ge.s32.totalorder %s13_s12, 6  }
 0x52b   :  { %12 = sbr.rel (!%p10_p4) target bundleno = 1 (0x1), region = 77 }

</bundles_post_ra>
